<compile_context>
chip_gen: v7x
topology: tpu7x:2x2x1
jax: 0.10.0
libtpu: 0.0.40
codegen_flags: <defaults>
</compile_context>

<pallas_src>
import functools

import jax
import jax.numpy as jnp
from jax.experimental import pallas as pl
from jax.experimental.pallas import tpu as pltpu


# ----------------------------------------------------------------------------
# Small helpers
# ----------------------------------------------------------------------------
def _ru(x, m):
    return (x + m - 1) // m * m


def _choose_k_tile(K):
    """Pick (padded_K, k_tile) so k_tile is 128-aligned and divides padded_K."""
    Kp = _ru(K, 128)
    if Kp <= 640:
        return Kp, Kp
    for tk in (512, 640, 384, 256):
        if Kp % tk == 0:
            return Kp, tk
    return _ru(Kp, 512), 512


# ----------------------------------------------------------------------------
# Pallas kernels
# ----------------------------------------------------------------------------
def _gemm_bn_act_kernel(apply_relu, x_ref, w_ref, s_ref, t_ref, o_ref, acc_ref):
    # Tiled GEMM with f32 accumulator; epilogue: y = relu?(acc * scale + shift)
    k = pl.program_id(2)

    @pl.when(k == 0)
    def _():
        acc_ref[...] = jnp.zeros_like(acc_ref)

    acc_ref[...] += jnp.dot(x_ref[...], w_ref[...],
                            preferred_element_type=jnp.float32)

    @pl.when(k == pl.num_programs(2) - 1)
    def _():
        y = acc_ref[...] * s_ref[...] + t_ref[...]
        if apply_relu:
            y = jnp.maximum(y, 0.0)
        o_ref[...] = y.astype(o_ref.dtype)


def gemm_bn_act(x, w, scale, shift, *, apply_relu=True, out_dtype=jnp.bfloat16):
    """Fused (x @ w) * scale + shift (+ReLU). bf16 MXU operands, f32 epilogue."""
    M, K = x.shape
    K2, N = w.shape
    assert K == K2

    Mp = _ru(M, 8)
    tm = min(128, Mp)
    Mp = _ru(Mp, tm)
    Np = _ru(N, 128)
    tn = min(256, Np)
    Kp, tk = _choose_k_tile(K)

    xb = jnp.pad(x.astype(jnp.bfloat16), ((0, Mp - M), (0, Kp - K)))
    wb = jnp.pad(w.astype(jnp.bfloat16), ((0, Kp - K), (0, Np - N)))
    sb = jnp.pad(scale.astype(jnp.float32), (0, Np - N)).reshape(1, Np)
    tb = jnp.pad(shift.astype(jnp.float32), (0, Np - N)).reshape(1, Np)

    grid = (Mp // tm, Np // tn, Kp // tk)
    out_bytes = Mp * Np * jnp.dtype(out_dtype).itemsize
    out = pl.pallas_call(
        functools.partial(_gemm_bn_act_kernel, apply_relu),
        out_shape=jax.ShapeDtypeStruct((Mp, Np), out_dtype),
        grid=grid,
        in_specs=[
            pl.BlockSpec((tm, tk), lambda i, j, k: (i, k)),
            pl.BlockSpec((tk, tn), lambda i, j, k: (k, j)),
            pl.BlockSpec((1, tn), lambda i, j, k: (0, j)),
            pl.BlockSpec((1, tn), lambda i, j, k: (0, j)),
        ],
        out_specs=pl.BlockSpec((tm, tn), lambda i, j, k: (i, j)),
        scratch_shapes=[pltpu.VMEM((tm, tn), jnp.float32)],
        compiler_params=pltpu.CompilerParams(
            dimension_semantics=("parallel", "parallel", "arbitrary"),
            vmem_limit_bytes=32 * 1024 * 1024),
        cost_estimate=pl.CostEstimate(
            flops=2 * Mp * Np * Kp,
            transcendentals=0,
            bytes_accessed=2 * (Mp * Kp + Kp * Np) + out_bytes),
    )(xb, wb, sb, tb)
    return out[:M, :N]


def _maxpool_kernel(c, x_ref, o_ref):
    # x_ref: (rows, 2, Wo, 2*C) -- contiguous reinterpretation of NHWC.
    a = jnp.maximum(x_ref[:, 0], x_ref[:, 1])          # max over H pair (major dim)
    o_ref[...] = jnp.maximum(a[..., :c], a[..., c:])   # max over W pair (lane halves)


def maxpool2x2(x):
    """2x2/stride-2 max pool on NHWC input without any HBM transpose."""
    N, H, W, C = x.shape
    Ho, Wo = H // 2, W // 2
    R = N * Ho
    xr = x.reshape(R, 2, Wo, 2 * C)   # pure contiguous reshape (no data movement)

    rt = R
    for cand in (512, 256, 128):
        if R > cand and R % cand == 0:
            rt = cand
            break

    out = pl.pallas_call(
        functools.partial(_maxpool_kernel, C),
        out_shape=jax.ShapeDtypeStruct((R, Wo, C), x.dtype),
        grid=(R // rt,),
        in_specs=[pl.BlockSpec((rt, 2, Wo, 2 * C), lambda i: (i, 0, 0, 0))],
        out_specs=pl.BlockSpec((rt, Wo, C), lambda i: (i, 0, 0)),
        compiler_params=pltpu.CompilerParams(
            dimension_semantics=("parallel",),
            vmem_limit_bytes=32 * 1024 * 1024),
    )(xr)
    return out.reshape(N, Ho, Wo, C)


def _coarse_head_kernel(x_ref, w1_ref, s1_ref, t1_ref, w2_ref, t2_ref,
                        o_ref, acc_ref):
    # Fused CoarseBlock: fc1(+BN+ReLU) accumulated over K tiles, fc2 at the end.
    k = pl.program_id(0)

    @pl.when(k == 0)
    def _():
        acc_ref[...] = jnp.zeros_like(acc_ref)

    acc_ref[...] += jnp.dot(x_ref[...], w1_ref[...],
                            preferred_element_type=jnp.float32)

    @pl.when(k == pl.num_programs(0) - 1)
    def _():
        h = jnp.maximum(acc_ref[...] * s1_ref[...] + t1_ref[...], 0.0)
        logits = jnp.dot(h.astype(jnp.bfloat16), w2_ref[...],
                         preferred_element_type=jnp.float32) + t2_ref[...]
        o_ref[...] = logits.astype(o_ref.dtype)


def coarse_head(x_flat, p):
    """Fused Linear->BN->ReLU->Linear in a single pallas_call. Returns f32 logits."""
    w1, s1, t1 = p["w1"], p["s1"], p["t1"]
    w2, t2 = p["w2"], p["t2"]
    M, K1 = x_flat.shape
    N1 = w1.shape[1]
    N2 = w2.shape[1]

    Mp = _ru(M, 8)
    Kp, tk = _choose_k_tile(K1)
    N1p = _ru(N1, 128)
    N2p = _ru(N2, 128)   # lane-dense logits; sliced back outside

    xb = jnp.pad(x_flat.astype(jnp.bfloat16), ((0, Mp - M), (0, Kp - K1)))
    w1b = jnp.pad(w1, ((0, Kp - K1), (0, N1p - N1)))
    s1b = jnp.pad(s1, (0, N1p - N1)).reshape(1, N1p)
    t1b = jnp.pad(t1, (0, N1p - N1)).reshape(1, N1p)
    w2b = jnp.pad(w2, ((0, N1p - N1), (0, N2p - N2)))
    t2b = jnp.pad(t2, (0, N2p - N2)).reshape(1, N2p)

    out = pl.pallas_call(
        _coarse_head_kernel,
        out_shape=jax.ShapeDtypeStruct((Mp, N2p), jnp.float32),
        grid=(Kp // tk,),
        in_specs=[
            pl.BlockSpec((Mp, tk), lambda k: (0, k)),
            pl.BlockSpec((tk, N1p), lambda k: (k, 0)),
            pl.BlockSpec((1, N1p), lambda k: (0, 0)),
            pl.BlockSpec((1, N1p), lambda k: (0, 0)),
            pl.BlockSpec((N1p, N2p), lambda k: (0, 0)),
            pl.BlockSpec((1, N2p), lambda k: (0, 0)),
        ],
        out_specs=pl.BlockSpec((Mp, N2p), lambda k: (0, 0)),
        scratch_shapes=[pltpu.VMEM((Mp, N1p), jnp.float32)],
        compiler_params=pltpu.CompilerParams(
            dimension_semantics=("arbitrary",),
            vmem_limit_bytes=32 * 1024 * 1024),
    )(xb, w1b, s1b, t1b, w2b, t2b)
    # TODO(synk): CoarseBlock also returns a softmax/argmax "pred" that is
    # unused by BCNN.forward, so it is not computed here.
    return out[:M, :N2]


# ----------------------------------------------------------------------------
# Layer glue (plain JAX): im2col patch extraction, block wiring
# ----------------------------------------------------------------------------
def im2col_3x3_same(x):
    # x: (N, H, W, C) bf16 -> (N*H*W, 9*C); (ky, kx, cin) ordering matches the
    # (3,3,Cin,Cout) weights reshaped to (9*Cin, Cout).
    N, H, W, C = x.shape
    xp = jnp.pad(x, ((0, 0), (1, 1), (1, 1), (0, 0)))
    cols = [xp[:, dy:dy + H, dx:dx + W, :] for dy in range(3) for dx in range(3)]
    return jnp.concatenate(cols, axis=-1).reshape(N * H * W, 9 * C)


def conv_bn_relu(x, p):
    N, H, W, _ = x.shape
    cout = p["w"].shape[1]
    patches = im2col_3x3_same(x)
    y = gemm_bn_act(patches, p["w"], p["scale"], p["shift"],
                    apply_relu=True, out_dtype=jnp.bfloat16)
    return y.reshape(N, H, W, cout)


def conv_block(x, p):
    x = conv_bn_relu(x, p["c1"])
    x = conv_bn_relu(x, p["c2"])
    return maxpool2x2(x)


def bcnn_forward(x_nchw, p):
    x = jnp.transpose(x_nchw, (0, 2, 3, 1)).astype(jnp.bfloat16)  # NCHW -> NHWC
    x = conv_block(x, p["cb1"])
    x = conv_block(x, p["cb2"])
    c1 = coarse_head(x.reshape(x.shape[0], -1), p["coarse1"])
    x = conv_block(x, p["cb3"])
    c2 = coarse_head(x.reshape(x.shape[0], -1), p["coarse2"])
    x = conv_block(x, p["cb4"])
    f1 = coarse_head(x.reshape(x.shape[0], -1), p["coarse3"])
    return c1, c2, f1


# ----------------------------------------------------------------------------
# Deterministic parameter construction (synthetic weights; BN + bias folded)
# ----------------------------------------------------------------------------
def _bn_fold(kg, kb, km, kv, c):
    gamma = 1.0 + 0.1 * jax.random.normal(kg, (c,), jnp.float32)
    beta = 0.1 * jax.random.normal(kb, (c,), jnp.float32)
    mean = 0.1 * jax.random.normal(km, (c,), jnp.float32)
    var = 1.0 + 0.05 * jax.random.uniform(kv, (c,), jnp.float32)
    scale = gamma / jnp.sqrt(var + 1e-5)
    shift = beta - mean * scale
    return scale, shift


def _conv_p(ks, cin, cout, k=3):
    kw, kb, kg, kbt, km, kv = (next(ks) for _ in range(6))
    w = jax.random.normal(kw, (k, k, cin, cout), jnp.float32) * (2.0 / (k * k * cin)) ** 0.5
    b = 0.01 * jax.random.normal(kb, (cout,), jnp.float32)
    s, t = _bn_fold(kg, kbt, km, kv, cout)
    # Fold conv bias into the BN shift: (acc + b)*s + t == acc*s + (b*s + t)
    return dict(w=w.reshape(k * k * cin, cout).astype(jnp.bfloat16),
                scale=s, shift=t + b * s)


def _nchw_to_nhwc_rows(w, c, h, wd):
    # w rows are indexed in PyTorch NCHW-flatten order (c, h, w); permute once
    # to NHWC-flatten order so no runtime transpose is needed before fc1.
    idx = jnp.arange(c * h * wd).reshape(c, h, wd).transpose(1, 2, 0).reshape(-1)
    return w[idx]


def _coarse_p(ks, c, h, wd, hidden, nout):
    k1w, k1b, kg, kbt, km, kv, k2w, k2b = (next(ks) for _ in range(8))
    fin = c * h * wd
    w1 = jax.random.normal(k1w, (fin, hidden), jnp.float32) * (2.0 / fin) ** 0.5
    b1 = 0.01 * jax.random.normal(k1b, (hidden,), jnp.float32)
    s, t = _bn_fold(kg, kbt, km, kv, hidden)
    w1 = _nchw_to_nhwc_rows(w1, c, h, wd)
    w2 = jax.random.normal(k2w, (hidden, nout), jnp.float32) * (1.0 / hidden) ** 0.5
    b2 = 0.01 * jax.random.normal(k2b, (nout,), jnp.float32)
    return dict(w1=w1.astype(jnp.bfloat16), s1=s, t1=t + b1 * s,
                w2=w2.astype(jnp.bfloat16), t2=b2)


def init_bcnn_params(key, in_chan, cfg, imsize):
    c1_t, c2_t, out_chan = cfg
    im4, im8, im16 = imsize // 4, imsize // 8, imsize // 16
    ks = iter(jax.random.split(key, 128))
    return {
        "cb1": dict(c1=_conv_p(ks, in_chan, 32), c2=_conv_p(ks, 32, 64)),
        "cb2": dict(c1=_conv_p(ks, 64, 128), c2=_conv_p(ks, 128, 128)),
        "coarse1": _coarse_p(ks, 128, im4, im4, 128, c1_t),
        "cb3": dict(c1=_conv_p(ks, 128, 256), c2=_conv_p(ks, 256, 256)),
        "coarse2": _coarse_p(ks, 256, im8, im8, 1024, c2_t),
        "cb4": dict(c1=_conv_p(ks, 256, 512), c2=_conv_p(ks, 512, 512)),
        "coarse3": _coarse_p(ks, 512, im16, im16, 1024, out_chan),
    }


# ----------------------------------------------------------------------------
if __name__ == "__main__":
    batch = 2
    in_chan = 3
    imsize = 16                   # divisible by 16 so all pooled sizes are integral
    cfg = (2, 4, 8)               # (c1_targets, c2_targets, out_chan)

    root = jax.random.PRNGKey(0)
    kparams, kx = jax.random.split(root)
    params = init_bcnn_params(kparams, in_chan, cfg, imsize)
    x = jax.random.normal(kx, (batch, in_chan, imsize, imsize), jnp.float32)

    fwd = jax.jit(bcnn_forward)
    c1, c2, f1 = fwd(x, params)
    jax.block_until_ready((c1, c2, f1))

    assert c1.shape == (batch, cfg[0]) and c1.dtype == jnp.float32
    assert c2.shape == (batch, cfg[1]) and c2.dtype == jnp.float32
    assert f1.shape == (batch, cfg[2]) and f1.dtype == jnp.float32
    assert all(bool(jnp.all(jnp.isfinite(v))) for v in (c1, c2, f1))
    print("KERNEL_OK")
</pallas_src>

<mosaic_0001>
module attributes {stable_mosaic.version = 11 : i64} {
  func.func @_gemm_bn_act_kernel(%arg0: i32, %arg1: i32, %arg2: i32, %arg3: memref<128x128xbf16, #tpu.memory_space<vmem>>, %arg4: memref<128x128xbf16, #tpu.memory_space<vmem>>, %arg5: memref<1x128xf32, #tpu.memory_space<vmem>>, %arg6: memref<1x128xf32, #tpu.memory_space<vmem>>, %arg7: memref<128x128xbf16, #tpu.memory_space<vmem>>, %arg8: memref<128x128xf32, #tpu.memory_space<vmem>>) attributes {dimension_semantics = [#tpu.dimension_semantics<parallel>, #tpu.dimension_semantics<parallel>, #tpu.dimension_semantics<arbitrary>], iteration_bounds = array<i64: 4, 1, 1>, scalar_prefetch = 0 : i64, scratch_operands = 1 : i64, tpu.core_type = #tpu.core_type<tc>, window_params = [{transform_indices = @transform_0, window_bounds = array<i64: 128, 128>}, {transform_indices = @transform_1, window_bounds = array<i64: 128, 128>}, {transform_indices = @transform_2, window_bounds = array<i64: 1, 128>}, {transform_indices = @transform_3, window_bounds = array<i64: 1, 128>}, {transform_indices = @transform_4, window_bounds = array<i64: 128, 128>}]} {
    %c0_i32 = arith.constant 0 : i32
    %0 = arith.cmpi eq, %arg2, %c0_i32 : i32
    %1 = arith.extui %0 : i1 to i32
    %c0_i32_0 = arith.constant 0 : i32
    %2 = arith.cmpi ne, %1, %c0_i32_0 : i32
    scf.if %2 {
      %cst_10 = arith.constant 0.000000e+00 : f32
      %12 = vector.broadcast %cst_10 : f32 to vector<128x128xf32>
      %c0_11 = arith.constant 0 : index
      %c0_12 = arith.constant 0 : index
      %13 = vector.load %arg8[%c0_11, %c0_12] : memref<128x128xf32, #tpu.memory_space<vmem>>, vector<128x128xf32>
      tpu.vector_store %arg8[%c0_11, %c0_12], %12 {strides = array<i32>} : memref<128x128xf32, #tpu.memory_space<vmem>>, vector<128x128xf32>,
    } else {
    }
    %c0 = arith.constant 0 : index
    %c0_1 = arith.constant 0 : index
    %3 = vector.load %arg8[%c0, %c0_1] : memref<128x128xf32, #tpu.memory_space<vmem>>, vector<128x128xf32>
    %c0_2 = arith.constant 0 : index
    %c0_3 = arith.constant 0 : index
    %4 = vector.load %arg3[%c0_2, %c0_3] : memref<128x128xbf16, #tpu.memory_space<vmem>>, vector<128x128xbf16>
    %c0_4 = arith.constant 0 : index
    %c0_5 = arith.constant 0 : index
    %5 = vector.load %arg4[%c0_4, %c0_5] : memref<128x128xbf16, #tpu.memory_space<vmem>>, vector<128x128xbf16>
    %cst = arith.constant dense<0.000000e+00> : vector<128x128xf32>
    %6 = tpu.matmul %4, %5, %cst {dimension_numbers = #tpu.dot_dimension_numbers<[1], [0], [0], [1], [0, 0, 1, 1], [], []>} : vector<128x128xbf16>, vector<128x128xbf16>, vector<128x128xf32> -> vector<128x128xf32>
    %7 = arith.addf %3, %6 : vector<128x128xf32>
    %c0_6 = arith.constant 0 : index
    %c0_7 = arith.constant 0 : index
    %8 = vector.load %arg8[%c0_6, %c0_7] : memref<128x128xf32, #tpu.memory_space<vmem>>, vector<128x128xf32>
    tpu.vector_store %arg8[%c0_6, %c0_7], %7 {strides = array<i32>} : memref<128x128xf32, #tpu.memory_space<vmem>>, vector<128x128xf32>,
    %c0_i32_8 = arith.constant 0 : i32
    %9 = arith.cmpi eq, %arg2, %c0_i32_8 : i32
    %10 = arith.extui %9 : i1 to i32
    %c0_i32_9 = arith.constant 0 : i32
    %11 = arith.cmpi ne, %10, %c0_i32_9 : i32
    scf.if %11 {
      %c0_10 = arith.constant 0 : index
      %c0_11 = arith.constant 0 : index
      %12 = vector.load %arg8[%c0_10, %c0_11] : memref<128x128xf32, #tpu.memory_space<vmem>>, vector<128x128xf32>
      %c0_12 = arith.constant 0 : index
      %c0_13 = arith.constant 0 : index
      %13 = vector.load %arg5[%c0_12, %c0_13] : memref<1x128xf32, #tpu.memory_space<vmem>>, vector<1x128xf32>
      %14 = vector.broadcast %13 : vector<1x128xf32> to vector<128x128xf32>
      %15 = arith.mulf %12, %14 : vector<128x128xf32>
      %c0_14 = arith.constant 0 : index
      %c0_15 = arith.constant 0 : index
      %16 = vector.load %arg6[%c0_14, %c0_15] : memref<1x128xf32, #tpu.memory_space<vmem>>, vector<1x128xf32>
      %17 = vector.broadcast %16 : vector<1x128xf32> to vector<128x128xf32>
      %18 = arith.addf %15, %17 : vector<128x128xf32>
      %cst_16 = arith.constant 0.000000e+00 : f32
      %19 = vector.broadcast %cst_16 : f32 to vector<128x128xf32>
      %20 = arith.maximumf %18, %19 : vector<128x128xf32>
      %21 = arith.truncf %20 : vector<128x128xf32> to vector<128x128xbf16>
      %c0_17 = arith.constant 0 : index
      %c0_18 = arith.constant 0 : index
      %22 = vector.load %arg7[%c0_17, %c0_18] : memref<128x128xbf16, #tpu.memory_space<vmem>>, vector<128x128xbf16>
      tpu.vector_store %arg7[%c0_17, %c0_18], %21 {strides = array<i32>} : memref<128x128xbf16, #tpu.memory_space<vmem>>, vector<128x128xbf16>,
    } else {
    }
    return
  }
  func.func @transform_0(%arg0: i32, %arg1: i32, %arg2: i32) -> (i32, i32) {
    %c0_i32 = arith.constant 0 : i32
    return %arg0, %arg2 : i32, i32
  }
  func.func @transform_1(%arg0: i32, %arg1: i32, %arg2: i32) -> (i32, i32) {
    %c0_i32 = arith.constant 0 : i32
    return %arg2, %arg1 : i32, i32
  }
  func.func @transform_2(%arg0: i32, %arg1: i32, %arg2: i32) -> (i32, i32) {
    %c0_i32 = arith.constant 0 : i32
    %c0_i32_0 = arith.constant 0 : i32
    return %c0_i32, %arg1 : i32, i32
  }
  func.func @transform_3(%arg0: i32, %arg1: i32, %arg2: i32) -> (i32, i32) {
    %c0_i32 = arith.constant 0 : i32
    %c0_i32_0 = arith.constant 0 : i32
    return %c0_i32, %arg1 : i32, i32
  }
  func.func @transform_4(%arg0: i32, %arg1: i32, %arg2: i32) -> (i32, i32) {
    %c0_i32 = arith.constant 0 : i32
    return %arg0, %arg1 : i32, i32
  }
}

module attributes {stable_mosaic.version = 11 : i64} {
  func.func @_gemm_bn_act_kernel(%arg0: i32, %arg1: i32, %arg2: i32, %arg3: memref<128x384xbf16, #tpu.memory_space<vmem>>, %arg4: memref<384x128xbf16, #tpu.memory_space<vmem>>, %arg5: memref<1x128xf32, #tpu.memory_space<vmem>>, %arg6: memref<1x128xf32, #tpu.memory_space<vmem>>, %arg7: memref<128x128xbf16, #tpu.memory_space<vmem>>, %arg8: memref<128x128xf32, #tpu.memory_space<vmem>>) attributes {dimension_semantics = [#tpu.dimension_semantics<parallel>, #tpu.dimension_semantics<parallel>, #tpu.dimension_semantics<arbitrary>], iteration_bounds = array<i64: 4, 1, 1>, scalar_prefetch = 0 : i64, scratch_operands = 1 : i64, tpu.core_type = #tpu.core_type<tc>, window_params = [{transform_indices = @transform_0, window_bounds = array<i64: 128, 384>}, {transform_indices = @transform_1, window_bounds = array<i64: 384, 128>}, {transform_indices = @transform_2, window_bounds = array<i64: 1, 128>}, {transform_indices = @transform_3, window_bounds = array<i64: 1, 128>}, {transform_indices = @transform_4, window_bounds = array<i64: 128, 128>}]} {
    %c0_i32 = arith.constant 0 : i32
    %0 = arith.cmpi eq, %arg2, %c0_i32 : i32
    %1 = arith.extui %0 : i1 to i32
    %c0_i32_0 = arith.constant 0 : i32
    %2 = arith.cmpi ne, %1, %c0_i32_0 : i32
    scf.if %2 {
      %cst_10 = arith.constant 0.000000e+00 : f32
      %12 = vector.broadcast %cst_10 : f32 to vector<128x128xf32>
      %c0_11 = arith.constant 0 : index
      %c0_12 = arith.constant 0 : index
      %13 = vector.load %arg8[%c0_11, %c0_12] : memref<128x128xf32, #tpu.memory_space<vmem>>, vector<128x128xf32>
      tpu.vector_store %arg8[%c0_11, %c0_12], %12 {strides = array<i32>} : memref<128x128xf32, #tpu.memory_space<vmem>>, vector<128x128xf32>,
    } else {
    }
    %c0 = arith.constant 0 : index
    %c0_1 = arith.constant 0 : index
    %3 = vector.load %arg8[%c0, %c0_1] : memref<128x128xf32, #tpu.memory_space<vmem>>, vector<128x128xf32>
    %c0_2 = arith.constant 0 : index
    %c0_3 = arith.constant 0 : index
    %4 = vector.load %arg3[%c0_2, %c0_3] : memref<128x384xbf16, #tpu.memory_space<vmem>>, vector<128x384xbf16>
    %c0_4 = arith.constant 0 : index
    %c0_5 = arith.constant 0 : index
    %5 = vector.load %arg4[%c0_4, %c0_5] : memref<384x128xbf16, #tpu.memory_space<vmem>>, vector<384x128xbf16>
    %cst = arith.constant dense<0.000000e+00> : vector<128x128xf32>
    %6 = tpu.matmul %4, %5, %cst {dimension_numbers = #tpu.dot_dimension_numbers<[1], [0], [0], [1], [0, 0, 1, 1], [], []>} : vector<128x384xbf16>, vector<384x128xbf16>, vector<128x128xf32> -> vector<128x128xf32>
    %7 = arith.addf %3, %6 : vector<128x128xf32>
    %c0_6 = arith.constant 0 : index
    %c0_7 = arith.constant 0 : index
    %8 = vector.load %arg8[%c0_6, %c0_7] : memref<128x128xf32, #tpu.memory_space<vmem>>, vector<128x128xf32>
    tpu.vector_store %arg8[%c0_6, %c0_7], %7 {strides = array<i32>} : memref<128x128xf32, #tpu.memory_space<vmem>>, vector<128x128xf32>,
    %c0_i32_8 = arith.constant 0 : i32
    %9 = arith.cmpi eq, %arg2, %c0_i32_8 : i32
    %10 = arith.extui %9 : i1 to i32
    %c0_i32_9 = arith.constant 0 : i32
    %11 = arith.cmpi ne, %10, %c0_i32_9 : i32
    scf.if %11 {
      %c0_10 = arith.constant 0 : index
      %c0_11 = arith.constant 0 : index
      %12 = vector.load %arg8[%c0_10, %c0_11] : memref<128x128xf32, #tpu.memory_space<vmem>>, vector<128x128xf32>
      %c0_12 = arith.constant 0 : index
      %c0_13 = arith.constant 0 : index
      %13 = vector.load %arg5[%c0_12, %c0_13] : memref<1x128xf32, #tpu.memory_space<vmem>>, vector<1x128xf32>
      %14 = vector.broadcast %13 : vector<1x128xf32> to vector<128x128xf32>
      %15 = arith.mulf %12, %14 : vector<128x128xf32>
      %c0_14 = arith.constant 0 : index
      %c0_15 = arith.constant 0 : index
      %16 = vector.load %arg6[%c0_14, %c0_15] : memref<1x128xf32, #tpu.memory_space<vmem>>, vector<1x128xf32>
      %17 = vector.broadcast %16 : vector<1x128xf32> to vector<128x128xf32>
      %18 = arith.addf %15, %17 : vector<128x128xf32>
      %cst_16 = arith.constant 0.000000e+00 : f32
      %19 = vector.broadcast %cst_16 : f32 to vector<128x128xf32>
      %20 = arith.maximumf %18, %19 : vector<128x128xf32>
      %21 = arith.truncf %20 : vector<128x128xf32> to vector<128x128xbf16>
      %c0_17 = arith.constant 0 : index
      %c0_18 = arith.constant 0 : index
      %22 = vector.load %arg7[%c0_17, %c0_18] : memref<128x128xbf16, #tpu.memory_space<vmem>>, vector<128x128xbf16>
      tpu.vector_store %arg7[%c0_17, %c0_18], %21 {strides = array<i32>} : memref<128x128xbf16, #tpu.memory_space<vmem>>, vector<128x128xbf16>,
    } else {
    }
    return
  }
  func.func @transform_0(%arg0: i32, %arg1: i32, %arg2: i32) -> (i32, i32) {
    %c0_i32 = arith.constant 0 : i32
    return %arg0, %arg2 : i32, i32
  }
  func.func @transform_1(%arg0: i32, %arg1: i32, %arg2: i32) -> (i32, i32) {
    %c0_i32 = arith.constant 0 : i32
    return %arg2, %arg1 : i32, i32
  }
  func.func @transform_2(%arg0: i32, %arg1: i32, %arg2: i32) -> (i32, i32) {
    %c0_i32 = arith.constant 0 : i32
    %c0_i32_0 = arith.constant 0 : i32
    return %c0_i32, %arg1 : i32, i32
  }
  func.func @transform_3(%arg0: i32, %arg1: i32, %arg2: i32) -> (i32, i32) {
    %c0_i32 = arith.constant 0 : i32
    %c0_i32_0 = arith.constant 0 : i32
    return %c0_i32, %arg1 : i32, i32
  }
  func.func @transform_4(%arg0: i32, %arg1: i32, %arg2: i32) -> (i32, i32) {
    %c0_i32 = arith.constant 0 : i32
    return %arg0, %arg1 : i32, i32
  }
}

module attributes {stable_mosaic.version = 11 : i64} {
  func.func @_maxpool_kernel(%arg0: i32, %arg1: memref<16x2x8x128xbf16, #tpu.memory_space<vmem>>, %arg2: memref<16x8x64xbf16, #tpu.memory_space<vmem>>) attributes {dimension_semantics = [#tpu.dimension_semantics<parallel>], iteration_bounds = array<i64: 1>, scalar_prefetch = 0 : i64, scratch_operands = 0 : i64, tpu.core_type = #tpu.core_type<tc>, window_params = [{transform_indices = @transform_0, window_bounds = array<i64: 16, 2, 8, 128>}, {transform_indices = @transform_1, window_bounds = array<i64: 16, 8, 64>}]} {
    %c0 = arith.constant 0 : index
    %c0_0 = arith.constant 0 : index
    %c0_1 = arith.constant 0 : index
    %c0_2 = arith.constant 0 : index
    %0 = vector.load %arg1[%c0, %c0_0, %c0_1, %c0_2] : memref<16x2x8x128xbf16, #tpu.memory_space<vmem>>, vector<16x1x8x128xbf16>
    %1 = vector.shape_cast %0 : vector<16x1x8x128xbf16> to vector<16x8x128xbf16>
    %c0_3 = arith.constant 0 : index
    %c1 = arith.constant 1 : index
    %c0_4 = arith.constant 0 : index
    %c0_5 = arith.constant 0 : index
    %2 = vector.load %arg1[%c0_3, %c1, %c0_4, %c0_5] : memref<16x2x8x128xbf16, #tpu.memory_space<vmem>>, vector<16x1x8x128xbf16>
    %3 = vector.shape_cast %2 : vector<16x1x8x128xbf16> to vector<16x8x128xbf16>
    %4 = arith.maximumf %1, %3 : vector<16x8x128xbf16>
    %5 = vector.extract_strided_slice %4 {offsets = [0, 0, 0], sizes = [16, 8, 64], strides = [1, 1, 1]} : vector<16x8x128xbf16> to vector<16x8x64xbf16>
    %6 = vector.extract_strided_slice %4 {offsets = [0, 0, 64], sizes = [16, 8, 64], strides = [1, 1, 1]} : vector<16x8x128xbf16> to vector<16x8x64xbf16>
    %7 = arith.maximumf %5, %6 : vector<16x8x64xbf16>
    %c0_6 = arith.constant 0 : index
    %c0_7 = arith.constant 0 : index
    %c0_8 = arith.constant 0 : index
    %8 = vector.load %arg2[%c0_6, %c0_7, %c0_8] : memref<16x8x64xbf16, #tpu.memory_space<vmem>>, vector<16x8x64xbf16>
    tpu.vector_store %arg2[%c0_6, %c0_7, %c0_8], %7 {strides = array<i32>} : memref<16x8x64xbf16, #tpu.memory_space<vmem>>, vector<16x8x64xbf16>,
    return
  }
  func.func @transform_0(%arg0: i32) -> (i32, i32, i32, i32) {
    %c0_i32 = arith.constant 0 : i32
    %c0_i32_0 = arith.constant 0 : i32
    %c0_i32_1 = arith.constant 0 : i32
    %c0_i32_2 = arith.constant 0 : i32
    return %arg0, %c0_i32, %c0_i32_0, %c0_i32_1 : i32, i32, i32, i32
  }
  func.func @transform_1(%arg0: i32) -> (i32, i32, i32) {
    %c0_i32 = arith.constant 0 : i32
    %c0_i32_0 = arith.constant 0 : i32
    %c0_i32_1 = arith.constant 0 : i32
    return %arg0, %c0_i32, %c0_i32_0 : i32, i32, i32
  }
}

module attributes {stable_mosaic.version = 11 : i64} {
  func.func @_gemm_bn_act_kernel(%arg0: i32, %arg1: i32, %arg2: i32, %arg3: memref<128x640xbf16, #tpu.memory_space<vmem>>, %arg4: memref<640x128xbf16, #tpu.memory_space<vmem>>, %arg5: memref<1x128xf32, #tpu.memory_space<vmem>>, %arg6: memref<1x128xf32, #tpu.memory_space<vmem>>, %arg7: memref<128x128xbf16, #tpu.memory_space<vmem>>, %arg8: memref<128x128xf32, #tpu.memory_space<vmem>>) attributes {dimension_semantics = [#tpu.dimension_semantics<parallel>, #tpu.dimension_semantics<parallel>, #tpu.dimension_semantics<arbitrary>], iteration_bounds = array<i64: 1, 1, 1>, scalar_prefetch = 0 : i64, scratch_operands = 1 : i64, tpu.core_type = #tpu.core_type<tc>, window_params = [{transform_indices = @transform_0, window_bounds = array<i64: 128, 640>}, {transform_indices = @transform_1, window_bounds = array<i64: 640, 128>}, {transform_indices = @transform_2, window_bounds = array<i64: 1, 128>}, {transform_indices = @transform_3, window_bounds = array<i64: 1, 128>}, {transform_indices = @transform_4, window_bounds = array<i64: 128, 128>}]} {
    %c0_i32 = arith.constant 0 : i32
    %0 = arith.cmpi eq, %arg2, %c0_i32 : i32
    %1 = arith.extui %0 : i1 to i32
    %c0_i32_0 = arith.constant 0 : i32
    %2 = arith.cmpi ne, %1, %c0_i32_0 : i32
    scf.if %2 {
      %cst_10 = arith.constant 0.000000e+00 : f32
      %12 = vector.broadcast %cst_10 : f32 to vector<128x128xf32>
      %c0_11 = arith.constant 0 : index
      %c0_12 = arith.constant 0 : index
      %13 = vector.load %arg8[%c0_11, %c0_12] : memref<128x128xf32, #tpu.memory_space<vmem>>, vector<128x128xf32>
      tpu.vector_store %arg8[%c0_11, %c0_12], %12 {strides = array<i32>} : memref<128x128xf32, #tpu.memory_space<vmem>>, vector<128x128xf32>,
    } else {
    }
    %c0 = arith.constant 0 : index
    %c0_1 = arith.constant 0 : index
    %3 = vector.load %arg8[%c0, %c0_1] : memref<128x128xf32, #tpu.memory_space<vmem>>, vector<128x128xf32>
    %c0_2 = arith.constant 0 : index
    %c0_3 = arith.constant 0 : index
    %4 = vector.load %arg3[%c0_2, %c0_3] : memref<128x640xbf16, #tpu.memory_space<vmem>>, vector<128x640xbf16>
    %c0_4 = arith.constant 0 : index
    %c0_5 = arith.constant 0 : index
    %5 = vector.load %arg4[%c0_4, %c0_5] : memref<640x128xbf16, #tpu.memory_space<vmem>>, vector<640x128xbf16>
    %cst = arith.constant dense<0.000000e+00> : vector<128x128xf32>
    %6 = tpu.matmul %4, %5, %cst {dimension_numbers = #tpu.dot_dimension_numbers<[1], [0], [0], [1], [0, 0, 1, 1], [], []>} : vector<128x640xbf16>, vector<640x128xbf16>, vector<128x128xf32> -> vector<128x128xf32>
    %7 = arith.addf %3, %6 : vector<128x128xf32>
    %c0_6 = arith.constant 0 : index
    %c0_7 = arith.constant 0 : index
    %8 = vector.load %arg8[%c0_6, %c0_7] : memref<128x128xf32, #tpu.memory_space<vmem>>, vector<128x128xf32>
    tpu.vector_store %arg8[%c0_6, %c0_7], %7 {strides = array<i32>} : memref<128x128xf32, #tpu.memory_space<vmem>>, vector<128x128xf32>,
    %c0_i32_8 = arith.constant 0 : i32
    %9 = arith.cmpi eq, %arg2, %c0_i32_8 : i32
    %10 = arith.extui %9 : i1 to i32
    %c0_i32_9 = arith.constant 0 : i32
    %11 = arith.cmpi ne, %10, %c0_i32_9 : i32
    scf.if %11 {
      %c0_10 = arith.constant 0 : index
      %c0_11 = arith.constant 0 : index
      %12 = vector.load %arg8[%c0_10, %c0_11] : memref<128x128xf32, #tpu.memory_space<vmem>>, vector<128x128xf32>
      %c0_12 = arith.constant 0 : index
      %c0_13 = arith.constant 0 : index
      %13 = vector.load %arg5[%c0_12, %c0_13] : memref<1x128xf32, #tpu.memory_space<vmem>>, vector<1x128xf32>
      %14 = vector.broadcast %13 : vector<1x128xf32> to vector<128x128xf32>
      %15 = arith.mulf %12, %14 : vector<128x128xf32>
      %c0_14 = arith.constant 0 : index
      %c0_15 = arith.constant 0 : index
      %16 = vector.load %arg6[%c0_14, %c0_15] : memref<1x128xf32, #tpu.memory_space<vmem>>, vector<1x128xf32>
      %17 = vector.broadcast %16 : vector<1x128xf32> to vector<128x128xf32>
      %18 = arith.addf %15, %17 : vector<128x128xf32>
      %cst_16 = arith.constant 0.000000e+00 : f32
      %19 = vector.broadcast %cst_16 : f32 to vector<128x128xf32>
      %20 = arith.maximumf %18, %19 : vector<128x128xf32>
      %21 = arith.truncf %20 : vector<128x128xf32> to vector<128x128xbf16>
      %c0_17 = arith.constant 0 : index
      %c0_18 = arith.constant 0 : index
      %22 = vector.load %arg7[%c0_17, %c0_18] : memref<128x128xbf16, #tpu.memory_space<vmem>>, vector<128x128xbf16>
      tpu.vector_store %arg7[%c0_17, %c0_18], %21 {strides = array<i32>} : memref<128x128xbf16, #tpu.memory_space<vmem>>, vector<128x128xbf16>,
    } else {
    }
    return
  }
  func.func @transform_0(%arg0: i32, %arg1: i32, %arg2: i32) -> (i32, i32) {
    %c0_i32 = arith.constant 0 : i32
    return %arg0, %arg2 : i32, i32
  }
  func.func @transform_1(%arg0: i32, %arg1: i32, %arg2: i32) -> (i32, i32) {
    %c0_i32 = arith.constant 0 : i32
    return %arg2, %arg1 : i32, i32
  }
  func.func @transform_2(%arg0: i32, %arg1: i32, %arg2: i32) -> (i32, i32) {
    %c0_i32 = arith.constant 0 : i32
    %c0_i32_0 = arith.constant 0 : i32
    return %c0_i32, %arg1 : i32, i32
  }
  func.func @transform_3(%arg0: i32, %arg1: i32, %arg2: i32) -> (i32, i32) {
    %c0_i32 = arith.constant 0 : i32
    %c0_i32_0 = arith.constant 0 : i32
    return %c0_i32, %arg1 : i32, i32
  }
  func.func @transform_4(%arg0: i32, %arg1: i32, %arg2: i32) -> (i32, i32) {
    %c0_i32 = arith.constant 0 : i32
    return %arg0, %arg1 : i32, i32
  }
}

module attributes {stable_mosaic.version = 11 : i64} {
  func.func @_maxpool_kernel(%arg0: i32, %arg1: memref<8x2x4x256xbf16, #tpu.memory_space<vmem>>, %arg2: memref<8x4x128xbf16, #tpu.memory_space<vmem>>) attributes {dimension_semantics = [#tpu.dimension_semantics<parallel>], iteration_bounds = array<i64: 1>, scalar_prefetch = 0 : i64, scratch_operands = 0 : i64, tpu.core_type = #tpu.core_type<tc>, window_params = [{transform_indices = @transform_0, window_bounds = array<i64: 8, 2, 4, 256>}, {transform_indices = @transform_1, window_bounds = array<i64: 8, 4, 128>}]} {
    %c0 = arith.constant 0 : index
    %c0_0 = arith.constant 0 : index
    %c0_1 = arith.constant 0 : index
    %c0_2 = arith.constant 0 : index
    %0 = vector.load %arg1[%c0, %c0_0, %c0_1, %c0_2] : memref<8x2x4x256xbf16, #tpu.memory_space<vmem>>, vector<8x1x4x256xbf16>
    %1 = vector.shape_cast %0 : vector<8x1x4x256xbf16> to vector<8x4x256xbf16>
    %c0_3 = arith.constant 0 : index
    %c1 = arith.constant 1 : index
    %c0_4 = arith.constant 0 : index
    %c0_5 = arith.constant 0 : index
    %2 = vector.load %arg1[%c0_3, %c1, %c0_4, %c0_5] : memref<8x2x4x256xbf16, #tpu.memory_space<vmem>>, vector<8x1x4x256xbf16>
    %3 = vector.shape_cast %2 : vector<8x1x4x256xbf16> to vector<8x4x256xbf16>
    %4 = arith.maximumf %1, %3 : vector<8x4x256xbf16>
    %5 = vector.extract_strided_slice %4 {offsets = [0, 0, 0], sizes = [8, 4, 128], strides = [1, 1, 1]} : vector<8x4x256xbf16> to vector<8x4x128xbf16>
    %6 = vector.extract_strided_slice %4 {offsets = [0, 0, 128], sizes = [8, 4, 128], strides = [1, 1, 1]} : vector<8x4x256xbf16> to vector<8x4x128xbf16>
    %7 = arith.maximumf %5, %6 : vector<8x4x128xbf16>
    %c0_6 = arith.constant 0 : index
    %c0_7 = arith.constant 0 : index
    %c0_8 = arith.constant 0 : index
    %8 = vector.load %arg2[%c0_6, %c0_7, %c0_8] : memref<8x4x128xbf16, #tpu.memory_space<vmem>>, vector<8x4x128xbf16>
    tpu.vector_store %arg2[%c0_6, %c0_7, %c0_8], %7 {strides = array<i32>} : memref<8x4x128xbf16, #tpu.memory_space<vmem>>, vector<8x4x128xbf16>,
    return
  }
  func.func @transform_0(%arg0: i32) -> (i32, i32, i32, i32) {
    %c0_i32 = arith.constant 0 : i32
    %c0_i32_0 = arith.constant 0 : i32
    %c0_i32_1 = arith.constant 0 : i32
    %c0_i32_2 = arith.constant 0 : i32
    return %arg0, %c0_i32, %c0_i32_0, %c0_i32_1 : i32, i32, i32, i32
  }
  func.func @transform_1(%arg0: i32) -> (i32, i32, i32) {
    %c0_i32 = arith.constant 0 : i32
    %c0_i32_0 = arith.constant 0 : i32
    %c0_i32_1 = arith.constant 0 : i32
    return %arg0, %c0_i32, %c0_i32_0 : i32, i32, i32
  }
}

module attributes {stable_mosaic.version = 11 : i64} {
  func.func @_gemm_bn_act_kernel(%arg0: i32, %arg1: i32, %arg2: i32, %arg3: memref<128x384xbf16, #tpu.memory_space<vmem>>, %arg4: memref<384x128xbf16, #tpu.memory_space<vmem>>, %arg5: memref<1x128xf32, #tpu.memory_space<vmem>>, %arg6: memref<1x128xf32, #tpu.memory_space<vmem>>, %arg7: memref<128x128xbf16, #tpu.memory_space<vmem>>, %arg8: memref<128x128xf32, #tpu.memory_space<vmem>>) attributes {dimension_semantics = [#tpu.dimension_semantics<parallel>, #tpu.dimension_semantics<parallel>, #tpu.dimension_semantics<arbitrary>], iteration_bounds = array<i64: 1, 1, 3>, scalar_prefetch = 0 : i64, scratch_operands = 1 : i64, tpu.core_type = #tpu.core_type<tc>, window_params = [{transform_indices = @transform_0, window_bounds = array<i64: 128, 384>}, {transform_indices = @transform_1, window_bounds = array<i64: 384, 128>}, {transform_indices = @transform_2, window_bounds = array<i64: 1, 128>}, {transform_indices = @transform_3, window_bounds = array<i64: 1, 128>}, {transform_indices = @transform_4, window_bounds = array<i64: 128, 128>}]} {
    %c0_i32 = arith.constant 0 : i32
    %0 = arith.cmpi eq, %arg2, %c0_i32 : i32
    %1 = arith.extui %0 : i1 to i32
    %c0_i32_0 = arith.constant 0 : i32
    %2 = arith.cmpi ne, %1, %c0_i32_0 : i32
    scf.if %2 {
      %cst_9 = arith.constant 0.000000e+00 : f32
      %12 = vector.broadcast %cst_9 : f32 to vector<128x128xf32>
      %c0_10 = arith.constant 0 : index
      %c0_11 = arith.constant 0 : index
      %13 = vector.load %arg8[%c0_10, %c0_11] : memref<128x128xf32, #tpu.memory_space<vmem>>, vector<128x128xf32>
      tpu.vector_store %arg8[%c0_10, %c0_11], %12 {strides = array<i32>} : memref<128x128xf32, #tpu.memory_space<vmem>>, vector<128x128xf32>,
    } else {
    }
    %c0 = arith.constant 0 : index
    %c0_1 = arith.constant 0 : index
    %3 = vector.load %arg8[%c0, %c0_1] : memref<128x128xf32, #tpu.memory_space<vmem>>, vector<128x128xf32>
    %c0_2 = arith.constant 0 : index
    %c0_3 = arith.constant 0 : index
    %4 = vector.load %arg3[%c0_2, %c0_3] : memref<128x384xbf16, #tpu.memory_space<vmem>>, vector<128x384xbf16>
    %c0_4 = arith.constant 0 : index
    %c0_5 = arith.constant 0 : index
    %5 = vector.load %arg4[%c0_4, %c0_5] : memref<384x128xbf16, #tpu.memory_space<vmem>>, vector<384x128xbf16>
    %cst = arith.constant dense<0.000000e+00> : vector<128x128xf32>
    %6 = tpu.matmul %4, %5, %cst {dimension_numbers = #tpu.dot_dimension_numbers<[1], [0], [0], [1], [0, 0, 1, 1], [], []>} : vector<128x384xbf16>, vector<384x128xbf16>, vector<128x128xf32> -> vector<128x128xf32>
    %7 = arith.addf %3, %6 : vector<128x128xf32>
    %c0_6 = arith.constant 0 : index
    %c0_7 = arith.constant 0 : index
    %8 = vector.load %arg8[%c0_6, %c0_7] : memref<128x128xf32, #tpu.memory_space<vmem>>, vector<128x128xf32>
    tpu.vector_store %arg8[%c0_6, %c0_7], %7 {strides = array<i32>} : memref<128x128xf32, #tpu.memory_space<vmem>>, vector<128x128xf32>,
    %c2_i32 = arith.constant 2 : i32
    %9 = arith.cmpi eq, %arg2, %c2_i32 : i32
    %10 = arith.extui %9 : i1 to i32
    %c0_i32_8 = arith.constant 0 : i32
    %11 = arith.cmpi ne, %10, %c0_i32_8 : i32
    scf.if %11 {
      %c0_9 = arith.constant 0 : index
      %c0_10 = arith.constant 0 : index
      %12 = vector.load %arg8[%c0_9, %c0_10] : memref<128x128xf32, #tpu.memory_space<vmem>>, vector<128x128xf32>
      %c0_11 = arith.constant 0 : index
      %c0_12 = arith.constant 0 : index
      %13 = vector.load %arg5[%c0_11, %c0_12] : memref<1x128xf32, #tpu.memory_space<vmem>>, vector<1x128xf32>
      %14 = vector.broadcast %13 : vector<1x128xf32> to vector<128x128xf32>
      %15 = arith.mulf %12, %14 : vector<128x128xf32>
      %c0_13 = arith.constant 0 : index
      %c0_14 = arith.constant 0 : index
      %16 = vector.load %arg6[%c0_13, %c0_14] : memref<1x128xf32, #tpu.memory_space<vmem>>, vector<1x128xf32>
      %17 = vector.broadcast %16 : vector<1x128xf32> to vector<128x128xf32>
      %18 = arith.addf %15, %17 : vector<128x128xf32>
      %cst_15 = arith.constant 0.000000e+00 : f32
      %19 = vector.broadcast %cst_15 : f32 to vector<128x128xf32>
      %20 = arith.maximumf %18, %19 : vector<128x128xf32>
      %21 = arith.truncf %20 : vector<128x128xf32> to vector<128x128xbf16>
      %c0_16 = arith.constant 0 : index
      %c0_17 = arith.constant 0 : index
      %22 = vector.load %arg7[%c0_16, %c0_17] : memref<128x128xbf16, #tpu.memory_space<vmem>>, vector<128x128xbf16>
      tpu.vector_store %arg7[%c0_16, %c0_17], %21 {strides = array<i32>} : memref<128x128xbf16, #tpu.memory_space<vmem>>, vector<128x128xbf16>,
    } else {
    }
    return
  }
  func.func @transform_0(%arg0: i32, %arg1: i32, %arg2: i32) -> (i32, i32) {
    %c0_i32 = arith.constant 0 : i32
    return %arg0, %arg2 : i32, i32
  }
  func.func @transform_1(%arg0: i32, %arg1: i32, %arg2: i32) -> (i32, i32) {
    %c0_i32 = arith.constant 0 : i32
    return %arg2, %arg1 : i32, i32
  }
  func.func @transform_2(%arg0: i32, %arg1: i32, %arg2: i32) -> (i32, i32) {
    %c0_i32 = arith.constant 0 : i32
    %c0_i32_0 = arith.constant 0 : i32
    return %c0_i32, %arg1 : i32, i32
  }
  func.func @transform_3(%arg0: i32, %arg1: i32, %arg2: i32) -> (i32, i32) {
    %c0_i32 = arith.constant 0 : i32
    %c0_i32_0 = arith.constant 0 : i32
    return %c0_i32, %arg1 : i32, i32
  }
  func.func @transform_4(%arg0: i32, %arg1: i32, %arg2: i32) -> (i32, i32) {
    %c0_i32 = arith.constant 0 : i32
    return %arg0, %arg1 : i32, i32
  }
}

module attributes {stable_mosaic.version = 11 : i64} {
  func.func @_gemm_bn_act_kernel(%arg0: i32, %arg1: i32, %arg2: i32, %arg3: memref<32x384xbf16, #tpu.memory_space<vmem>>, %arg4: memref<384x256xbf16, #tpu.memory_space<vmem>>, %arg5: memref<1x256xf32, #tpu.memory_space<vmem>>, %arg6: memref<1x256xf32, #tpu.memory_space<vmem>>, %arg7: memref<32x256xbf16, #tpu.memory_space<vmem>>, %arg8: memref<32x256xf32, #tpu.memory_space<vmem>>) attributes {dimension_semantics = [#tpu.dimension_semantics<parallel>, #tpu.dimension_semantics<parallel>, #tpu.dimension_semantics<arbitrary>], iteration_bounds = array<i64: 1, 1, 3>, scalar_prefetch = 0 : i64, scratch_operands = 1 : i64, tpu.core_type = #tpu.core_type<tc>, window_params = [{transform_indices = @transform_0, window_bounds = array<i64: 32, 384>}, {transform_indices = @transform_1, window_bounds = array<i64: 384, 256>}, {transform_indices = @transform_2, window_bounds = array<i64: 1, 256>}, {transform_indices = @transform_3, window_bounds = array<i64: 1, 256>}, {transform_indices = @transform_4, window_bounds = array<i64: 32, 256>}]} {
    %c0_i32 = arith.constant 0 : i32
    %0 = arith.cmpi eq, %arg2, %c0_i32 : i32
    %1 = arith.extui %0 : i1 to i32
    %c0_i32_0 = arith.constant 0 : i32
    %2 = arith.cmpi ne, %1, %c0_i32_0 : i32
    scf.if %2 {
      %cst_9 = arith.constant 0.000000e+00 : f32
      %12 = vector.broadcast %cst_9 : f32 to vector<32x256xf32>
      %c0_10 = arith.constant 0 : index
      %c0_11 = arith.constant 0 : index
      %13 = vector.load %arg8[%c0_10, %c0_11] : memref<32x256xf32, #tpu.memory_space<vmem>>, vector<32x256xf32>
      tpu.vector_store %arg8[%c0_10, %c0_11], %12 {strides = array<i32>} : memref<32x256xf32, #tpu.memory_space<vmem>>, vector<32x256xf32>,
    } else {
    }
    %c0 = arith.constant 0 : index
    %c0_1 = arith.constant 0 : index
    %3 = vector.load %arg8[%c0, %c0_1] : memref<32x256xf32, #tpu.memory_space<vmem>>, vector<32x256xf32>
    %c0_2 = arith.constant 0 : index
    %c0_3 = arith.constant 0 : index
    %4 = vector.load %arg3[%c0_2, %c0_3] : memref<32x384xbf16, #tpu.memory_space<vmem>>, vector<32x384xbf16>
    %c0_4 = arith.constant 0 : index
    %c0_5 = arith.constant 0 : index
    %5 = vector.load %arg4[%c0_4, %c0_5] : memref<384x256xbf16, #tpu.memory_space<vmem>>, vector<384x256xbf16>
    %cst = arith.constant dense<0.000000e+00> : vector<32x256xf32>
    %6 = tpu.matmul %4, %5, %cst {dimension_numbers = #tpu.dot_dimension_numbers<[1], [0], [0], [1], [0, 0, 1, 1], [], []>} : vector<32x384xbf16>, vector<384x256xbf16>, vector<32x256xf32> -> vector<32x256xf32>
    %7 = arith.addf %3, %6 : vector<32x256xf32>
    %c0_6 = arith.constant 0 : index
    %c0_7 = arith.constant 0 : index
    %8 = vector.load %arg8[%c0_6, %c0_7] : memref<32x256xf32, #tpu.memory_space<vmem>>, vector<32x256xf32>
    tpu.vector_store %arg8[%c0_6, %c0_7], %7 {strides = array<i32>} : memref<32x256xf32, #tpu.memory_space<vmem>>, vector<32x256xf32>,
    %c2_i32 = arith.constant 2 : i32
    %9 = arith.cmpi eq, %arg2, %c2_i32 : i32
    %10 = arith.extui %9 : i1 to i32
    %c0_i32_8 = arith.constant 0 : i32
    %11 = arith.cmpi ne, %10, %c0_i32_8 : i32
    scf.if %11 {
      %c0_9 = arith.constant 0 : index
      %c0_10 = arith.constant 0 : index
      %12 = vector.load %arg8[%c0_9, %c0_10] : memref<32x256xf32, #tpu.memory_space<vmem>>, vector<32x256xf32>
      %c0_11 = arith.constant 0 : index
      %c0_12 = arith.constant 0 : index
      %13 = vector.load %arg5[%c0_11, %c0_12] : memref<1x256xf32, #tpu.memory_space<vmem>>, vector<1x256xf32>
      %14 = vector.broadcast %13 : vector<1x256xf32> to vector<32x256xf32>
      %15 = arith.mulf %12, %14 : vector<32x256xf32>
      %c0_13 = arith.constant 0 : index
      %c0_14 = arith.constant 0 : index
      %16 = vector.load %arg6[%c0_13, %c0_14] : memref<1x256xf32, #tpu.memory_space<vmem>>, vector<1x256xf32>
      %17 = vector.broadcast %16 : vector<1x256xf32> to vector<32x256xf32>
      %18 = arith.addf %15, %17 : vector<32x256xf32>
      %cst_15 = arith.constant 0.000000e+00 : f32
      %19 = vector.broadcast %cst_15 : f32 to vector<32x256xf32>
      %20 = arith.maximumf %18, %19 : vector<32x256xf32>
      %21 = arith.truncf %20 : vector<32x256xf32> to vector<32x256xbf16>
      %c0_16 = arith.constant 0 : index
      %c0_17 = arith.constant 0 : index
      %22 = vector.load %arg7[%c0_16, %c0_17] : memref<32x256xbf16, #tpu.memory_space<vmem>>, vector<32x256xbf16>
      tpu.vector_store %arg7[%c0_16, %c0_17], %21 {strides = array<i32>} : memref<32x256xbf16, #tpu.memory_space<vmem>>, vector<32x256xbf16>,
    } else {
    }
    return
  }
  func.func @transform_0(%arg0: i32, %arg1: i32, %arg2: i32) -> (i32, i32) {
    %c0_i32 = arith.constant 0 : i32
    return %arg0, %arg2 : i32, i32
  }
  func.func @transform_1(%arg0: i32, %arg1: i32, %arg2: i32) -> (i32, i32) {
    %c0_i32 = arith.constant 0 : i32
    return %arg2, %arg1 : i32, i32
  }
  func.func @transform_2(%arg0: i32, %arg1: i32, %arg2: i32) -> (i32, i32) {
    %c0_i32 = arith.constant 0 : i32
    %c0_i32_0 = arith.constant 0 : i32
    return %c0_i32, %arg1 : i32, i32
  }
  func.func @transform_3(%arg0: i32, %arg1: i32, %arg2: i32) -> (i32, i32) {
    %c0_i32 = arith.constant 0 : i32
    %c0_i32_0 = arith.constant 0 : i32
    return %c0_i32, %arg1 : i32, i32
  }
  func.func @transform_4(%arg0: i32, %arg1: i32, %arg2: i32) -> (i32, i32) {
    %c0_i32 = arith.constant 0 : i32
    return %arg0, %arg1 : i32, i32
  }
}

module attributes {stable_mosaic.version = 11 : i64} {
  func.func @_gemm_bn_act_kernel(%arg0: i32, %arg1: i32, %arg2: i32, %arg3: memref<32x384xbf16, #tpu.memory_space<vmem>>, %arg4: memref<384x256xbf16, #tpu.memory_space<vmem>>, %arg5: memref<1x256xf32, #tpu.memory_space<vmem>>, %arg6: memref<1x256xf32, #tpu.memory_space<vmem>>, %arg7: memref<32x256xbf16, #tpu.memory_space<vmem>>, %arg8: memref<32x256xf32, #tpu.memory_space<vmem>>) attributes {dimension_semantics = [#tpu.dimension_semantics<parallel>, #tpu.dimension_semantics<parallel>, #tpu.dimension_semantics<arbitrary>], iteration_bounds = array<i64: 1, 1, 6>, scalar_prefetch = 0 : i64, scratch_operands = 1 : i64, tpu.core_type = #tpu.core_type<tc>, window_params = [{transform_indices = @transform_0, window_bounds = array<i64: 32, 384>}, {transform_indices = @transform_1, window_bounds = array<i64: 384, 256>}, {transform_indices = @transform_2, window_bounds = array<i64: 1, 256>}, {transform_indices = @transform_3, window_bounds = array<i64: 1, 256>}, {transform_indices = @transform_4, window_bounds = array<i64: 32, 256>}]} {
    %c0_i32 = arith.constant 0 : i32
    %0 = arith.cmpi eq, %arg2, %c0_i32 : i32
    %1 = arith.extui %0 : i1 to i32
    %c0_i32_0 = arith.constant 0 : i32
    %2 = arith.cmpi ne, %1, %c0_i32_0 : i32
    scf.if %2 {
      %cst_9 = arith.constant 0.000000e+00 : f32
      %12 = vector.broadcast %cst_9 : f32 to vector<32x256xf32>
      %c0_10 = arith.constant 0 : index
      %c0_11 = arith.constant 0 : index
      %13 = vector.load %arg8[%c0_10, %c0_11] : memref<32x256xf32, #tpu.memory_space<vmem>>, vector<32x256xf32>
      tpu.vector_store %arg8[%c0_10, %c0_11], %12 {strides = array<i32>} : memref<32x256xf32, #tpu.memory_space<vmem>>, vector<32x256xf32>,
    } else {
    }
    %c0 = arith.constant 0 : index
    %c0_1 = arith.constant 0 : index
    %3 = vector.load %arg8[%c0, %c0_1] : memref<32x256xf32, #tpu.memory_space<vmem>>, vector<32x256xf32>
    %c0_2 = arith.constant 0 : index
    %c0_3 = arith.constant 0 : index
    %4 = vector.load %arg3[%c0_2, %c0_3] : memref<32x384xbf16, #tpu.memory_space<vmem>>, vector<32x384xbf16>
    %c0_4 = arith.constant 0 : index
    %c0_5 = arith.constant 0 : index
    %5 = vector.load %arg4[%c0_4, %c0_5] : memref<384x256xbf16, #tpu.memory_space<vmem>>, vector<384x256xbf16>
    %cst = arith.constant dense<0.000000e+00> : vector<32x256xf32>
    %6 = tpu.matmul %4, %5, %cst {dimension_numbers = #tpu.dot_dimension_numbers<[1], [0], [0], [1], [0, 0, 1, 1], [], []>} : vector<32x384xbf16>, vector<384x256xbf16>, vector<32x256xf32> -> vector<32x256xf32>
    %7 = arith.addf %3, %6 : vector<32x256xf32>
    %c0_6 = arith.constant 0 : index
    %c0_7 = arith.constant 0 : index
    %8 = vector.load %arg8[%c0_6, %c0_7] : memref<32x256xf32, #tpu.memory_space<vmem>>, vector<32x256xf32>
    tpu.vector_store %arg8[%c0_6, %c0_7], %7 {strides = array<i32>} : memref<32x256xf32, #tpu.memory_space<vmem>>, vector<32x256xf32>,
    %c5_i32 = arith.constant 5 : i32
    %9 = arith.cmpi eq, %arg2, %c5_i32 : i32
    %10 = arith.extui %9 : i1 to i32
    %c0_i32_8 = arith.constant 0 : i32
    %11 = arith.cmpi ne, %10, %c0_i32_8 : i32
    scf.if %11 {
      %c0_9 = arith.constant 0 : index
      %c0_10 = arith.constant 0 : index
      %12 = vector.load %arg8[%c0_9, %c0_10] : memref<32x256xf32, #tpu.memory_space<vmem>>, vector<32x256xf32>
      %c0_11 = arith.constant 0 : index
      %c0_12 = arith.constant 0 : index
      %13 = vector.load %arg5[%c0_11, %c0_12] : memref<1x256xf32, #tpu.memory_space<vmem>>, vector<1x256xf32>
      %14 = vector.broadcast %13 : vector<1x256xf32> to vector<32x256xf32>
      %15 = arith.mulf %12, %14 : vector<32x256xf32>
      %c0_13 = arith.constant 0 : index
      %c0_14 = arith.constant 0 : index
      %16 = vector.load %arg6[%c0_13, %c0_14] : memref<1x256xf32, #tpu.memory_space<vmem>>, vector<1x256xf32>
      %17 = vector.broadcast %16 : vector<1x256xf32> to vector<32x256xf32>
      %18 = arith.addf %15, %17 : vector<32x256xf32>
      %cst_15 = arith.constant 0.000000e+00 : f32
      %19 = vector.broadcast %cst_15 : f32 to vector<32x256xf32>
      %20 = arith.maximumf %18, %19 : vector<32x256xf32>
      %21 = arith.truncf %20 : vector<32x256xf32> to vector<32x256xbf16>
      %c0_16 = arith.constant 0 : index
      %c0_17 = arith.constant 0 : index
      %22 = vector.load %arg7[%c0_16, %c0_17] : memref<32x256xbf16, #tpu.memory_space<vmem>>, vector<32x256xbf16>
      tpu.vector_store %arg7[%c0_16, %c0_17], %21 {strides = array<i32>} : memref<32x256xbf16, #tpu.memory_space<vmem>>, vector<32x256xbf16>,
    } else {
    }
    return
  }
  func.func @transform_0(%arg0: i32, %arg1: i32, %arg2: i32) -> (i32, i32) {
    %c0_i32 = arith.constant 0 : i32
    return %arg0, %arg2 : i32, i32
  }
  func.func @transform_1(%arg0: i32, %arg1: i32, %arg2: i32) -> (i32, i32) {
    %c0_i32 = arith.constant 0 : i32
    return %arg2, %arg1 : i32, i32
  }
  func.func @transform_2(%arg0: i32, %arg1: i32, %arg2: i32) -> (i32, i32) {
    %c0_i32 = arith.constant 0 : i32
    %c0_i32_0 = arith.constant 0 : i32
    return %c0_i32, %arg1 : i32, i32
  }
  func.func @transform_3(%arg0: i32, %arg1: i32, %arg2: i32) -> (i32, i32) {
    %c0_i32 = arith.constant 0 : i32
    %c0_i32_0 = arith.constant 0 : i32
    return %c0_i32, %arg1 : i32, i32
  }
  func.func @transform_4(%arg0: i32, %arg1: i32, %arg2: i32) -> (i32, i32) {
    %c0_i32 = arith.constant 0 : i32
    return %arg0, %arg1 : i32, i32
  }
}

module attributes {stable_mosaic.version = 11 : i64} {
  func.func @_maxpool_kernel(%arg0: i32, %arg1: memref<4x2x2x512xbf16, #tpu.memory_space<vmem>>, %arg2: memref<4x2x256xbf16, #tpu.memory_space<vmem>>) attributes {dimension_semantics = [#tpu.dimension_semantics<parallel>], iteration_bounds = array<i64: 1>, scalar_prefetch = 0 : i64, scratch_operands = 0 : i64, tpu.core_type = #tpu.core_type<tc>, window_params = [{transform_indices = @transform_0, window_bounds = array<i64: 4, 2, 2, 512>}, {transform_indices = @transform_1, window_bounds = array<i64: 4, 2, 256>}]} {
    %c0 = arith.constant 0 : index
    %c0_0 = arith.constant 0 : index
    %c0_1 = arith.constant 0 : index
    %c0_2 = arith.constant 0 : index
    %0 = vector.load %arg1[%c0, %c0_0, %c0_1, %c0_2] : memref<4x2x2x512xbf16, #tpu.memory_space<vmem>>, vector<4x1x2x512xbf16>
    %1 = vector.shape_cast %0 : vector<4x1x2x512xbf16> to vector<4x2x512xbf16>
    %c0_3 = arith.constant 0 : index
    %c1 = arith.constant 1 : index
    %c0_4 = arith.constant 0 : index
    %c0_5 = arith.constant 0 : index
    %2 = vector.load %arg1[%c0_3, %c1, %c0_4, %c0_5] : memref<4x2x2x512xbf16, #tpu.memory_space<vmem>>, vector<4x1x2x512xbf16>
    %3 = vector.shape_cast %2 : vector<4x1x2x512xbf16> to vector<4x2x512xbf16>
    %4 = arith.maximumf %1, %3 : vector<4x2x512xbf16>
    %5 = vector.extract_strided_slice %4 {offsets = [0, 0, 0], sizes = [4, 2, 256], strides = [1, 1, 1]} : vector<4x2x512xbf16> to vector<4x2x256xbf16>
    %6 = vector.extract_strided_slice %4 {offsets = [0, 0, 256], sizes = [4, 2, 256], strides = [1, 1, 1]} : vector<4x2x512xbf16> to vector<4x2x256xbf16>
    %7 = arith.maximumf %5, %6 : vector<4x2x256xbf16>
    %c0_6 = arith.constant 0 : index
    %c0_7 = arith.constant 0 : index
    %c0_8 = arith.constant 0 : index
    %8 = vector.load %arg2[%c0_6, %c0_7, %c0_8] : memref<4x2x256xbf16, #tpu.memory_space<vmem>>, vector<4x2x256xbf16>
    tpu.vector_store %arg2[%c0_6, %c0_7, %c0_8], %7 {strides = array<i32>} : memref<4x2x256xbf16, #tpu.memory_space<vmem>>, vector<4x2x256xbf16>,
    return
  }
  func.func @transform_0(%arg0: i32) -> (i32, i32, i32, i32) {
    %c0_i32 = arith.constant 0 : i32
    %c0_i32_0 = arith.constant 0 : i32
    %c0_i32_1 = arith.constant 0 : i32
    %c0_i32_2 = arith.constant 0 : i32
    return %arg0, %c0_i32, %c0_i32_0, %c0_i32_1 : i32, i32, i32, i32
  }
  func.func @transform_1(%arg0: i32) -> (i32, i32, i32) {
    %c0_i32 = arith.constant 0 : i32
    %c0_i32_0 = arith.constant 0 : i32
    %c0_i32_1 = arith.constant 0 : i32
    return %arg0, %c0_i32, %c0_i32_0 : i32, i32, i32
  }
}

module attributes {stable_mosaic.version = 11 : i64} {
  func.func @_gemm_bn_act_kernel(%arg0: i32, %arg1: i32, %arg2: i32, %arg3: memref<8x384xbf16, #tpu.memory_space<vmem>>, %arg4: memref<384x256xbf16, #tpu.memory_space<vmem>>, %arg5: memref<1x256xf32, #tpu.memory_space<vmem>>, %arg6: memref<1x256xf32, #tpu.memory_space<vmem>>, %arg7: memref<8x256xbf16, #tpu.memory_space<vmem>>, %arg8: memref<8x256xf32, #tpu.memory_space<vmem>>) attributes {dimension_semantics = [#tpu.dimension_semantics<parallel>, #tpu.dimension_semantics<parallel>, #tpu.dimension_semantics<arbitrary>], iteration_bounds = array<i64: 1, 2, 6>, scalar_prefetch = 0 : i64, scratch_operands = 1 : i64, tpu.core_type = #tpu.core_type<tc>, window_params = [{transform_indices = @transform_0, window_bounds = array<i64: 8, 384>}, {transform_indices = @transform_1, window_bounds = array<i64: 384, 256>}, {transform_indices = @transform_2, window_bounds = array<i64: 1, 256>}, {transform_indices = @transform_3, window_bounds = array<i64: 1, 256>}, {transform_indices = @transform_4, window_bounds = array<i64: 8, 256>}]} {
    %c0_i32 = arith.constant 0 : i32
    %0 = arith.cmpi eq, %arg2, %c0_i32 : i32
    %1 = arith.extui %0 : i1 to i32
    %c0_i32_0 = arith.constant 0 : i32
    %2 = arith.cmpi ne, %1, %c0_i32_0 : i32
    scf.if %2 {
      %cst_9 = arith.constant 0.000000e+00 : f32
      %12 = vector.broadcast %cst_9 : f32 to vector<8x256xf32>
      %c0_10 = arith.constant 0 : index
      %c0_11 = arith.constant 0 : index
      %13 = vector.load %arg8[%c0_10, %c0_11] : memref<8x256xf32, #tpu.memory_space<vmem>>, vector<8x256xf32>
      tpu.vector_store %arg8[%c0_10, %c0_11], %12 {strides = array<i32>} : memref<8x256xf32, #tpu.memory_space<vmem>>, vector<8x256xf32>,
    } else {
    }
    %c0 = arith.constant 0 : index
    %c0_1 = arith.constant 0 : index
    %3 = vector.load %arg8[%c0, %c0_1] : memref<8x256xf32, #tpu.memory_space<vmem>>, vector<8x256xf32>
    %c0_2 = arith.constant 0 : index
    %c0_3 = arith.constant 0 : index
    %4 = vector.load %arg3[%c0_2, %c0_3] : memref<8x384xbf16, #tpu.memory_space<vmem>>, vector<8x384xbf16>
    %c0_4 = arith.constant 0 : index
    %c0_5 = arith.constant 0 : index
    %5 = vector.load %arg4[%c0_4, %c0_5] : memref<384x256xbf16, #tpu.memory_space<vmem>>, vector<384x256xbf16>
    %cst = arith.constant dense<0.000000e+00> : vector<8x256xf32>
    %6 = tpu.matmul %4, %5, %cst {dimension_numbers = #tpu.dot_dimension_numbers<[1], [0], [0], [1], [0, 0, 1, 1], [], []>} : vector<8x384xbf16>, vector<384x256xbf16>, vector<8x256xf32> -> vector<8x256xf32>
    %7 = arith.addf %3, %6 : vector<8x256xf32>
    %c0_6 = arith.constant 0 : index
    %c0_7 = arith.constant 0 : index
    %8 = vector.load %arg8[%c0_6, %c0_7] : memref<8x256xf32, #tpu.memory_space<vmem>>, vector<8x256xf32>
    tpu.vector_store %arg8[%c0_6, %c0_7], %7 {strides = array<i32>} : memref<8x256xf32, #tpu.memory_space<vmem>>, vector<8x256xf32>,
    %c5_i32 = arith.constant 5 : i32
    %9 = arith.cmpi eq, %arg2, %c5_i32 : i32
    %10 = arith.extui %9 : i1 to i32
    %c0_i32_8 = arith.constant 0 : i32
    %11 = arith.cmpi ne, %10, %c0_i32_8 : i32
    scf.if %11 {
      %c0_9 = arith.constant 0 : index
      %c0_10 = arith.constant 0 : index
      %12 = vector.load %arg8[%c0_9, %c0_10] : memref<8x256xf32, #tpu.memory_space<vmem>>, vector<8x256xf32>
      %c0_11 = arith.constant 0 : index
      %c0_12 = arith.constant 0 : index
      %13 = vector.load %arg5[%c0_11, %c0_12] : memref<1x256xf32, #tpu.memory_space<vmem>>, vector<1x256xf32>
      %14 = vector.broadcast %13 : vector<1x256xf32> to vector<8x256xf32>
      %15 = arith.mulf %12, %14 : vector<8x256xf32>
      %c0_13 = arith.constant 0 : index
      %c0_14 = arith.constant 0 : index
      %16 = vector.load %arg6[%c0_13, %c0_14] : memref<1x256xf32, #tpu.memory_space<vmem>>, vector<1x256xf32>
      %17 = vector.broadcast %16 : vector<1x256xf32> to vector<8x256xf32>
      %18 = arith.addf %15, %17 : vector<8x256xf32>
      %cst_15 = arith.constant 0.000000e+00 : f32
      %19 = vector.broadcast %cst_15 : f32 to vector<8x256xf32>
      %20 = arith.maximumf %18, %19 : vector<8x256xf32>
      %21 = arith.truncf %20 : vector<8x256xf32> to vector<8x256xbf16>
      %c0_16 = arith.constant 0 : index
      %c0_17 = arith.constant 0 : index
      %22 = vector.load %arg7[%c0_16, %c0_17] : memref<8x256xbf16, #tpu.memory_space<vmem>>, vector<8x256xbf16>
      tpu.vector_store %arg7[%c0_16, %c0_17], %21 {strides = array<i32>} : memref<8x256xbf16, #tpu.memory_space<vmem>>, vector<8x256xbf16>,
    } else {
    }
    return
  }
  func.func @transform_0(%arg0: i32, %arg1: i32, %arg2: i32) -> (i32, i32) {
    %c0_i32 = arith.constant 0 : i32
    return %arg0, %arg2 : i32, i32
  }
  func.func @transform_1(%arg0: i32, %arg1: i32, %arg2: i32) -> (i32, i32) {
    %c0_i32 = arith.constant 0 : i32
    return %arg2, %arg1 : i32, i32
  }
  func.func @transform_2(%arg0: i32, %arg1: i32, %arg2: i32) -> (i32, i32) {
    %c0_i32 = arith.constant 0 : i32
    %c0_i32_0 = arith.constant 0 : i32
    return %c0_i32, %arg1 : i32, i32
  }
  func.func @transform_3(%arg0: i32, %arg1: i32, %arg2: i32) -> (i32, i32) {
    %c0_i32 = arith.constant 0 : i32
    %c0_i32_0 = arith.constant 0 : i32
    return %c0_i32, %arg1 : i32, i32
  }
  func.func @transform_4(%arg0: i32, %arg1: i32, %arg2: i32) -> (i32, i32) {
    %c0_i32 = arith.constant 0 : i32
    return %arg0, %arg1 : i32, i32
  }
}

module attributes {stable_mosaic.version = 11 : i64} {
  func.func @_gemm_bn_act_kernel(%arg0: i32, %arg1: i32, %arg2: i32, %arg3: memref<8x512xbf16, #tpu.memory_space<vmem>>, %arg4: memref<512x256xbf16, #tpu.memory_space<vmem>>, %arg5: memref<1x256xf32, #tpu.memory_space<vmem>>, %arg6: memref<1x256xf32, #tpu.memory_space<vmem>>, %arg7: memref<8x256xbf16, #tpu.memory_space<vmem>>, %arg8: memref<8x256xf32, #tpu.memory_space<vmem>>) attributes {dimension_semantics = [#tpu.dimension_semantics<parallel>, #tpu.dimension_semantics<parallel>, #tpu.dimension_semantics<arbitrary>], iteration_bounds = array<i64: 1, 2, 9>, scalar_prefetch = 0 : i64, scratch_operands = 1 : i64, tpu.core_type = #tpu.core_type<tc>, window_params = [{transform_indices = @transform_0, window_bounds = array<i64: 8, 512>}, {transform_indices = @transform_1, window_bounds = array<i64: 512, 256>}, {transform_indices = @transform_2, window_bounds = array<i64: 1, 256>}, {transform_indices = @transform_3, window_bounds = array<i64: 1, 256>}, {transform_indices = @transform_4, window_bounds = array<i64: 8, 256>}]} {
    %c0_i32 = arith.constant 0 : i32
    %0 = arith.cmpi eq, %arg2, %c0_i32 : i32
    %1 = arith.extui %0 : i1 to i32
    %c0_i32_0 = arith.constant 0 : i32
    %2 = arith.cmpi ne, %1, %c0_i32_0 : i32
    scf.if %2 {
      %cst_9 = arith.constant 0.000000e+00 : f32
      %12 = vector.broadcast %cst_9 : f32 to vector<8x256xf32>
      %c0_10 = arith.constant 0 : index
      %c0_11 = arith.constant 0 : index
      %13 = vector.load %arg8[%c0_10, %c0_11] : memref<8x256xf32, #tpu.memory_space<vmem>>, vector<8x256xf32>
      tpu.vector_store %arg8[%c0_10, %c0_11], %12 {strides = array<i32>} : memref<8x256xf32, #tpu.memory_space<vmem>>, vector<8x256xf32>,
    } else {
    }
    %c0 = arith.constant 0 : index
    %c0_1 = arith.constant 0 : index
    %3 = vector.load %arg8[%c0, %c0_1] : memref<8x256xf32, #tpu.memory_space<vmem>>, vector<8x256xf32>
    %c0_2 = arith.constant 0 : index
    %c0_3 = arith.constant 0 : index
    %4 = vector.load %arg3[%c0_2, %c0_3] : memref<8x512xbf16, #tpu.memory_space<vmem>>, vector<8x512xbf16>
    %c0_4 = arith.constant 0 : index
    %c0_5 = arith.constant 0 : index
    %5 = vector.load %arg4[%c0_4, %c0_5] : memref<512x256xbf16, #tpu.memory_space<vmem>>, vector<512x256xbf16>
    %cst = arith.constant dense<0.000000e+00> : vector<8x256xf32>
    %6 = tpu.matmul %4, %5, %cst {dimension_numbers = #tpu.dot_dimension_numbers<[1], [0], [0], [1], [0, 0, 1, 1], [], []>} : vector<8x512xbf16>, vector<512x256xbf16>, vector<8x256xf32> -> vector<8x256xf32>
    %7 = arith.addf %3, %6 : vector<8x256xf32>
    %c0_6 = arith.constant 0 : index
    %c0_7 = arith.constant 0 : index
    %8 = vector.load %arg8[%c0_6, %c0_7] : memref<8x256xf32, #tpu.memory_space<vmem>>, vector<8x256xf32>
    tpu.vector_store %arg8[%c0_6, %c0_7], %7 {strides = array<i32>} : memref<8x256xf32, #tpu.memory_space<vmem>>, vector<8x256xf32>,
    %c8_i32 = arith.constant 8 : i32
    %9 = arith.cmpi eq, %arg2, %c8_i32 : i32
    %10 = arith.extui %9 : i1 to i32
    %c0_i32_8 = arith.constant 0 : i32
    %11 = arith.cmpi ne, %10, %c0_i32_8 : i32
    scf.if %11 {
      %c0_9 = arith.constant 0 : index
      %c0_10 = arith.constant 0 : index
      %12 = vector.load %arg8[%c0_9, %c0_10] : memref<8x256xf32, #tpu.memory_space<vmem>>, vector<8x256xf32>
      %c0_11 = arith.constant 0 : index
      %c0_12 = arith.constant 0 : index
      %13 = vector.load %arg5[%c0_11, %c0_12] : memref<1x256xf32, #tpu.memory_space<vmem>>, vector<1x256xf32>
      %14 = vector.broadcast %13 : vector<1x256xf32> to vector<8x256xf32>
      %15 = arith.mulf %12, %14 : vector<8x256xf32>
      %c0_13 = arith.constant 0 : index
      %c0_14 = arith.constant 0 : index
      %16 = vector.load %arg6[%c0_13, %c0_14] : memref<1x256xf32, #tpu.memory_space<vmem>>, vector<1x256xf32>
      %17 = vector.broadcast %16 : vector<1x256xf32> to vector<8x256xf32>
      %18 = arith.addf %15, %17 : vector<8x256xf32>
      %cst_15 = arith.constant 0.000000e+00 : f32
      %19 = vector.broadcast %cst_15 : f32 to vector<8x256xf32>
      %20 = arith.maximumf %18, %19 : vector<8x256xf32>
      %21 = arith.truncf %20 : vector<8x256xf32> to vector<8x256xbf16>
      %c0_16 = arith.constant 0 : index
      %c0_17 = arith.constant 0 : index
      %22 = vector.load %arg7[%c0_16, %c0_17] : memref<8x256xbf16, #tpu.memory_space<vmem>>, vector<8x256xbf16>
      tpu.vector_store %arg7[%c0_16, %c0_17], %21 {strides = array<i32>} : memref<8x256xbf16, #tpu.memory_space<vmem>>, vector<8x256xbf16>,
    } else {
    }
    return
  }
  func.func @transform_0(%arg0: i32, %arg1: i32, %arg2: i32) -> (i32, i32) {
    %c0_i32 = arith.constant 0 : i32
    return %arg0, %arg2 : i32, i32
  }
  func.func @transform_1(%arg0: i32, %arg1: i32, %arg2: i32) -> (i32, i32) {
    %c0_i32 = arith.constant 0 : i32
    return %arg2, %arg1 : i32, i32
  }
  func.func @transform_2(%arg0: i32, %arg1: i32, %arg2: i32) -> (i32, i32) {
    %c0_i32 = arith.constant 0 : i32
    %c0_i32_0 = arith.constant 0 : i32
    return %c0_i32, %arg1 : i32, i32
  }
  func.func @transform_3(%arg0: i32, %arg1: i32, %arg2: i32) -> (i32, i32) {
    %c0_i32 = arith.constant 0 : i32
    %c0_i32_0 = arith.constant 0 : i32
    return %c0_i32, %arg1 : i32, i32
  }
  func.func @transform_4(%arg0: i32, %arg1: i32, %arg2: i32) -> (i32, i32) {
    %c0_i32 = arith.constant 0 : i32
    return %arg0, %arg1 : i32, i32
  }
}

module attributes {stable_mosaic.version = 11 : i64} {
  func.func @_maxpool_kernel(%arg0: i32, %arg1: memref<2x2x1x1024xbf16, #tpu.memory_space<vmem>>, %arg2: memref<2x1x512xbf16, #tpu.memory_space<vmem>>) attributes {dimension_semantics = [#tpu.dimension_semantics<parallel>], iteration_bounds = array<i64: 1>, scalar_prefetch = 0 : i64, scratch_operands = 0 : i64, tpu.core_type = #tpu.core_type<tc>, window_params = [{transform_indices = @transform_0, window_bounds = array<i64: 2, 2, 1, 1024>}, {transform_indices = @transform_1, window_bounds = array<i64: 2, 1, 512>}]} {
    %c0 = arith.constant 0 : index
    %c0_0 = arith.constant 0 : index
    %c0_1 = arith.constant 0 : index
    %c0_2 = arith.constant 0 : index
    %0 = vector.load %arg1[%c0, %c0_0, %c0_1, %c0_2] : memref<2x2x1x1024xbf16, #tpu.memory_space<vmem>>, vector<2x1x1x1024xbf16>
    %1 = vector.shape_cast %0 : vector<2x1x1x1024xbf16> to vector<2x1x1024xbf16>
    %c0_3 = arith.constant 0 : index
    %c1 = arith.constant 1 : index
    %c0_4 = arith.constant 0 : index
    %c0_5 = arith.constant 0 : index
    %2 = vector.load %arg1[%c0_3, %c1, %c0_4, %c0_5] : memref<2x2x1x1024xbf16, #tpu.memory_space<vmem>>, vector<2x1x1x1024xbf16>
    %3 = vector.shape_cast %2 : vector<2x1x1x1024xbf16> to vector<2x1x1024xbf16>
    %4 = arith.maximumf %1, %3 : vector<2x1x1024xbf16>
    %5 = vector.extract_strided_slice %4 {offsets = [0, 0, 0], sizes = [2, 1, 512], strides = [1, 1, 1]} : vector<2x1x1024xbf16> to vector<2x1x512xbf16>
    %6 = vector.extract_strided_slice %4 {offsets = [0, 0, 512], sizes = [2, 1, 512], strides = [1, 1, 1]} : vector<2x1x1024xbf16> to vector<2x1x512xbf16>
    %7 = arith.maximumf %5, %6 : vector<2x1x512xbf16>
    %c0_6 = arith.constant 0 : index
    %c0_7 = arith.constant 0 : index
    %c0_8 = arith.constant 0 : index
    %8 = vector.load %arg2[%c0_6, %c0_7, %c0_8] : memref<2x1x512xbf16, #tpu.memory_space<vmem>>, vector<2x1x512xbf16>
    tpu.vector_store %arg2[%c0_6, %c0_7, %c0_8], %7 {strides = array<i32>} : memref<2x1x512xbf16, #tpu.memory_space<vmem>>, vector<2x1x512xbf16>,
    return
  }
  func.func @transform_0(%arg0: i32) -> (i32, i32, i32, i32) {
    %c0_i32 = arith.constant 0 : i32
    %c0_i32_0 = arith.constant 0 : i32
    %c0_i32_1 = arith.constant 0 : i32
    %c0_i32_2 = arith.constant 0 : i32
    return %arg0, %c0_i32, %c0_i32_0, %c0_i32_1 : i32, i32, i32, i32
  }
  func.func @transform_1(%arg0: i32) -> (i32, i32, i32) {
    %c0_i32 = arith.constant 0 : i32
    %c0_i32_0 = arith.constant 0 : i32
    %c0_i32_1 = arith.constant 0 : i32
    return %arg0, %c0_i32, %c0_i32_0 : i32, i32, i32
  }
}

module attributes {stable_mosaic.version = 11 : i64} {
  func.func @_coarse_head_kernel(%arg0: i32, %arg1: memref<8x512xbf16, #tpu.memory_space<vmem>>, %arg2: memref<512x1024xbf16, #tpu.memory_space<vmem>>, %arg3: memref<1x1024xf32, #tpu.memory_space<vmem>>, %arg4: memref<1x1024xf32, #tpu.memory_space<vmem>>, %arg5: memref<1024x128xbf16, #tpu.memory_space<vmem>>, %arg6: memref<1x128xf32, #tpu.memory_space<vmem>>, %arg7: memref<8x128xf32, #tpu.memory_space<vmem>>, %arg8: memref<8x1024xf32, #tpu.memory_space<vmem>>) attributes {dimension_semantics = [#tpu.dimension_semantics<arbitrary>], iteration_bounds = array<i64: 1>, scalar_prefetch = 0 : i64, scratch_operands = 1 : i64, tpu.core_type = #tpu.core_type<tc>, window_params = [{transform_indices = @transform_0, window_bounds = array<i64: 8, 512>}, {transform_indices = @transform_1, window_bounds = array<i64: 512, 1024>}, {pipeline_mode = #tpu.pipeline_mode<synchronous>, transform_indices = @transform_2, window_bounds = array<i64: 1, 1024>}, {pipeline_mode = #tpu.pipeline_mode<synchronous>, transform_indices = @transform_3, window_bounds = array<i64: 1, 1024>}, {pipeline_mode = #tpu.pipeline_mode<synchronous>, transform_indices = @transform_4, window_bounds = array<i64: 1024, 128>}, {pipeline_mode = #tpu.pipeline_mode<synchronous>, transform_indices = @transform_5, window_bounds = array<i64: 1, 128>}, {pipeline_mode = #tpu.pipeline_mode<synchronous>, transform_indices = @transform_6, window_bounds = array<i64: 8, 128>}]} {
    %c0_i32 = arith.constant 0 : i32
    %0 = arith.cmpi eq, %arg0, %c0_i32 : i32
    %1 = arith.extui %0 : i1 to i32
    %c0_i32_0 = arith.constant 0 : i32
    %2 = arith.cmpi ne, %1, %c0_i32_0 : i32
    scf.if %2 {
      %cst_10 = arith.constant 0.000000e+00 : f32
      %12 = vector.broadcast %cst_10 : f32 to vector<8x1024xf32>
      %c0_11 = arith.constant 0 : index
      %c0_12 = arith.constant 0 : index
      %13 = vector.load %arg8[%c0_11, %c0_12] : memref<8x1024xf32, #tpu.memory_space<vmem>>, vector<8x1024xf32>
      tpu.vector_store %arg8[%c0_11, %c0_12], %12 {strides = array<i32>} : memref<8x1024xf32, #tpu.memory_space<vmem>>, vector<8x1024xf32>,
    } else {
    }
    %c0 = arith.constant 0 : index
    %c0_1 = arith.constant 0 : index
    %3 = vector.load %arg8[%c0, %c0_1] : memref<8x1024xf32, #tpu.memory_space<vmem>>, vector<8x1024xf32>
    %c0_2 = arith.constant 0 : index
    %c0_3 = arith.constant 0 : index
    %4 = vector.load %arg1[%c0_2, %c0_3] : memref<8x512xbf16, #tpu.memory_space<vmem>>, vector<8x512xbf16>
    %c0_4 = arith.constant 0 : index
    %c0_5 = arith.constant 0 : index
    %5 = vector.load %arg2[%c0_4, %c0_5] : memref<512x1024xbf16, #tpu.memory_space<vmem>>, vector<512x1024xbf16>
    %cst = arith.constant dense<0.000000e+00> : vector<8x1024xf32>
    %6 = tpu.matmul %4, %5, %cst {dimension_numbers = #tpu.dot_dimension_numbers<[1], [0], [0], [1], [0, 0, 1, 1], [], []>} : vector<8x512xbf16>, vector<512x1024xbf16>, vector<8x1024xf32> -> vector<8x1024xf32>
    %7 = arith.addf %3, %6 : vector<8x1024xf32>
    %c0_6 = arith.constant 0 : index
    %c0_7 = arith.constant 0 : index
    %8 = vector.load %arg8[%c0_6, %c0_7] : memref<8x1024xf32, #tpu.memory_space<vmem>>, vector<8x1024xf32>
    tpu.vector_store %arg8[%c0_6, %c0_7], %7 {strides = array<i32>} : memref<8x1024xf32, #tpu.memory_space<vmem>>, vector<8x1024xf32>,
    %c0_i32_8 = arith.constant 0 : i32
    %9 = arith.cmpi eq, %arg0, %c0_i32_8 : i32
    %10 = arith.extui %9 : i1 to i32
    %c0_i32_9 = arith.constant 0 : i32
    %11 = arith.cmpi ne, %10, %c0_i32_9 : i32
    scf.if %11 {
      %c0_10 = arith.constant 0 : index
      %c0_11 = arith.constant 0 : index
      %12 = vector.load %arg8[%c0_10, %c0_11] : memref<8x1024xf32, #tpu.memory_space<vmem>>, vector<8x1024xf32>
      %c0_12 = arith.constant 0 : index
      %c0_13 = arith.constant 0 : index
      %13 = vector.load %arg3[%c0_12, %c0_13] : memref<1x1024xf32, #tpu.memory_space<vmem>>, vector<1x1024xf32>
      %14 = vector.broadcast %13 : vector<1x1024xf32> to vector<8x1024xf32>
      %15 = arith.mulf %12, %14 : vector<8x1024xf32>
      %c0_14 = arith.constant 0 : index
      %c0_15 = arith.constant 0 : index
      %16 = vector.load %arg4[%c0_14, %c0_15] : memref<1x1024xf32, #tpu.memory_space<vmem>>, vector<1x1024xf32>
      %17 = vector.broadcast %16 : vector<1x1024xf32> to vector<8x1024xf32>
      %18 = arith.addf %15, %17 : vector<8x1024xf32>
      %cst_16 = arith.constant 0.000000e+00 : f32
      %19 = vector.broadcast %cst_16 : f32 to vector<8x1024xf32>
      %20 = arith.maximumf %18, %19 : vector<8x1024xf32>
      %21 = arith.truncf %20 : vector<8x1024xf32> to vector<8x1024xbf16>
      %c0_17 = arith.constant 0 : index
      %c0_18 = arith.constant 0 : index
      %22 = vector.load %arg5[%c0_17, %c0_18] : memref<1024x128xbf16, #tpu.memory_space<vmem>>, vector<1024x128xbf16>
      %cst_19 = arith.constant dense<0.000000e+00> : vector<8x128xf32>
      %23 = tpu.matmul %21, %22, %cst_19 {dimension_numbers = #tpu.dot_dimension_numbers<[1], [0], [0], [1], [0, 0, 1, 1], [], []>} : vector<8x1024xbf16>, vector<1024x128xbf16>, vector<8x128xf32> -> vector<8x128xf32>
      %c0_20 = arith.constant 0 : index
      %c0_21 = arith.constant 0 : index
      %24 = vector.load %arg6[%c0_20, %c0_21] : memref<1x128xf32, #tpu.memory_space<vmem>>, vector<1x128xf32>
      %25 = vector.broadcast %24 : vector<1x128xf32> to vector<8x128xf32>
      %26 = arith.addf %23, %25 : vector<8x128xf32>
      %c0_22 = arith.constant 0 : index
      %c0_23 = arith.constant 0 : index
      %27 = vector.load %arg7[%c0_22, %c0_23] : memref<8x128xf32, #tpu.memory_space<vmem>>, vector<8x128xf32>
      tpu.vector_store %arg7[%c0_22, %c0_23], %26 {strides = array<i32>} : memref<8x128xf32, #tpu.memory_space<vmem>>, vector<8x128xf32>,
    } else {
    }
    return
  }
  func.func @transform_0(%arg0: i32) -> (i32, i32) {
    %c0_i32 = arith.constant 0 : i32
    %c0_i32_0 = arith.constant 0 : i32
    return %c0_i32, %arg0 : i32, i32
  }
  func.func @transform_1(%arg0: i32) -> (i32, i32) {
    %c0_i32 = arith.constant 0 : i32
    %c0_i32_0 = arith.constant 0 : i32
    return %arg0, %c0_i32 : i32, i32
  }
  func.func @transform_2(%arg0: i32) -> (i32, i32) {
    %c0_i32 = arith.constant 0 : i32
    %c0_i32_0 = arith.constant 0 : i32
    %c0_i32_1 = arith.constant 0 : i32
    return %c0_i32, %c0_i32_0 : i32, i32
  }
  func.func @transform_3(%arg0: i32) -> (i32, i32) {
    %c0_i32 = arith.constant 0 : i32
    %c0_i32_0 = arith.constant 0 : i32
    %c0_i32_1 = arith.constant 0 : i32
    return %c0_i32, %c0_i32_0 : i32, i32
  }
  func.func @transform_4(%arg0: i32) -> (i32, i32) {
    %c0_i32 = arith.constant 0 : i32
    %c0_i32_0 = arith.constant 0 : i32
    %c0_i32_1 = arith.constant 0 : i32
    return %c0_i32, %c0_i32_0 : i32, i32
  }
  func.func @transform_5(%arg0: i32) -> (i32, i32) {
    %c0_i32 = arith.constant 0 : i32
    %c0_i32_0 = arith.constant 0 : i32
    %c0_i32_1 = arith.constant 0 : i32
    return %c0_i32, %c0_i32_0 : i32, i32
  }
  func.func @transform_6(%arg0: i32) -> (i32, i32) {
    %c0_i32 = arith.constant 0 : i32
    %c0_i32_0 = arith.constant 0 : i32
    %c0_i32_1 = arith.constant 0 : i32
    return %c0_i32, %c0_i32_0 : i32, i32
  }
}

module attributes {stable_mosaic.version = 11 : i64} {
  func.func @_coarse_head_kernel(%arg0: i32, %arg1: memref<8x512xbf16, #tpu.memory_space<vmem>>, %arg2: memref<512x1024xbf16, #tpu.memory_space<vmem>>, %arg3: memref<1x1024xf32, #tpu.memory_space<vmem>>, %arg4: memref<1x1024xf32, #tpu.memory_space<vmem>>, %arg5: memref<1024x128xbf16, #tpu.memory_space<vmem>>, %arg6: memref<1x128xf32, #tpu.memory_space<vmem>>, %arg7: memref<8x128xf32, #tpu.memory_space<vmem>>, %arg8: memref<8x1024xf32, #tpu.memory_space<vmem>>) attributes {dimension_semantics = [#tpu.dimension_semantics<arbitrary>], iteration_bounds = array<i64: 2>, scalar_prefetch = 0 : i64, scratch_operands = 1 : i64, tpu.core_type = #tpu.core_type<tc>, window_params = [{transform_indices = @transform_0, window_bounds = array<i64: 8, 512>}, {transform_indices = @transform_1, window_bounds = array<i64: 512, 1024>}, {pipeline_mode = #tpu.pipeline_mode<synchronous>, transform_indices = @transform_2, window_bounds = array<i64: 1, 1024>}, {pipeline_mode = #tpu.pipeline_mode<synchronous>, transform_indices = @transform_3, window_bounds = array<i64: 1, 1024>}, {pipeline_mode = #tpu.pipeline_mode<synchronous>, transform_indices = @transform_4, window_bounds = array<i64: 1024, 128>}, {pipeline_mode = #tpu.pipeline_mode<synchronous>, transform_indices = @transform_5, window_bounds = array<i64: 1, 128>}, {pipeline_mode = #tpu.pipeline_mode<synchronous>, transform_indices = @transform_6, window_bounds = array<i64: 8, 128>}]} {
    %c0_i32 = arith.constant 0 : i32
    %0 = arith.cmpi eq, %arg0, %c0_i32 : i32
    %1 = arith.extui %0 : i1 to i32
    %c0_i32_0 = arith.constant 0 : i32
    %2 = arith.cmpi ne, %1, %c0_i32_0 : i32
    scf.if %2 {
      %cst_9 = arith.constant 0.000000e+00 : f32
      %12 = vector.broadcast %cst_9 : f32 to vector<8x1024xf32>
      %c0_10 = arith.constant 0 : index
      %c0_11 = arith.constant 0 : index
      %13 = vector.load %arg8[%c0_10, %c0_11] : memref<8x1024xf32, #tpu.memory_space<vmem>>, vector<8x1024xf32>
      tpu.vector_store %arg8[%c0_10, %c0_11], %12 {strides = array<i32>} : memref<8x1024xf32, #tpu.memory_space<vmem>>, vector<8x1024xf32>,
    } else {
    }
    %c0 = arith.constant 0 : index
    %c0_1 = arith.constant 0 : index
    %3 = vector.load %arg8[%c0, %c0_1] : memref<8x1024xf32, #tpu.memory_space<vmem>>, vector<8x1024xf32>
    %c0_2 = arith.constant 0 : index
    %c0_3 = arith.constant 0 : index
    %4 = vector.load %arg1[%c0_2, %c0_3] : memref<8x512xbf16, #tpu.memory_space<vmem>>, vector<8x512xbf16>
    %c0_4 = arith.constant 0 : index
    %c0_5 = arith.constant 0 : index
    %5 = vector.load %arg2[%c0_4, %c0_5] : memref<512x1024xbf16, #tpu.memory_space<vmem>>, vector<512x1024xbf16>
    %cst = arith.constant dense<0.000000e+00> : vector<8x1024xf32>
    %6 = tpu.matmul %4, %5, %cst {dimension_numbers = #tpu.dot_dimension_numbers<[1], [0], [0], [1], [0, 0, 1, 1], [], []>} : vector<8x512xbf16>, vector<512x1024xbf16>, vector<8x1024xf32> -> vector<8x1024xf32>
    %7 = arith.addf %3, %6 : vector<8x1024xf32>
    %c0_6 = arith.constant 0 : index
    %c0_7 = arith.constant 0 : index
    %8 = vector.load %arg8[%c0_6, %c0_7] : memref<8x1024xf32, #tpu.memory_space<vmem>>, vector<8x1024xf32>
    tpu.vector_store %arg8[%c0_6, %c0_7], %7 {strides = array<i32>} : memref<8x1024xf32, #tpu.memory_space<vmem>>, vector<8x1024xf32>,
    %c1_i32 = arith.constant 1 : i32
    %9 = arith.cmpi eq, %arg0, %c1_i32 : i32
    %10 = arith.extui %9 : i1 to i32
    %c0_i32_8 = arith.constant 0 : i32
    %11 = arith.cmpi ne, %10, %c0_i32_8 : i32
    scf.if %11 {
      %c0_9 = arith.constant 0 : index
      %c0_10 = arith.constant 0 : index
      %12 = vector.load %arg8[%c0_9, %c0_10] : memref<8x1024xf32, #tpu.memory_space<vmem>>, vector<8x1024xf32>
      %c0_11 = arith.constant 0 : index
      %c0_12 = arith.constant 0 : index
      %13 = vector.load %arg3[%c0_11, %c0_12] : memref<1x1024xf32, #tpu.memory_space<vmem>>, vector<1x1024xf32>
      %14 = vector.broadcast %13 : vector<1x1024xf32> to vector<8x1024xf32>
      %15 = arith.mulf %12, %14 : vector<8x1024xf32>
      %c0_13 = arith.constant 0 : index
      %c0_14 = arith.constant 0 : index
      %16 = vector.load %arg4[%c0_13, %c0_14] : memref<1x1024xf32, #tpu.memory_space<vmem>>, vector<1x1024xf32>
      %17 = vector.broadcast %16 : vector<1x1024xf32> to vector<8x1024xf32>
      %18 = arith.addf %15, %17 : vector<8x1024xf32>
      %cst_15 = arith.constant 0.000000e+00 : f32
      %19 = vector.broadcast %cst_15 : f32 to vector<8x1024xf32>
      %20 = arith.maximumf %18, %19 : vector<8x1024xf32>
      %21 = arith.truncf %20 : vector<8x1024xf32> to vector<8x1024xbf16>
      %c0_16 = arith.constant 0 : index
      %c0_17 = arith.constant 0 : index
      %22 = vector.load %arg5[%c0_16, %c0_17] : memref<1024x128xbf16, #tpu.memory_space<vmem>>, vector<1024x128xbf16>
      %cst_18 = arith.constant dense<0.000000e+00> : vector<8x128xf32>
      %23 = tpu.matmul %21, %22, %cst_18 {dimension_numbers = #tpu.dot_dimension_numbers<[1], [0], [0], [1], [0, 0, 1, 1], [], []>} : vector<8x1024xbf16>, vector<1024x128xbf16>, vector<8x128xf32> -> vector<8x128xf32>
      %c0_19 = arith.constant 0 : index
      %c0_20 = arith.constant 0 : index
      %24 = vector.load %arg6[%c0_19, %c0_20] : memref<1x128xf32, #tpu.memory_space<vmem>>, vector<1x128xf32>
      %25 = vector.broadcast %24 : vector<1x128xf32> to vector<8x128xf32>
      %26 = arith.addf %23, %25 : vector<8x128xf32>
      %c0_21 = arith.constant 0 : index
      %c0_22 = arith.constant 0 : index
      %27 = vector.load %arg7[%c0_21, %c0_22] : memref<8x128xf32, #tpu.memory_space<vmem>>, vector<8x128xf32>
      tpu.vector_store %arg7[%c0_21, %c0_22], %26 {strides = array<i32>} : memref<8x128xf32, #tpu.memory_space<vmem>>, vector<8x128xf32>,
    } else {
    }
    return
  }
  func.func @transform_0(%arg0: i32) -> (i32, i32) {
    %c0_i32 = arith.constant 0 : i32
    %c0_i32_0 = arith.constant 0 : i32
    return %c0_i32, %arg0 : i32, i32
  }
  func.func @transform_1(%arg0: i32) -> (i32, i32) {
    %c0_i32 = arith.constant 0 : i32
    %c0_i32_0 = arith.constant 0 : i32
    return %arg0, %c0_i32 : i32, i32
  }
  func.func @transform_2(%arg0: i32) -> (i32, i32) {
    %c0_i32 = arith.constant 0 : i32
    %c0_i32_0 = arith.constant 0 : i32
    %c0_i32_1 = arith.constant 0 : i32
    return %c0_i32, %c0_i32_0 : i32, i32
  }
  func.func @transform_3(%arg0: i32) -> (i32, i32) {
    %c0_i32 = arith.constant 0 : i32
    %c0_i32_0 = arith.constant 0 : i32
    %c0_i32_1 = arith.constant 0 : i32
    return %c0_i32, %c0_i32_0 : i32, i32
  }
  func.func @transform_4(%arg0: i32) -> (i32, i32) {
    %c0_i32 = arith.constant 0 : i32
    %c0_i32_0 = arith.constant 0 : i32
    %c0_i32_1 = arith.constant 0 : i32
    return %c0_i32, %c0_i32_0 : i32, i32
  }
  func.func @transform_5(%arg0: i32) -> (i32, i32) {
    %c0_i32 = arith.constant 0 : i32
    %c0_i32_0 = arith.constant 0 : i32
    %c0_i32_1 = arith.constant 0 : i32
    return %c0_i32, %c0_i32_0 : i32, i32
  }
  func.func @transform_6(%arg0: i32) -> (i32, i32) {
    %c0_i32 = arith.constant 0 : i32
    %c0_i32_0 = arith.constant 0 : i32
    %c0_i32_1 = arith.constant 0 : i32
    return %c0_i32, %c0_i32_0 : i32, i32
  }
}

module attributes {stable_mosaic.version = 11 : i64} {
  func.func @_coarse_head_kernel(%arg0: i32, %arg1: memref<8x512xbf16, #tpu.memory_space<vmem>>, %arg2: memref<512x128xbf16, #tpu.memory_space<vmem>>, %arg3: memref<1x128xf32, #tpu.memory_space<vmem>>, %arg4: memref<1x128xf32, #tpu.memory_space<vmem>>, %arg5: memref<128x128xbf16, #tpu.memory_space<vmem>>, %arg6: memref<1x128xf32, #tpu.memory_space<vmem>>, %arg7: memref<8x128xf32, #tpu.memory_space<vmem>>, %arg8: memref<8x128xf32, #tpu.memory_space<vmem>>) attributes {dimension_semantics = [#tpu.dimension_semantics<arbitrary>], iteration_bounds = array<i64: 4>, scalar_prefetch = 0 : i64, scratch_operands = 1 : i64, tpu.core_type = #tpu.core_type<tc>, window_params = [{transform_indices = @transform_0, window_bounds = array<i64: 8, 512>}, {transform_indices = @transform_1, window_bounds = array<i64: 512, 128>}, {pipeline_mode = #tpu.pipeline_mode<synchronous>, transform_indices = @transform_2, window_bounds = array<i64: 1, 128>}, {pipeline_mode = #tpu.pipeline_mode<synchronous>, transform_indices = @transform_3, window_bounds = array<i64: 1, 128>}, {pipeline_mode = #tpu.pipeline_mode<synchronous>, transform_indices = @transform_4, window_bounds = array<i64: 128, 128>}, {pipeline_mode = #tpu.pipeline_mode<synchronous>, transform_indices = @transform_5, window_bounds = array<i64: 1, 128>}, {pipeline_mode = #tpu.pipeline_mode<synchronous>, transform_indices = @transform_6, window_bounds = array<i64: 8, 128>}]} {
    %c0_i32 = arith.constant 0 : i32
    %0 = arith.cmpi eq, %arg0, %c0_i32 : i32
    %1 = arith.extui %0 : i1 to i32
    %c0_i32_0 = arith.constant 0 : i32
    %2 = arith.cmpi ne, %1, %c0_i32_0 : i32
    scf.if %2 {
      %cst_9 = arith.constant 0.000000e+00 : f32
      %12 = vector.broadcast %cst_9 : f32 to vector<8x128xf32>
      %c0_10 = arith.constant 0 : index
      %c0_11 = arith.constant 0 : index
      %13 = vector.load %arg8[%c0_10, %c0_11] : memref<8x128xf32, #tpu.memory_space<vmem>>, vector<8x128xf32>
      tpu.vector_store %arg8[%c0_10, %c0_11], %12 {strides = array<i32>} : memref<8x128xf32, #tpu.memory_space<vmem>>, vector<8x128xf32>,
    } else {
    }
    %c0 = arith.constant 0 : index
    %c0_1 = arith.constant 0 : index
    %3 = vector.load %arg8[%c0, %c0_1] : memref<8x128xf32, #tpu.memory_space<vmem>>, vector<8x128xf32>
    %c0_2 = arith.constant 0 : index
    %c0_3 = arith.constant 0 : index
    %4 = vector.load %arg1[%c0_2, %c0_3] : memref<8x512xbf16, #tpu.memory_space<vmem>>, vector<8x512xbf16>
    %c0_4 = arith.constant 0 : index
    %c0_5 = arith.constant 0 : index
    %5 = vector.load %arg2[%c0_4, %c0_5] : memref<512x128xbf16, #tpu.memory_space<vmem>>, vector<512x128xbf16>
    %cst = arith.constant dense<0.000000e+00> : vector<8x128xf32>
    %6 = tpu.matmul %4, %5, %cst {dimension_numbers = #tpu.dot_dimension_numbers<[1], [0], [0], [1], [0, 0, 1, 1], [], []>} : vector<8x512xbf16>, vector<512x128xbf16>, vector<8x128xf32> -> vector<8x128xf32>
    %7 = arith.addf %3, %6 : vector<8x128xf32>
    %c0_6 = arith.constant 0 : index
    %c0_7 = arith.constant 0 : index
    %8 = vector.load %arg8[%c0_6, %c0_7] : memref<8x128xf32, #tpu.memory_space<vmem>>, vector<8x128xf32>
    tpu.vector_store %arg8[%c0_6, %c0_7], %7 {strides = array<i32>} : memref<8x128xf32, #tpu.memory_space<vmem>>, vector<8x128xf32>,
    %c3_i32 = arith.constant 3 : i32
    %9 = arith.cmpi eq, %arg0, %c3_i32 : i32
    %10 = arith.extui %9 : i1 to i32
    %c0_i32_8 = arith.constant 0 : i32
    %11 = arith.cmpi ne, %10, %c0_i32_8 : i32
    scf.if %11 {
      %c0_9 = arith.constant 0 : index
      %c0_10 = arith.constant 0 : index
      %12 = vector.load %arg8[%c0_9, %c0_10] : memref<8x128xf32, #tpu.memory_space<vmem>>, vector<8x128xf32>
      %c0_11 = arith.constant 0 : index
      %c0_12 = arith.constant 0 : index
      %13 = vector.load %arg3[%c0_11, %c0_12] : memref<1x128xf32, #tpu.memory_space<vmem>>, vector<1x128xf32>
      %14 = vector.broadcast %13 : vector<1x128xf32> to vector<8x128xf32>
      %15 = arith.mulf %12, %14 : vector<8x128xf32>
      %c0_13 = arith.constant 0 : index
      %c0_14 = arith.constant 0 : index
      %16 = vector.load %arg4[%c0_13, %c0_14] : memref<1x128xf32, #tpu.memory_space<vmem>>, vector<1x128xf32>
      %17 = vector.broadcast %16 : vector<1x128xf32> to vector<8x128xf32>
      %18 = arith.addf %15, %17 : vector<8x128xf32>
      %cst_15 = arith.constant 0.000000e+00 : f32
      %19 = vector.broadcast %cst_15 : f32 to vector<8x128xf32>
      %20 = arith.maximumf %18, %19 : vector<8x128xf32>
      %21 = arith.truncf %20 : vector<8x128xf32> to vector<8x128xbf16>
      %c0_16 = arith.constant 0 : index
      %c0_17 = arith.constant 0 : index
      %22 = vector.load %arg5[%c0_16, %c0_17] : memref<128x128xbf16, #tpu.memory_space<vmem>>, vector<128x128xbf16>
      %cst_18 = arith.constant dense<0.000000e+00> : vector<8x128xf32>
      %23 = tpu.matmul %21, %22, %cst_18 {dimension_numbers = #tpu.dot_dimension_numbers<[1], [0], [0], [1], [0, 0, 1, 1], [], []>} : vector<8x128xbf16>, vector<128x128xbf16>, vector<8x128xf32> -> vector<8x128xf32>
      %c0_19 = arith.constant 0 : index
      %c0_20 = arith.constant 0 : index
      %24 = vector.load %arg6[%c0_19, %c0_20] : memref<1x128xf32, #tpu.memory_space<vmem>>, vector<1x128xf32>
      %25 = vector.broadcast %24 : vector<1x128xf32> to vector<8x128xf32>
      %26 = arith.addf %23, %25 : vector<8x128xf32>
      %c0_21 = arith.constant 0 : index
      %c0_22 = arith.constant 0 : index
      %27 = vector.load %arg7[%c0_21, %c0_22] : memref<8x128xf32, #tpu.memory_space<vmem>>, vector<8x128xf32>
      tpu.vector_store %arg7[%c0_21, %c0_22], %26 {strides = array<i32>} : memref<8x128xf32, #tpu.memory_space<vmem>>, vector<8x128xf32>,
    } else {
    }
    return
  }
  func.func @transform_0(%arg0: i32) -> (i32, i32) {
    %c0_i32 = arith.constant 0 : i32
    %c0_i32_0 = arith.constant 0 : i32
    return %c0_i32, %arg0 : i32, i32
  }
  func.func @transform_1(%arg0: i32) -> (i32, i32) {
    %c0_i32 = arith.constant 0 : i32
    %c0_i32_0 = arith.constant 0 : i32
    return %arg0, %c0_i32 : i32, i32
  }
  func.func @transform_2(%arg0: i32) -> (i32, i32) {
    %c0_i32 = arith.constant 0 : i32
    %c0_i32_0 = arith.constant 0 : i32
    %c0_i32_1 = arith.constant 0 : i32
    return %c0_i32, %c0_i32_0 : i32, i32
  }
  func.func @transform_3(%arg0: i32) -> (i32, i32) {
    %c0_i32 = arith.constant 0 : i32
    %c0_i32_0 = arith.constant 0 : i32
    %c0_i32_1 = arith.constant 0 : i32
    return %c0_i32, %c0_i32_0 : i32, i32
  }
  func.func @transform_4(%arg0: i32) -> (i32, i32) {
    %c0_i32 = arith.constant 0 : i32
    %c0_i32_0 = arith.constant 0 : i32
    %c0_i32_1 = arith.constant 0 : i32
    return %c0_i32, %c0_i32_0 : i32, i32
  }
  func.func @transform_5(%arg0: i32) -> (i32, i32) {
    %c0_i32 = arith.constant 0 : i32
    %c0_i32_0 = arith.constant 0 : i32
    %c0_i32_1 = arith.constant 0 : i32
    return %c0_i32, %c0_i32_0 : i32, i32
  }
  func.func @transform_6(%arg0: i32) -> (i32, i32) {
    %c0_i32 = arith.constant 0 : i32
    %c0_i32_0 = arith.constant 0 : i32
    %c0_i32_1 = arith.constant 0 : i32
    return %c0_i32, %c0_i32_0 : i32, i32
  }
}

</mosaic_0001>

<bundles_post_ra>
// kernel: bcnn_forward.15
= control target key start
LH: loop header
LB: loop body
LE: loop exit
PB: predicated region body
PF: predicated region fallthrough
CT: control target
= control target key end

     0   :  { %s1142_s15 = smov 0   ;;  %s1144_s16 = smov 0   ;;  %s1250_s0 = inlined_call_operand.vmem [shape: bf16[512,128], index: 0, kind: input, shape index: {}]   ;;  %s1251_s1 = inlined_call_operand.vmem [shape: bf16[128,128], index: 1, kind: input, shape index: {}]   ;;  %s1252_s2 = inlined_call_operand.vmem [shape: f32[1,128], index: 2, kind: input, shape index: {}]   ;;  %s1253_s3 = inlined_call_operand.vmem [shape: f32[1,128], index: 3, kind: input, shape index: {}]   ;;  %s1254_s4 = inlined_call_operand.vmem [shape: bf16[512,128], index: 4, kind: output, shape index: {}]  }
   0x1   :  { %s1146_s17 = smov 0  }
   0x2 LB: > { %s33_s18 = sadd.s32 1, %s1111_s16  ;;  %p885_p0 = scmp.ge.s32.totalorder %s1115_s17, 1  ;;  %s1115_s17 = sphi %s1146_s17, %s14_s17   ;;  %s1111_s16 = sphi %s1144_s16, %s1256_s16   ;;  %s1107_s15 = sphi %s1142_s15, %s1255_s15  }
   0x3   : > { %p35_p1 = scmp.ge.s32.totalorder %s33_s18, 4  ;;  %p221_p2 = scmp.lt.s32.totalorder %s1115_s17, 5 }
   0x5   : > { %s1258_s18 = smov (%p35_p1, %s33_s18), 0  ;;  %p222_p3 = pnand %p885_p0, %p221_p2 }
   0x6   : > { %v1077_v0 = vld [vmem:[%s1251_s1] sm:$0xff] (!%p222_p3)   ;;  %s886_s21 = sshll.u32 (!%p222_p3), %s1107_s15, 4  ;;  %v1078_v1 = vld [vmem:[%s1251_s1 + $0x8] sm:$0xff] (!%p222_p3)   ;;  %v1079_v2 = vld [vmem:[%s1251_s1 + $0x10] sm:$0xff] (!%p222_p3)  }
   0x7   : > { %225 = sbr.rel (%p222_p3) target bundleno = 272 (0x110), region = 36  ;;  %p268_p4 = scmp.lt.s32.totalorder (!%p222_p3), %s886_s21, 63  ;;  %1005 = vmatprep.subr.bf16.mxu0 (!%p222_p3), %v1077_v0  ;;  %1037 = vmatprep.subr.bf16.mxu1 (!%p222_p3), %v1077_v0  ;;  %v1080_v3 = vld [vmem:[%s1251_s1 + $0x18] sm:$0xff] (!%p222_p3)   ;;  %v1081_v6 = vld [vmem:[%s1251_s1 + $0x20] sm:$0xff] (!%p222_p3)   ;;  %v1082_v7 = vld [vmem:[%s1251_s1 + $0x28] sm:$0xff] (!%p222_p3)  }
   0x8   : > { %1006 = vmatpush3.bf16.msra.mxu0 (!%p222_p3), %v1077_v0  ;;  %1045 = vmatpush3.bf16.msra.mxu1 (!%p222_p3), %v1077_v0  ;;  %v1083_v8 = vld [vmem:[%s1251_s1 + $0x30] sm:$0xff] (!%p222_p3)   ;;  %v1084_v9 = vld [vmem:[%s1251_s1 + $0x38] sm:$0xff] (!%p222_p3)   ;;  %v906_v16 = vld [vmem:[%s1252_s2] ss:$0 sm:$0xff] (!%p222_p3) }
   0x9   : > { %1007 = vmatprep.subr.bf16.mxu0 (!%p222_p3), %v1078_v1  ;;  %1038 = vmatprep.subr.bf16.mxu1 (!%p222_p3), %v1078_v1  ;;  %v1208_v18 = vld [vmem:[%s1253_s3] ss:$0 sm:$0xff] (!%p222_p3) }
   0xc   : > { %1008 = vmatpush3.bf16.msra.mxu0 (!%p222_p3), %v1078_v1  ;;  %1046 = vmatpush3.bf16.msra.mxu1 (!%p222_p3), %v1078_v1 }
   0xd   : > { %1009 = vmatprep.subr.bf16.mxu0 (!%p222_p3), %v1079_v2  ;;  %1039 = vmatprep.subr.bf16.mxu1 (!%p222_p3), %v1079_v2 }
   0xe   : > { %s1260_s21 = smov (!%p268_p4, %s886_s21), 63 }
   0xf   : > { %s887_s26 = sshll.u32 %s1260_s21, 2 }
  0x10   : > { %s1177_s29 = scalar_lea.vmem %s1250_s0, %s887_s26  ;;  %1010 = vmatpush3.bf16.msra.mxu0 %v1079_v2  ;;  %1047 = vmatpush3.bf16.msra.mxu1 %v1079_v2  ;;  %s1223_s24 = scalar_lea.vmem %s1254_s4, %s887_s26 }
  0x11   : > { %v1085_v4 = vld [vmem:[%s1177_s29] sm:$0xff]   ;;  %1011 = vmatprep.subr.bf16.mxu0 %v1080_v3  ;;  %1040 = vmatprep.subr.bf16.mxu1 %v1080_v3  ;;  %v1087_v10 = vld [vmem:[%s1177_s29 + $0x8] sm:$0xff]   ;;  %v1089_v12 = vld [vmem:[%s1177_s29 + $0x10] sm:$0xff]  }
  0x12   : > { %v1086_v5 = vld [vmem:[%s1177_s29 + $0x20] sm:$0xff]   ;;  %1021 = vmatprep.mubr.bf16.mxu0 %v1085_v4  ;;  %v1088_v11 = vld [vmem:[%s1177_s29 + $0x28] sm:$0xff]   ;;  %v1090_v13 = vld [vmem:[%s1177_s29 + $0x30] sm:$0xff]  }
  0x13   : > { %1029 = vmatprep.mubr.bf16.mxu1 %v1086_v5  ;;  %v1091_v14 = vld [vmem:[%s1177_s29 + $0x18] sm:$0xff]  }
  0x14   : > { %1012 = vmatpush3.bf16.msra.mxu0 %v1080_v3  ;;  %1048 = vmatpush3.bf16.msra.mxu1 %v1080_v3  ;;  %v1092_v15 = vld [vmem:[%s1177_s29 + $0x38] sm:$0xff]  }
  0x15   : > { %1013 = vmatprep.subr.bf16.mxu0 %v1081_v6  ;;  %1041 = vmatprep.subr.bf16.mxu1 %v1081_v6 }
  0x18   : > { %1014 = vmatpush3.bf16.msra.mxu0 %v1081_v6  ;;  %1049 = vmatpush3.bf16.msra.mxu1 %v1081_v6 }
  0x19   : > { %1015 = vmatprep.subr.bf16.mxu0 %v1082_v7  ;;  %1042 = vmatprep.subr.bf16.mxu1 %v1082_v7 }
  0x1c   : > { %1016 = vmatpush3.bf16.msra.mxu0 %v1082_v7  ;;  %1050 = vmatpush3.bf16.msra.mxu1 %v1082_v7 }
  0x1d   : > { %1017 = vmatprep.subr.bf16.mxu0 %v1083_v8  ;;  %1043 = vmatprep.subr.bf16.mxu1 %v1083_v8 }
  0x20   : > { %1018 = vmatpush3.bf16.msra.mxu0 %v1083_v8  ;;  %1051 = vmatpush3.bf16.msra.mxu1 %v1083_v8 }
  0x21   : > { %1019 = vmatprep.subr.bf16.mxu0 %v1084_v9  ;;  %1044 = vmatprep.subr.bf16.mxu1 %v1084_v9 }
  0x24   : > { %1020 = vmatpush3.bf16.msra.mxu0 %v1084_v9  ;;  %1052 = vmatpush3.bf16.msra.mxu1 %v1084_v9 }
  0x27   : > { %1022 = vmatmul.mubr.bf16.vlgmr.msra.gmra.mrb[0].mxu0 %v1087_v10  ;;  %1030 = vmatmul.mubr.bf16.vlgmr.msra.gmra.mrb[0].mxu1 %v1088_v11 }
  0x28   : > { %1025 = vmatprep.mubr.bf16.mxu0 %v1089_v12  ;;  %1033 = vmatprep.mubr.bf16.mxu1 %v1090_v13 }
  0x2f   : > { %1026 = vmatmul.mubr.bf16.gmra.mrb[4].mxu0 %v1091_v14  ;;  %1034 = vmatmul.mubr.bf16.gmra.mrb[4].mxu1 %v1092_v15 }
  0xfa   : > { %v1023_v17 = vpop.f32.mrb[0].mxu0  ;;  %v1031_v19 = vpop.f32.mrb[0].mxu1 }
  0xfb   : > { %v622_v20 = vmul.f32 %v1023_v17, %v906_v16  ;;  %v630_v21 = vmul.f32 %v1031_v19, %v906_v16  ;;  %v499_v22 = vpop.f32.mrb[1].mxu0  ;;  %v531_v23 = vpop.f32.mrb[1].mxu1 }
  0xfc   : > { %v620_v24 = vmul.f32 %v906_v16, %v499_v22  ;;  %v628_v25 = vmul.f32 %v906_v16, %v531_v23  ;;  %v1024_v26 = vpop.f32.mrb[2].mxu0  ;;  %v1032_v27 = vpop.f32.mrb[2].mxu1 }
  0xfd   : > { %v645_v28 = vadd.f32 %v1208_v18, %v622_v20  ;;  %v653_v29 = vadd.f32 %v1208_v18, %v630_v21  ;;  %v623_v30 = vmul.f32 %v1024_v26, %v906_v16  ;;  %v631_v31 = vmul.f32 %v1032_v27, %v906_v16  ;;  %v502_v32 = vpop.f32.mrb[3].mxu0  ;;  %v534_v33 = vpop.f32.mrb[3].mxu1 }
  0xfe   : > { %v643_v34 = vadd.f32 %v1208_v18, %v620_v24  ;;  %v651_v35 = vadd.f32 %v1208_v18, %v628_v25  ;;  %v621_v36 = vmul.f32 %v906_v16, %v502_v32  ;;  %v629_v37 = vmul.f32 %v906_v16, %v534_v33 }
  0xff   : > { %v646_v38 = vadd.f32 %v1208_v18, %v623_v30  ;;  %v654_v39 = vadd.f32 %v1208_v18, %v631_v31  ;;  %v661_v42 = vmax.f32 %v645_v28, 0.0  ;;  %v669_v43 = vmax.f32 %v653_v29, 0.0 }
 0x100   : > { %v644_v40 = vadd.f32 %v1208_v18, %v621_v36  ;;  %v652_v41 = vadd.f32 %v1208_v18, %v629_v37  ;;  %v659_v46 = vmax.f32 %v643_v34, 0.0  ;;  %v667_v47 = vmax.f32 %v651_v35, 0.0 }
 0x101   : > { %v662_v44 = vmax.f32 %v646_v38, 0.0  ;;  %v670_v45 = vmax.f32 %v654_v39, 0.0 }
 0x102   : > { %v660_v48 = vmax.f32 %v644_v40, 0.0  ;;  %v668_v49 = vmax.f32 %v652_v41, 0.0  ;;  %v1027_v50 = vpop.f32.mrb[4].mxu0  ;;  %v1035_v51 = vpop.f32.mrb[4].mxu1 }
 0x103   : > { %v950_v52 = vpack.c.bf16 %v662_v44, %v661_v42  ;;  %v970_v53 = vpack.c.bf16 %v670_v45, %v669_v43  ;;  %v626_v54 = vmul.f32 %v1027_v50, %v906_v16  ;;  %v634_v55 = vmul.f32 %v1035_v51, %v906_v16  ;;  %v515_v56 = vpop.f32.mrb[5].mxu0  ;;  %v547_v57 = vpop.f32.mrb[5].mxu1 }
 0x104   : > { %v945_v58 = vpack.c.bf16 %v660_v48, %v659_v46  ;;  %v965_v59 = vpack.c.bf16 %v668_v49, %v667_v47  ;;  %v624_v60 = vmul.f32 %v906_v16, %v515_v56  ;;  %v632_v61 = vmul.f32 %v906_v16, %v547_v57  ;;  %v1028_v62 = vpop.f32.mrb[6].mxu0  ;;  %v1036_v63 = vpop.f32.mrb[6].mxu1 }
 0x105   : > { %982 = vst [vmem:[%s1223_s24 + $0x8] sm:$0xff] %v950_v52   ;;  %986 = vst [vmem:[%s1223_s24 + $0x28] sm:$0xff] %v970_v53   ;;  %v649_v0 = vadd.f32 %v1208_v18, %v626_v54  ;;  %v657_v1 = vadd.f32 %v1208_v18, %v634_v55  ;;  %v627_v2 = vmul.f32 %v1028_v62, %v906_v16  ;;  %v518_v4 = vpop.f32.mrb[7].mxu0  ;;  %v550_v5 = vpop.f32.mrb[7].mxu1 }
 0x106   : > { %v635_v3 = vmul.f32 %v1036_v63, %v906_v16  ;;  %946 = vst [vmem:[%s1223_s24] sm:$0xff] %v945_v58   ;;  %985 = vst [vmem:[%s1223_s24 + $0x20] sm:$0xff] %v965_v59   ;;  %v647_v6 = vadd.f32 %v1208_v18, %v624_v60  ;;  %v655_v7 = vadd.f32 %v1208_v18, %v632_v61 }
 0x107   : > { %v625_v8 = vmul.f32 %v906_v16, %v518_v4  ;;  %v633_v9 = vmul.f32 %v906_v16, %v550_v5  ;;  %v650_v10 = vadd.f32 %v1208_v18, %v627_v2  ;;  %v665_v14 = vmax.f32 %v649_v0, 0.0 }
 0x108   : > { %v658_v11 = vadd.f32 %v1208_v18, %v635_v3  ;;  %v673_v15 = vmax.f32 %v657_v1, 0.0  ;;  %v663_v20 = vmax.f32 %v647_v6, 0.0  ;;  %v671_v21 = vmax.f32 %v655_v7, 0.0 }
 0x109   : > { %v648_v12 = vadd.f32 %v1208_v18, %v625_v8  ;;  %v656_v13 = vadd.f32 %v1208_v18, %v633_v9  ;;  %v666_v17 = vmax.f32 %v650_v10, 0.0 }
 0x10a   : > { %v674_v19 = vmax.f32 %v658_v11, 0.0 }
 0x10b   : > { %v664_v22 = vmax.f32 %v648_v12, 0.0  ;;  %v672_v16 = vmax.f32 %v656_v13, 0.0  ;;  %v960_v23 = vpack.c.bf16 %v666_v17, %v665_v14 }
 0x10c   : > { %v980_v24 = vpack.c.bf16 %v674_v19, %v673_v15 }
 0x10d   : > { %v955_v25 = vpack.c.bf16 %v664_v22, %v663_v20  ;;  %v975_v26 = vpack.c.bf16 %v672_v16, %v671_v21  ;;  %984 = vst [vmem:[%s1223_s24 + $0x18] sm:$0xff] %v960_v23  }
 0x10e   : > { %988 = vst [vmem:[%s1223_s24 + $0x38] sm:$0xff] %v980_v24  }
 0x10f   : > { %983 = vst [vmem:[%s1223_s24 + $0x10] sm:$0xff] %v955_v25   ;;  %987 = vst [vmem:[%s1223_s24 + $0x30] sm:$0xff] %v975_v26  }
 0x110 PF: > { %s14_s17 = sadd.s32 1, %s1115_s17   ;;  %s1255_s15 = smov %s1111_s16 }
 0x111   : > { %p11_p5 = scmp.ge.s32.totalorder %s14_s17, 6   ;;  %s1256_s16 = smov %s1258_s18 }
 0x113   :  { %13 = sbr.rel (!%p11_p5) target bundleno = 2 (0x2), region = 83 }

// kernel: bcnn_forward.17
= control target key start
LH: loop header
LB: loop body
LE: loop exit
PB: predicated region body
PF: predicated region fallthrough
CT: control target
= control target key end

     0   :  { %s175_s22 = smov 64   ;;  %vm137_vm0 = vcmask 519168   ;;  %s386_s0 = inlined_call_operand.vmem [shape: bf16[16,2,8,128], index: 0, kind: input, shape index: {}]   ;;  %s387_s1 = inlined_call_operand.vmem [shape: bf16[16,8,64], index: 1, kind: output, shape index: {}]  }
   0x1   :  { %v10_v0 = vld [vmem:[%s386_s0 + $0x10] sm:$0xf]  ;;  %v160_v1 = vld [vmem:[%s386_s0 + $0x14] sm:$0xf]  ;;  %v8_v2 = vld [vmem:[%s386_s0] sm:$0xf] }
   0x2   :  { %v195_v3 = vmax.bf16 %v160_v1, %v10_v0  ;;  %v158_v4 = vld [vmem:[%s386_s0 + $0x4] sm:$0xf]  ;;  %v11_v5 = vld [vmem:[%s386_s0 + $0x18] sm:$0xf]  ;;  %v161_v6 = vld [vmem:[%s386_s0 + $0x1c] sm:$0xf] }
   0x3   :  { %v206_v7 = vmax.bf16 %v158_v4, %v8_v2  ;;  %v9_v8 = vld [vmem:[%s386_s0 + $0x8] sm:$0xf]  ;;  %v159_v9 = vld [vmem:[%s386_s0 + $0xc] sm:$0xf]  ;;  %v216_v10 = vmax.bf16 %v161_v6, %v11_v5  ;;  %v12_v14 = vld [vmem:[%s386_s0 + $0x20] sm:$0xf] }
   0x4   :  { %77 = vrot.lane.b32.xlu1 %v195_v3, %s175_s22  ;;  %v220_v11 = vmax.bf16 %v159_v9, %v9_v8  ;;  %v13_v12 = vld [vmem:[%s386_s0 + $0x28] sm:$0xf]  ;;  %v163_v13 = vld [vmem:[%s386_s0 + $0x2c] sm:$0xf]  ;;  %v162_v15 = vld [vmem:[%s386_s0 + $0x24] sm:$0xf] }
   0x5   :  { %73 = vrot.lane.b32.xlu0 %v206_v7, %s175_s22  ;;  %v236_v16 = vmax.bf16 %v163_v13, %v13_v12  ;;  %v240_v17 = vmax.bf16 %v162_v15, %v12_v14  ;;  %v15_v18 = vld [vmem:[%s386_s0 + $0x38] sm:$0xf]  ;;  %v165_v19 = vld [vmem:[%s386_s0 + $0x3c] sm:$0xf]  ;;  %v14_v20 = vld [vmem:[%s386_s0 + $0x30] sm:$0xf] }
   0x6   :  { %v164_v21 = vld [vmem:[%s386_s0 + $0x34] sm:$0xf]  ;;  %v48_v22 = vmax.bf16 %v165_v19, %v15_v18  ;;  %v17_v24 = vld [vmem:[%s386_s0 + $0x48] sm:$0xf]  ;;  %v167_v25 = vld [vmem:[%s386_s0 + $0x4c] sm:$0xf] }
   0x7   :  { %v47_v23 = vmax.bf16 %v164_v21, %v14_v20  ;;  %v16_v26 = vld [vmem:[%s386_s0 + $0x40] sm:$0xf]  ;;  %v166_v27 = vld [vmem:[%s386_s0 + $0x44] sm:$0xf]  ;;  %v50_v28 = vmax.bf16 %v167_v25, %v17_v24  ;;  %v19_v30 = vld [vmem:[%s386_s0 + $0x58] sm:$0xf] }
   0x8   :  { %79 = vrot.lane.b32.xlu1 %v216_v10, %s175_s22  ;;  %v49_v29 = vmax.bf16 %v166_v27, %v16_v26  ;;  %v169_v31 = vld [vmem:[%s386_s0 + $0x5c] sm:$0xf]  ;;  %v18_v32 = vld [vmem:[%s386_s0 + $0x50] sm:$0xf]  ;;  %v168_v33 = vld [vmem:[%s386_s0 + $0x54] sm:$0xf] }
   0x9   :  { %75 = vrot.lane.b32.xlu0 %v220_v11, %s175_s22  ;;  %v52_v34 = vmax.bf16 %v169_v31, %v19_v30  ;;  %v51_v35 = vmax.bf16 %v168_v33, %v18_v32  ;;  %v21_v36 = vld [vmem:[%s386_s0 + $0x68] sm:$0xf]  ;;  %v171_v37 = vld [vmem:[%s386_s0 + $0x6c] sm:$0xf]  ;;  %v20_v38 = vld [vmem:[%s386_s0 + $0x60] sm:$0xf] }
   0xa   :  { %v170_v39 = vld [vmem:[%s386_s0 + $0x64] sm:$0xf]  ;;  %v54_v40 = vmax.bf16 %v171_v37, %v21_v36  ;;  %v23_v42 = vld [vmem:[%s386_s0 + $0x78] sm:$0xf]  ;;  %v173_v43 = vld [vmem:[%s386_s0 + $0x7c] sm:$0xf] }
   0xb   :  { %v53_v41 = vmax.bf16 %v170_v39, %v20_v38  ;;  %v22_v44 = vld [vmem:[%s386_s0 + $0x70] sm:$0xf]  ;;  %v172_v45 = vld [vmem:[%s386_s0 + $0x74] sm:$0xf]  ;;  %v56_v46 = vmax.bf16 %v173_v43, %v23_v42 }
   0xc   :  { %83 = vrot.lane.b32.xlu1 %v236_v16, %s175_s22  ;;  %v55_v47 = vmax.bf16 %v172_v45, %v22_v44 }
   0xd   :  { %81 = vrot.lane.b32.xlu0 %v240_v17, %s175_s22 }
  0x10   :  { %87 = vrot.lane.b32.xlu1 %v48_v22, %s175_s22 }
  0x11   :  { %85 = vrot.lane.b32.xlu0 %v47_v23, %s175_s22 }
  0x14   :  { %91 = vrot.lane.b32.xlu1 %v50_v28, %s175_s22 }
  0x15   :  { %89 = vrot.lane.b32.xlu0 %v49_v29, %s175_s22 }
  0x18   :  { %95 = vrot.lane.b32.xlu1 %v52_v34, %s175_s22 }
  0x19   :  { %93 = vrot.lane.b32.xlu0 %v51_v35, %s175_s22 }
  0x1c   :  { %99 = vrot.lane.b32.xlu1 %v54_v40, %s175_s22 }
  0x1d   :  { %97 = vrot.lane.b32.xlu0 %v53_v41, %s175_s22 }
  0x20   :  { %103 = vrot.lane.b32.xlu1 %v56_v46, %s175_s22 }
  0x21   :  { %101 = vrot.lane.b32.xlu0 %v55_v47, %s175_s22 }
  0x76   :  { %v78_v48 = vpop.permute.xlu1 %77 }
  0x77   :  { %v123_v49 = vmax.bf16 %v78_v48, %v195_v3  ;;  %v74_v50 = vpop.permute.xlu0 %73 }
  0x78   :  { %v121_v51 = vmax.bf16 %v74_v50, %v206_v7 }
  0x79   :  { %140 = vst.msk [vmem:[%s387_s1 + $0x8] sm:$0xf] %vm137_vm0, %v123_v49 }
  0x7a   :  { %138 = vst.msk [vmem:[%s387_s1] sm:$0xf] %vm137_vm0, %v121_v51  ;;  %v80_v52 = vpop.permute.xlu1 %79 }
  0x7b   :  { %v124_v53 = vmax.bf16 %v80_v52, %v216_v10  ;;  %v76_v54 = vpop.permute.xlu0 %75 }
  0x7c   :  { %v122_v55 = vmax.bf16 %v76_v54, %v220_v11 }
  0x7d   :  { %141 = vst.msk [vmem:[%s387_s1 + $0xc] sm:$0xf] %vm137_vm0, %v124_v53 }
  0x7e   :  { %139 = vst.msk [vmem:[%s387_s1 + $0x4] sm:$0xf] %vm137_vm0, %v122_v55  ;;  %v84_v56 = vpop.permute.xlu1 %83 }
  0x7f   :  { %v126_v57 = vmax.bf16 %v84_v56, %v236_v16  ;;  %v82_v58 = vpop.permute.xlu0 %81 }
  0x80   :  { %v125_v59 = vmax.bf16 %v82_v58, %v240_v17 }
  0x81   :  { %143 = vst.msk [vmem:[%s387_s1 + $0x14] sm:$0xf] %vm137_vm0, %v126_v57 }
  0x82   :  { %142 = vst.msk [vmem:[%s387_s1 + $0x10] sm:$0xf] %vm137_vm0, %v125_v59  ;;  %v88_v60 = vpop.permute.xlu1 %87 }
  0x83   :  { %v128_v61 = vmax.bf16 %v88_v60, %v48_v22  ;;  %v86_v62 = vpop.permute.xlu0 %85 }
  0x84   :  { %v127_v63 = vmax.bf16 %v86_v62, %v47_v23 }
  0x85   :  { %145 = vst.msk [vmem:[%s387_s1 + $0x1c] sm:$0xf] %vm137_vm0, %v128_v61 }
  0x86   :  { %144 = vst.msk [vmem:[%s387_s1 + $0x18] sm:$0xf] %vm137_vm0, %v127_v63  ;;  %v92_v0 = vpop.permute.xlu1 %91 }
  0x87   :  { %v130_v1 = vmax.bf16 %v92_v0, %v50_v28  ;;  %v90_v2 = vpop.permute.xlu0 %89 }
  0x88   :  { %v129_v3 = vmax.bf16 %v90_v2, %v49_v29 }
  0x89   :  { %147 = vst.msk [vmem:[%s387_s1 + $0x24] sm:$0xf] %vm137_vm0, %v130_v1 }
  0x8a   :  { %146 = vst.msk [vmem:[%s387_s1 + $0x20] sm:$0xf] %vm137_vm0, %v129_v3  ;;  %v96_v4 = vpop.permute.xlu1 %95 }
  0x8b   :  { %v132_v5 = vmax.bf16 %v96_v4, %v52_v34  ;;  %v94_v6 = vpop.permute.xlu0 %93 }
  0x8c   :  { %v131_v7 = vmax.bf16 %v94_v6, %v51_v35 }
  0x8d   :  { %149 = vst.msk [vmem:[%s387_s1 + $0x2c] sm:$0xf] %vm137_vm0, %v132_v5 }
  0x8e   :  { %148 = vst.msk [vmem:[%s387_s1 + $0x28] sm:$0xf] %vm137_vm0, %v131_v7  ;;  %v100_v8 = vpop.permute.xlu1 %99 }
  0x8f   :  { %v134_v9 = vmax.bf16 %v100_v8, %v54_v40  ;;  %v98_v10 = vpop.permute.xlu0 %97 }
  0x90   :  { %v133_v11 = vmax.bf16 %v98_v10, %v53_v41 }
  0x91   :  { %151 = vst.msk [vmem:[%s387_s1 + $0x34] sm:$0xf] %vm137_vm0, %v134_v9 }
  0x92   :  { %150 = vst.msk [vmem:[%s387_s1 + $0x30] sm:$0xf] %vm137_vm0, %v133_v11  ;;  %v104_v12 = vpop.permute.xlu1 %103 }
  0x93   :  { %v136_v13 = vmax.bf16 %v104_v12, %v56_v46  ;;  %v102_v14 = vpop.permute.xlu0 %101 }
  0x94   :  { %v135_v15 = vmax.bf16 %v102_v14, %v55_v47 }
  0x95   :  { %153 = vst.msk [vmem:[%s387_s1 + $0x3c] sm:$0xf] %vm137_vm0, %v136_v13 }
  0x96   :  { %152 = vst.msk [vmem:[%s387_s1 + $0x38] sm:$0xf] %vm137_vm0, %v135_v15 }

// kernel: bcnn_forward.16
= control target key start
LH: loop header
LB: loop body
LE: loop exit
PB: predicated region body
PF: predicated region fallthrough
CT: control target
= control target key end

     0   :  { %s1595_s15 = smov 0   ;;  %s1597_s16 = smov 0   ;;  %s1791_s0 = inlined_call_operand.vmem [shape: bf16[512,384], index: 0, kind: input, shape index: {}]   ;;  %s1792_s1 = inlined_call_operand.vmem [shape: bf16[384,128], index: 1, kind: input, shape index: {}]   ;;  %s1793_s2 = inlined_call_operand.vmem [shape: f32[1,128], index: 2, kind: input, shape index: {}]   ;;  %s1794_s3 = inlined_call_operand.vmem [shape: f32[1,128], index: 3, kind: input, shape index: {}]   ;;  %s1795_s4 = inlined_call_operand.vmem [shape: bf16[512,128], index: 4, kind: output, shape index: {}]  }
   0x1   :  { %s1599_s17 = smov 0  }
   0x2 LB: > { %s33_s18 = sadd.s32 1, %s1564_s16  ;;  %p1217_p0 = scmp.ge.s32.totalorder %s1568_s17, 1  ;;  %s1568_s17 = sphi %s1599_s17, %s14_s17   ;;  %s1564_s16 = sphi %s1597_s16, %s1797_s16   ;;  %s1560_s15 = sphi %s1595_s15, %s1796_s15  }
   0x3   : > { %p35_p1 = scmp.ge.s32.totalorder %s33_s18, 4  ;;  %p224_p2 = scmp.lt.s32.totalorder %s1568_s17, 5 }
   0x5   : > { %s1799_s18 = smov (%p35_p1, %s33_s18), 0  ;;  %p225_p3 = pnand %p1217_p0, %p224_p2 }
   0x6   : > { %v1490_v0 = vld [vmem:[%s1792_s1 + $0x40] sm:$0xff] (!%p225_p3)   ;;  %v1493_v3 = vld [vmem:[%s1792_s1 + $0x48] sm:$0xff] (!%p225_p3)   ;;  %v1496_v6 = vld [vmem:[%s1792_s1 + $0x50] sm:$0xff] (!%p225_p3)   ;;  %s1218_s9 = sshll.u32 (!%p225_p3), %s1560_s15, 4 }
   0x7   : > { %228 = sbr.rel (%p225_p3) target bundleno = 323 (0x143), region = 36  ;;  %v1491_v1 = vld [vmem:[%s1792_s1] sm:$0xff] (!%p225_p3)   ;;  %1353 = vmatprep.subr.bf16.mxu0 (!%p225_p3), %v1490_v0  ;;  %v1494_v4 = vld [vmem:[%s1792_s1 + $0x8] sm:$0xff] (!%p225_p3)   ;;  %v1497_v7 = vld [vmem:[%s1792_s1 + $0x10] sm:$0xff] (!%p225_p3)   ;;  %p274_p4 = scmp.lt.s32.totalorder (!%p225_p3), %s1218_s9, 63 }
   0x8   : > { %v1492_v2 = vld [vmem:[%s1792_s1 + $0x80] sm:$0xff] (!%p225_p3)   ;;  %1354 = vmatpush3.bf16.msra.mxu0 (!%p225_p3), %v1491_v1  ;;  %v1495_v5 = vld [vmem:[%s1792_s1 + $0x88] sm:$0xff] (!%p225_p3)   ;;  %v1498_v8 = vld [vmem:[%s1792_s1 + $0x90] sm:$0xff] (!%p225_p3)  }
   0x9   : > { %1433 = vmatprep.subr.bf16.mxu1 (!%p225_p3), %v1492_v2  ;;  %1355 = vmatprep.subr.bf16.mxu0 (!%p225_p3), %v1493_v3  ;;  %v1499_v9 = vld [vmem:[%s1792_s1 + $0x58] sm:$0xff] (!%p225_p3)   ;;  %v1502_v12 = vld [vmem:[%s1792_s1 + $0x60] sm:$0xff] (!%p225_p3)   ;;  %v1505_v15 = vld [vmem:[%s1792_s1 + $0x68] sm:$0xff] (!%p225_p3)  }
   0xa   : > { %1434 = vmatpush3.bf16.msra.mxu1 (!%p225_p3), %v1492_v2  ;;  %v1500_v10 = vld [vmem:[%s1792_s1 + $0x18] sm:$0xff] (!%p225_p3)   ;;  %v1504_v13 = vld [vmem:[%s1792_s1 + $0xa0] sm:$0xff] (!%p225_p3)   ;;  %v1507_v16 = vld [vmem:[%s1792_s1 + $0xa8] sm:$0xff] (!%p225_p3)  }
   0xb   : > { %1435 = vmatprep.subr.bf16.mxu1 (!%p225_p3), %v1495_v5  ;;  %v1501_v11 = vld [vmem:[%s1792_s1 + $0x98] sm:$0xff] (!%p225_p3)   ;;  %v1503_v14 = vld [vmem:[%s1792_s1 + $0x20] sm:$0xff] (!%p225_p3)   ;;  %v1506_v17 = vld [vmem:[%s1792_s1 + $0x28] sm:$0xff] (!%p225_p3)  }
   0xc   : > { %1356 = vmatpush3.bf16.msra.mxu0 (!%p225_p3), %v1494_v4  ;;  %v1508_v18 = vld [vmem:[%s1792_s1 + $0x70] sm:$0xff] (!%p225_p3)   ;;  %v1511_v21 = vld [vmem:[%s1792_s1 + $0x78] sm:$0xff] (!%p225_p3)   ;;  %v1723_v55 = vld [vmem:[%s1793_s2] ss:$0 sm:$0xff] (!%p225_p3) }
   0xd   : > { %1357 = vmatprep.subr.bf16.mxu0 (!%p225_p3), %v1496_v6  ;;  %v1509_v19 = vld [vmem:[%s1792_s1 + $0x30] sm:$0xff] (!%p225_p3)   ;;  %v1513_v22 = vld [vmem:[%s1792_s1 + $0xb8] sm:$0xff] (!%p225_p3)   ;;  %v1728_v59 = vld [vmem:[%s1794_s3] ss:$0 sm:$0xff] (!%p225_p3) }
   0xe   : > { %1436 = vmatpush3.bf16.msra.mxu1 %v1495_v5  ;;  %s1801_s9 = smov (!%p274_p4, %s1218_s9), 63  ;;  %v1510_v20 = vld [vmem:[%s1792_s1 + $0xb0] sm:$0xff]   ;;  %v1512_v25 = vld [vmem:[%s1792_s1 + $0x38] sm:$0xff]  }
   0xf   : > { %1437 = vmatprep.subr.bf16.mxu1 %v1498_v8  ;;  %s1465_s5 = smul.u32 12, %s1801_s9 }
  0x10   : > { %1358 = vmatpush3.bf16.msra.mxu0 %v1497_v7 }
  0x11   : > { %1359 = vmatprep.subr.bf16.mxu0 %v1499_v9  ;;  %s1685_s21 = scalar_lea.vmem %s1791_s0, %s1465_s5  ;;  %s1221_s5 = sshll.u32 %s1801_s9, 2 }
  0x12   : > { %1438 = vmatpush3.bf16.msra.mxu1 %v1498_v8  ;;  %v1516_v23 = vld [vmem:[%s1685_s21 + $0x4] ss:$12 sps:$4 sm:$0xff]   ;;  %v1517_v24 = vld [vmem:[%s1685_s21 + $0x8] ss:$12 sps:$4 sm:$0xff]   ;;  %v1514_v26 = vld [vmem:[%s1685_s21] ss:$12 sps:$4 sm:$0xff]   ;;  %s1738_s8 = scalar_lea.vmem %s1795_s4, %s1221_s5 }
  0x13   : > { %1439 = vmatprep.subr.bf16.mxu1 %v1501_v11  ;;  %729 = vmatprep.mubr.bf16.mxu0 %v1516_v23  ;;  %v1519_v27 = vld [vmem:[%s1685_s21 + $0x1c] ss:$12 sps:$4 sm:$0xff]   ;;  %v1518_v28 = vld [vmem:[%s1685_s21 + $0x20] ss:$12 sps:$4 sm:$0xff]   ;;  %v1525_v29 = vld [vmem:[%s1685_s21 + $0x38] ss:$12 sps:$4 sm:$0xff]  }
  0x14   : > { %1360 = vmatpush3.bf16.msra.mxu0 %v1500_v10  ;;  %1449 = vmatprep.mubr.bf16.mxu1 %v1517_v24  ;;  %v1521_v30 = vld [vmem:[%s1685_s21 + $0x18] ss:$12 sps:$4 sm:$0xff]   ;;  %v1522_v31 = vld [vmem:[%s1685_s21 + $0x34] ss:$12 sps:$4 sm:$0xff]   ;;  %v1526_v32 = vld [vmem:[%s1685_s21 + $0x50] ss:$12 sps:$4 sm:$0xff]  }
  0x15   : > { %1361 = vmatprep.subr.bf16.mxu0 %v1502_v12  ;;  %v1533_v33 = vld [vmem:[%s1685_s21 + $0x68] ss:$12 sps:$4 sm:$0xff]   ;;  %v1524_v34 = vld [vmem:[%s1685_s21 + $0x30] ss:$12 sps:$4 sm:$0xff]   ;;  %v1527_v35 = vld [vmem:[%s1685_s21 + $0x4c] ss:$12 sps:$4 sm:$0xff]  }
  0x16   : > { %1440 = vmatpush3.bf16.msra.mxu1 %v1501_v11  ;;  %v1534_v36 = vld [vmem:[%s1685_s21 + $0x80] ss:$12 sps:$4 sm:$0xff]   ;;  %v1541_v37 = vld [vmem:[%s1685_s21 + $0x98] ss:$12 sps:$4 sm:$0xff]   ;;  %v1529_v38 = vld [vmem:[%s1685_s21 + $0x48] ss:$12 sps:$4 sm:$0xff]  }
  0x17   : > { %1441 = vmatprep.subr.bf16.mxu1 %v1504_v13  ;;  %v1530_v39 = vld [vmem:[%s1685_s21 + $0x64] ss:$12 sps:$4 sm:$0xff]   ;;  %v1532_v41 = vld [vmem:[%s1685_s21 + $0x60] ss:$12 sps:$4 sm:$0xff]   ;;  %v1535_v42 = vld [vmem:[%s1685_s21 + $0x7c] ss:$12 sps:$4 sm:$0xff]  }
  0x18   : > { %1362 = vmatpush3.bf16.msra.mxu0 %v1503_v14  ;;  %v1542_v40 = vld [vmem:[%s1685_s21 + $0xb0] ss:$12 sps:$4 sm:$0xff]   ;;  %v1537_v43 = vld [vmem:[%s1685_s21 + $0x78] ss:$12 sps:$4 sm:$0xff]   ;;  %v1538_v44 = vld [vmem:[%s1685_s21 + $0x94] ss:$12 sps:$4 sm:$0xff]  }
  0x19   : > { %1363 = vmatprep.subr.bf16.mxu0 %v1505_v15  ;;  %v1540_v45 = vld [vmem:[%s1685_s21 + $0x90] ss:$12 sps:$4 sm:$0xff]   ;;  %v1543_v46 = vld [vmem:[%s1685_s21 + $0xac] ss:$12 sps:$4 sm:$0xff]   ;;  %v1545_v47 = vld [vmem:[%s1685_s21 + $0xa8] ss:$12 sps:$4 sm:$0xff]  }
  0x1a   : > { %1442 = vmatpush3.bf16.msra.mxu1 %v1504_v13 }
  0x1b   : > { %1443 = vmatprep.subr.bf16.mxu1 %v1507_v16 }
  0x1c   : > { %1364 = vmatpush3.bf16.msra.mxu0 %v1506_v17 }
  0x1d   : > { %1365 = vmatprep.subr.bf16.mxu0 %v1508_v18 }
  0x1e   : > { %1444 = vmatpush3.bf16.msra.mxu1 %v1507_v16 }
  0x1f   : > { %1445 = vmatprep.subr.bf16.mxu1 %v1510_v20 }
  0x20   : > { %1366 = vmatpush3.bf16.msra.mxu0 %v1509_v19 }
  0x21   : > { %1367 = vmatprep.subr.bf16.mxu0 %v1511_v21 }
  0x22   : > { %1446 = vmatpush3.bf16.msra.mxu1 %v1510_v20 }
  0x23   : > { %1447 = vmatprep.subr.bf16.mxu1 %v1513_v22 }
  0x24   : > { %1368 = vmatpush3.bf16.msra.mxu0 %v1512_v25 }
  0x26   : > { %1448 = vmatpush3.bf16.msra.mxu1 %v1513_v22 }
  0x27   : > { %730 = vmatmul.mubr.bf16.vlgmr.msra.gmra.mrb[0].mxu0 %v1514_v26 }
  0x28   : > { %737 = vmatprep.mubr.bf16.mxu0 %v1519_v27 }
  0x29   : > { %1450 = vmatmul.mubr.bf16.vlgmr.msra.gmra.mrb[0].mxu1 %v1518_v28 }
  0x2a   : > { %1453 = vmatprep.mubr.bf16.mxu1 %v1525_v29 }
  0x2f   : > { %738 = vmatmul.mubr.bf16.gmra.mrb[4].mxu0 %v1521_v30 }
  0x30   : > { %745 = vmatprep.mubr.bf16.mxu0 %v1522_v31 }
  0x31   : > { %1454 = vmatmul.mubr.bf16.gmra.mrb[4].mxu1 %v1526_v32 }
  0x32   : > { %1457 = vmatprep.mubr.bf16.mxu1 %v1533_v33 }
  0x37   : > { %746 = vmatmul.mubr.bf16.gmra.mrb[8].mxu0 %v1524_v34 }
  0x38   : > { %753 = vmatprep.mubr.bf16.mxu0 %v1527_v35 }
  0x39   : > { %1458 = vmatmul.mubr.bf16.gmra.mrb[8].mxu1 %v1534_v36 }
  0x3a   : > { %1461 = vmatprep.mubr.bf16.mxu1 %v1541_v37 }
  0x3f   : > { %754 = vmatmul.mubr.bf16.gmra.mrb[12].mxu0 %v1529_v38 }
  0x40   : > { %761 = vmatprep.mubr.bf16.mxu0 %v1530_v39 }
  0x41   : > { %1462 = vmatmul.mubr.bf16.gmra.mrb[12].mxu1 %v1542_v40 }
  0x47   : > { %762 = vmatmul.mubr.bf16.gmra.mrb[16].mxu0 %v1532_v41 }
  0x48   : > { %769 = vmatprep.mubr.bf16.mxu0 %v1535_v42 }
  0x4f   : > { %770 = vmatmul.mubr.bf16.gmra.mrb[20].mxu0 %v1537_v43 }
  0x50   : > { %777 = vmatprep.mubr.bf16.mxu0 %v1538_v44 }
  0x57   : > { %778 = vmatmul.mubr.bf16.gmra.mrb[24].mxu0 %v1540_v45 }
  0x58   : > { %785 = vmatprep.mubr.bf16.mxu0 %v1543_v46 }
  0x5f   : > { %786 = vmatmul.mubr.bf16.gmra.mrb[28].mxu0 %v1545_v47 }
  0xfa   : > { %v1369_v48 = vpop.f32.mrb[0].mxu0 }
  0xfb   : > { %v1370_v49 = vpop.f32.mrb[1].mxu0 }
  0xfc   : > { %v1371_v50 = vadd.f32 %v1370_v49, %v1369_v48  ;;  %v1372_v51 = vpop.f32.mrb[2].mxu0  ;;  %v1451_v52 = vpop.f32.mrb[0].mxu1 }
  0xfd   : > { %v1373_v53 = vpop.f32.mrb[3].mxu0  ;;  %v828_v54 = vpop.f32.mrb[1].mxu1 }
  0xfe   : > { %v1374_v56 = vadd.f32 %v1373_v53, %v1372_v51  ;;  %v829_v57 = vadd.f32 %v1371_v50, %v828_v54  ;;  %v1452_v58 = vpop.f32.mrb[2].mxu1 }
  0xff   : > { %v831_v60 = vpop.f32.mrb[3].mxu1 }
 0x100   : > { %v949_v61 = vmul.f32 %v1723_v55, %v829_v57  ;;  %v832_v62 = vadd.f32 %v1374_v56, %v831_v60 }
 0x102   : > { %v972_v63 = vadd.f32 %v1728_v59, %v949_v61  ;;  %v950_v0 = vmul.f32 %v1723_v55, %v832_v62  ;;  %v1375_v1 = vpop.f32.mrb[4].mxu0 }
 0x103   : > { %v1376_v2 = vpop.f32.mrb[5].mxu0 }
 0x104   : > { %v973_v3 = vadd.f32 %v1728_v59, %v950_v0  ;;  %v1377_v4 = vadd.f32 %v1376_v2, %v1375_v1  ;;  %v1378_v5 = vpop.f32.mrb[6].mxu0  ;;  %v1455_v6 = vpop.f32.mrb[4].mxu1  ;;  %v988_v9 = vmax.f32 %v972_v63, 0.0 }
 0x105   : > { %v1379_v7 = vpop.f32.mrb[7].mxu0  ;;  %v844_v8 = vpop.f32.mrb[5].mxu1 }
 0x106   : > { %v989_v10 = vmax.f32 %v973_v3, 0.0  ;;  %v837_v11 = vadd.f32 %v1451_v52, %v1377_v4  ;;  %v1380_v12 = vadd.f32 %v1379_v7, %v1378_v5  ;;  %v1456_v13 = vpop.f32.mrb[6].mxu1 }
 0x107   : > { %v847_v14 = vpop.f32.mrb[7].mxu1 }
 0x108   : > { %v1309_v15 = vpack.c.bf16 %v989_v10, %v988_v9  ;;  %v951_v16 = vmul.f32 %v1723_v55, %v837_v11  ;;  %v840_v17 = vadd.f32 %v1452_v58, %v1380_v12 }
 0x10a   : > { %1310 = vst [vmem:[%s1738_s8] sm:$0xff] %v1309_v15   ;;  %v974_v18 = vadd.f32 %v1728_v59, %v951_v16  ;;  %v952_v19 = vmul.f32 %v1723_v55, %v840_v17  ;;  %v1381_v20 = vpop.f32.mrb[8].mxu0 }
 0x10b   : > { %v1382_v21 = vpop.f32.mrb[9].mxu0 }
 0x10c   : > { %v975_v22 = vadd.f32 %v1728_v59, %v952_v19  ;;  %v1383_v23 = vadd.f32 %v1382_v21, %v1381_v20  ;;  %v1384_v24 = vpop.f32.mrb[10].mxu0  ;;  %v1459_v25 = vpop.f32.mrb[8].mxu1  ;;  %v990_v28 = vmax.f32 %v974_v18, 0.0 }
 0x10d   : > { %v1385_v26 = vpop.f32.mrb[11].mxu0  ;;  %v860_v27 = vpop.f32.mrb[9].mxu1 }
 0x10e   : > { %v991_v29 = vmax.f32 %v975_v22, 0.0  ;;  %v1386_v30 = vadd.f32 %v1385_v26, %v1384_v24  ;;  %v845_v31 = vadd.f32 %v1383_v23, %v844_v8  ;;  %v1460_v32 = vpop.f32.mrb[10].mxu1 }
 0x10f   : > { %v863_v33 = vpop.f32.mrb[11].mxu1 }
 0x110   : > { %v1314_v34 = vpack.c.bf16 %v991_v29, %v990_v28  ;;  %v953_v35 = vmul.f32 %v1723_v55, %v845_v31  ;;  %v848_v36 = vadd.f32 %v1386_v30, %v847_v14 }
 0x112   : > { %1346 = vst [vmem:[%s1738_s8 + $0x8] sm:$0xff] %v1314_v34   ;;  %v976_v37 = vadd.f32 %v1728_v59, %v953_v35  ;;  %v954_v38 = vmul.f32 %v1723_v55, %v848_v36  ;;  %v1387_v39 = vpop.f32.mrb[12].mxu0 }
 0x113   : > { %v1388_v40 = vpop.f32.mrb[13].mxu0 }
 0x114   : > { %v977_v41 = vadd.f32 %v1728_v59, %v954_v38  ;;  %v1389_v42 = vadd.f32 %v1388_v40, %v1387_v39  ;;  %v1390_v43 = vpop.f32.mrb[14].mxu0  ;;  %v1750_v44 = vpop.f32.mrb[12].mxu1  ;;  %v992_v47 = vmax.f32 %v976_v37, 0.0 }
 0x115   : > { %v1391_v45 = vpop.f32.mrb[15].mxu0  ;;  %v876_v46 = vpop.f32.mrb[13].mxu1 }
 0x116   : > { %v993_v48 = vmax.f32 %v977_v41, 0.0  ;;  %v853_v49 = vadd.f32 %v1455_v6, %v1389_v42  ;;  %v1392_v50 = vadd.f32 %v1391_v45, %v1390_v43  ;;  %v1752_v51 = vpop.f32.mrb[14].mxu1 }
 0x117   : > { %v879_v52 = vpop.f32.mrb[15].mxu1 }
 0x118   : > { %v1319_v53 = vpack.c.bf16 %v993_v48, %v992_v47  ;;  %v955_v54 = vmul.f32 %v1723_v55, %v853_v49  ;;  %v856_v56 = vadd.f32 %v1456_v13, %v1392_v50 }
 0x11a   : > { %1347 = vst [vmem:[%s1738_s8 + $0x10] sm:$0xff] %v1319_v53   ;;  %v978_v57 = vadd.f32 %v1728_v59, %v955_v54  ;;  %v956_v58 = vmul.f32 %v1723_v55, %v856_v56  ;;  %v1393_v60 = vpop.f32.mrb[16].mxu0 }
 0x11b   : > { %v1394_v61 = vpop.f32.mrb[17].mxu0 }
 0x11c   : > { %v979_v62 = vadd.f32 %v1728_v59, %v956_v58  ;;  %v1395_v63 = vadd.f32 %v1394_v61, %v1393_v60  ;;  %v1396_v0 = vpop.f32.mrb[18].mxu0  ;;  %v994_v2 = vmax.f32 %v978_v57, 0.0 }
 0x11d   : > { %v1397_v1 = vpop.f32.mrb[19].mxu0 }
 0x11e   : > { %v995_v3 = vmax.f32 %v979_v62, 0.0  ;;  %v1398_v4 = vadd.f32 %v1397_v1, %v1396_v0  ;;  %v861_v5 = vadd.f32 %v1395_v63, %v860_v27 }
 0x120   : > { %v1324_v6 = vpack.c.bf16 %v995_v3, %v994_v2  ;;  %v957_v7 = vmul.f32 %v1723_v55, %v861_v5  ;;  %v864_v8 = vadd.f32 %v1398_v4, %v863_v33 }
 0x122   : > { %1348 = vst [vmem:[%s1738_s8 + $0x18] sm:$0xff] %v1324_v6   ;;  %v980_v9 = vadd.f32 %v1728_v59, %v957_v7  ;;  %v958_v10 = vmul.f32 %v1723_v55, %v864_v8  ;;  %v1399_v11 = vpop.f32.mrb[20].mxu0 }
 0x123   : > { %v1400_v12 = vpop.f32.mrb[21].mxu0 }
 0x124   : > { %v981_v13 = vadd.f32 %v1728_v59, %v958_v10  ;;  %v1401_v14 = vadd.f32 %v1400_v12, %v1399_v11  ;;  %v1402_v15 = vpop.f32.mrb[22].mxu0  ;;  %v996_v17 = vmax.f32 %v980_v9, 0.0 }
 0x125   : > { %v1403_v16 = vpop.f32.mrb[23].mxu0 }
 0x126   : > { %v997_v18 = vmax.f32 %v981_v13, 0.0  ;;  %v869_v19 = vadd.f32 %v1459_v25, %v1401_v14  ;;  %v1404_v20 = vadd.f32 %v1403_v16, %v1402_v15 }
 0x128   : > { %v1329_v21 = vpack.c.bf16 %v997_v18, %v996_v17  ;;  %v959_v22 = vmul.f32 %v1723_v55, %v869_v19  ;;  %v872_v23 = vadd.f32 %v1460_v32, %v1404_v20 }
 0x12a   : > { %1349 = vst [vmem:[%s1738_s8 + $0x20] sm:$0xff] %v1329_v21   ;;  %v982_v24 = vadd.f32 %v1728_v59, %v959_v22  ;;  %v960_v26 = vmul.f32 %v1723_v55, %v872_v23  ;;  %v1405_v27 = vpop.f32.mrb[24].mxu0 }
 0x12b   : > { %v1406_v28 = vpop.f32.mrb[25].mxu0 }
 0x12c   : > { %v983_v29 = vadd.f32 %v1728_v59, %v960_v26  ;;  %v1407_v30 = vadd.f32 %v1406_v28, %v1405_v27  ;;  %v1408_v31 = vpop.f32.mrb[26].mxu0  ;;  %v998_v34 = vmax.f32 %v982_v24, 0.0 }
 0x12d   : > { %v1409_v33 = vpop.f32.mrb[27].mxu0 }
 0x12e   : > { %v999_v25 = vmax.f32 %v983_v29, 0.0  ;;  %v1410_v35 = vadd.f32 %v1409_v33, %v1408_v31  ;;  %v877_v36 = vadd.f32 %v1407_v30, %v876_v46 }
 0x130   : > { %v1334_v37 = vpack.c.bf16 %v999_v25, %v998_v34  ;;  %v961_v32 = vmul.f32 %v1723_v55, %v877_v36  ;;  %v880_v38 = vadd.f32 %v1410_v35, %v879_v52 }
 0x132   : > { %1350 = vst [vmem:[%s1738_s8 + $0x28] sm:$0xff] %v1334_v37   ;;  %v984_v39 = vadd.f32 %v1728_v59, %v961_v32  ;;  %v962_v40 = vmul.f32 %v1723_v55, %v880_v38  ;;  %v1411_v41 = vpop.f32.mrb[28].mxu0 }
 0x133   : > { %v1412_v42 = vpop.f32.mrb[29].mxu0 }
 0x134   : > { %v985_v43 = vadd.f32 %v1728_v59, %v962_v40  ;;  %v1413_v45 = vadd.f32 %v1412_v42, %v1411_v41  ;;  %v1414_v47 = vpop.f32.mrb[30].mxu0  ;;  %v1000_v49 = vmax.f32 %v984_v39, 0.0 }
 0x135   : > { %v1415_v48 = vpop.f32.mrb[31].mxu0 }
 0x136   : > { %v1001_v46 = vmax.f32 %v985_v43, 0.0  ;;  %v885_v50 = vadd.f32 %v1750_v44, %v1413_v45  ;;  %v1416_v53 = vadd.f32 %v1415_v48, %v1414_v47 }
 0x138   : > { %v1339_v52 = vpack.c.bf16 %v1001_v46, %v1000_v49  ;;  %v963_v54 = vmul.f32 %v1723_v55, %v885_v50  ;;  %v888_v56 = vadd.f32 %v1752_v51, %v1416_v53 }
 0x13a   : > { %1351 = vst [vmem:[%s1738_s8 + $0x30] sm:$0xff] %v1339_v52   ;;  %v986_v57 = vadd.f32 %v1728_v59, %v963_v54  ;;  %v964_v58 = vmul.f32 %v1723_v55, %v888_v56 }
 0x13c   : > { %v987_v60 = vadd.f32 %v1728_v59, %v964_v58  ;;  %v1002_v61 = vmax.f32 %v986_v57, 0.0 }
 0x13e   : > { %v1003_v62 = vmax.f32 %v987_v60, 0.0 }
 0x140   : > { %v1344_v63 = vpack.c.bf16 %v1003_v62, %v1002_v61 }
 0x142   : > { %1352 = vst [vmem:[%s1738_s8 + $0x38] sm:$0xff] %v1344_v63  }
 0x143 PF: > { %s14_s17 = sadd.s32 1, %s1568_s17   ;;  %s1796_s15 = smov %s1564_s16 }
 0x144   : > { %p11_p5 = scmp.ge.s32.totalorder %s14_s17, 6   ;;  %s1797_s16 = smov %s1799_s18 }
 0x146   :  { %13 = sbr.rel (!%p11_p5) target bundleno = 2 (0x2), region = 83 }

// kernel: bcnn_forward.20
= control target key start
LH: loop header
LB: loop body
LE: loop exit
PB: predicated region body
PF: predicated region fallthrough
CT: control target
= control target key end

     0   :  { %s167_s0 = inlined_call_operand.vmem [shape: bf16[8,2,4,256], index: 0, kind: input, shape index: {}]   ;;  %s168_s1 = inlined_call_operand.vmem [shape: bf16[8,4,128], index: 1, kind: output, shape index: {}]  }
   0x1   :  { %v8_v0 = vld [vmem:[%s167_s0] sm:$0xf]  ;;  %v77_v1 = vld [vmem:[%s167_s0 + $0x4] sm:$0xf]  ;;  %v9_v2 = vld [vmem:[%s167_s0 + $0x8] sm:$0xf] }
   0x2   :  { %v25_v3 = vmax.bf16 %v77_v1, %v8_v0  ;;  %v78_v4 = vld [vmem:[%s167_s0 + $0xc] sm:$0xf]  ;;  %v10_v5 = vld [vmem:[%s167_s0 + $0x10] sm:$0xf]  ;;  %v79_v6 = vld [vmem:[%s167_s0 + $0x14] sm:$0xf] }
   0x3   :  { %v26_v7 = vmax.bf16 %v78_v4, %v9_v2  ;;  %v27_v8 = vmax.bf16 %v79_v6, %v10_v5  ;;  %v11_v9 = vld [vmem:[%s167_s0 + $0x18] sm:$0xf]  ;;  %v80_v10 = vld [vmem:[%s167_s0 + $0x1c] sm:$0xf]  ;;  %v12_v11 = vld [vmem:[%s167_s0 + $0x20] sm:$0xf] }
   0x4   :  { %v41_v12 = vrot.slane %v25_v3, 2  ;;  %v28_v13 = vmax.bf16 %v80_v10, %v11_v9  ;;  %v81_v14 = vld [vmem:[%s167_s0 + $0x24] sm:$0xf]  ;;  %v13_v15 = vld [vmem:[%s167_s0 + $0x28] sm:$0xf] }
   0x5   :  { %v42_v16 = vrot.slane %v26_v7, 2  ;;  %v43_v17 = vrot.slane %v27_v8, 2  ;;  %v29_v18 = vmax.bf16 %v81_v14, %v12_v11  ;;  %v82_v19 = vld [vmem:[%s167_s0 + $0x2c] sm:$0xf]  ;;  %v14_v20 = vld [vmem:[%s167_s0 + $0x30] sm:$0xf] }
   0x6   :  { %v57_v21 = vmax.bf16 %v41_v12, %v25_v3  ;;  %v44_v22 = vrot.slane %v28_v13, 2  ;;  %v30_v23 = vmax.bf16 %v82_v19, %v13_v15  ;;  %v83_v24 = vld [vmem:[%s167_s0 + $0x34] sm:$0xf]  ;;  %v15_v25 = vld [vmem:[%s167_s0 + $0x38] sm:$0xf] }
   0x7   :  { %v58_v26 = vmax.bf16 %v42_v16, %v26_v7  ;;  %v59_v27 = vmax.bf16 %v43_v17, %v27_v8  ;;  %v45_v28 = vrot.slane %v29_v18, 2  ;;  %v31_v29 = vmax.bf16 %v83_v24, %v14_v20  ;;  %v84_v30 = vld [vmem:[%s167_s0 + $0x3c] sm:$0xf] }
   0x8   :  { %65 = vst [vmem:[%s168_s1] sm:$0x3] %v57_v21  ;;  %v60_v31 = vmax.bf16 %v44_v22, %v28_v13  ;;  %v46_v32 = vrot.slane %v30_v23, 2  ;;  %v32_v33 = vmax.bf16 %v84_v30, %v15_v25 }
   0x9   :  { %66 = vst [vmem:[%s168_s1 + $0x2] sm:$0x3] %v58_v26  ;;  %67 = vst [vmem:[%s168_s1 + $0x4] sm:$0x3] %v59_v27  ;;  %v61_v34 = vmax.bf16 %v45_v28, %v29_v18  ;;  %v47_v35 = vrot.slane %v31_v29, 2 }
   0xa   :  { %68 = vst [vmem:[%s168_s1 + $0x6] sm:$0x3] %v60_v31  ;;  %v62_v36 = vmax.bf16 %v46_v32, %v30_v23  ;;  %v48_v37 = vrot.slane %v32_v33, 2 }
   0xb   :  { %69 = vst [vmem:[%s168_s1 + $0x8] sm:$0x3] %v61_v34  ;;  %v63_v38 = vmax.bf16 %v47_v35, %v31_v29 }
   0xc   :  { %70 = vst [vmem:[%s168_s1 + $0xa] sm:$0x3] %v62_v36  ;;  %v64_v39 = vmax.bf16 %v48_v37, %v32_v33 }
   0xd   :  { %71 = vst [vmem:[%s168_s1 + $0xc] sm:$0x3] %v63_v38 }
   0xe   :  { %72 = vst [vmem:[%s168_s1 + $0xe] sm:$0x3] %v64_v39 }

// kernel: bcnn_forward.19
= control target key start
LH: loop header
LB: loop body
LE: loop exit
PB: predicated region body
PF: predicated region fallthrough
CT: control target
= control target key end

     0   :  { %s1742_s15 = smov 0   ;;  %s1744_s16 = smov 0   ;;  %s1995_s0 = inlined_call_operand.vmem [shape: bf16[128,1152], index: 0, kind: input, shape index: {}]   ;;  %s1996_s1 = inlined_call_operand.vmem [shape: bf16[1152,128], index: 1, kind: input, shape index: {}]   ;;  %s1997_s2 = inlined_call_operand.vmem [shape: f32[1,128], index: 2, kind: input, shape index: {}]   ;;  %s1998_s3 = inlined_call_operand.vmem [shape: f32[1,128], index: 3, kind: input, shape index: {}]   ;;  %s1999_s4 = inlined_call_operand.vmem [shape: bf16[128,128], index: 4, kind: output, shape index: {}]  }
   0x1   :  { %s1746_s17 = smov 0   ;;  %s1748_s18 = smov 0  }
   0x2   :  { %s1750_s19 = smov 0  }
   0x3 LB: > { %s26_s20 = sadd.s32 1, %s1710_s18  ;;  %p49_p1 = scmp.ne.s32.totalorder %s1702_s16, %s1698_s15  ;;  %s1714_s19 = sphi %s1750_s19, %s14_s19   ;;  %s1710_s18 = sphi %s1748_s18, %s2003_s18   ;;  %s1706_s17 = sphi %s1746_s17, %s2002_s17   ;;  %s1702_s16 = sphi %s1744_s16, %s2001_s16   ;;  %s1698_s15 = sphi %s1742_s15, %s2000_s15  }
   0x4   : > { %p27_p0 = scmp.ge.s32.totalorder %s26_s20, 3  ;;  %p50_p2 = scmp.eq.s32.totalorder %s1714_s19, 0 }
   0x5   : > { %s42_s22 = sadd.s32 1, %s1702_s16  ;;  %p1293_p5 = scmp.ge.s32.totalorder %s1714_s19, 3 }
   0x6   : > { %s2005_s20 = smov (%p27_p0, %s26_s20), 0  ;;  %p51_p3 = por %p50_p2, %p49_p1 }
   0x7   : > { %s38_s21 = ssub.s32 %s1710_s18, %s2005_s20  ;;  %195 = sbr.rel (%p1293_p5) target bundleno = 37 (0x25), region = 24 }
   0x8   : > { %p40_p4 = scmp.eq.s32.totalorder %s38_s21, 0 }
   0xa   : > { %s1777_s23 = scalar_select %p40_p4, %s1702_s16, %s42_s22  }
   0xe   : > { %198 = sbr.rel (!%p51_p3) target bundleno = 37 (0x25), region = 28  ;;  %s200_s24 = sand.u32 (%p51_p3), 1, %s1702_s16  }
   0xf   : > { %s1401_s25 = smul.u32 (%p51_p3), 12, %s1710_s18 }
  0x10   : > { %s1577_s26 = smul.u32 (%p51_p3), 192, %s200_s24 }
  0x11   : > { %s1785_s29 = scalar_lea.vmem (%p51_p3), %s1995_s0, %s1401_s25 }
  0x12   : > { %v223_v0 = vld [vmem:[%s1785_s29] sm:$0xff] (%p51_p3)  ;;  %v227_v2 = vld [vmem:[%s1785_s29 + $0x48] sm:$0xff] (%p51_p3)  ;;  %s1790_s30 = scalar_lea.vmem (%p51_p3), [#allocation3], %s1577_s26  ;;  %v231_v4 = vld [vmem:[%s1785_s29 + $0x90] sm:$0xff] (%p51_p3) }
  0x13   : > { %v225_v1 = vld [vmem:[%s1785_s29 + $0x24] sm:$0xff] (%p51_p3)  ;;  %224 = vst [vmem:[%s1790_s30] sm:$0xff] (%p51_p3), %v223_v0  ;;  %228 = vst [vmem:[%s1790_s30 + $0x18] sm:$0xff] (%p51_p3), %v227_v2  ;;  %v229_v3 = vld [vmem:[%s1785_s29 + $0x6c] sm:$0xff] (%p51_p3) }
  0x14   : > { %226 = vst [vmem:[%s1790_s30 + $0xc] sm:$0xff] (%p51_p3), %v225_v1  ;;  %v233_v5 = vld [vmem:[%s1785_s29 + $0xb4] sm:$0xff] (%p51_p3)  ;;  %230 = vst [vmem:[%s1790_s30 + $0x24] sm:$0xff] (%p51_p3), %v229_v3  ;;  %v237_v7 = vld [vmem:[%s1785_s29 + $0xfc] sm:$0xff] (%p51_p3) }
  0x15   : > { %232 = vst [vmem:[%s1790_s30 + $0x30] sm:$0xff] %v231_v4  ;;  %234 = vst [vmem:[%s1790_s30 + $0x3c] sm:$0xff] %v233_v5  ;;  %v235_v6 = vld [vmem:[%s1785_s29 + $0xd8] sm:$0xff]  ;;  %v239_v8 = vld [vmem:[%s1785_s29 + $0x120] sm:$0xff] }
  0x16   : > { %236 = vst [vmem:[%s1790_s30 + $0x48] sm:$0xff] %v235_v6  ;;  %238 = vst [vmem:[%s1790_s30 + $0x54] sm:$0xff] %v237_v7  ;;  %v241_v9 = vld [vmem:[%s1785_s29 + $0x144] sm:$0xff]  ;;  %v245_v11 = vld [vmem:[%s1785_s29 + $0x18c] sm:$0xff] }
  0x17   : > { %240 = vst [vmem:[%s1790_s30 + $0x60] sm:$0xff] %v239_v8  ;;  %v243_v10 = vld [vmem:[%s1785_s29 + $0x168] sm:$0xff]  ;;  %242 = vst [vmem:[%s1790_s30 + $0x6c] sm:$0xff] %v241_v9  ;;  %v247_v12 = vld [vmem:[%s1785_s29 + $0x1b0] sm:$0xff] }
  0x18   : > { %244 = vst [vmem:[%s1790_s30 + $0x78] sm:$0xff] %v243_v10  ;;  %246 = vst [vmem:[%s1790_s30 + $0x84] sm:$0xff] %v245_v11  ;;  %v249_v13 = vld [vmem:[%s1785_s29 + $0x1d4] sm:$0xff]  ;;  %v253_v15 = vld [vmem:[%s1785_s29 + $0x21c] sm:$0xff] }
  0x19   : > { %v251_v14 = vld [vmem:[%s1785_s29 + $0x1f8] sm:$0xff]  ;;  %248 = vst [vmem:[%s1790_s30 + $0x90] sm:$0xff] %v247_v12  ;;  %250 = vst [vmem:[%s1790_s30 + $0x9c] sm:$0xff] %v249_v13  ;;  %v1295_v16 = vld [vmem:[%s1785_s29 + $0x8] sm:$0xf] }
  0x1a   : > { %252 = vst [vmem:[%s1790_s30 + $0xa8] sm:$0xff] %v251_v14  ;;  %v1297_v17 = vld [vmem:[%s1785_s29 + $0x2c] sm:$0xf]  ;;  %254 = vst [vmem:[%s1790_s30 + $0xb4] sm:$0xff] %v253_v15  ;;  %v1299_v18 = vld [vmem:[%s1785_s29 + $0x50] sm:$0xf] }
  0x1b   : > { %1296 = vst [vmem:[%s1790_s30 + $0x8] sm:$0xf] %v1295_v16  ;;  %1298 = vst [vmem:[%s1790_s30 + $0x14] sm:$0xf] %v1297_v17  ;;  %v1301_v19 = vld [vmem:[%s1785_s29 + $0x74] sm:$0xf] }
  0x1c   : > { %v1303_v20 = vld [vmem:[%s1785_s29 + $0x98] sm:$0xf]  ;;  %1300 = vst [vmem:[%s1790_s30 + $0x20] sm:$0xf] %v1299_v18  ;;  %1302 = vst [vmem:[%s1790_s30 + $0x2c] sm:$0xf] %v1301_v19 }
  0x1d   : > { %1304 = vst [vmem:[%s1790_s30 + $0x38] sm:$0xf] %v1303_v20  ;;  %v1305_v21 = vld [vmem:[%s1785_s29 + $0xbc] sm:$0xf]  ;;  %v1307_v22 = vld [vmem:[%s1785_s29 + $0xe0] sm:$0xf] }
  0x1e   : > { %v1309_v23 = vld [vmem:[%s1785_s29 + $0x104] sm:$0xf]  ;;  %1306 = vst [vmem:[%s1790_s30 + $0x44] sm:$0xf] %v1305_v21  ;;  %1308 = vst [vmem:[%s1790_s30 + $0x50] sm:$0xf] %v1307_v22 }
  0x1f   : > { %1310 = vst [vmem:[%s1790_s30 + $0x5c] sm:$0xf] %v1309_v23  ;;  %v1311_v24 = vld [vmem:[%s1785_s29 + $0x128] sm:$0xf]  ;;  %v1313_v25 = vld [vmem:[%s1785_s29 + $0x14c] sm:$0xf] }
  0x20   : > { %v1315_v26 = vld [vmem:[%s1785_s29 + $0x170] sm:$0xf]  ;;  %1312 = vst [vmem:[%s1790_s30 + $0x68] sm:$0xf] %v1311_v24  ;;  %1314 = vst [vmem:[%s1790_s30 + $0x74] sm:$0xf] %v1313_v25 }
  0x21   : > { %1316 = vst [vmem:[%s1790_s30 + $0x80] sm:$0xf] %v1315_v26  ;;  %v1317_v27 = vld [vmem:[%s1785_s29 + $0x194] sm:$0xf]  ;;  %v1319_v28 = vld [vmem:[%s1785_s29 + $0x1b8] sm:$0xf] }
  0x22   : > { %v1321_v29 = vld [vmem:[%s1785_s29 + $0x1dc] sm:$0xf]  ;;  %1318 = vst [vmem:[%s1790_s30 + $0x8c] sm:$0xf] %v1317_v27  ;;  %1320 = vst [vmem:[%s1790_s30 + $0x98] sm:$0xf] %v1319_v28 }
  0x23   : > { %1322 = vst [vmem:[%s1790_s30 + $0xa4] sm:$0xf] %v1321_v29  ;;  %v1323_v30 = vld [vmem:[%s1785_s29 + $0x200] sm:$0xf]  ;;  %v1325_v31 = vld [vmem:[%s1785_s29 + $0x224] sm:$0xf] }
  0x24   : > { %1324 = vst [vmem:[%s1790_s30 + $0xb0] sm:$0xf] %v1323_v30  ;;  %1326 = vst [vmem:[%s1790_s30 + $0xbc] sm:$0xf] %v1325_v31 }
  0x25 PF: > { %p1327_p6 = scmp.ge.s32.totalorder %s1714_s19, 1  ;;  %p310_p7 = scmp.lt.s32.totalorder %s1714_s19, 4 }
  0x27   : > { %p311_p8 = pnand %p1327_p6, %p310_p7 }
  0x28   : > { %s317_s5 = sand.u32 (!%p311_p8), 1, %s1698_s15   ;;  %s361_s6 = smul.u32 (!%p311_p8), 48, %s1706_s17 }
  0x29   : > { %314 = sbr.rel (%p311_p8) target bundleno = 385 (0x181), region = 58  ;;  %p1329_p10 = scmp.ne.s32.totalorder (!%p311_p8), %s1706_s17, 0 }
  0x2a   : > { %s1578_s7 = smul.u32 (!%p311_p8), 192, %s317_s5  ;;  %p362_p9 = scmp.lt.s32.totalorder (!%p311_p8), %s361_s6, 143 }
  0x2c   : > { %s1862_s12 = scalar_lea.vmem (!%p311_p8), [#allocation3], %s1578_s7 }
  0x30   : > { %s2007_s6 = smov (!%p362_p9, %s361_s6), 143  ;;  %389 = sbr.rel (%p1329_p10) target bundleno = 58 (0x3a), region = 66 }
  0x31   : > { %s1328_s8 = sshll.u32 %s2007_s6, 2  ;;  %v1716_v32 = vmov (!%p1329_p10), 0.0  }
  0x32   : > { %s1860_s11 = scalar_lea.vmem %s1996_s1, %s1328_s8  ;;  %390 = vst [vmem:[#allocation2] sm:$0xff] (!%p1329_p10), %v1716_v32  ;;  %391 = vst [vmem:[#allocation2 + $0x8] sm:$0xff] (!%p1329_p10), %v1716_v32 }
  0x33   : > { %392 = vst [vmem:[#allocation2 + $0x10] sm:$0xff] (!%p1329_p10), %v1716_v32  ;;  %393 = vst [vmem:[#allocation2 + $0x18] sm:$0xff] (!%p1329_p10), %v1716_v32 }
  0x34   : > { %394 = vst [vmem:[#allocation2 + $0x20] sm:$0xff] (!%p1329_p10), %v1716_v32  ;;  %395 = vst [vmem:[#allocation2 + $0x28] sm:$0xff] (!%p1329_p10), %v1716_v32 }
  0x35   : > { %396 = vst [vmem:[#allocation2 + $0x30] sm:$0xff] (!%p1329_p10), %v1716_v32  ;;  %397 = vst [vmem:[#allocation2 + $0x38] sm:$0xff] (!%p1329_p10), %v1716_v32 }
  0x36   : > { %398 = vst [vmem:[#allocation2 + $0x40] sm:$0xff] (!%p1329_p10), %v1716_v32  ;;  %399 = vst [vmem:[#allocation2 + $0x48] sm:$0xff] (!%p1329_p10), %v1716_v32 }
  0x37   : > { %400 = vst [vmem:[#allocation2 + $0x50] sm:$0xff] %v1716_v32  ;;  %401 = vst [vmem:[#allocation2 + $0x58] sm:$0xff] %v1716_v32 }
  0x38   : > { %402 = vst [vmem:[#allocation2 + $0x60] sm:$0xff] %v1716_v32  ;;  %403 = vst [vmem:[#allocation2 + $0x68] sm:$0xff] %v1716_v32 }
  0x39   : > { %404 = vst [vmem:[#allocation2 + $0x70] sm:$0xff] %v1716_v32  ;;  %405 = vst [vmem:[#allocation2 + $0x78] sm:$0xff] %v1716_v32 }
  0x3a PF: > { %v1620_v33 = vld [vmem:[%s1860_s11 + $0x40] sm:$0xff]   ;;  %v1623_v36 = vld [vmem:[%s1860_s11 + $0x48] sm:$0xff]   ;;  %v1626_v39 = vld [vmem:[%s1860_s11 + $0x50] sm:$0xff]   ;;  %p1378_p11 = scmp.ne.s32.totalorder %s1706_s17, 2 }
  0x3b   : > { %v1621_v34 = vld [vmem:[%s1860_s11] sm:$0xff]   ;;  %1465 = vmatprep.subr.bf16.mxu0 %v1620_v33  ;;  %v1624_v37 = vld [vmem:[%s1860_s11 + $0x8] sm:$0xff]   ;;  %v1627_v40 = vld [vmem:[%s1860_s11 + $0x10] sm:$0xff]  }
  0x3c   : > { %v1622_v35 = vld [vmem:[%s1860_s11 + $0x80] sm:$0xff]   ;;  %1466 = vmatpush3.bf16.msra.mxu0 %v1621_v34  ;;  %v1625_v38 = vld [vmem:[%s1860_s11 + $0x88] sm:$0xff]   ;;  %v1628_v41 = vld [vmem:[%s1860_s11 + $0x90] sm:$0xff]  }
  0x3d   : > { %1545 = vmatprep.subr.bf16.mxu1 %v1622_v35  ;;  %1467 = vmatprep.subr.bf16.mxu0 %v1623_v36  ;;  %v1629_v42 = vld [vmem:[%s1860_s11 + $0x58] sm:$0xff]   ;;  %v1632_v45 = vld [vmem:[%s1860_s11 + $0x60] sm:$0xff]   ;;  %v1635_v48 = vld [vmem:[%s1860_s11 + $0x68] sm:$0xff]  }
  0x3e   : > { %1546 = vmatpush3.bf16.msra.mxu1 %v1622_v35  ;;  %v1630_v43 = vld [vmem:[%s1860_s11 + $0x18] sm:$0xff]   ;;  %v1634_v46 = vld [vmem:[%s1860_s11 + $0xa0] sm:$0xff]   ;;  %v1637_v49 = vld [vmem:[%s1860_s11 + $0xa8] sm:$0xff]  }
  0x3f   : > { %1547 = vmatprep.subr.bf16.mxu1 %v1625_v38  ;;  %v1631_v44 = vld [vmem:[%s1860_s11 + $0x98] sm:$0xff]   ;;  %v1633_v47 = vld [vmem:[%s1860_s11 + $0x20] sm:$0xff]   ;;  %v1636_v50 = vld [vmem:[%s1860_s11 + $0x28] sm:$0xff]  }
  0x40   : > { %1468 = vmatpush3.bf16.msra.mxu0 %v1624_v37  ;;  %v1638_v51 = vld [vmem:[%s1860_s11 + $0x70] sm:$0xff]   ;;  %v1641_v54 = vld [vmem:[%s1860_s11 + $0x78] sm:$0xff]   ;;  %v1644_v59 = vld [vmem:[%s1862_s12] ss:$12 sps:$4 sm:$0xff]  }
  0x41   : > { %1469 = vmatprep.subr.bf16.mxu0 %v1626_v39  ;;  %v1639_v52 = vld [vmem:[%s1860_s11 + $0x30] sm:$0xff]   ;;  %v1643_v55 = vld [vmem:[%s1860_s11 + $0xb8] sm:$0xff]   ;;  %v1648_v61 = vld [vmem:[%s1862_s12 + $0x20] ss:$12 sps:$4 sm:$0xff]  }
  0x42   : > { %1548 = vmatpush3.bf16.msra.mxu1 %v1625_v38  ;;  %v1640_v53 = vld [vmem:[%s1860_s11 + $0xb0] sm:$0xff]   ;;  %v1642_v58 = vld [vmem:[%s1860_s11 + $0x38] sm:$0xff]   ;;  %v1664_v5 = vld [vmem:[%s1862_s12 + $0x80] ss:$12 sps:$4 sm:$0xff]  }
  0x43   : > { %1549 = vmatprep.subr.bf16.mxu1 %v1628_v41  ;;  %v1646_v56 = vld [vmem:[%s1862_s12 + $0x4] ss:$12 sps:$4 sm:$0xff]   ;;  %v1647_v57 = vld [vmem:[%s1862_s12 + $0x8] ss:$12 sps:$4 sm:$0xff]   ;;  %v1657_v4 = vld [vmem:[%s1862_s12 + $0x4c] ss:$12 sps:$4 sm:$0xff]  }
  0x44   : > { %1470 = vmatpush3.bf16.msra.mxu0 %v1627_v40  ;;  %806 = vmatprep.mubr.bf16.mxu0 %v1646_v56  ;;  %v1649_v60 = vld [vmem:[%s1862_s12 + $0x1c] ss:$12 sps:$4 sm:$0xff]   ;;  %v1655_v62 = vld [vmem:[%s1862_s12 + $0x38] ss:$12 sps:$4 sm:$0xff]   ;;  %v1652_v0 = vld [vmem:[%s1862_s12 + $0x34] ss:$12 sps:$4 sm:$0xff]  }
  0x45   : > { %1471 = vmatprep.subr.bf16.mxu0 %v1629_v42  ;;  %1561 = vmatprep.mubr.bf16.mxu1 %v1647_v57  ;;  %v1651_v63 = vld [vmem:[%s1862_s12 + $0x18] ss:$12 sps:$4 sm:$0xff]   ;;  %v1656_v1 = vld [vmem:[%s1862_s12 + $0x50] ss:$12 sps:$4 sm:$0xff]   ;;  %v1663_v2 = vld [vmem:[%s1862_s12 + $0x68] ss:$12 sps:$4 sm:$0xff]  }
  0x46   : > { %1550 = vmatpush3.bf16.msra.mxu1 %v1628_v41  ;;  %v1654_v3 = vld [vmem:[%s1862_s12 + $0x30] ss:$12 sps:$4 sm:$0xff]   ;;  %v1671_v6 = vld [vmem:[%s1862_s12 + $0x98] ss:$12 sps:$4 sm:$0xff]   ;;  %v1659_v7 = vld [vmem:[%s1862_s12 + $0x48] ss:$12 sps:$4 sm:$0xff]  }
  0x47   : > { %1551 = vmatprep.subr.bf16.mxu1 %v1631_v44  ;;  %v1660_v8 = vld [vmem:[%s1862_s12 + $0x64] ss:$12 sps:$4 sm:$0xff]   ;;  %v1662_v10 = vld [vmem:[%s1862_s12 + $0x60] ss:$12 sps:$4 sm:$0xff]   ;;  %v1665_v11 = vld [vmem:[%s1862_s12 + $0x7c] ss:$12 sps:$4 sm:$0xff]  }
  0x48   : > { %1472 = vmatpush3.bf16.msra.mxu0 %v1630_v43  ;;  %v1672_v9 = vld [vmem:[%s1862_s12 + $0xb0] ss:$12 sps:$4 sm:$0xff]   ;;  %v1667_v12 = vld [vmem:[%s1862_s12 + $0x78] ss:$12 sps:$4 sm:$0xff]   ;;  %v1668_v13 = vld [vmem:[%s1862_s12 + $0x94] ss:$12 sps:$4 sm:$0xff]  }
  0x49   : > { %1473 = vmatprep.subr.bf16.mxu0 %v1632_v45  ;;  %v1670_v14 = vld [vmem:[%s1862_s12 + $0x90] ss:$12 sps:$4 sm:$0xff]   ;;  %v1673_v15 = vld [vmem:[%s1862_s12 + $0xac] ss:$12 sps:$4 sm:$0xff]   ;;  %v1675_v16 = vld [vmem:[%s1862_s12 + $0xa8] ss:$12 sps:$4 sm:$0xff]  }
  0x4a   : > { %1552 = vmatpush3.bf16.msra.mxu1 %v1631_v44  ;;  %v406_v23 = vld [vmem:[#allocation2] sm:$0xff]  ;;  %v407_v28 = vld [vmem:[#allocation2 + $0x8] sm:$0xff]  ;;  %v408_v38 = vld [vmem:[#allocation2 + $0x10] sm:$0xff] }
  0x4b   : > { %1553 = vmatprep.subr.bf16.mxu1 %v1634_v46  ;;  %v409_v44 = vld [vmem:[#allocation2 + $0x18] sm:$0xff] }
  0x4c   : > { %1474 = vmatpush3.bf16.msra.mxu0 %v1633_v47 }
  0x4d   : > { %1475 = vmatprep.subr.bf16.mxu0 %v1635_v48 }
  0x4e   : > { %1554 = vmatpush3.bf16.msra.mxu1 %v1634_v46 }
  0x4f   : > { %1555 = vmatprep.subr.bf16.mxu1 %v1637_v49 }
  0x50   : > { %1476 = vmatpush3.bf16.msra.mxu0 %v1636_v50 }
  0x51   : > { %1477 = vmatprep.subr.bf16.mxu0 %v1638_v51 }
  0x52   : > { %1556 = vmatpush3.bf16.msra.mxu1 %v1637_v49 }
  0x53   : > { %1557 = vmatprep.subr.bf16.mxu1 %v1640_v53 }
  0x54   : > { %1478 = vmatpush3.bf16.msra.mxu0 %v1639_v52 }
  0x55   : > { %1479 = vmatprep.subr.bf16.mxu0 %v1641_v54 }
  0x56   : > { %1558 = vmatpush3.bf16.msra.mxu1 %v1640_v53 }
  0x57   : > { %1559 = vmatprep.subr.bf16.mxu1 %v1643_v55 }
  0x58   : > { %1480 = vmatpush3.bf16.msra.mxu0 %v1642_v58 }
  0x5a   : > { %1560 = vmatpush3.bf16.msra.mxu1 %v1643_v55  ;;  %v410_v55 = vld [vmem:[#allocation2 + $0x20] sm:$0xff] }
  0x5b   : > { %807 = vmatmul.mubr.bf16.vlgmr.msra.gmra.mrb[0].mxu0 %v1644_v59 }
  0x5c   : > { %814 = vmatprep.mubr.bf16.mxu0 %v1649_v60  ;;  %v411_v60 = vld [vmem:[#allocation2 + $0x28] sm:$0xff] }
  0x5d   : > { %1562 = vmatmul.mubr.bf16.vlgmr.msra.gmra.mrb[0].mxu1 %v1648_v61 }
  0x5e   : > { %1565 = vmatprep.mubr.bf16.mxu1 %v1655_v62 }
  0x63   : > { %815 = vmatmul.mubr.bf16.gmra.mrb[4].mxu0 %v1651_v63 }
  0x64   : > { %822 = vmatprep.mubr.bf16.mxu0 %v1652_v0 }
  0x65   : > { %1566 = vmatmul.mubr.bf16.gmra.mrb[4].mxu1 %v1656_v1 }
  0x66   : > { %1569 = vmatprep.mubr.bf16.mxu1 %v1663_v2 }
  0x6b   : > { %823 = vmatmul.mubr.bf16.gmra.mrb[8].mxu0 %v1654_v3 }
  0x6c   : > { %830 = vmatprep.mubr.bf16.mxu0 %v1657_v4 }
  0x6d   : > { %1570 = vmatmul.mubr.bf16.gmra.mrb[8].mxu1 %v1664_v5 }
  0x6e   : > { %1573 = vmatprep.mubr.bf16.mxu1 %v1671_v6  ;;  %v412_v6 = vld [vmem:[#allocation2 + $0x30] sm:$0xff] }
  0x73   : > { %831 = vmatmul.mubr.bf16.gmra.mrb[12].mxu0 %v1659_v7 }
  0x74   : > { %838 = vmatprep.mubr.bf16.mxu0 %v1660_v8 }
  0x75   : > { %1574 = vmatmul.mubr.bf16.gmra.mrb[12].mxu1 %v1672_v9 }
  0x7b   : > { %839 = vmatmul.mubr.bf16.gmra.mrb[16].mxu0 %v1662_v10 }
  0x7c   : > { %846 = vmatprep.mubr.bf16.mxu0 %v1665_v11 }
  0x83   : > { %847 = vmatmul.mubr.bf16.gmra.mrb[20].mxu0 %v1667_v12  ;;  %v413_v12 = vld [vmem:[#allocation2 + $0x38] sm:$0xff] }
  0x84   : > { %854 = vmatprep.mubr.bf16.mxu0 %v1668_v13 }
  0x8b   : > { %855 = vmatmul.mubr.bf16.gmra.mrb[24].mxu0 %v1670_v14 }
  0x8c   : > { %862 = vmatprep.mubr.bf16.mxu0 %v1673_v15 }
  0x93   : > { %863 = vmatmul.mubr.bf16.gmra.mrb[28].mxu0 %v1675_v16 }
 0x12e   : > { %v1481_v17 = vpop.f32.mrb[0].mxu0 }
 0x12f   : > { %v1482_v18 = vpop.f32.mrb[1].mxu0 }
 0x130   : > { %v1483_v19 = vadd.f32 %v1482_v18, %v1481_v17  ;;  %v1484_v20 = vpop.f32.mrb[2].mxu0  ;;  %v1563_v21 = vpop.f32.mrb[0].mxu1 }
 0x131   : > { %v1485_v22 = vpop.f32.mrb[3].mxu0  ;;  %v905_v24 = vpop.f32.mrb[1].mxu1 }
 0x132   : > { %v1486_v25 = vadd.f32 %v1485_v22, %v1484_v20  ;;  %v906_v26 = vadd.f32 %v1483_v19, %v905_v24  ;;  %v1564_v27 = vpop.f32.mrb[2].mxu1  ;;  %v414_v22 = vld [vmem:[#allocation2 + $0x40] sm:$0xff] }
 0x133   : > { %v908_v29 = vpop.f32.mrb[3].mxu1 }
 0x134   : > { %v968_v30 = vadd.f32 %v906_v26, %v406_v23  ;;  %v909_v31 = vadd.f32 %v1486_v25, %v908_v29  ;;  %v415_v25 = vld [vmem:[#allocation2 + $0x48] sm:$0xff] }
 0x136   : > { %984 = vst [vmem:[#allocation2] sm:$0xff] %v968_v30  ;;  %v969_v32 = vadd.f32 %v909_v31, %v407_v28  ;;  %v1487_v33 = vpop.f32.mrb[4].mxu0 }
 0x137   : > { %v1488_v34 = vpop.f32.mrb[5].mxu0 }
 0x138   : > { %985 = vst [vmem:[#allocation2 + $0x8] sm:$0xff] %v969_v32  ;;  %v1489_v35 = vadd.f32 %v1488_v34, %v1487_v33  ;;  %v1490_v36 = vpop.f32.mrb[6].mxu0  ;;  %v1567_v37 = vpop.f32.mrb[4].mxu1  ;;  %v416_v33 = vld [vmem:[#allocation2 + $0x50] sm:$0xff] }
 0x139   : > { %v1491_v39 = vpop.f32.mrb[7].mxu0  ;;  %v921_v40 = vpop.f32.mrb[5].mxu1 }
 0x13a   : > { %v914_v41 = vadd.f32 %v1563_v21, %v1489_v35  ;;  %v1492_v42 = vadd.f32 %v1491_v39, %v1490_v36  ;;  %v1568_v43 = vpop.f32.mrb[6].mxu1 }
 0x13b   : > { %v924_v45 = vpop.f32.mrb[7].mxu1 }
 0x13c   : > { %v970_v46 = vadd.f32 %v914_v41, %v408_v38  ;;  %v917_v47 = vadd.f32 %v1564_v27, %v1492_v42 }
 0x13e   : > { %986 = vst [vmem:[#allocation2 + $0x10] sm:$0xff] %v970_v46  ;;  %v971_v48 = vadd.f32 %v917_v47, %v409_v44  ;;  %v1493_v49 = vpop.f32.mrb[8].mxu0  ;;  %v418_v46 = vld [vmem:[#allocation2 + $0x60] sm:$0xff] }
 0x13f   : > { %v1494_v50 = vpop.f32.mrb[9].mxu0 }
 0x140   : > { %987 = vst [vmem:[#allocation2 + $0x18] sm:$0xff] %v971_v48  ;;  %v1495_v51 = vadd.f32 %v1494_v50, %v1493_v49  ;;  %v1496_v52 = vpop.f32.mrb[10].mxu0  ;;  %v1571_v53 = vpop.f32.mrb[8].mxu1  ;;  %v419_v49 = vld [vmem:[#allocation2 + $0x68] sm:$0xff] }
 0x141   : > { %v1497_v54 = vpop.f32.mrb[11].mxu0  ;;  %v937_v56 = vpop.f32.mrb[9].mxu1 }
 0x142   : > { %v1498_v57 = vadd.f32 %v1497_v54, %v1496_v52  ;;  %v922_v58 = vadd.f32 %v1495_v51, %v921_v40  ;;  %v1572_v59 = vpop.f32.mrb[10].mxu1 }
 0x143   : > { %v940_v61 = vpop.f32.mrb[11].mxu1 }
 0x144   : > { %v972_v62 = vadd.f32 %v922_v58, %v410_v55  ;;  %v925_v63 = vadd.f32 %v1498_v57, %v924_v45  ;;  %v420_v57 = vld [vmem:[#allocation2 + $0x70] sm:$0xff] }
 0x146   : > { %988 = vst [vmem:[#allocation2 + $0x20] sm:$0xff] %v972_v62  ;;  %v973_v0 = vadd.f32 %v925_v63, %v411_v60  ;;  %v1499_v1 = vpop.f32.mrb[12].mxu0 }
 0x147   : > { %v1500_v2 = vpop.f32.mrb[13].mxu0 }
 0x148   : > { %989 = vst [vmem:[#allocation2 + $0x28] sm:$0xff] %v973_v0  ;;  %v1501_v3 = vadd.f32 %v1500_v2, %v1499_v1  ;;  %v1502_v4 = vpop.f32.mrb[14].mxu0  ;;  %v1575_v5 = vpop.f32.mrb[12].mxu1  ;;  %v1004_v1 = vld [vmem:[#allocation2] sm:$0xff] (!%p1378_p11)  ;;  %v1005_v2 = vld [vmem:[#allocation2 + $0x8] sm:$0xff] (!%p1378_p11) }
 0x149   : > { %v1503_v7 = vpop.f32.mrb[15].mxu0  ;;  %v953_v8 = vpop.f32.mrb[13].mxu1 }
 0x14a   : > { %v930_v9 = vadd.f32 %v1567_v37, %v1501_v3  ;;  %v1504_v10 = vadd.f32 %v1503_v7, %v1502_v4  ;;  %v1576_v11 = vpop.f32.mrb[14].mxu1  ;;  %v417_v37 = vld [vmem:[#allocation2 + $0x58] sm:$0xff]  ;;  %v1917_v3 = vld [vmem:[%s1997_s2] ss:$0 sm:$0xff] (!%p1378_p11)  ;;  %v1006_v7 = vld [vmem:[#allocation2 + $0x10] sm:$0xff] (!%p1378_p11) }
 0x14b   : > { %v956_v13 = vpop.f32.mrb[15].mxu1  ;;  %v1027_v4 = vmul.f32 (!%p1378_p11), %v1917_v3, %v1004_v1 }
 0x14c   : > { %v974_v14 = vadd.f32 %v930_v9, %v412_v6  ;;  %v933_v15 = vadd.f32 %v1568_v43, %v1504_v10  ;;  %v1924_v6 = vld [vmem:[%s1998_s3] ss:$0 sm:$0xff] (!%p1378_p11)  ;;  %v1029_v9 = vmul.f32 (!%p1378_p11), %v1917_v3, %v1006_v7 }
 0x14e   : > { %990 = vst [vmem:[#allocation2 + $0x30] sm:$0xff] %v974_v14  ;;  %v975_v16 = vadd.f32 %v933_v15, %v413_v12  ;;  %v1505_v17 = vpop.f32.mrb[16].mxu0  ;;  %v1050_v14 = vadd.f32 (!%p1378_p11), %v1924_v6, %v1027_v4 }
 0x14f   : > { %v1506_v18 = vpop.f32.mrb[17].mxu0  ;;  %v1009_v12 = vld [vmem:[#allocation2 + $0x28] sm:$0xff] (!%p1378_p11) }
 0x150   : > { %991 = vst [vmem:[#allocation2 + $0x38] sm:$0xff] %v975_v16  ;;  %v1507_v19 = vadd.f32 %v1506_v18, %v1505_v17  ;;  %v1508_v20 = vpop.f32.mrb[18].mxu0  ;;  %v1032_v17 = vmul.f32 (!%p1378_p11), %v1917_v3, %v1009_v12 }
 0x151   : > { %v1509_v21 = vpop.f32.mrb[19].mxu0 }
 0x152   : > { %v1510_v23 = vadd.f32 %v1509_v21, %v1508_v20  ;;  %v938_v24 = vadd.f32 %v1507_v19, %v937_v56  ;;  %v1052_v19 = vadd.f32 (!%p1378_p11), %v1924_v6, %v1029_v9 }
 0x154   : > { %v976_v26 = vadd.f32 %v938_v24, %v414_v22  ;;  %v941_v27 = vadd.f32 %v1510_v23, %v940_v61  ;;  %v421_v61 = vld [vmem:[#allocation2 + $0x78] sm:$0xff]  ;;  %v1066_v24 = vmax.f32 (!%p1378_p11), %v1050_v14, 0.0 }
 0x156   : > { %992 = vst [vmem:[#allocation2 + $0x40] sm:$0xff] %v976_v26  ;;  %v977_v28 = vadd.f32 %v941_v27, %v415_v25  ;;  %v1511_v29 = vpop.f32.mrb[20].mxu0  ;;  %v1055_v27 = vadd.f32 (!%p1378_p11), %v1924_v6, %v1032_v17 }
 0x157   : > { %v1512_v30 = vpop.f32.mrb[21].mxu0  ;;  %v1011_v18 = vld [vmem:[#allocation2 + $0x38] sm:$0xff] (!%p1378_p11) }
 0x158   : > { %993 = vst [vmem:[#allocation2 + $0x48] sm:$0xff] %v977_v28  ;;  %v1513_v31 = vadd.f32 %v1512_v30, %v1511_v29  ;;  %v1514_v32 = vpop.f32.mrb[22].mxu0  ;;  %v1034_v22 = vmul.f32 (!%p1378_p11), %v1917_v3, %v1011_v18  ;;  %v1068_v29 = vmax.f32 (!%p1378_p11), %v1052_v19, 0.0 }
 0x159   : > { %v1515_v34 = vpop.f32.mrb[23].mxu0 }
 0x15a   : > { %v946_v35 = vadd.f32 %v1571_v53, %v1513_v31  ;;  %v1516_v36 = vadd.f32 %v1515_v34, %v1514_v32  ;;  %v1057_v32 = vadd.f32 (!%p1378_p11), %v1924_v6, %v1034_v22 }
 0x15c   : > { %v978_v38 = vadd.f32 %v946_v35, %v416_v33  ;;  %v949_v39 = vadd.f32 %v1572_v59, %v1516_v36 }
 0x15d   : > { %v1012_v23 = vld [vmem:[#allocation2 + $0x40] sm:$0xff] (!%p1378_p11) }
 0x15e   : > { %994 = vst [vmem:[#allocation2 + $0x50] sm:$0xff] %v978_v38  ;;  %v979_v40 = vadd.f32 %v949_v39, %v417_v37  ;;  %v1517_v41 = vpop.f32.mrb[24].mxu0  ;;  %v1071_v37 = vmax.f32 (!%p1378_p11), %v1055_v27, 0.0  ;;  %v1035_v38 = vmul.f32 (!%p1378_p11), %v1917_v3, %v1012_v23 }
 0x15f   : > { %v1518_v42 = vpop.f32.mrb[25].mxu0  ;;  %v1013_v28 = vld [vmem:[#allocation2 + $0x48] sm:$0xff] (!%p1378_p11) }
 0x160   : > { %995 = vst [vmem:[#allocation2 + $0x58] sm:$0xff] %v979_v40  ;;  %v1519_v43 = vadd.f32 %v1518_v42, %v1517_v41  ;;  %v1520_v44 = vpop.f32.mrb[26].mxu0 }
 0x161   : > { %v1521_v45 = vpop.f32.mrb[27].mxu0 }
 0x162   : > { %v1522_v47 = vadd.f32 %v1521_v45, %v1520_v44  ;;  %v954_v48 = vadd.f32 %v1519_v43, %v953_v8  ;;  %v1007_v8 = vld [vmem:[#allocation2 + $0x18] sm:$0xff] (!%p1378_p11)  ;;  %v1073_v43 = vmax.f32 (!%p1378_p11), %v1057_v32, 0.0  ;;  %v1036_v44 = vmul.f32 (!%p1378_p11), %v1917_v3, %v1013_v28 }
 0x163   : > { %v1030_v10 = vmul.f32 (!%p1378_p11), %v1917_v3, %v1007_v8 }
 0x164   : > { %v980_v50 = vadd.f32 %v954_v48, %v418_v46  ;;  %v957_v51 = vadd.f32 %v1522_v47, %v956_v13  ;;  %v1010_v13 = vld [vmem:[#allocation2 + $0x30] sm:$0xff] (!%p1378_p11)  ;;  %v1058_v47 = vadd.f32 (!%p1378_p11), %v1924_v6, %v1035_v38 }
 0x165   : > { %v1053_v20 = vadd.f32 (!%p1378_p11), %v1924_v6, %v1030_v10  ;;  %v1033_v21 = vmul.f32 (!%p1378_p11), %v1917_v3, %v1010_v13  ;;  %v1014_v33 = vld [vmem:[#allocation2 + $0x50] sm:$0xff] (!%p1378_p11) }
 0x166   : > { %996 = vst [vmem:[#allocation2 + $0x60] sm:$0xff] %v980_v50  ;;  %v981_v52 = vadd.f32 %v957_v51, %v419_v49  ;;  %v1523_v53 = vpop.f32.mrb[28].mxu0  ;;  %v1037_v48 = vmul.f32 (!%p1378_p11), %v1917_v3, %v1014_v33 }
 0x167   : > { %v1524_v54 = vpop.f32.mrb[29].mxu0  ;;  %v1069_v30 = vmax.f32 (!%p1378_p11), %v1053_v20, 0.0  ;;  %v1056_v31 = vadd.f32 (!%p1378_p11), %v1924_v6, %v1033_v21  ;;  %v1015_v34 = vld [vmem:[#allocation2 + $0x58] sm:$0xff] (!%p1378_p11) }
 0x168   : > { %997 = vst [vmem:[#allocation2 + $0x68] sm:$0xff] %v981_v52  ;;  %v1525_v55 = vadd.f32 %v1524_v54, %v1523_v53  ;;  %v1526_v56 = vpop.f32.mrb[30].mxu0  ;;  %v1038_v49 = vmul.f32 (!%p1378_p11), %v1917_v3, %v1015_v34  ;;  %v1059_v52 = vadd.f32 (!%p1378_p11), %v1924_v6, %v1036_v44 }
 0x169   : > { %v1527_v58 = vpop.f32.mrb[31].mxu0  ;;  %v1426_v41 = vpack.c.bf16 (!%p1378_p11), %v1069_v30, %v1068_v29  ;;  %v1072_v42 = vmax.f32 (!%p1378_p11), %v1056_v31, 0.0 }
 0x16a   : > { %v962_v59 = vadd.f32 %v1575_v5, %v1525_v55  ;;  %v1528_v60 = vadd.f32 %v1527_v58, %v1526_v56  ;;  %1003 = sbr.rel (%p1378_p11) target bundleno = 385 (0x181), region = 70  ;;  %v1028_v5 = vmul.f32 (!%p1378_p11), %v1917_v3, %v1005_v2  ;;  %v1074_v55 = vmax.f32 (!%p1378_p11), %v1058_v47, 0.0 }
 0x16b   : > { %1458 = vst [vmem:[%s1999_s4 + $0x8] sm:$0xff] (!%p1378_p11), %v1426_v41   ;;  %v1436_v51 = vpack.c.bf16 (!%p1378_p11), %v1073_v43, %v1072_v42  ;;  %v1060_v56 = vadd.f32 (!%p1378_p11), %v1924_v6, %v1037_v48 }
 0x16c   : > { %v982_v62 = vadd.f32 %v962_v59, %v420_v57  ;;  %v965_v63 = vadd.f32 %v1576_v11, %v1528_v60  ;;  %v1008_v11 = vld [vmem:[#allocation2 + $0x20] sm:$0xff] (!%p1378_p11)  ;;  %v1051_v15 = vadd.f32 (!%p1378_p11), %v1924_v6, %v1028_v5  ;;  %v1061_v57 = vadd.f32 (!%p1378_p11), %v1924_v6, %v1038_v49 }
 0x16d   : > { %v1031_v16 = vmul.f32 (!%p1378_p11), %v1917_v3, %v1008_v11  ;;  %v1016_v39 = vld [vmem:[#allocation2 + $0x60] sm:$0xff] (!%p1378_p11)  ;;  %1460 = vst [vmem:[%s1999_s4 + $0x18] sm:$0xff] (!%p1378_p11), %v1436_v51   ;;  %v1075_v59 = vmax.f32 (!%p1378_p11), %v1059_v52, 0.0 }
 0x16e   : > { %998 = vst [vmem:[#allocation2 + $0x70] sm:$0xff] %v982_v62  ;;  %v983_v0 = vadd.f32 %v965_v63, %v421_v61  ;;  %v1067_v25 = vmax.f32 (!%p1378_p11), %v1051_v15, 0.0  ;;  %v1039_v53 = vmul.f32 (!%p1378_p11), %v1917_v3, %v1016_v39  ;;  %v1076_v63 = vmax.f32 (!%p1378_p11), %v1060_v56, 0.0 }
 0x16f   : > { %v1054_v26 = vadd.f32 (!%p1378_p11), %v1924_v6, %v1031_v16  ;;  %v1017_v40 = vld [vmem:[#allocation2 + $0x68] sm:$0xff] (!%p1378_p11)  ;;  %v1441_v2 = vpack.c.bf16 (!%p1378_p11), %v1075_v59, %v1074_v55 }
 0x170   : > { %999 = vst [vmem:[#allocation2 + $0x78] sm:$0xff] %v983_v0  ;;  %v1421_v35 = vpack.c.bf16 (!%p1378_p11), %v1067_v25, %v1066_v24  ;;  %v1040_v54 = vmul.f32 (!%p1378_p11), %v1917_v3, %v1017_v40  ;;  %v1062_v60 = vadd.f32 (!%p1378_p11), %v1924_v6, %v1039_v53  ;;  %v1077_v0 = vmax.f32 (!%p1378_p11), %v1061_v57, 0.0 }
 0x171   : > { %v1070_v36 = vmax.f32 %v1054_v26, 0.0  ;;  %1461 = vst [vmem:[%s1999_s4 + $0x20] sm:$0xff] %v1441_v2  }
 0x172   : > { %1422 = vst [vmem:[%s1999_s4] sm:$0xff] %v1421_v35   ;;  %v1063_v61 = vadd.f32 %v1924_v6, %v1040_v54  ;;  %v1078_v4 = vmax.f32 %v1062_v60, 0.0  ;;  %v1446_v8 = vpack.c.bf16 %v1077_v0, %v1076_v63 }
 0x173   : > { %v1431_v46 = vpack.c.bf16 %v1071_v37, %v1070_v36 }
 0x174   : > { %v1079_v5 = vmax.f32 %v1063_v61, 0.0  ;;  %1462 = vst [vmem:[%s1999_s4 + $0x28] sm:$0xff] %v1446_v8  }
 0x175   : > { %v1018_v45 = vld [vmem:[#allocation2 + $0x70] sm:$0xff]  ;;  %1459 = vst [vmem:[%s1999_s4 + $0x10] sm:$0xff] %v1431_v46  }
 0x176   : > { %v1041_v58 = vmul.f32 %v1917_v3, %v1018_v45  ;;  %v1451_v10 = vpack.c.bf16 %v1079_v5, %v1078_v4 }
 0x177   : > { %v1019_v50 = vld [vmem:[#allocation2 + $0x78] sm:$0xff] }
 0x178   : > { %v1042_v62 = vmul.f32 %v1917_v3, %v1019_v50  ;;  %v1064_v1 = vadd.f32 %v1924_v6, %v1041_v58  ;;  %1463 = vst [vmem:[%s1999_s4 + $0x30] sm:$0xff] %v1451_v10  }
 0x17a   : > { %v1065_v7 = vadd.f32 %v1924_v6, %v1042_v62  ;;  %v1080_v9 = vmax.f32 %v1064_v1, 0.0 }
 0x17c   : > { %v1081_v11 = vmax.f32 %v1065_v7, 0.0 }
 0x17e   : > { %v1456_v3 = vpack.c.bf16 %v1081_v11, %v1080_v9 }
 0x180   : > { %1464 = vst [vmem:[%s1999_s4 + $0x38] sm:$0xff] %v1456_v3  }
 0x181 PF: > { %s14_s19 = sadd.s32 1, %s1714_s19   ;;  %s2000_s15 = smov %s1702_s16 }
 0x182   : > { %p11_p12 = scmp.ge.s32.totalorder %s14_s19, 5   ;;  %s2001_s16 = smov %s1777_s23 }
 0x183   : > { %s2002_s17 = smov %s1710_s18  ;;  %s2003_s18 = smov %s2005_s20 }
 0x184   :  { %13 = sbr.rel (!%p11_p12) target bundleno = 3 (0x3), region = 120 }

// kernel: bcnn_forward.18
= control target key start
LH: loop header
LB: loop body
LE: loop exit
PB: predicated region body
PF: predicated region fallthrough
CT: control target
= control target key end

     0   :  { %s1934_s1 = inlined_call_operand.vmem [shape: bf16[640,128], index: 1, kind: input, shape index: {}]   ;;  %s1935_s0 = inlined_call_operand.vmem [shape: bf16[128,640], index: 0, kind: input, shape index: {}]   ;;  %s1936_s2 = inlined_call_operand.vmem [shape: f32[1,128], index: 2, kind: input, shape index: {}]   ;;  %s1937_s3 = inlined_call_operand.vmem [shape: f32[1,128], index: 3, kind: input, shape index: {}]   ;;  %s1938_s4 = inlined_call_operand.vmem [shape: bf16[128,128], index: 4, kind: output, shape index: {}]  }
   0x1   :  { %v1471_v0 = vld [vmem:[%s1934_s1 + $0x40] sm:$0xff]   ;;  %v1475_v4 = vld [vmem:[%s1934_s1 + $0x48] sm:$0xff]   ;;  %v1479_v8 = vld [vmem:[%s1934_s1 + $0x50] sm:$0xff]  }
   0x2   :  { %v1472_v1 = vld [vmem:[%s1934_s1 + $0xc0] sm:$0xff]   ;;  %1279 = vmatprep.subr.bf16.mxu0 %v1471_v0  ;;  %v1476_v5 = vld [vmem:[%s1934_s1 + $0xc8] sm:$0xff]   ;;  %v1480_v9 = vld [vmem:[%s1934_s1 + $0xd0] sm:$0xff]  }
   0x3   :  { %v1473_v2 = vld [vmem:[%s1934_s1] sm:$0xff]   ;;  %1343 = vmatprep.subr.bf16.mxu1 %v1472_v1  ;;  %v1477_v6 = vld [vmem:[%s1934_s1 + $0x8] sm:$0xff]   ;;  %v1481_v10 = vld [vmem:[%s1934_s1 + $0x10] sm:$0xff]  }
   0x4   :  { %v1474_v3 = vld [vmem:[%s1934_s1 + $0x80] sm:$0xff]   ;;  %1280 = vmatpush3.bf16.msra.mxu0 %v1473_v2  ;;  %v1478_v7 = vld [vmem:[%s1934_s1 + $0x88] sm:$0xff]   ;;  %v1482_v11 = vld [vmem:[%s1934_s1 + $0x90] sm:$0xff]  }
   0x5   :  { %1344 = vmatpush3.bf16.msra.mxu1 %v1474_v3  ;;  %1281 = vmatprep.subr.bf16.mxu0 %v1475_v4  ;;  %v1483_v12 = vld [vmem:[%s1934_s1 + $0x58] sm:$0xff]   ;;  %v1487_v16 = vld [vmem:[%s1934_s1 + $0x60] sm:$0xff]   ;;  %v1491_v20 = vld [vmem:[%s1934_s1 + $0x68] sm:$0xff]  }
   0x6   :  { %1345 = vmatprep.subr.bf16.mxu1 %v1476_v5  ;;  %v1484_v13 = vld [vmem:[%s1934_s1 + $0xd8] sm:$0xff]   ;;  %v1488_v17 = vld [vmem:[%s1934_s1 + $0xe0] sm:$0xff]   ;;  %v1492_v21 = vld [vmem:[%s1934_s1 + $0xe8] sm:$0xff]  }
   0x7   :  { %v1485_v14 = vld [vmem:[%s1934_s1 + $0x18] sm:$0xff]   ;;  %v1489_v18 = vld [vmem:[%s1934_s1 + $0x20] sm:$0xff]   ;;  %v1493_v22 = vld [vmem:[%s1934_s1 + $0x28] sm:$0xff]  }
   0x8   :  { %1282 = vmatpush3.bf16.msra.mxu0 %v1477_v6  ;;  %v1486_v15 = vld [vmem:[%s1934_s1 + $0x98] sm:$0xff]   ;;  %v1490_v19 = vld [vmem:[%s1934_s1 + $0xa0] sm:$0xff]   ;;  %v1494_v23 = vld [vmem:[%s1934_s1 + $0xa8] sm:$0xff]  }
   0x9   :  { %1346 = vmatpush3.bf16.msra.mxu1 %v1478_v7  ;;  %1283 = vmatprep.subr.bf16.mxu0 %v1479_v8  ;;  %v1495_v24 = vld [vmem:[%s1934_s1 + $0x70] sm:$0xff]   ;;  %v1499_v28 = vld [vmem:[%s1934_s1 + $0x78] sm:$0xff]   ;;  %v1508_v35 = vld [vmem:[%s1935_s0 + $0xc] ss:$20 sps:$4 sm:$0xff]  }
   0xa   :  { %1347 = vmatprep.subr.bf16.mxu1 %v1480_v9  ;;  %v1496_v25 = vld [vmem:[%s1934_s1 + $0xf0] sm:$0xff]   ;;  %v1500_v29 = vld [vmem:[%s1934_s1 + $0xf8] sm:$0xff]   ;;  %v1509_v36 = vld [vmem:[%s1934_s1 + $0x100] sm:$0xff]   ;;  %759 = vmatprep.mubr.bf16.mxu1 %v1508_v35 }
   0xb   :  { %v1497_v26 = vld [vmem:[%s1934_s1 + $0x30] sm:$0xff]   ;;  %v1501_v30 = vld [vmem:[%s1934_s1 + $0x38] sm:$0xff]   ;;  %v1510_v37 = vld [vmem:[%s1935_s0 + $0x2c] ss:$20 sps:$4 sm:$0xff]  }
   0xc   :  { %1284 = vmatpush3.bf16.msra.mxu0 %v1481_v10  ;;  %v1498_v27 = vld [vmem:[%s1934_s1 + $0xb0] sm:$0xff]   ;;  %v1502_v31 = vld [vmem:[%s1934_s1 + $0xb8] sm:$0xff]   ;;  %v1516_v39 = vld [vmem:[%s1934_s1 + $0x108] sm:$0xff]  }
   0xd   :  { %1348 = vmatpush3.bf16.msra.mxu1 %v1482_v11  ;;  %1285 = vmatprep.subr.bf16.mxu0 %v1483_v12  ;;  %v1503_v32 = vld [vmem:[%s1935_s0] ss:$20 sps:$4 sm:$0xff]   ;;  %v1505_v33 = vld [vmem:[%s1935_s0 + $0x4] ss:$20 sps:$4 sm:$0xff]   ;;  %v1506_v34 = vld [vmem:[%s1935_s0 + $0x8] ss:$20 sps:$4 sm:$0xff]  }
   0xe   :  { %1349 = vmatprep.subr.bf16.mxu1 %v1484_v13  ;;  %662 = vmatprep.mubr.bf16.mxu0 %v1505_v33  ;;  %v1512_v38 = vld [vmem:[%s1935_s0 + $0x34] ss:$20 sps:$4 sm:$0xff]   ;;  %v1515_v41 = vld [vmem:[%s1935_s0 + $0x30] ss:$20 sps:$4 sm:$0xff]   ;;  %v1530_v45 = vld [vmem:[%s1934_s1 + $0x118] sm:$0xff]  }
   0xf   :  { %v1514_v40 = vld [vmem:[%s1935_s0 + $0x28] ss:$20 sps:$4 sm:$0xff]   ;;  %v1523_v44 = vld [vmem:[%s1934_s1 + $0x110] sm:$0xff]   ;;  %v1522_v47 = vld [vmem:[%s1935_s0 + $0x58] ss:$20 sps:$4 sm:$0xff]  }
  0x10   :  { %1286 = vmatpush3.bf16.msra.mxu0 %v1485_v14  ;;  %v1517_v42 = vld [vmem:[%s1935_s0 + $0x54] ss:$20 sps:$4 sm:$0xff]   ;;  %v1519_v43 = vld [vmem:[%s1935_s0 + $0x5c] ss:$20 sps:$4 sm:$0xff]   ;;  %v1526_v49 = vld [vmem:[%s1935_s0 + $0x84] ss:$20 sps:$4 sm:$0xff]  }
  0x11   :  { %1350 = vmatpush3.bf16.msra.mxu1 %v1486_v15  ;;  %1287 = vmatprep.subr.bf16.mxu0 %v1487_v16  ;;  %v1521_v46 = vld [vmem:[%s1935_s0 + $0x50] ss:$20 sps:$4 sm:$0xff]   ;;  %v1544_v51 = vld [vmem:[%s1934_s1 + $0x128] sm:$0xff]   ;;  %v1529_v53 = vld [vmem:[%s1935_s0 + $0x80] ss:$20 sps:$4 sm:$0xff]  }
  0x12   :  { %1351 = vmatprep.subr.bf16.mxu1 %v1488_v17  ;;  %v1524_v48 = vld [vmem:[%s1935_s0 + $0x7c] ss:$20 sps:$4 sm:$0xff]   ;;  %v1537_v50 = vld [vmem:[%s1934_s1 + $0x120] sm:$0xff]   ;;  %v1528_v52 = vld [vmem:[%s1935_s0 + $0x78] ss:$20 sps:$4 sm:$0xff]  }
  0x13   :  { %v1531_v54 = vld [vmem:[%s1935_s0 + $0xa4] ss:$20 sps:$4 sm:$0xff]   ;;  %v1551_v55 = vld [vmem:[%s1934_s1 + $0x130] sm:$0xff]   ;;  %v1533_v56 = vld [vmem:[%s1935_s0 + $0xac] ss:$20 sps:$4 sm:$0xff]  }
  0x14   :  { %1288 = vmatpush3.bf16.msra.mxu0 %v1489_v18  ;;  %v1558_v57 = vld [vmem:[%s1934_s1 + $0x138] sm:$0xff]   ;;  %v1535_v58 = vld [vmem:[%s1935_s0 + $0xa0] ss:$20 sps:$4 sm:$0xff]   ;;  %v1543_v63 = vld [vmem:[%s1935_s0 + $0xd0] ss:$20 sps:$4 sm:$0xff]  }
  0x15   :  { %1352 = vmatpush3.bf16.msra.mxu1 %v1490_v19  ;;  %1289 = vmatprep.subr.bf16.mxu0 %v1491_v20  ;;  %v1536_v59 = vld [vmem:[%s1935_s0 + $0xa8] ss:$20 sps:$4 sm:$0xff]   ;;  %v1538_v60 = vld [vmem:[%s1935_s0 + $0xcc] ss:$20 sps:$4 sm:$0xff]   ;;  %v1549_v2 = vld [vmem:[%s1935_s0 + $0xf0] ss:$20 sps:$4 sm:$0xff]  }
  0x16   :  { %1353 = vmatprep.subr.bf16.mxu1 %v1492_v21  ;;  %v1540_v61 = vld [vmem:[%s1935_s0 + $0xd4] ss:$20 sps:$4 sm:$0xff]   ;;  %v1547_v1 = vld [vmem:[%s1935_s0 + $0xfc] ss:$20 sps:$4 sm:$0xff]   ;;  %v1550_v3 = vld [vmem:[%s1935_s0 + $0xf8] ss:$20 sps:$4 sm:$0xff]  }
  0x17   :  { %v1542_v62 = vld [vmem:[%s1935_s0 + $0xc8] ss:$20 sps:$4 sm:$0xff]   ;;  %v1554_v5 = vld [vmem:[%s1935_s0 + $0x124] ss:$20 sps:$4 sm:$0xff]   ;;  %v1557_v7 = vld [vmem:[%s1935_s0 + $0x120] ss:$20 sps:$4 sm:$0xff]  }
  0x18   :  { %1290 = vmatpush3.bf16.msra.mxu0 %v1493_v22  ;;  %v1545_v0 = vld [vmem:[%s1935_s0 + $0xf4] ss:$20 sps:$4 sm:$0xff]   ;;  %v1552_v4 = vld [vmem:[%s1935_s0 + $0x11c] ss:$20 sps:$4 sm:$0xff]   ;;  %v1556_v6 = vld [vmem:[%s1935_s0 + $0x118] ss:$20 sps:$4 sm:$0xff]  }
  0x19   :  { %1354 = vmatpush3.bf16.msra.mxu1 %v1494_v23  ;;  %1291 = vmatprep.subr.bf16.mxu0 %v1495_v24  ;;  %v1559_v8 = vld [vmem:[%s1935_s0 + $0x10] ss:$20 sps:$4 sm:$0xff]   ;;  %v1561_v10 = vld [vmem:[%s1935_s0 + $0x38] ss:$20 sps:$4 sm:$0xff]   ;;  %v1563_v12 = vld [vmem:[%s1935_s0 + $0x60] ss:$20 sps:$4 sm:$0xff]  }
  0x1a   :  { %1355 = vmatprep.subr.bf16.mxu1 %v1496_v25  ;;  %v1560_v9 = vld [vmem:[%s1935_s0 + $0xb0] ss:$20 sps:$4 sm:$0xff]   ;;  %v1562_v11 = vld [vmem:[%s1935_s0 + $0xd8] ss:$20 sps:$4 sm:$0xff]   ;;  %v1564_v13 = vld [vmem:[%s1935_s0 + $0x100] ss:$20 sps:$4 sm:$0xff]  }
  0x1b   :  { %v1565_v14 = vld [vmem:[%s1935_s0 + $0x88] ss:$20 sps:$4 sm:$0xff]  }
  0x1c   :  { %1292 = vmatpush3.bf16.msra.mxu0 %v1497_v26  ;;  %v1566_v15 = vld [vmem:[%s1935_s0 + $0x128] ss:$20 sps:$4 sm:$0xff]  }
  0x1d   :  { %1356 = vmatpush3.bf16.msra.mxu1 %v1498_v27  ;;  %1293 = vmatprep.subr.bf16.mxu0 %v1499_v28 }
  0x1e   :  { %1357 = vmatprep.subr.bf16.mxu1 %v1500_v29 }
  0x20   :  { %1294 = vmatpush3.bf16.msra.mxu0 %v1501_v30 }
  0x21   :  { %1358 = vmatpush3.bf16.msra.mxu1 %v1502_v31  ;;  %1423 = vmatprep.subr.bf16.mxu0 %v1509_v36 }
  0x22   :  { %1455 = vmatprep.subr.bf16.mxu1 %v1509_v36 }
  0x23   :  { %663 = vmatmul.mubr.bf16.vlgmr.msra.gmra.mrb[0].mxu0 %v1503_v32 }
  0x24   :  { %760 = vmatmul.mubr.bf16.vlgmr.msra.gmra.mrb[0].mxu1 %v1506_v34  ;;  %1424 = vmatpush3.bf16.msra.mxu0 %v1509_v36 }
  0x25   :  { %1463 = vmatpush3.bf16.msra.mxu1 %v1509_v36  ;;  %670 = vmatprep.mubr.bf16.mxu0 %v1510_v37 }
  0x26   :  { %767 = vmatprep.mubr.bf16.mxu1 %v1512_v38  ;;  %1425 = vmatprep.subr.bf16.mxu0 %v1516_v39 }
  0x27   :  { %1456 = vmatprep.subr.bf16.mxu1 %v1516_v39 }
  0x28   :  { %1426 = vmatpush3.bf16.msra.mxu0 %v1516_v39 }
  0x29   :  { %1464 = vmatpush3.bf16.msra.mxu1 %v1516_v39  ;;  %1427 = vmatprep.subr.bf16.mxu0 %v1523_v44 }
  0x2a   :  { %1457 = vmatprep.subr.bf16.mxu1 %v1523_v44 }
  0x2b   :  { %671 = vmatmul.mubr.bf16.gmra.mrb[4].mxu0 %v1514_v40 }
  0x2c   :  { %768 = vmatmul.mubr.bf16.gmra.mrb[4].mxu1 %v1515_v41  ;;  %678 = vmatprep.mubr.bf16.mxu0 %v1517_v42 }
  0x2d   :  { %775 = vmatprep.mubr.bf16.mxu1 %v1519_v43  ;;  %1428 = vmatpush3.bf16.msra.mxu0 %v1523_v44 }
  0x2e   :  { %1465 = vmatpush3.bf16.msra.mxu1 %v1523_v44  ;;  %1429 = vmatprep.subr.bf16.mxu0 %v1530_v45 }
  0x2f   :  { %1458 = vmatprep.subr.bf16.mxu1 %v1530_v45 }
  0x31   :  { %1430 = vmatpush3.bf16.msra.mxu0 %v1530_v45 }
  0x32   :  { %1466 = vmatpush3.bf16.msra.mxu1 %v1530_v45  ;;  %1431 = vmatprep.subr.bf16.mxu0 %v1537_v50 }
  0x33   :  { %679 = vmatmul.mubr.bf16.gmra.mrb[8].mxu0 %v1521_v46  ;;  %1459 = vmatprep.subr.bf16.mxu1 %v1537_v50 }
  0x34   :  { %776 = vmatmul.mubr.bf16.gmra.mrb[8].mxu1 %v1522_v47  ;;  %686 = vmatprep.mubr.bf16.mxu0 %v1524_v48 }
  0x35   :  { %783 = vmatprep.mubr.bf16.mxu1 %v1526_v49  ;;  %1432 = vmatpush3.bf16.msra.mxu0 %v1537_v50 }
  0x36   :  { %1467 = vmatpush3.bf16.msra.mxu1 %v1537_v50  ;;  %1433 = vmatprep.subr.bf16.mxu0 %v1544_v51 }
  0x37   :  { %1460 = vmatprep.subr.bf16.mxu1 %v1544_v51 }
  0x39   :  { %1434 = vmatpush3.bf16.msra.mxu0 %v1544_v51 }
  0x3a   :  { %1468 = vmatpush3.bf16.msra.mxu1 %v1544_v51  ;;  %1435 = vmatprep.subr.bf16.mxu0 %v1551_v55 }
  0x3b   :  { %687 = vmatmul.mubr.bf16.gmra.mrb[12].mxu0 %v1528_v52  ;;  %1461 = vmatprep.subr.bf16.mxu1 %v1551_v55 }
  0x3c   :  { %784 = vmatmul.mubr.bf16.gmra.mrb[12].mxu1 %v1529_v53  ;;  %694 = vmatprep.mubr.bf16.mxu0 %v1531_v54 }
  0x3d   :  { %791 = vmatprep.mubr.bf16.mxu1 %v1533_v56  ;;  %1436 = vmatpush3.bf16.msra.mxu0 %v1551_v55 }
  0x3e   :  { %1469 = vmatpush3.bf16.msra.mxu1 %v1551_v55  ;;  %1437 = vmatprep.subr.bf16.mxu0 %v1558_v57 }
  0x3f   :  { %1462 = vmatprep.subr.bf16.mxu1 %v1558_v57 }
  0x41   :  { %1438 = vmatpush3.bf16.msra.mxu0 %v1558_v57 }
  0x42   :  { %1470 = vmatpush3.bf16.msra.mxu1 %v1558_v57 }
  0x43   :  { %695 = vmatmul.mubr.bf16.gmra.mrb[16].mxu0 %v1535_v58 }
  0x44   :  { %792 = vmatmul.mubr.bf16.gmra.mrb[16].mxu1 %v1536_v59  ;;  %702 = vmatprep.mubr.bf16.mxu0 %v1538_v60 }
  0x45   :  { %799 = vmatprep.mubr.bf16.mxu1 %v1540_v61 }
  0x4b   :  { %703 = vmatmul.mubr.bf16.gmra.mrb[20].mxu0 %v1542_v62 }
  0x4c   :  { %800 = vmatmul.mubr.bf16.gmra.mrb[20].mxu1 %v1543_v63  ;;  %710 = vmatprep.mubr.bf16.mxu0 %v1545_v0 }
  0x4d   :  { %807 = vmatprep.mubr.bf16.mxu1 %v1547_v1 }
  0x53   :  { %711 = vmatmul.mubr.bf16.gmra.mrb[24].mxu0 %v1549_v2 }
  0x54   :  { %808 = vmatmul.mubr.bf16.gmra.mrb[24].mxu1 %v1550_v3  ;;  %718 = vmatprep.mubr.bf16.mxu0 %v1552_v4 }
  0x55   :  { %815 = vmatprep.mubr.bf16.mxu1 %v1554_v5 }
  0x5b   :  { %719 = vmatmul.mubr.bf16.gmra.mrb[28].mxu0 %v1556_v6 }
  0x5c   :  { %816 = vmatmul.mubr.bf16.gmra.mrb[28].mxu1 %v1557_v7  ;;  %1439 = vmatprep.mubr.bf16.mxu0 %v1559_v8 }
  0x5d   :  { %1447 = vmatprep.mubr.bf16.mxu1 %v1560_v9 }
  0x63   :  { %1440 = vmatmul.mubr.bf16.vlgmr.msra.gmra.mrb[32].mxu0 %v1561_v10 }
  0x64   :  { %1448 = vmatmul.mubr.bf16.vlgmr.msra.gmra.mrb[32].mxu1 %v1562_v11  ;;  %1443 = vmatprep.mubr.bf16.mxu0 %v1563_v12 }
  0x65   :  { %1451 = vmatprep.mubr.bf16.mxu1 %v1564_v13 }
  0x6b   :  { %1444 = vmatmul.mubr.bf16.gmra.mrb[36].mxu0 %v1565_v14 }
  0x6c   :  { %1452 = vmatmul.mubr.bf16.gmra.mrb[36].mxu1 %v1566_v15 }
  0xf6   :  { %v1295_v16 = vpop.f32.mrb[0].mxu0 }
  0xf7   :  { %v1359_v17 = vpop.f32.mrb[0].mxu1  ;;  %v1296_v18 = vpop.f32.mrb[1].mxu0 }
  0xf8   :  { %v1297_v19 = vadd.f32 %v1296_v18, %v1295_v16  ;;  %v1360_v20 = vpop.f32.mrb[1].mxu1  ;;  %v1298_v21 = vpop.f32.mrb[2].mxu0 }
  0xf9   :  { %v1361_v22 = vadd.f32 %v1360_v20, %v1359_v17  ;;  %v1362_v23 = vpop.f32.mrb[2].mxu1  ;;  %v1299_v24 = vpop.f32.mrb[3].mxu0 }
  0xfa   :  { %v1300_v25 = vadd.f32 %v1299_v24, %v1298_v21  ;;  %v1363_v26 = vpop.f32.mrb[3].mxu1 }
  0xfb   :  { %v1364_v27 = vadd.f32 %v1363_v26, %v1362_v23  ;;  %v1832_v28 = vadd.f32 %v1361_v22, %v1297_v19 }
  0xfd   :  { %v1834_v29 = vadd.f32 %v1364_v27, %v1300_v25 }
  0xfe   :  { %v1301_v30 = vpop.f32.mrb[4].mxu0 }
  0xff   :  { %v1365_v31 = vpop.f32.mrb[4].mxu1  ;;  %v1302_v32 = vpop.f32.mrb[5].mxu0 }
 0x100   :  { %v1303_v33 = vadd.f32 %v1302_v32, %v1301_v30  ;;  %v1366_v34 = vpop.f32.mrb[5].mxu1  ;;  %v1304_v35 = vpop.f32.mrb[6].mxu0 }
 0x101   :  { %v1367_v36 = vadd.f32 %v1366_v34, %v1365_v31  ;;  %v1368_v37 = vpop.f32.mrb[6].mxu1  ;;  %v1305_v38 = vpop.f32.mrb[7].mxu0 }
 0x102   :  { %v1306_v39 = vadd.f32 %v1305_v38, %v1304_v35  ;;  %v1369_v40 = vpop.f32.mrb[7].mxu1 }
 0x103   :  { %v1370_v41 = vadd.f32 %v1369_v40, %v1368_v37  ;;  %v1836_v42 = vadd.f32 %v1367_v36, %v1303_v33 }
 0x105   :  { %v1838_v43 = vadd.f32 %v1370_v41, %v1306_v39 }
 0x106   :  { %v1307_v44 = vpop.f32.mrb[8].mxu0 }
 0x107   :  { %v1371_v45 = vpop.f32.mrb[8].mxu1  ;;  %v1308_v46 = vpop.f32.mrb[9].mxu0 }
 0x108   :  { %v1309_v47 = vadd.f32 %v1308_v46, %v1307_v44  ;;  %v1372_v48 = vpop.f32.mrb[9].mxu1  ;;  %v1310_v49 = vpop.f32.mrb[10].mxu0 }
 0x109   :  { %v1373_v50 = vadd.f32 %v1372_v48, %v1371_v45  ;;  %v1374_v51 = vpop.f32.mrb[10].mxu1  ;;  %v1311_v52 = vpop.f32.mrb[11].mxu0 }
 0x10a   :  { %v1312_v53 = vadd.f32 %v1311_v52, %v1310_v49  ;;  %v1375_v54 = vpop.f32.mrb[11].mxu1 }
 0x10b   :  { %v1376_v55 = vadd.f32 %v1375_v54, %v1374_v51  ;;  %v1840_v56 = vadd.f32 %v1373_v50, %v1309_v47 }
 0x10d   :  { %v1842_v57 = vadd.f32 %v1376_v55, %v1312_v53 }
 0x10e   :  { %v1313_v58 = vpop.f32.mrb[12].mxu0 }
 0x10f   :  { %v1377_v59 = vpop.f32.mrb[12].mxu1  ;;  %v1314_v60 = vpop.f32.mrb[13].mxu0 }
 0x110   :  { %v1315_v61 = vadd.f32 %v1314_v60, %v1313_v58  ;;  %v1378_v62 = vpop.f32.mrb[13].mxu1  ;;  %v1316_v63 = vpop.f32.mrb[14].mxu0 }
 0x111   :  { %v1379_v0 = vadd.f32 %v1378_v62, %v1377_v59  ;;  %v1380_v1 = vpop.f32.mrb[14].mxu1  ;;  %v1317_v2 = vpop.f32.mrb[15].mxu0 }
 0x112   :  { %v1318_v3 = vadd.f32 %v1317_v2, %v1316_v63  ;;  %v1381_v4 = vpop.f32.mrb[15].mxu1 }
 0x113   :  { %v1382_v5 = vadd.f32 %v1381_v4, %v1380_v1  ;;  %v1844_v6 = vadd.f32 %v1379_v0, %v1315_v61 }
 0x115   :  { %v1846_v7 = vadd.f32 %v1382_v5, %v1318_v3 }
 0x116   :  { %v1319_v8 = vpop.f32.mrb[16].mxu0 }
 0x117   :  { %v1383_v9 = vpop.f32.mrb[16].mxu1  ;;  %v1320_v10 = vpop.f32.mrb[17].mxu0 }
 0x118   :  { %v1321_v11 = vadd.f32 %v1320_v10, %v1319_v8  ;;  %v1384_v12 = vpop.f32.mrb[17].mxu1  ;;  %v1322_v13 = vpop.f32.mrb[18].mxu0 }
 0x119   :  { %v1385_v14 = vadd.f32 %v1384_v12, %v1383_v9  ;;  %v1386_v15 = vpop.f32.mrb[18].mxu1  ;;  %v1323_v16 = vpop.f32.mrb[19].mxu0  ;;  %v1859_v9 = vld [vmem:[%s1936_s2] ss:$0 sm:$0xff] }
 0x11a   :  { %v1324_v17 = vadd.f32 %v1323_v16, %v1322_v13  ;;  %v1387_v18 = vpop.f32.mrb[19].mxu1  ;;  %v1865_v13 = vld [vmem:[%s1937_s3] ss:$0 sm:$0xff] }
 0x11b   :  { %v1388_v19 = vadd.f32 %v1387_v18, %v1386_v15  ;;  %v794_v20 = vadd.f32 %v1385_v14, %v1321_v11 }
 0x11d   :  { %v1848_v21 = vadd.f32 %v1388_v19, %v1324_v17 }
 0x11e   :  { %v1325_v22 = vpop.f32.mrb[20].mxu0 }
 0x11f   :  { %v1389_v23 = vpop.f32.mrb[20].mxu1  ;;  %v1326_v24 = vpop.f32.mrb[21].mxu0 }
 0x120   :  { %v1327_v25 = vadd.f32 %v1326_v24, %v1325_v22  ;;  %v1390_v26 = vpop.f32.mrb[21].mxu1  ;;  %v1328_v27 = vpop.f32.mrb[22].mxu0 }
 0x121   :  { %v1391_v30 = vadd.f32 %v1390_v26, %v1389_v23  ;;  %v1392_v31 = vpop.f32.mrb[22].mxu1  ;;  %v1329_v32 = vpop.f32.mrb[23].mxu0 }
 0x122   :  { %v1330_v33 = vadd.f32 %v1329_v32, %v1328_v27  ;;  %v1393_v34 = vpop.f32.mrb[23].mxu1 }
 0x123   :  { %v1394_v35 = vadd.f32 %v1393_v34, %v1392_v31  ;;  %v802_v36 = vadd.f32 %v1391_v30, %v1327_v25 }
 0x125   :  { %v805_v37 = vadd.f32 %v1394_v35, %v1330_v33 }
 0x126   :  { %v1331_v38 = vpop.f32.mrb[24].mxu0 }
 0x127   :  { %v1395_v39 = vpop.f32.mrb[24].mxu1  ;;  %v1332_v40 = vpop.f32.mrb[25].mxu0 }
 0x128   :  { %v1333_v41 = vadd.f32 %v1332_v40, %v1331_v38  ;;  %v1396_v44 = vpop.f32.mrb[25].mxu1  ;;  %v1334_v45 = vpop.f32.mrb[26].mxu0 }
 0x129   :  { %v1397_v46 = vadd.f32 %v1396_v44, %v1395_v39  ;;  %v1398_v47 = vpop.f32.mrb[26].mxu1  ;;  %v1335_v48 = vpop.f32.mrb[27].mxu0 }
 0x12a   :  { %v1336_v49 = vadd.f32 %v1335_v48, %v1334_v45  ;;  %v1399_v50 = vpop.f32.mrb[27].mxu1 }
 0x12b   :  { %v1400_v51 = vadd.f32 %v1399_v50, %v1398_v47  ;;  %v1850_v52 = vadd.f32 %v1397_v46, %v1333_v41 }
 0x12d   :  { %v1852_v53 = vadd.f32 %v1400_v51, %v1336_v49 }
 0x12e   :  { %v1337_v54 = vpop.f32.mrb[28].mxu0 }
 0x12f   :  { %v1401_v55 = vpop.f32.mrb[28].mxu1  ;;  %v1338_v58 = vpop.f32.mrb[29].mxu0 }
 0x130   :  { %v1339_v59 = vadd.f32 %v1338_v58, %v1337_v54  ;;  %v1402_v60 = vpop.f32.mrb[29].mxu1  ;;  %v1340_v61 = vpop.f32.mrb[30].mxu0 }
 0x131   :  { %v1403_v62 = vadd.f32 %v1402_v60, %v1401_v55  ;;  %v1404_v63 = vpop.f32.mrb[30].mxu1  ;;  %v1341_v0 = vpop.f32.mrb[31].mxu0 }
 0x132   :  { %v1342_v1 = vadd.f32 %v1341_v0, %v1340_v61  ;;  %v1405_v2 = vpop.f32.mrb[31].mxu1 }
 0x133   :  { %v1406_v3 = vadd.f32 %v1405_v2, %v1404_v63  ;;  %v818_v4 = vadd.f32 %v1403_v62, %v1339_v59 }
 0x135   :  { %v1854_v5 = vadd.f32 %v1406_v3, %v1342_v1 }
 0x136   :  { %v1441_v8 = vpop.f32.mrb[32].mxu0 }
 0x137   :  { %v867_v10 = vadd.f32 %v1441_v8, %v1836_v42  ;;  %v1449_v11 = vpop.f32.mrb[32].mxu1  ;;  %v858_v12 = vpop.f32.mrb[33].mxu0 }
 0x138   :  { %v899_v14 = vadd.f32 %v1449_v11, %v802_v36  ;;  %v859_v15 = vadd.f32 %v858_v12, %v1832_v28  ;;  %v890_v16 = vpop.f32.mrb[33].mxu1  ;;  %v1442_v17 = vpop.f32.mrb[34].mxu0 }
 0x139   :  { %v981_v18 = vmul.f32 %v1859_v9, %v867_v10  ;;  %v891_v19 = vadd.f32 %v890_v16, %v794_v20  ;;  %v870_v22 = vadd.f32 %v1442_v17, %v1838_v43  ;;  %v1450_v23 = vpop.f32.mrb[34].mxu1  ;;  %v861_v24 = vpop.f32.mrb[35].mxu0 }
 0x13a   :  { %v989_v42 = vmul.f32 %v1859_v9, %v899_v14  ;;  %v979_v25 = vmul.f32 %v1859_v9, %v859_v15  ;;  %v902_v26 = vadd.f32 %v1450_v23, %v805_v37  ;;  %v862_v27 = vadd.f32 %v861_v24, %v1834_v29  ;;  %v893_v30 = vpop.f32.mrb[35].mxu1 }
 0x13b   :  { %v1004_v31 = vadd.f32 %v1865_v13, %v981_v18  ;;  %v987_v28 = vmul.f32 %v1859_v9, %v891_v19  ;;  %v982_v32 = vmul.f32 %v1859_v9, %v870_v22  ;;  %v894_v20 = vadd.f32 %v893_v30, %v1848_v21 }
 0x13c   :  { %v1012_v43 = vadd.f32 %v1865_v13, %v989_v42  ;;  %v1002_v33 = vadd.f32 %v1865_v13, %v979_v25  ;;  %v990_v34 = vmul.f32 %v1859_v9, %v902_v26  ;;  %v980_v35 = vmul.f32 %v1859_v9, %v862_v27 }
 0x13d   :  { %v1020_v36 = vmax.f32 %v1004_v31, 0.0  ;;  %v1010_v29 = vadd.f32 %v1865_v13, %v987_v28  ;;  %v1005_v37 = vadd.f32 %v1865_v13, %v982_v32  ;;  %v988_v38 = vmul.f32 %v1859_v9, %v894_v20 }
 0x13e   :  { %v1028_v39 = vmax.f32 %v1012_v43, 0.0  ;;  %v1018_v40 = vmax.f32 %v1002_v33, 0.0  ;;  %v1013_v41 = vadd.f32 %v1865_v13, %v990_v34  ;;  %v1003_v21 = vadd.f32 %v1865_v13, %v980_v35  ;;  %v1445_v44 = vpop.f32.mrb[36].mxu0 }
 0x13f   :  { %v1026_v45 = vmax.f32 %v1010_v29, 0.0  ;;  %v1021_v46 = vmax.f32 %v1005_v37, 0.0  ;;  %v1011_v47 = vadd.f32 %v1865_v13, %v988_v38  ;;  %v883_v48 = vadd.f32 %v1445_v44, %v1844_v6  ;;  %v1453_v49 = vpop.f32.mrb[36].mxu1  ;;  %v874_v50 = vpop.f32.mrb[37].mxu0 }
 0x140   :  { %v1029_v51 = vmax.f32 %v1013_v41, 0.0  ;;  %v1019_v54 = vmax.f32 %v1003_v21, 0.0  ;;  %v915_v55 = vadd.f32 %v1453_v49, %v818_v4  ;;  %v875_v58 = vadd.f32 %v874_v50, %v1840_v56  ;;  %v906_v59 = vpop.f32.mrb[37].mxu1  ;;  %v1446_v60 = vpop.f32.mrb[38].mxu0 }
 0x141   :  { %v1240_v61 = vpack.c.bf16 %v1021_v46, %v1020_v36  ;;  %v1027_v62 = vmax.f32 %v1011_v47, 0.0  ;;  %v985_v63 = vmul.f32 %v1859_v9, %v883_v48  ;;  %v907_v0 = vadd.f32 %v906_v59, %v1850_v52  ;;  %v1454_v1 = vpop.f32.mrb[38].mxu1  ;;  %v877_v2 = vpop.f32.mrb[39].mxu0 }
 0x142   :  { %v1260_v3 = vpack.c.bf16 %v1029_v51, %v1028_v39  ;;  %v1235_v8 = vpack.c.bf16 %v1019_v54, %v1018_v40  ;;  %v993_v6 = vmul.f32 %v1859_v9, %v915_v55  ;;  %v983_v10 = vmul.f32 %v1859_v9, %v875_v58  ;;  %v909_v11 = vpop.f32.mrb[39].mxu1 }
 0x143   :  { %1272 = vst [vmem:[%s1938_s4 + $0x8] sm:$0xff] %v1240_v61   ;;  %v1255_v56 = vpack.c.bf16 %v1027_v62, %v1026_v45  ;;  %v991_v4 = vmul.f32 %v1859_v9, %v907_v0  ;;  %v886_v12 = vadd.f32 %v1446_v60, %v1846_v7  ;;  %v918_v52 = vadd.f32 %v1454_v1, %v1854_v5 }
 0x144   :  { %1276 = vst [vmem:[%s1938_s4 + $0x28] sm:$0xff] %v1260_v3   ;;  %1236 = vst [vmem:[%s1938_s4] sm:$0xff] %v1235_v8   ;;  %v878_v14 = vadd.f32 %v877_v2, %v1842_v57  ;;  %v1008_v15 = vadd.f32 %v1865_v13, %v985_v63  ;;  %v910_v16 = vadd.f32 %v909_v11, %v1852_v53 }
 0x145   :  { %1275 = vst [vmem:[%s1938_s4 + $0x20] sm:$0xff] %v1255_v56   ;;  %v986_v7 = vmul.f32 %v1859_v9, %v886_v12  ;;  %v1016_v17 = vadd.f32 %v1865_v13, %v993_v6  ;;  %v1006_v18 = vadd.f32 %v1865_v13, %v983_v10  ;;  %v994_v19 = vmul.f32 %v1859_v9, %v918_v52 }
 0x146   :  { %v984_v5 = vmul.f32 %v1859_v9, %v878_v14  ;;  %v1014_v57 = vadd.f32 %v1865_v13, %v991_v4  ;;  %v992_v23 = vmul.f32 %v1859_v9, %v910_v16  ;;  %v1024_v25 = vmax.f32 %v1008_v15, 0.0 }
 0x147   :  { %v1009_v22 = vadd.f32 %v1865_v13, %v986_v7  ;;  %v1017_v24 = vadd.f32 %v1865_v13, %v994_v19  ;;  %v1032_v27 = vmax.f32 %v1016_v17, 0.0  ;;  %v1022_v30 = vmax.f32 %v1006_v18, 0.0 }
 0x148   :  { %v1007_v42 = vadd.f32 %v1865_v13, %v984_v5  ;;  %v1015_v26 = vadd.f32 %v1865_v13, %v992_v23  ;;  %v1030_v32 = vmax.f32 %v1014_v57, 0.0 }
 0x149   :  { %v1025_v53 = vmax.f32 %v1009_v22, 0.0  ;;  %v1033_v31 = vmax.f32 %v1017_v24, 0.0 }
 0x14a   :  { %v1023_v28 = vmax.f32 %v1007_v42, 0.0  ;;  %v1031_v43 = vmax.f32 %v1015_v26, 0.0 }
 0x14b   :  { %v1250_v20 = vpack.c.bf16 %v1025_v53, %v1024_v25  ;;  %v1270_v33 = vpack.c.bf16 %v1033_v31, %v1032_v27 }
 0x14c   :  { %v1245_v34 = vpack.c.bf16 %v1023_v28, %v1022_v30  ;;  %v1265_v9 = vpack.c.bf16 %v1031_v43, %v1030_v32 }
 0x14d   :  { %1274 = vst [vmem:[%s1938_s4 + $0x18] sm:$0xff] %v1250_v20   ;;  %1278 = vst [vmem:[%s1938_s4 + $0x38] sm:$0xff] %v1270_v33  }
 0x14e   :  { %1273 = vst [vmem:[%s1938_s4 + $0x10] sm:$0xff] %v1245_v34   ;;  %1277 = vst [vmem:[%s1938_s4 + $0x30] sm:$0xff] %v1265_v9  }

// kernel: bcnn_forward.22
= control target key start
LH: loop header
LB: loop body
LE: loop exit
PB: predicated region body
PF: predicated region fallthrough
CT: control target
= control target key end

     0   :  { %s1344_s15 = smov 0   ;;  %s1346_s16 = smov 0   ;;  %s1489_s0 = inlined_call_operand.vmem [shape: bf16[32,1152], index: 0, kind: input, shape index: {}]   ;;  %s1490_s1 = inlined_call_operand.vmem [shape: bf16[1152,256], index: 1, kind: input, shape index: {}]   ;;  %s1491_s2 = inlined_call_operand.vmem [shape: f32[1,256], index: 2, kind: input, shape index: {}]   ;;  %s1492_s3 = inlined_call_operand.vmem [shape: f32[1,256], index: 3, kind: input, shape index: {}]   ;;  %s1493_s4 = inlined_call_operand.vmem [shape: bf16[32,256], index: 4, kind: output, shape index: {}]  }
   0x1   :  { %s1348_s17 = smov 0   ;;  %s1350_s18 = smov 0  }
   0x2   :  { %s1352_s19 = smov 0  }
   0x3 LB: > { %s26_s20 = sadd.s32 1, %s1311_s18  ;;  %p49_p1 = scmp.ne.s32.totalorder %s1303_s16, %s1299_s15  ;;  %s1315_s19 = sphi %s1352_s19, %s14_s19   ;;  %s1311_s18 = sphi %s1350_s18, %s1497_s18   ;;  %s1307_s17 = sphi %s1348_s17, %s1496_s17   ;;  %s1303_s16 = sphi %s1346_s16, %s1495_s16   ;;  %s1299_s15 = sphi %s1344_s15, %s1494_s15  }
   0x4   : > { %p27_p0 = scmp.ge.s32.totalorder %s26_s20, 3  ;;  %p50_p2 = scmp.eq.s32.totalorder %s1315_s19, 0 }
   0x5   : > { %s42_s22 = sadd.s32 1, %s1303_s16  ;;  %p1062_p5 = scmp.ge.s32.totalorder %s1315_s19, 3 }
   0x6   : > { %s1499_s20 = smov (%p27_p0, %s26_s20), 0  ;;  %p51_p3 = por %p50_p2, %p49_p1 }
   0x7   : > { %s38_s21 = ssub.s32 %s1311_s18, %s1499_s20  ;;  %199 = sbr.rel (%p1062_p5) target bundleno = 23 (0x17), region = 24 }
   0x8   : > { %p40_p4 = scmp.eq.s32.totalorder %s38_s21, 0 }
   0xa   : > { %s1379_s23 = scalar_select %p40_p4, %s1303_s16, %s42_s22  }
   0xe   : > { %202 = sbr.rel (!%p51_p3) target bundleno = 23 (0x17), region = 28  ;;  %s204_s24 = sand.u32 (%p51_p3), 1, %s1303_s16  }
   0xf   : > { %s1139_s25 = smul.u32 (%p51_p3), 12, %s1311_s18 }
  0x10   : > { %s1153_s26 = smul.u32 (%p51_p3), 48, %s204_s24 }
  0x11   : > { %s212_s29 = scalar_lea.vmem (%p51_p3), %s1489_s0, %s1139_s25 }
  0x12   : > { %v227_v0 = vld [vmem:[%s212_s29] sm:$0xff] (%p51_p3)  ;;  %v231_v2 = vld [vmem:[%s212_s29 + $0x48] sm:$0xff] (%p51_p3)  ;;  %s206_s30 = scalar_lea.vmem (%p51_p3), [#allocation3], %s1153_s26  ;;  %v1068_v6 = vld [vmem:[%s212_s29 + $0x50] sm:$0xf] (%p51_p3) }
  0x13   : > { %v229_v1 = vld [vmem:[%s212_s29 + $0x24] sm:$0xff] (%p51_p3)  ;;  %228 = vst [vmem:[%s206_s30] sm:$0xff] (%p51_p3), %v227_v0  ;;  %232 = vst [vmem:[%s206_s30 + $0x18] sm:$0xff] (%p51_p3), %v231_v2  ;;  %v233_v3 = vld [vmem:[%s212_s29 + $0x6c] sm:$0xff] (%p51_p3) }
  0x14   : > { %230 = vst [vmem:[%s206_s30 + $0xc] sm:$0xff] (%p51_p3), %v229_v1  ;;  %v1064_v4 = vld [vmem:[%s212_s29 + $0x8] sm:$0xf] (%p51_p3)  ;;  %v1066_v5 = vld [vmem:[%s212_s29 + $0x2c] sm:$0xf] (%p51_p3)  ;;  %234 = vst [vmem:[%s206_s30 + $0x24] sm:$0xff] (%p51_p3), %v233_v3 }
  0x15   : > { %1065 = vst [vmem:[%s206_s30 + $0x8] sm:$0xf] %v1064_v4  ;;  %1067 = vst [vmem:[%s206_s30 + $0x14] sm:$0xf] %v1066_v5  ;;  %v1070_v7 = vld [vmem:[%s212_s29 + $0x74] sm:$0xf] }
  0x16   : > { %1069 = vst [vmem:[%s206_s30 + $0x20] sm:$0xf] %v1068_v6  ;;  %1071 = vst [vmem:[%s206_s30 + $0x2c] sm:$0xf] %v1070_v7 }
  0x17 PF: > { %p1072_p6 = scmp.ge.s32.totalorder %s1315_s19, 1  ;;  %p269_p7 = scmp.lt.s32.totalorder %s1315_s19, 4 }
  0x19   : > { %p270_p8 = pnand %p1072_p6, %p269_p7 }
  0x1a   : > { %s276_s5 = sand.u32 (!%p270_p8), 1, %s1299_s15   ;;  %s326_s6 = smul.u32 (!%p270_p8), 48, %s1307_s17 }
  0x1b   : > { %273 = sbr.rel (%p270_p8) target bundleno = 350 (0x15e), region = 58  ;;  %p1075_p10 = scmp.ne.s32.totalorder (!%p270_p8), %s1307_s17, 0 }
  0x1c   : > { %s1154_s7 = smul.u32 (!%p270_p8), 48, %s276_s5  ;;  %p328_p9 = scmp.lt.s32.totalorder (!%p270_p8), %s326_s6, 143 }
  0x1e   : > { %s1396_s12 = scalar_lea.vmem (!%p270_p8), [#allocation3], %s1154_s7 }
  0x22   : > { %s1501_s6 = smov (!%p328_p9, %s326_s6), 143  ;;  %364 = sbr.rel (%p1075_p10) target bundleno = 41 (0x29), region = 66 }
  0x23   : > { %s1140_s8 = sshll.u32 %s1501_s6, 3  ;;  %v1317_v8 = vmov (!%p1075_p10), 0.0  }
  0x24   : > { %s1394_s11 = scalar_lea.vmem %s1490_s1, %s1140_s8  ;;  %365 = vst [vmem:[#allocation2] sm:$0xff] (!%p1075_p10), %v1317_v8  ;;  %366 = vst [vmem:[#allocation2 + $0x8] sm:$0xff] (!%p1075_p10), %v1317_v8 }
  0x25   : > { %367 = vst [vmem:[#allocation2 + $0x10] sm:$0xff] (!%p1075_p10), %v1317_v8  ;;  %368 = vst [vmem:[#allocation2 + $0x18] sm:$0xff] (!%p1075_p10), %v1317_v8 }
  0x26   : > { %369 = vst [vmem:[#allocation2 + $0x20] sm:$0xff] (!%p1075_p10), %v1317_v8  ;;  %370 = vst [vmem:[#allocation2 + $0x28] sm:$0xff] (!%p1075_p10), %v1317_v8 }
  0x27   : > { %371 = vst [vmem:[#allocation2 + $0x30] sm:$0xff] (!%p1075_p10), %v1317_v8  ;;  %372 = vst [vmem:[#allocation2 + $0x38] sm:$0xff] (!%p1075_p10), %v1317_v8 }
  0x29 PF: > { %v1197_v9 = vld [vmem:[%s1394_s11 + $0x4] ss:$8 sps:$4 sm:$0xff]   ;;  %v1199_v10 = vld [vmem:[%s1394_s11] ss:$8 sps:$4 sm:$0xff]   ;;  %v1318_v11 = vmov 0   ;;  %p1130_p11 = scmp.ne.s32.totalorder %s1307_s17, 2 }
  0x2a   : > { %794 = vmatprep.mubr.bf16.mxu0 %v1318_v11  ;;  %709 = vmatprep.subr.bf16.mxu1 %v1197_v9  ;;  %v1200_v12 = vld [vmem:[%s1394_s11 + $0x14] ss:$8 sps:$4 sm:$0xff]   ;;  %v1202_v13 = vld [vmem:[%s1394_s11 + $0x10] ss:$8 sps:$4 sm:$0xff]   ;;  %v1203_v14 = vld [vmem:[%s1394_s11 + $0x24] ss:$8 sps:$4 sm:$0xff]  }
  0x2b   : > { %710 = vmatpush1.bf16.msra.mxu1 %v1199_v10  ;;  %v1205_v15 = vld [vmem:[%s1394_s11 + $0x20] ss:$8 sps:$4 sm:$0xff]   ;;  %v1206_v16 = vld [vmem:[%s1394_s11 + $0x34] ss:$8 sps:$4 sm:$0xff]   ;;  %v1208_v17 = vld [vmem:[%s1394_s11 + $0x30] ss:$8 sps:$4 sm:$0xff]  }
  0x2c   : > { %711 = vmatprep.subr.bf16.mxu1 %v1200_v12  ;;  %v1221_v18 = vld [vmem:[%s1394_s11 + $0x104] ss:$8 sps:$4 sm:$0xff]   ;;  %v1223_v19 = vld [vmem:[%s1394_s11 + $0x100] ss:$8 sps:$4 sm:$0xff]   ;;  %v1227_v21 = vld [vmem:[%s1394_s11 + $0x114] ss:$8 sps:$4 sm:$0xff]  }
  0x2d   : > { %v1209_v20 = vld [vmem:[%s1394_s11 + $0x44] ss:$8 sps:$4 sm:$0xff]   ;;  %762 = vmatprep.subr.bf16.mxu0 %v1221_v18  ;;  %v1229_v22 = vld [vmem:[%s1394_s11 + $0x110] ss:$8 sps:$4 sm:$0xff]   ;;  %v1211_v23 = vld [vmem:[%s1394_s11 + $0x40] ss:$8 sps:$4 sm:$0xff]  }
  0x2e   : > { %763 = vmatpush1.bf16.msra.mxu0 %v1223_v19  ;;  %v1212_v24 = vld [vmem:[%s1394_s11 + $0x54] ss:$8 sps:$4 sm:$0xff]   ;;  %v1233_v25 = vld [vmem:[%s1394_s11 + $0x124] ss:$8 sps:$4 sm:$0xff]   ;;  %v1235_v26 = vld [vmem:[%s1394_s11 + $0x120] ss:$8 sps:$4 sm:$0xff]  }
  0x2f   : > { %712 = vmatpush1.bf16.msra.mxu1 %v1202_v13  ;;  %764 = vmatprep.subr.bf16.mxu0 %v1227_v21  ;;  %v1214_v27 = vld [vmem:[%s1394_s11 + $0x50] ss:$8 sps:$4 sm:$0xff]   ;;  %v1239_v28 = vld [vmem:[%s1394_s11 + $0x134] ss:$8 sps:$4 sm:$0xff]   ;;  %v1215_v29 = vld [vmem:[%s1394_s11 + $0x64] ss:$8 sps:$4 sm:$0xff]  }
  0x30   : > { %713 = vmatprep.subr.bf16.mxu1 %v1203_v14  ;;  %v1241_v30 = vld [vmem:[%s1394_s11 + $0x130] ss:$8 sps:$4 sm:$0xff]   ;;  %v1217_v31 = vld [vmem:[%s1394_s11 + $0x60] ss:$8 sps:$4 sm:$0xff]   ;;  %v1245_v32 = vld [vmem:[%s1394_s11 + $0x144] ss:$8 sps:$4 sm:$0xff]  }
  0x31   : > { %v1218_v33 = vld [vmem:[%s1394_s11 + $0x74] ss:$8 sps:$4 sm:$0xff]   ;;  %v1247_v34 = vld [vmem:[%s1394_s11 + $0x140] ss:$8 sps:$4 sm:$0xff]   ;;  %v1220_v35 = vld [vmem:[%s1394_s11 + $0x70] ss:$8 sps:$4 sm:$0xff]  }
  0x32   : > { %765 = vmatpush1.bf16.msra.mxu0 %v1229_v22  ;;  %v1251_v36 = vld [vmem:[%s1394_s11 + $0x154] ss:$8 sps:$4 sm:$0xff]   ;;  %v1224_v37 = vld [vmem:[%s1394_s11 + $0x84] ss:$8 sps:$4 sm:$0xff]   ;;  %v1253_v38 = vld [vmem:[%s1394_s11 + $0x150] ss:$8 sps:$4 sm:$0xff]  }
  0x33   : > { %714 = vmatpush1.bf16.msra.mxu1 %v1205_v15  ;;  %766 = vmatprep.subr.bf16.mxu0 %v1233_v25  ;;  %v1226_v39 = vld [vmem:[%s1394_s11 + $0x80] ss:$8 sps:$4 sm:$0xff]   ;;  %v1257_v40 = vld [vmem:[%s1394_s11 + $0x164] ss:$8 sps:$4 sm:$0xff]   ;;  %v1230_v41 = vld [vmem:[%s1394_s11 + $0x94] ss:$8 sps:$4 sm:$0xff]  }
  0x34   : > { %715 = vmatprep.subr.bf16.mxu1 %v1206_v16  ;;  %v1232_v42 = vld [vmem:[%s1394_s11 + $0x90] ss:$8 sps:$4 sm:$0xff]   ;;  %v1259_v43 = vld [vmem:[%s1394_s11 + $0x160] ss:$8 sps:$4 sm:$0xff]   ;;  %v1263_v45 = vld [vmem:[%s1394_s11 + $0x174] ss:$8 sps:$4 sm:$0xff]  }
  0x35   : > { %v1272_v44 = vld [vmem:[%s1396_s12 + $0x4] ss:$12 sps:$4 sm:$0xff]   ;;  %v1269_v50 = vld [vmem:[%s1396_s12 + $0x8] ss:$12 sps:$4 sm:$0xff]   ;;  %v1273_v55 = vld [vmem:[%s1396_s12 + $0x20] ss:$12 sps:$4 sm:$0xff]  }
  0x36   : > { %767 = vmatpush1.bf16.msra.mxu0 %v1235_v26  ;;  %v1236_v46 = vld [vmem:[%s1394_s11 + $0xa4] ss:$8 sps:$4 sm:$0xff]   ;;  %741 = vmatprep.mubr.bf16.mxu1 %v1272_v44  ;;  %v1265_v47 = vld [vmem:[%s1394_s11 + $0x170] ss:$8 sps:$4 sm:$0xff]   ;;  %v1238_v48 = vld [vmem:[%s1394_s11 + $0xa0] ss:$8 sps:$4 sm:$0xff]  }
  0x37   : > { %716 = vmatpush1.bf16.msra.mxu1 %v1208_v17  ;;  %768 = vmatprep.subr.bf16.mxu0 %v1239_v28  ;;  %v1242_v49 = vld [vmem:[%s1394_s11 + $0xb4] ss:$8 sps:$4 sm:$0xff]   ;;  %v1244_v51 = vld [vmem:[%s1394_s11 + $0xb0] ss:$8 sps:$4 sm:$0xff]   ;;  %v1248_v52 = vld [vmem:[%s1394_s11 + $0xc4] ss:$8 sps:$4 sm:$0xff]  }
  0x38   : > { %717 = vmatprep.subr.bf16.mxu1 %v1209_v20  ;;  %v1250_v53 = vld [vmem:[%s1394_s11 + $0xc0] ss:$8 sps:$4 sm:$0xff]   ;;  %v1254_v54 = vld [vmem:[%s1394_s11 + $0xd4] ss:$8 sps:$4 sm:$0xff]   ;;  %v1256_v56 = vld [vmem:[%s1394_s11 + $0xd0] ss:$8 sps:$4 sm:$0xff]  }
  0x39   : > { %v1260_v57 = vld [vmem:[%s1394_s11 + $0xe4] ss:$8 sps:$4 sm:$0xff]   ;;  %v1262_v58 = vld [vmem:[%s1394_s11 + $0xe0] ss:$8 sps:$4 sm:$0xff]   ;;  %v1266_v59 = vld [vmem:[%s1394_s11 + $0xf4] ss:$8 sps:$4 sm:$0xff]  }
  0x3a   : > { %769 = vmatpush1.bf16.msra.mxu0 %v1241_v30  ;;  %v1268_v60 = vld [vmem:[%s1394_s11 + $0xf0] ss:$8 sps:$4 sm:$0xff]   ;;  %v373_v8 = vld [vmem:[#allocation2] sm:$0xff] }
  0x3b   : > { %718 = vmatpush1.bf16.msra.mxu1 %v1211_v23  ;;  %770 = vmatprep.subr.bf16.mxu0 %v1245_v32  ;;  %v1270_v61 = vld [vmem:[%s1396_s12] ss:$12 sps:$4 sm:$0xff]   ;;  %v1274_v62 = vld [vmem:[%s1396_s12 + $0x1c] ss:$12 sps:$4 sm:$0xff]   ;;  %v1276_v63 = vld [vmem:[%s1396_s12 + $0x18] ss:$12 sps:$4 sm:$0xff]  }
  0x3c   : > { %719 = vmatprep.subr.bf16.mxu1 %v1212_v24  ;;  %v375_v14 = vld [vmem:[#allocation2 + $0x10] sm:$0xff]  ;;  %v376_v18 = vld [vmem:[#allocation2 + $0x18] sm:$0xff]  ;;  %v377_v24 = vld [vmem:[#allocation2 + $0x20] sm:$0xff] }
  0x3d   : > { %v379_v30 = vld [vmem:[#allocation2 + $0x30] sm:$0xff] }
  0x3e   : > { %771 = vmatpush1.bf16.msra.mxu0 %v1247_v34  ;;  %v380_v34 = vld [vmem:[#allocation2 + $0x38] sm:$0xff] }
  0x3f   : > { %720 = vmatpush1.bf16.msra.mxu1 %v1214_v27  ;;  %772 = vmatprep.subr.bf16.mxu0 %v1251_v36  ;;  %v378_v27 = vld [vmem:[#allocation2 + $0x28] sm:$0xff] }
  0x40   : > { %721 = vmatprep.subr.bf16.mxu1 %v1215_v29 }
  0x42   : > { %773 = vmatpush1.bf16.msra.mxu0 %v1253_v38 }
  0x43   : > { %722 = vmatpush1.bf16.msra.mxu1 %v1217_v31  ;;  %774 = vmatprep.subr.bf16.mxu0 %v1257_v40  ;;  %v845_v40 = vlaneseq (!%p1130_p11) }
  0x44   : > { %723 = vmatprep.subr.bf16.mxu1 %v1218_v33 }
  0x46   : > { %775 = vmatpush1.bf16.msra.mxu0 %v1259_v43  ;;  %v863_v43 = vld [vmem:[%s1492_s3] sm:$0x3] (!%p1130_p11) }
  0x47   : > { %724 = vmatpush1.bf16.msra.mxu1 %v1220_v35  ;;  %776 = vmatprep.subr.bf16.mxu0 %v1263_v45 }
  0x48   : > { %725 = vmatprep.subr.bf16.mxu1 %v1224_v37 }
  0x4a   : > { %777 = vmatpush1.bf16.msra.mxu0 %v1265_v47 }
  0x4b   : > { %726 = vmatpush1.bf16.msra.mxu1 %v1226_v39 }
  0x4c   : > { %727 = vmatprep.subr.bf16.mxu1 %v1230_v41  ;;  %v846_v41 = vshrl.u32 (!%p1130_p11), %v845_v40, 7 }
  0x4d   : > { %795 = vmatmul.mubr.bf16.vlgmr.msra.gmra.mrb[0].mxu0 %v1269_v50 }
  0x4e   : > { %804 = vmatprep.mubr.bf16.mxu0 %v1318_v11  ;;  %v374_v11 = vld [vmem:[#allocation2 + $0x8] sm:$0xff]  ;;  %v851_v47 = vsub.s32 (!%p1130_p11), 1, %v846_v41 }
  0x4f   : > { %728 = vmatpush1.bf16.msra.mxu1 %v1232_v42  ;;  %v843_v42 = vld [vmem:[%s1491_s2] sm:$0x3] (!%p1130_p11) }
  0x50   : > { %729 = vmatprep.subr.bf16.mxu1 %v1236_v46  ;;  %v847_v46 = vsub.s32 (!%p1130_p11), 0, %v846_v41 }
  0x53   : > { %730 = vmatpush1.bf16.msra.mxu1 %v1238_v48 }
  0x54   : > { %731 = vmatprep.subr.bf16.mxu1 %v1242_v49 }
  0x55   : > { %805 = vmatmul.mubr.bf16.gmra.mrb[4].mxu0 %v1273_v55 }
  0x57   : > { %732 = vmatpush1.bf16.msra.mxu1 %v1244_v51  ;;  %v848_v51 = vrot.slane (!%p1130_p11), %v843_v42, %v847_v46 }
  0x58   : > { %733 = vmatprep.subr.bf16.mxu1 %v1248_v52  ;;  %v852_v52 = vrot.slane (!%p1130_p11), %v843_v42, %v851_v47 }
  0x5b   : > { %734 = vmatpush1.bf16.msra.mxu1 %v1250_v53  ;;  %v868_v53 = vrot.slane (!%p1130_p11), %v863_v43, %v847_v46 }
  0x5c   : > { %735 = vmatprep.subr.bf16.mxu1 %v1254_v54  ;;  %v872_v54 = vrot.slane (!%p1130_p11), %v863_v43, %v851_v47 }
  0x5f   : > { %736 = vmatpush1.bf16.msra.mxu1 %v1256_v56 }
  0x60   : > { %737 = vmatprep.subr.bf16.mxu1 %v1260_v57 }
  0x63   : > { %738 = vmatpush1.bf16.msra.mxu1 %v1262_v58 }
  0x64   : > { %739 = vmatprep.subr.bf16.mxu1 %v1266_v59 }
  0x67   : > { %740 = vmatpush1.bf16.msra.mxu1 %v1268_v60 }
  0x6a   : > { %742 = vmatmul.mubr.bf16.vlgmr.msra.gmra.mrb[0].mxu1 %v1270_v61 }
  0x6b   : > { %751 = vmatprep.mubr.bf16.mxu1 %v1274_v62 }
  0x72   : > { %752 = vmatmul.mubr.bf16.gmra.mrb[4].mxu1 %v1276_v63 }
 0x120   : > { %v796_v0 = vpop.f32.mrb[0].mxu0 }
 0x121   : > { %v798_v1 = vpop.f32.mrb[1].mxu0 }
 0x122   : > { %v800_v2 = vpop.f32.mrb[2].mxu0 }
 0x123   : > { %v802_v3 = vpop.f32.mrb[3].mxu0 }
 0x128   : > { %v806_v4 = vpop.f32.mrb[4].mxu0 }
 0x129   : > { %v808_v5 = vpop.f32.mrb[5].mxu0 }
 0x12a   : > { %v810_v6 = vpop.f32.mrb[6].mxu0 }
 0x12b   : > { %v812_v7 = vpop.f32.mrb[7].mxu0 }
 0x13d   : > { %v743_v9 = vpop.f32.mrb[0].mxu1 }
 0x13e   : > { %v797_v10 = vadd.f32 %v796_v0, %v743_v9  ;;  %v745_v12 = vpop.f32.mrb[1].mxu1 }
 0x13f   : > { %v799_v13 = vadd.f32 %v798_v1, %v745_v12  ;;  %v747_v15 = vpop.f32.mrb[2].mxu1 }
 0x140   : > { %v815_v16 = vadd.f32 %v797_v10, %v373_v8  ;;  %v801_v17 = vadd.f32 %v800_v2, %v747_v15  ;;  %v749_v19 = vpop.f32.mrb[3].mxu1 }
 0x141   : > { %v816_v20 = vadd.f32 %v799_v13, %v374_v11  ;;  %v803_v21 = vadd.f32 %v802_v3, %v749_v19 }
 0x142   : > { %823 = vst [vmem:[#allocation2] sm:$0xff] %v815_v16  ;;  %v817_v22 = vadd.f32 %v801_v17, %v375_v14 }
 0x143   : > { %824 = vst [vmem:[#allocation2 + $0x8] sm:$0xff] %v816_v20  ;;  %v818_v23 = vadd.f32 %v803_v21, %v376_v18 }
 0x144   : > { %825 = vst [vmem:[#allocation2 + $0x10] sm:$0xff] %v817_v22 }
 0x145   : > { %826 = vst [vmem:[#allocation2 + $0x18] sm:$0xff] %v818_v23  ;;  %v753_v25 = vpop.f32.mrb[4].mxu1 }
 0x146   : > { %v807_v26 = vadd.f32 %v806_v4, %v753_v25  ;;  %v755_v28 = vpop.f32.mrb[5].mxu1 }
 0x147   : > { %v809_v29 = vadd.f32 %v808_v5, %v755_v28  ;;  %v757_v31 = vpop.f32.mrb[6].mxu1  ;;  %834 = sbr.rel (%p1130_p11) target bundleno = 350 (0x15e), region = 70 }
 0x148   : > { %v819_v32 = vadd.f32 %v807_v26, %v377_v24  ;;  %v811_v33 = vadd.f32 %v810_v6, %v757_v31  ;;  %v759_v35 = vpop.f32.mrb[7].mxu1 }
 0x149   : > { %v820_v36 = vadd.f32 %v809_v29, %v378_v27  ;;  %v813_v37 = vadd.f32 %v812_v7, %v759_v35  ;;  %v835_v44 = vld [vmem:[#allocation2] sm:$0xff] (!%p1130_p11) }
 0x14a   : > { %827 = vst [vmem:[#allocation2 + $0x20] sm:$0xff] %v819_v32  ;;  %v821_v38 = vadd.f32 %v811_v33, %v379_v30  ;;  %v836_v45 = vld [vmem:[#allocation2 + $0x8] sm:$0xff] (!%p1130_p11)  ;;  %v855_v58 = vmul.f32 (!%p1130_p11), %v848_v51, %v835_v44 }
 0x14b   : > { %828 = vst [vmem:[#allocation2 + $0x28] sm:$0xff] %v820_v36  ;;  %v822_v39 = vadd.f32 %v813_v37, %v380_v34  ;;  %v837_v48 = vld [vmem:[#allocation2 + $0x10] sm:$0xff] (!%p1130_p11)  ;;  %v856_v59 = vmul.f32 (!%p1130_p11), %v852_v52, %v836_v45 }
 0x14c   : > { %829 = vst [vmem:[#allocation2 + $0x30] sm:$0xff] %v821_v38  ;;  %v838_v49 = vld [vmem:[#allocation2 + $0x18] sm:$0xff] (!%p1130_p11)  ;;  %v857_v60 = vmul.f32 (!%p1130_p11), %v848_v51, %v837_v48  ;;  %v875_v2 = vadd.f32 (!%p1130_p11), %v868_v53, %v855_v58 }
 0x14d   : > { %830 = vst [vmem:[#allocation2 + $0x38] sm:$0xff] %v822_v39  ;;  %v858_v61 = vmul.f32 (!%p1130_p11), %v852_v52, %v838_v49  ;;  %v876_v3 = vadd.f32 (!%p1130_p11), %v872_v54, %v856_v59 }
 0x14e   : > { %v877_v4 = vadd.f32 %v868_v53, %v857_v60  ;;  %v883_v10 = vmax.f32 %v875_v2, 0.0 }
 0x14f   : > { %v878_v5 = vadd.f32 %v872_v54, %v858_v61  ;;  %v884_v11 = vmax.f32 %v876_v3, 0.0 }
 0x150   : > { %v885_v12 = vmax.f32 %v877_v4, 0.0 }
 0x151   : > { %v839_v50 = vld [vmem:[#allocation2 + $0x20] sm:$0xff]  ;;  %v886_v13 = vmax.f32 %v878_v5, 0.0  ;;  %v1141_v18 = vpack.c.bf16 %v884_v11, %v883_v10 }
 0x152   : > { %v840_v55 = vld [vmem:[#allocation2 + $0x28] sm:$0xff]  ;;  %v859_v62 = vmul.f32 %v848_v51, %v839_v50 }
 0x153   : > { %v841_v56 = vld [vmem:[#allocation2 + $0x30] sm:$0xff]  ;;  %v860_v63 = vmul.f32 %v852_v52, %v840_v55  ;;  %v1142_v19 = vpack.c.bf16 %v886_v13, %v885_v12  ;;  %915 = vst [vmem:[%s1493_s4] sm:$0xff] %v1141_v18 }
 0x154   : > { %v842_v57 = vld [vmem:[#allocation2 + $0x38] sm:$0xff]  ;;  %v861_v0 = vmul.f32 %v848_v51, %v841_v56  ;;  %v879_v6 = vadd.f32 %v868_v53, %v859_v62 }
 0x155   : > { %v862_v1 = vmul.f32 %v852_v52, %v842_v57  ;;  %v880_v7 = vadd.f32 %v872_v54, %v860_v63  ;;  %916 = vst [vmem:[%s1493_s4 + $0x8] sm:$0xff] %v1142_v19 }
 0x156   : > { %v881_v8 = vadd.f32 %v868_v53, %v861_v0  ;;  %v887_v14 = vmax.f32 %v879_v6, 0.0 }
 0x157   : > { %v882_v9 = vadd.f32 %v872_v54, %v862_v1  ;;  %v888_v15 = vmax.f32 %v880_v7, 0.0 }
 0x158   : > { %v889_v16 = vmax.f32 %v881_v8, 0.0 }
 0x159   : > { %v890_v17 = vmax.f32 %v882_v9, 0.0  ;;  %v1143_v20 = vpack.c.bf16 %v888_v15, %v887_v14 }
 0x15b   : > { %v1144_v21 = vpack.c.bf16 %v890_v17, %v889_v16  ;;  %917 = vst [vmem:[%s1493_s4 + $0x10] sm:$0xff] %v1143_v20 }
 0x15d   : > { %918 = vst [vmem:[%s1493_s4 + $0x18] sm:$0xff] %v1144_v21 }
 0x15e PF: > { %s14_s19 = sadd.s32 1, %s1315_s19   ;;  %s1494_s15 = smov %s1303_s16 }
 0x15f   : > { %p11_p12 = scmp.ge.s32.totalorder %s14_s19, 5   ;;  %s1495_s16 = smov %s1379_s23 }
 0x160   : > { %s1496_s17 = smov %s1311_s18  ;;  %s1497_s18 = smov %s1499_s20 }
 0x161   :  { %13 = sbr.rel (!%p11_p12) target bundleno = 3 (0x3), region = 120 }

// kernel: bcnn_forward.24
= control target key start
LH: loop header
LB: loop body
LE: loop exit
PB: predicated region body
PF: predicated region fallthrough
CT: control target
= control target key end

     0   :  { %s95_s0 = inlined_call_operand.vmem [shape: bf16[4,2,2,512], index: 0, kind: input, shape index: {}]   ;;  %s96_s1 = inlined_call_operand.vmem [shape: bf16[4,2,256], index: 1, kind: output, shape index: {}]  }
   0x1   :  { %v8_v0 = vld [vmem:[%s95_s0] sm:$0xf]  ;;  %v45_v1 = vld [vmem:[%s95_s0 + $0x4] sm:$0xf]  ;;  %v9_v2 = vld [vmem:[%s95_s0 + $0x8] sm:$0xf] }
   0x2   :  { %v17_v3 = vmax.bf16 %v45_v1, %v8_v0  ;;  %v46_v4 = vld [vmem:[%s95_s0 + $0xc] sm:$0xf]  ;;  %v10_v5 = vld [vmem:[%s95_s0 + $0x10] sm:$0xf]  ;;  %v47_v6 = vld [vmem:[%s95_s0 + $0x14] sm:$0xf] }
   0x3   :  { %v18_v7 = vmax.bf16 %v46_v4, %v9_v2  ;;  %v19_v8 = vmax.bf16 %v47_v6, %v10_v5  ;;  %v11_v9 = vld [vmem:[%s95_s0 + $0x18] sm:$0xf]  ;;  %v48_v10 = vld [vmem:[%s95_s0 + $0x1c] sm:$0xf] }
   0x4   :  { %v25_v11 = vrot.slane %v17_v3, 2  ;;  %v20_v12 = vmax.bf16 %v48_v10, %v11_v9 }
   0x5   :  { %v26_v13 = vrot.slane %v18_v7, 2  ;;  %v27_v14 = vrot.slane %v19_v8, 2 }
   0x6   :  { %v33_v15 = vmax.bf16 %v25_v11, %v17_v3  ;;  %v28_v16 = vrot.slane %v20_v12, 2 }
   0x7   :  { %v34_v17 = vmax.bf16 %v26_v13, %v18_v7  ;;  %v35_v18 = vmax.bf16 %v27_v14, %v19_v8 }
   0x8   :  { %37 = vst [vmem:[%s96_s1] sm:$0x3] %v33_v15  ;;  %v36_v19 = vmax.bf16 %v28_v16, %v20_v12 }
   0x9   :  { %38 = vst [vmem:[%s96_s1 + $0x2] sm:$0x3] %v34_v17  ;;  %39 = vst [vmem:[%s96_s1 + $0x4] sm:$0x3] %v35_v18 }
   0xa   :  { %40 = vst [vmem:[%s96_s1 + $0x6] sm:$0x3] %v36_v19 }

// kernel: bcnn_forward.23
= control target key start
LH: loop header
LB: loop body
LE: loop exit
PB: predicated region body
PF: predicated region fallthrough
CT: control target
= control target key end

     0   :  { %s1344_s15 = smov 0   ;;  %s1346_s16 = smov 0   ;;  %s1489_s0 = inlined_call_operand.vmem [shape: bf16[32,2304], index: 0, kind: input, shape index: {}]   ;;  %s1490_s1 = inlined_call_operand.vmem [shape: bf16[2304,256], index: 1, kind: input, shape index: {}]   ;;  %s1491_s2 = inlined_call_operand.vmem [shape: f32[1,256], index: 2, kind: input, shape index: {}]   ;;  %s1492_s3 = inlined_call_operand.vmem [shape: f32[1,256], index: 3, kind: input, shape index: {}]   ;;  %s1493_s4 = inlined_call_operand.vmem [shape: bf16[32,256], index: 4, kind: output, shape index: {}]  }
   0x1   :  { %s1348_s17 = smov 0   ;;  %s1350_s18 = smov 0  }
   0x2   :  { %s1352_s19 = smov 0  }
   0x3 LB: > { %s26_s20 = sadd.s32 1, %s1311_s18  ;;  %p49_p1 = scmp.ne.s32.totalorder %s1303_s16, %s1299_s15  ;;  %s1315_s19 = sphi %s1352_s19, %s14_s19   ;;  %s1311_s18 = sphi %s1350_s18, %s1497_s18   ;;  %s1307_s17 = sphi %s1348_s17, %s1496_s17   ;;  %s1303_s16 = sphi %s1346_s16, %s1495_s16   ;;  %s1299_s15 = sphi %s1344_s15, %s1494_s15  }
   0x4   : > { %p27_p0 = scmp.ge.s32.totalorder %s26_s20, 6  ;;  %p50_p2 = scmp.eq.s32.totalorder %s1315_s19, 0 }
   0x5   : > { %s42_s22 = sadd.s32 1, %s1303_s16  ;;  %p1062_p5 = scmp.ge.s32.totalorder %s1315_s19, 6 }
   0x6   : > { %s1499_s20 = smov (%p27_p0, %s26_s20), 0  ;;  %p51_p3 = por %p50_p2, %p49_p1 }
   0x7   : > { %s38_s21 = ssub.s32 %s1311_s18, %s1499_s20  ;;  %199 = sbr.rel (%p1062_p5) target bundleno = 23 (0x17), region = 24 }
   0x8   : > { %p40_p4 = scmp.eq.s32.totalorder %s38_s21, 0 }
   0xa   : > { %s1379_s23 = scalar_select %p40_p4, %s1303_s16, %s42_s22  }
   0xe   : > { %202 = sbr.rel (!%p51_p3) target bundleno = 23 (0x17), region = 28  ;;  %s204_s24 = sand.u32 (%p51_p3), 1, %s1303_s16  }
   0xf   : > { %s1139_s25 = smul.u32 (%p51_p3), 12, %s1311_s18 }
  0x10   : > { %s1153_s26 = smul.u32 (%p51_p3), 48, %s204_s24 }
  0x11   : > { %s212_s29 = scalar_lea.vmem (%p51_p3), %s1489_s0, %s1139_s25 }
  0x12   : > { %v227_v0 = vld [vmem:[%s212_s29] sm:$0xff] (%p51_p3)  ;;  %v229_v1 = vld [vmem:[%s212_s29 + $0x48] sm:$0xff] (%p51_p3)  ;;  %v231_v2 = vld [vmem:[%s212_s29 + $0x90] sm:$0xff] (%p51_p3)  ;;  %s206_s30 = scalar_lea.vmem (%p51_p3), [#allocation3], %s1153_s26 }
  0x13   : > { %228 = vst [vmem:[%s206_s30] sm:$0xff] (%p51_p3), %v227_v0  ;;  %230 = vst [vmem:[%s206_s30 + $0xc] sm:$0xff] (%p51_p3), %v229_v1  ;;  %v233_v3 = vld [vmem:[%s212_s29 + $0xd8] sm:$0xff] (%p51_p3)  ;;  %v1064_v4 = vld [vmem:[%s212_s29 + $0x8] sm:$0xf] (%p51_p3) }
  0x14   : > { %232 = vst [vmem:[%s206_s30 + $0x18] sm:$0xff] (%p51_p3), %v231_v2  ;;  %v1066_v5 = vld [vmem:[%s212_s29 + $0x50] sm:$0xf] (%p51_p3)  ;;  %234 = vst [vmem:[%s206_s30 + $0x24] sm:$0xff] (%p51_p3), %v233_v3  ;;  %v1068_v6 = vld [vmem:[%s212_s29 + $0x98] sm:$0xf] (%p51_p3) }
  0x15   : > { %1065 = vst [vmem:[%s206_s30 + $0x8] sm:$0xf] %v1064_v4  ;;  %1067 = vst [vmem:[%s206_s30 + $0x14] sm:$0xf] %v1066_v5  ;;  %v1070_v7 = vld [vmem:[%s212_s29 + $0xe0] sm:$0xf] }
  0x16   : > { %1069 = vst [vmem:[%s206_s30 + $0x20] sm:$0xf] %v1068_v6  ;;  %1071 = vst [vmem:[%s206_s30 + $0x2c] sm:$0xf] %v1070_v7 }
  0x17 PF: > { %p1072_p6 = scmp.ge.s32.totalorder %s1315_s19, 1  ;;  %p269_p7 = scmp.lt.s32.totalorder %s1315_s19, 7 }
  0x19   : > { %p270_p8 = pnand %p1072_p6, %p269_p7 }
  0x1a   : > { %s276_s5 = sand.u32 (!%p270_p8), 1, %s1299_s15   ;;  %s326_s6 = smul.u32 (!%p270_p8), 48, %s1307_s17 }
  0x1b   : > { %273 = sbr.rel (%p270_p8) target bundleno = 350 (0x15e), region = 58  ;;  %p1075_p10 = scmp.ne.s32.totalorder (!%p270_p8), %s1307_s17, 0 }
  0x1c   : > { %s1154_s7 = smul.u32 (!%p270_p8), 48, %s276_s5  ;;  %p328_p9 = scmp.lt.s32.totalorder (!%p270_p8), %s326_s6, 287 }
  0x1e   : > { %s1396_s12 = scalar_lea.vmem (!%p270_p8), [#allocation3], %s1154_s7 }
  0x22   : > { %s1501_s6 = smov (!%p328_p9, %s326_s6), 287  ;;  %364 = sbr.rel (%p1075_p10) target bundleno = 41 (0x29), region = 66 }
  0x23   : > { %s1140_s8 = sshll.u32 %s1501_s6, 3  ;;  %v1317_v8 = vmov (!%p1075_p10), 0.0  }
  0x24   : > { %s1394_s11 = scalar_lea.vmem %s1490_s1, %s1140_s8  ;;  %365 = vst [vmem:[#allocation2] sm:$0xff] (!%p1075_p10), %v1317_v8  ;;  %366 = vst [vmem:[#allocation2 + $0x8] sm:$0xff] (!%p1075_p10), %v1317_v8 }
  0x25   : > { %367 = vst [vmem:[#allocation2 + $0x10] sm:$0xff] (!%p1075_p10), %v1317_v8  ;;  %368 = vst [vmem:[#allocation2 + $0x18] sm:$0xff] (!%p1075_p10), %v1317_v8 }
  0x26   : > { %369 = vst [vmem:[#allocation2 + $0x20] sm:$0xff] (!%p1075_p10), %v1317_v8  ;;  %370 = vst [vmem:[#allocation2 + $0x28] sm:$0xff] (!%p1075_p10), %v1317_v8 }
  0x27   : > { %371 = vst [vmem:[#allocation2 + $0x30] sm:$0xff] (!%p1075_p10), %v1317_v8  ;;  %372 = vst [vmem:[#allocation2 + $0x38] sm:$0xff] (!%p1075_p10), %v1317_v8 }
  0x29 PF: > { %v1197_v9 = vld [vmem:[%s1394_s11 + $0x4] ss:$8 sps:$4 sm:$0xff]   ;;  %v1199_v10 = vld [vmem:[%s1394_s11] ss:$8 sps:$4 sm:$0xff]   ;;  %v1318_v11 = vmov 0   ;;  %p1130_p11 = scmp.ne.s32.totalorder %s1307_s17, 5 }
  0x2a   : > { %794 = vmatprep.mubr.bf16.mxu0 %v1318_v11  ;;  %709 = vmatprep.subr.bf16.mxu1 %v1197_v9  ;;  %v1200_v12 = vld [vmem:[%s1394_s11 + $0x14] ss:$8 sps:$4 sm:$0xff]   ;;  %v1202_v13 = vld [vmem:[%s1394_s11 + $0x10] ss:$8 sps:$4 sm:$0xff]   ;;  %v1203_v14 = vld [vmem:[%s1394_s11 + $0x24] ss:$8 sps:$4 sm:$0xff]  }
  0x2b   : > { %710 = vmatpush1.bf16.msra.mxu1 %v1199_v10  ;;  %v1205_v15 = vld [vmem:[%s1394_s11 + $0x20] ss:$8 sps:$4 sm:$0xff]   ;;  %v1206_v16 = vld [vmem:[%s1394_s11 + $0x34] ss:$8 sps:$4 sm:$0xff]   ;;  %v1208_v17 = vld [vmem:[%s1394_s11 + $0x30] ss:$8 sps:$4 sm:$0xff]  }
  0x2c   : > { %711 = vmatprep.subr.bf16.mxu1 %v1200_v12  ;;  %v1221_v18 = vld [vmem:[%s1394_s11 + $0x104] ss:$8 sps:$4 sm:$0xff]   ;;  %v1223_v19 = vld [vmem:[%s1394_s11 + $0x100] ss:$8 sps:$4 sm:$0xff]   ;;  %v1227_v21 = vld [vmem:[%s1394_s11 + $0x114] ss:$8 sps:$4 sm:$0xff]  }
  0x2d   : > { %v1209_v20 = vld [vmem:[%s1394_s11 + $0x44] ss:$8 sps:$4 sm:$0xff]   ;;  %762 = vmatprep.subr.bf16.mxu0 %v1221_v18  ;;  %v1229_v22 = vld [vmem:[%s1394_s11 + $0x110] ss:$8 sps:$4 sm:$0xff]   ;;  %v1211_v23 = vld [vmem:[%s1394_s11 + $0x40] ss:$8 sps:$4 sm:$0xff]  }
  0x2e   : > { %763 = vmatpush1.bf16.msra.mxu0 %v1223_v19  ;;  %v1212_v24 = vld [vmem:[%s1394_s11 + $0x54] ss:$8 sps:$4 sm:$0xff]   ;;  %v1233_v25 = vld [vmem:[%s1394_s11 + $0x124] ss:$8 sps:$4 sm:$0xff]   ;;  %v1235_v26 = vld [vmem:[%s1394_s11 + $0x120] ss:$8 sps:$4 sm:$0xff]  }
  0x2f   : > { %712 = vmatpush1.bf16.msra.mxu1 %v1202_v13  ;;  %764 = vmatprep.subr.bf16.mxu0 %v1227_v21  ;;  %v1214_v27 = vld [vmem:[%s1394_s11 + $0x50] ss:$8 sps:$4 sm:$0xff]   ;;  %v1239_v28 = vld [vmem:[%s1394_s11 + $0x134] ss:$8 sps:$4 sm:$0xff]   ;;  %v1215_v29 = vld [vmem:[%s1394_s11 + $0x64] ss:$8 sps:$4 sm:$0xff]  }
  0x30   : > { %713 = vmatprep.subr.bf16.mxu1 %v1203_v14  ;;  %v1241_v30 = vld [vmem:[%s1394_s11 + $0x130] ss:$8 sps:$4 sm:$0xff]   ;;  %v1217_v31 = vld [vmem:[%s1394_s11 + $0x60] ss:$8 sps:$4 sm:$0xff]   ;;  %v1245_v32 = vld [vmem:[%s1394_s11 + $0x144] ss:$8 sps:$4 sm:$0xff]  }
  0x31   : > { %v1218_v33 = vld [vmem:[%s1394_s11 + $0x74] ss:$8 sps:$4 sm:$0xff]   ;;  %v1247_v34 = vld [vmem:[%s1394_s11 + $0x140] ss:$8 sps:$4 sm:$0xff]   ;;  %v1220_v35 = vld [vmem:[%s1394_s11 + $0x70] ss:$8 sps:$4 sm:$0xff]  }
  0x32   : > { %765 = vmatpush1.bf16.msra.mxu0 %v1229_v22  ;;  %v1251_v36 = vld [vmem:[%s1394_s11 + $0x154] ss:$8 sps:$4 sm:$0xff]   ;;  %v1224_v37 = vld [vmem:[%s1394_s11 + $0x84] ss:$8 sps:$4 sm:$0xff]   ;;  %v1253_v38 = vld [vmem:[%s1394_s11 + $0x150] ss:$8 sps:$4 sm:$0xff]  }
  0x33   : > { %714 = vmatpush1.bf16.msra.mxu1 %v1205_v15  ;;  %766 = vmatprep.subr.bf16.mxu0 %v1233_v25  ;;  %v1226_v39 = vld [vmem:[%s1394_s11 + $0x80] ss:$8 sps:$4 sm:$0xff]   ;;  %v1257_v40 = vld [vmem:[%s1394_s11 + $0x164] ss:$8 sps:$4 sm:$0xff]   ;;  %v1230_v41 = vld [vmem:[%s1394_s11 + $0x94] ss:$8 sps:$4 sm:$0xff]  }
  0x34   : > { %715 = vmatprep.subr.bf16.mxu1 %v1206_v16  ;;  %v1232_v42 = vld [vmem:[%s1394_s11 + $0x90] ss:$8 sps:$4 sm:$0xff]   ;;  %v1259_v43 = vld [vmem:[%s1394_s11 + $0x160] ss:$8 sps:$4 sm:$0xff]   ;;  %v1263_v45 = vld [vmem:[%s1394_s11 + $0x174] ss:$8 sps:$4 sm:$0xff]  }
  0x35   : > { %v1272_v44 = vld [vmem:[%s1396_s12 + $0x4] ss:$12 sps:$4 sm:$0xff]   ;;  %v1269_v50 = vld [vmem:[%s1396_s12 + $0x8] ss:$12 sps:$4 sm:$0xff]   ;;  %v1273_v55 = vld [vmem:[%s1396_s12 + $0x20] ss:$12 sps:$4 sm:$0xff]  }
  0x36   : > { %767 = vmatpush1.bf16.msra.mxu0 %v1235_v26  ;;  %v1236_v46 = vld [vmem:[%s1394_s11 + $0xa4] ss:$8 sps:$4 sm:$0xff]   ;;  %741 = vmatprep.mubr.bf16.mxu1 %v1272_v44  ;;  %v1265_v47 = vld [vmem:[%s1394_s11 + $0x170] ss:$8 sps:$4 sm:$0xff]   ;;  %v1238_v48 = vld [vmem:[%s1394_s11 + $0xa0] ss:$8 sps:$4 sm:$0xff]  }
  0x37   : > { %716 = vmatpush1.bf16.msra.mxu1 %v1208_v17  ;;  %768 = vmatprep.subr.bf16.mxu0 %v1239_v28  ;;  %v1242_v49 = vld [vmem:[%s1394_s11 + $0xb4] ss:$8 sps:$4 sm:$0xff]   ;;  %v1244_v51 = vld [vmem:[%s1394_s11 + $0xb0] ss:$8 sps:$4 sm:$0xff]   ;;  %v1248_v52 = vld [vmem:[%s1394_s11 + $0xc4] ss:$8 sps:$4 sm:$0xff]  }
  0x38   : > { %717 = vmatprep.subr.bf16.mxu1 %v1209_v20  ;;  %v1250_v53 = vld [vmem:[%s1394_s11 + $0xc0] ss:$8 sps:$4 sm:$0xff]   ;;  %v1254_v54 = vld [vmem:[%s1394_s11 + $0xd4] ss:$8 sps:$4 sm:$0xff]   ;;  %v1256_v56 = vld [vmem:[%s1394_s11 + $0xd0] ss:$8 sps:$4 sm:$0xff]  }
  0x39   : > { %v1260_v57 = vld [vmem:[%s1394_s11 + $0xe4] ss:$8 sps:$4 sm:$0xff]   ;;  %v1262_v58 = vld [vmem:[%s1394_s11 + $0xe0] ss:$8 sps:$4 sm:$0xff]   ;;  %v1266_v59 = vld [vmem:[%s1394_s11 + $0xf4] ss:$8 sps:$4 sm:$0xff]  }
  0x3a   : > { %769 = vmatpush1.bf16.msra.mxu0 %v1241_v30  ;;  %v1268_v60 = vld [vmem:[%s1394_s11 + $0xf0] ss:$8 sps:$4 sm:$0xff]   ;;  %v373_v8 = vld [vmem:[#allocation2] sm:$0xff] }
  0x3b   : > { %718 = vmatpush1.bf16.msra.mxu1 %v1211_v23  ;;  %770 = vmatprep.subr.bf16.mxu0 %v1245_v32  ;;  %v1270_v61 = vld [vmem:[%s1396_s12] ss:$12 sps:$4 sm:$0xff]   ;;  %v1274_v62 = vld [vmem:[%s1396_s12 + $0x1c] ss:$12 sps:$4 sm:$0xff]   ;;  %v1276_v63 = vld [vmem:[%s1396_s12 + $0x18] ss:$12 sps:$4 sm:$0xff]  }
  0x3c   : > { %719 = vmatprep.subr.bf16.mxu1 %v1212_v24  ;;  %v375_v14 = vld [vmem:[#allocation2 + $0x10] sm:$0xff]  ;;  %v376_v18 = vld [vmem:[#allocation2 + $0x18] sm:$0xff]  ;;  %v377_v24 = vld [vmem:[#allocation2 + $0x20] sm:$0xff] }
  0x3d   : > { %v379_v30 = vld [vmem:[#allocation2 + $0x30] sm:$0xff] }
  0x3e   : > { %771 = vmatpush1.bf16.msra.mxu0 %v1247_v34  ;;  %v380_v34 = vld [vmem:[#allocation2 + $0x38] sm:$0xff] }
  0x3f   : > { %720 = vmatpush1.bf16.msra.mxu1 %v1214_v27  ;;  %772 = vmatprep.subr.bf16.mxu0 %v1251_v36  ;;  %v378_v27 = vld [vmem:[#allocation2 + $0x28] sm:$0xff] }
  0x40   : > { %721 = vmatprep.subr.bf16.mxu1 %v1215_v29 }
  0x42   : > { %773 = vmatpush1.bf16.msra.mxu0 %v1253_v38 }
  0x43   : > { %722 = vmatpush1.bf16.msra.mxu1 %v1217_v31  ;;  %774 = vmatprep.subr.bf16.mxu0 %v1257_v40  ;;  %v845_v40 = vlaneseq (!%p1130_p11) }
  0x44   : > { %723 = vmatprep.subr.bf16.mxu1 %v1218_v33 }
  0x46   : > { %775 = vmatpush1.bf16.msra.mxu0 %v1259_v43  ;;  %v863_v43 = vld [vmem:[%s1492_s3] sm:$0x3] (!%p1130_p11) }
  0x47   : > { %724 = vmatpush1.bf16.msra.mxu1 %v1220_v35  ;;  %776 = vmatprep.subr.bf16.mxu0 %v1263_v45 }
  0x48   : > { %725 = vmatprep.subr.bf16.mxu1 %v1224_v37 }
  0x4a   : > { %777 = vmatpush1.bf16.msra.mxu0 %v1265_v47 }
  0x4b   : > { %726 = vmatpush1.bf16.msra.mxu1 %v1226_v39 }
  0x4c   : > { %727 = vmatprep.subr.bf16.mxu1 %v1230_v41  ;;  %v846_v41 = vshrl.u32 (!%p1130_p11), %v845_v40, 7 }
  0x4d   : > { %795 = vmatmul.mubr.bf16.vlgmr.msra.gmra.mrb[0].mxu0 %v1269_v50 }
  0x4e   : > { %804 = vmatprep.mubr.bf16.mxu0 %v1318_v11  ;;  %v374_v11 = vld [vmem:[#allocation2 + $0x8] sm:$0xff]  ;;  %v851_v47 = vsub.s32 (!%p1130_p11), 1, %v846_v41 }
  0x4f   : > { %728 = vmatpush1.bf16.msra.mxu1 %v1232_v42  ;;  %v843_v42 = vld [vmem:[%s1491_s2] sm:$0x3] (!%p1130_p11) }
  0x50   : > { %729 = vmatprep.subr.bf16.mxu1 %v1236_v46  ;;  %v847_v46 = vsub.s32 (!%p1130_p11), 0, %v846_v41 }
  0x53   : > { %730 = vmatpush1.bf16.msra.mxu1 %v1238_v48 }
  0x54   : > { %731 = vmatprep.subr.bf16.mxu1 %v1242_v49 }
  0x55   : > { %805 = vmatmul.mubr.bf16.gmra.mrb[4].mxu0 %v1273_v55 }
  0x57   : > { %732 = vmatpush1.bf16.msra.mxu1 %v1244_v51  ;;  %v848_v51 = vrot.slane (!%p1130_p11), %v843_v42, %v847_v46 }
  0x58   : > { %733 = vmatprep.subr.bf16.mxu1 %v1248_v52  ;;  %v852_v52 = vrot.slane (!%p1130_p11), %v843_v42, %v851_v47 }
  0x5b   : > { %734 = vmatpush1.bf16.msra.mxu1 %v1250_v53  ;;  %v868_v53 = vrot.slane (!%p1130_p11), %v863_v43, %v847_v46 }
  0x5c   : > { %735 = vmatprep.subr.bf16.mxu1 %v1254_v54  ;;  %v872_v54 = vrot.slane (!%p1130_p11), %v863_v43, %v851_v47 }
  0x5f   : > { %736 = vmatpush1.bf16.msra.mxu1 %v1256_v56 }
  0x60   : > { %737 = vmatprep.subr.bf16.mxu1 %v1260_v57 }
  0x63   : > { %738 = vmatpush1.bf16.msra.mxu1 %v1262_v58 }
  0x64   : > { %739 = vmatprep.subr.bf16.mxu1 %v1266_v59 }
  0x67   : > { %740 = vmatpush1.bf16.msra.mxu1 %v1268_v60 }
  0x6a   : > { %742 = vmatmul.mubr.bf16.vlgmr.msra.gmra.mrb[0].mxu1 %v1270_v61 }
  0x6b   : > { %751 = vmatprep.mubr.bf16.mxu1 %v1274_v62 }
  0x72   : > { %752 = vmatmul.mubr.bf16.gmra.mrb[4].mxu1 %v1276_v63 }
 0x120   : > { %v796_v0 = vpop.f32.mrb[0].mxu0 }
 0x121   : > { %v798_v1 = vpop.f32.mrb[1].mxu0 }
 0x122   : > { %v800_v2 = vpop.f32.mrb[2].mxu0 }
 0x123   : > { %v802_v3 = vpop.f32.mrb[3].mxu0 }
 0x128   : > { %v806_v4 = vpop.f32.mrb[4].mxu0 }
 0x129   : > { %v808_v5 = vpop.f32.mrb[5].mxu0 }
 0x12a   : > { %v810_v6 = vpop.f32.mrb[6].mxu0 }
 0x12b   : > { %v812_v7 = vpop.f32.mrb[7].mxu0 }
 0x13d   : > { %v743_v9 = vpop.f32.mrb[0].mxu1 }
 0x13e   : > { %v797_v10 = vadd.f32 %v796_v0, %v743_v9  ;;  %v745_v12 = vpop.f32.mrb[1].mxu1 }
 0x13f   : > { %v799_v13 = vadd.f32 %v798_v1, %v745_v12  ;;  %v747_v15 = vpop.f32.mrb[2].mxu1 }
 0x140   : > { %v815_v16 = vadd.f32 %v797_v10, %v373_v8  ;;  %v801_v17 = vadd.f32 %v800_v2, %v747_v15  ;;  %v749_v19 = vpop.f32.mrb[3].mxu1 }
 0x141   : > { %v816_v20 = vadd.f32 %v799_v13, %v374_v11  ;;  %v803_v21 = vadd.f32 %v802_v3, %v749_v19 }
 0x142   : > { %823 = vst [vmem:[#allocation2] sm:$0xff] %v815_v16  ;;  %v817_v22 = vadd.f32 %v801_v17, %v375_v14 }
 0x143   : > { %824 = vst [vmem:[#allocation2 + $0x8] sm:$0xff] %v816_v20  ;;  %v818_v23 = vadd.f32 %v803_v21, %v376_v18 }
 0x144   : > { %825 = vst [vmem:[#allocation2 + $0x10] sm:$0xff] %v817_v22 }
 0x145   : > { %826 = vst [vmem:[#allocation2 + $0x18] sm:$0xff] %v818_v23  ;;  %v753_v25 = vpop.f32.mrb[4].mxu1 }
 0x146   : > { %v807_v26 = vadd.f32 %v806_v4, %v753_v25  ;;  %v755_v28 = vpop.f32.mrb[5].mxu1 }
 0x147   : > { %v809_v29 = vadd.f32 %v808_v5, %v755_v28  ;;  %v757_v31 = vpop.f32.mrb[6].mxu1  ;;  %834 = sbr.rel (%p1130_p11) target bundleno = 350 (0x15e), region = 70 }
 0x148   : > { %v819_v32 = vadd.f32 %v807_v26, %v377_v24  ;;  %v811_v33 = vadd.f32 %v810_v6, %v757_v31  ;;  %v759_v35 = vpop.f32.mrb[7].mxu1 }
 0x149   : > { %v820_v36 = vadd.f32 %v809_v29, %v378_v27  ;;  %v813_v37 = vadd.f32 %v812_v7, %v759_v35  ;;  %v835_v44 = vld [vmem:[#allocation2] sm:$0xff] (!%p1130_p11) }
 0x14a   : > { %827 = vst [vmem:[#allocation2 + $0x20] sm:$0xff] %v819_v32  ;;  %v821_v38 = vadd.f32 %v811_v33, %v379_v30  ;;  %v836_v45 = vld [vmem:[#allocation2 + $0x8] sm:$0xff] (!%p1130_p11)  ;;  %v855_v58 = vmul.f32 (!%p1130_p11), %v848_v51, %v835_v44 }
 0x14b   : > { %828 = vst [vmem:[#allocation2 + $0x28] sm:$0xff] %v820_v36  ;;  %v822_v39 = vadd.f32 %v813_v37, %v380_v34  ;;  %v837_v48 = vld [vmem:[#allocation2 + $0x10] sm:$0xff] (!%p1130_p11)  ;;  %v856_v59 = vmul.f32 (!%p1130_p11), %v852_v52, %v836_v45 }
 0x14c   : > { %829 = vst [vmem:[#allocation2 + $0x30] sm:$0xff] %v821_v38  ;;  %v838_v49 = vld [vmem:[#allocation2 + $0x18] sm:$0xff] (!%p1130_p11)  ;;  %v857_v60 = vmul.f32 (!%p1130_p11), %v848_v51, %v837_v48  ;;  %v875_v2 = vadd.f32 (!%p1130_p11), %v868_v53, %v855_v58 }
 0x14d   : > { %830 = vst [vmem:[#allocation2 + $0x38] sm:$0xff] %v822_v39  ;;  %v858_v61 = vmul.f32 (!%p1130_p11), %v852_v52, %v838_v49  ;;  %v876_v3 = vadd.f32 (!%p1130_p11), %v872_v54, %v856_v59 }
 0x14e   : > { %v877_v4 = vadd.f32 %v868_v53, %v857_v60  ;;  %v883_v10 = vmax.f32 %v875_v2, 0.0 }
 0x14f   : > { %v878_v5 = vadd.f32 %v872_v54, %v858_v61  ;;  %v884_v11 = vmax.f32 %v876_v3, 0.0 }
 0x150   : > { %v885_v12 = vmax.f32 %v877_v4, 0.0 }
 0x151   : > { %v839_v50 = vld [vmem:[#allocation2 + $0x20] sm:$0xff]  ;;  %v886_v13 = vmax.f32 %v878_v5, 0.0  ;;  %v1141_v18 = vpack.c.bf16 %v884_v11, %v883_v10 }
 0x152   : > { %v840_v55 = vld [vmem:[#allocation2 + $0x28] sm:$0xff]  ;;  %v859_v62 = vmul.f32 %v848_v51, %v839_v50 }
 0x153   : > { %v841_v56 = vld [vmem:[#allocation2 + $0x30] sm:$0xff]  ;;  %v860_v63 = vmul.f32 %v852_v52, %v840_v55  ;;  %v1142_v19 = vpack.c.bf16 %v886_v13, %v885_v12  ;;  %915 = vst [vmem:[%s1493_s4] sm:$0xff] %v1141_v18 }
 0x154   : > { %v842_v57 = vld [vmem:[#allocation2 + $0x38] sm:$0xff]  ;;  %v861_v0 = vmul.f32 %v848_v51, %v841_v56  ;;  %v879_v6 = vadd.f32 %v868_v53, %v859_v62 }
 0x155   : > { %v862_v1 = vmul.f32 %v852_v52, %v842_v57  ;;  %v880_v7 = vadd.f32 %v872_v54, %v860_v63  ;;  %916 = vst [vmem:[%s1493_s4 + $0x8] sm:$0xff] %v1142_v19 }
 0x156   : > { %v881_v8 = vadd.f32 %v868_v53, %v861_v0  ;;  %v887_v14 = vmax.f32 %v879_v6, 0.0 }
 0x157   : > { %v882_v9 = vadd.f32 %v872_v54, %v862_v1  ;;  %v888_v15 = vmax.f32 %v880_v7, 0.0 }
 0x158   : > { %v889_v16 = vmax.f32 %v881_v8, 0.0 }
 0x159   : > { %v890_v17 = vmax.f32 %v882_v9, 0.0  ;;  %v1143_v20 = vpack.c.bf16 %v888_v15, %v887_v14 }
 0x15b   : > { %v1144_v21 = vpack.c.bf16 %v890_v17, %v889_v16  ;;  %917 = vst [vmem:[%s1493_s4 + $0x10] sm:$0xff] %v1143_v20 }
 0x15d   : > { %918 = vst [vmem:[%s1493_s4 + $0x18] sm:$0xff] %v1144_v21 }
 0x15e PF: > { %s14_s19 = sadd.s32 1, %s1315_s19   ;;  %s1494_s15 = smov %s1303_s16 }
 0x15f   : > { %p11_p12 = scmp.ge.s32.totalorder %s14_s19, 8   ;;  %s1495_s16 = smov %s1379_s23 }
 0x160   : > { %s1496_s17 = smov %s1311_s18  ;;  %s1497_s18 = smov %s1499_s20 }
 0x161   :  { %13 = sbr.rel (!%p11_p12) target bundleno = 3 (0x3), region = 120 }

// kernel: bcnn_forward.26
= control target key start
LH: loop header
LB: loop body
LE: loop exit
PB: predicated region body
PF: predicated region fallthrough
CT: control target
= control target key end

     0   :  { %s1394_s15 = smov 0   ;;  %s1396_s16 = smov 0   ;;  %s1666_s0 = inlined_call_operand.vmem [shape: bf16[8,2304], index: 0, kind: input, shape index: {}]   ;;  %s1667_s1 = inlined_call_operand.vmem [shape: bf16[2304,512], index: 1, kind: input, shape index: {}]   ;;  %s1668_s2 = inlined_call_operand.vmem [shape: f32[1,512], index: 2, kind: input, shape index: {}]   ;;  %s1669_s3 = inlined_call_operand.vmem [shape: f32[1,512], index: 3, kind: input, shape index: {}]   ;;  %s1670_s4 = inlined_call_operand.vmem [shape: bf16[8,512], index: 4, kind: output, shape index: {}]  }
   0x1   :  { %s1398_s17 = smov 0   ;;  %s1400_s18 = smov 0  }
   0x2   :  { %s1402_s19 = smov 0   ;;  %s1404_s20 = smov 0  }
   0x3   :  { %s1406_s21 = smov 0  }
   0x4 LB: > { %s26_s22 = sadd.s32 1, %s1357_s19  ;;  %s29_s23 = sadd.s32 1, %s1361_s20  ;;  %s1365_s21 = sphi %s1406_s21, %s14_s21   ;;  %s1361_s20 = sphi %s1404_s20, %s1676_s20   ;;  %s1357_s19 = sphi %s1402_s19, %s1675_s19   ;;  %s1353_s18 = sphi %s1400_s18, %s1674_s18   ;;  %s1349_s17 = sphi %s1398_s17, %s1673_s17   ;;  %s1345_s16 = sphi %s1396_s16, %s1672_s16   ;;  %s1341_s15 = sphi %s1394_s15, %s1671_s15  }
   0x5   : > { %p27_p0 = scmp.ge.s32.totalorder %s26_s22, 6  ;;  %p77_p1 = scmp.ne.s32.totalorder %s1345_s16, %s1341_s15 }
   0x6   : > { %p78_p2 = scmp.eq.s32.totalorder %s1365_s21, 0  ;;  %s70_s27 = sadd.s32 1, %s1345_s16 }
   0x7   : > { %s1678_s22 = smov (%p27_p0, %s26_s22), 0  ;;  %s1680_s23 = smov (!%p27_p0, %s29_s23), %s1361_s20 }
   0x8   : > { %p79_p3 = por %p78_p2, %p77_p1  ;;  %p31_p4 = scmp.ge.s32.totalorder %s1680_s23, 2 }
   0x9   : > { %s65_s24 = ssub.s32 %s1357_s19, %s1678_s22  ;;  %p1108_p6 = scmp.ge.s32.totalorder %s1365_s21, 12 }
   0xa   : > { %s1682_s23 = smov (%p31_p4, %s1680_s23), 0 }
   0xb   : > { %s66_s25 = ssub.s32 %s1361_s20, %s1682_s23  ;;  %183 = sbr.rel (%p1108_p6) target bundleno = 50 (0x32), region = 16 }
   0xc   : > { %s67_s26 = sor.u32 %s66_s25, %s65_s24 }
   0xd   : > { %p68_p5 = scmp.eq.s32.totalorder %s67_s26, 0 }
   0xf   : > { %s1445_s28 = scalar_select %p68_p5, %s1345_s16, %s70_s27  }
  0x12   : > { %199 = sbr.rel (!%p79_p3) target bundleno = 50 (0x32), region = 24  ;;  %s201_s29 = sand.u32 (%p79_p3), 1, %s1345_s16  }
  0x13   : > { %s1176_s30 = smul.u32 (%p79_p3), 384, %s201_s29  ;;  %s1109_s5 = sshll.u32 (%p79_p3), %s1361_s20, 1 }
  0x14   : > { %s1174_s6 = smul.u32 (%p79_p3), 192, %s1357_s19 }
  0x15   : > { %s1459_s12 = scalar_lea.vmem (%p79_p3), [#allocation3], %s1176_s30 }
  0x16   : > { %s207_s7 = sadd.s32 (%p79_p3), %s1174_s6, %s1109_s5 }
  0x17   : > { %s1111_s8 = sshll.u32 (%p79_p3), %s207_s7, 2 }
  0x18   : > { %s1454_s11 = scalar_lea.vmem (%p79_p3), %s1667_s1, %s1111_s8 }
  0x19   : > { %v331_v0 = vld [vmem:[%s1454_s11] sm:$0xff]  ;;  %v333_v1 = vld [vmem:[%s1454_s11 + $0x10] sm:$0xff] }
  0x1a   : > { %v335_v2 = vld [vmem:[%s1454_s11 + $0x20] sm:$0xff]  ;;  %332 = vst [vmem:[%s1459_s12] sm:$0xff] %v331_v0  ;;  %334 = vst [vmem:[%s1459_s12 + $0x8] sm:$0xff] %v333_v1  ;;  %v337_v3 = vld [vmem:[%s1454_s11 + $0x30] sm:$0xff] }
  0x1b   : > { %336 = vst [vmem:[%s1459_s12 + $0x10] sm:$0xff] %v335_v2  ;;  %v339_v4 = vld [vmem:[%s1454_s11 + $0x40] sm:$0xff]  ;;  %v341_v5 = vld [vmem:[%s1454_s11 + $0x50] sm:$0xff]  ;;  %338 = vst [vmem:[%s1459_s12 + $0x18] sm:$0xff] %v337_v3 }
  0x1c   : > { %340 = vst [vmem:[%s1459_s12 + $0x20] sm:$0xff] %v339_v4  ;;  %342 = vst [vmem:[%s1459_s12 + $0x28] sm:$0xff] %v341_v5  ;;  %v343_v6 = vld [vmem:[%s1454_s11 + $0x60] sm:$0xff]  ;;  %v345_v7 = vld [vmem:[%s1454_s11 + $0x70] sm:$0xff] }
  0x1d   : > { %v347_v8 = vld [vmem:[%s1454_s11 + $0x80] sm:$0xff]  ;;  %344 = vst [vmem:[%s1459_s12 + $0x30] sm:$0xff] %v343_v6  ;;  %346 = vst [vmem:[%s1459_s12 + $0x38] sm:$0xff] %v345_v7  ;;  %v349_v9 = vld [vmem:[%s1454_s11 + $0x90] sm:$0xff] }
  0x1e   : > { %348 = vst [vmem:[%s1459_s12 + $0x40] sm:$0xff] %v347_v8  ;;  %v351_v10 = vld [vmem:[%s1454_s11 + $0xa0] sm:$0xff]  ;;  %v353_v11 = vld [vmem:[%s1454_s11 + $0xb0] sm:$0xff]  ;;  %350 = vst [vmem:[%s1459_s12 + $0x48] sm:$0xff] %v349_v9 }
  0x1f   : > { %352 = vst [vmem:[%s1459_s12 + $0x50] sm:$0xff] %v351_v10  ;;  %354 = vst [vmem:[%s1459_s12 + $0x58] sm:$0xff] %v353_v11  ;;  %v355_v12 = vld [vmem:[%s1454_s11 + $0xc0] sm:$0xff]  ;;  %v357_v13 = vld [vmem:[%s1454_s11 + $0xd0] sm:$0xff] }
  0x20   : > { %v359_v14 = vld [vmem:[%s1454_s11 + $0xe0] sm:$0xff]  ;;  %356 = vst [vmem:[%s1459_s12 + $0x60] sm:$0xff] %v355_v12  ;;  %358 = vst [vmem:[%s1459_s12 + $0x68] sm:$0xff] %v357_v13  ;;  %v361_v15 = vld [vmem:[%s1454_s11 + $0xf0] sm:$0xff] }
  0x21   : > { %360 = vst [vmem:[%s1459_s12 + $0x70] sm:$0xff] %v359_v14  ;;  %v363_v16 = vld [vmem:[%s1454_s11 + $0x100] sm:$0xff]  ;;  %v365_v17 = vld [vmem:[%s1454_s11 + $0x110] sm:$0xff]  ;;  %362 = vst [vmem:[%s1459_s12 + $0x78] sm:$0xff] %v361_v15 }
  0x22   : > { %364 = vst [vmem:[%s1459_s12 + $0x80] sm:$0xff] %v363_v16  ;;  %366 = vst [vmem:[%s1459_s12 + $0x88] sm:$0xff] %v365_v17  ;;  %v367_v18 = vld [vmem:[%s1454_s11 + $0x120] sm:$0xff]  ;;  %v369_v19 = vld [vmem:[%s1454_s11 + $0x130] sm:$0xff] }
  0x23   : > { %v371_v20 = vld [vmem:[%s1454_s11 + $0x140] sm:$0xff]  ;;  %368 = vst [vmem:[%s1459_s12 + $0x90] sm:$0xff] %v367_v18  ;;  %370 = vst [vmem:[%s1459_s12 + $0x98] sm:$0xff] %v369_v19  ;;  %v373_v21 = vld [vmem:[%s1454_s11 + $0x150] sm:$0xff] }
  0x24   : > { %372 = vst [vmem:[%s1459_s12 + $0xa0] sm:$0xff] %v371_v20  ;;  %v375_v22 = vld [vmem:[%s1454_s11 + $0x160] sm:$0xff]  ;;  %v377_v23 = vld [vmem:[%s1454_s11 + $0x170] sm:$0xff]  ;;  %374 = vst [vmem:[%s1459_s12 + $0xa8] sm:$0xff] %v373_v21 }
  0x25   : > { %376 = vst [vmem:[%s1459_s12 + $0xb0] sm:$0xff] %v375_v22  ;;  %378 = vst [vmem:[%s1459_s12 + $0xb8] sm:$0xff] %v377_v23  ;;  %v379_v24 = vld [vmem:[%s1454_s11 + $0x180] sm:$0xff]  ;;  %v381_v25 = vld [vmem:[%s1454_s11 + $0x190] sm:$0xff] }
  0x26   : > { %v383_v26 = vld [vmem:[%s1454_s11 + $0x1a0] sm:$0xff]  ;;  %380 = vst [vmem:[%s1459_s12 + $0xc0] sm:$0xff] %v379_v24  ;;  %382 = vst [vmem:[%s1459_s12 + $0xc8] sm:$0xff] %v381_v25  ;;  %v385_v27 = vld [vmem:[%s1454_s11 + $0x1b0] sm:$0xff] }
  0x27   : > { %384 = vst [vmem:[%s1459_s12 + $0xd0] sm:$0xff] %v383_v26  ;;  %v387_v28 = vld [vmem:[%s1454_s11 + $0x1c0] sm:$0xff]  ;;  %v389_v29 = vld [vmem:[%s1454_s11 + $0x1d0] sm:$0xff]  ;;  %386 = vst [vmem:[%s1459_s12 + $0xd8] sm:$0xff] %v385_v27 }
  0x28   : > { %388 = vst [vmem:[%s1459_s12 + $0xe0] sm:$0xff] %v387_v28  ;;  %390 = vst [vmem:[%s1459_s12 + $0xe8] sm:$0xff] %v389_v29  ;;  %v391_v30 = vld [vmem:[%s1454_s11 + $0x1e0] sm:$0xff]  ;;  %v393_v31 = vld [vmem:[%s1454_s11 + $0x1f0] sm:$0xff] }
  0x29   : > { %v395_v32 = vld [vmem:[%s1454_s11 + $0x200] sm:$0xff]  ;;  %392 = vst [vmem:[%s1459_s12 + $0xf0] sm:$0xff] %v391_v30  ;;  %394 = vst [vmem:[%s1459_s12 + $0xf8] sm:$0xff] %v393_v31  ;;  %v397_v33 = vld [vmem:[%s1454_s11 + $0x210] sm:$0xff] }
  0x2a   : > { %396 = vst [vmem:[%s1459_s12 + $0x100] sm:$0xff] %v395_v32  ;;  %v399_v34 = vld [vmem:[%s1454_s11 + $0x220] sm:$0xff]  ;;  %v401_v35 = vld [vmem:[%s1454_s11 + $0x230] sm:$0xff]  ;;  %398 = vst [vmem:[%s1459_s12 + $0x108] sm:$0xff] %v397_v33 }
  0x2b   : > { %400 = vst [vmem:[%s1459_s12 + $0x110] sm:$0xff] %v399_v34  ;;  %402 = vst [vmem:[%s1459_s12 + $0x118] sm:$0xff] %v401_v35  ;;  %v403_v36 = vld [vmem:[%s1454_s11 + $0x240] sm:$0xff]  ;;  %v405_v37 = vld [vmem:[%s1454_s11 + $0x250] sm:$0xff] }
  0x2c   : > { %v407_v38 = vld [vmem:[%s1454_s11 + $0x260] sm:$0xff]  ;;  %404 = vst [vmem:[%s1459_s12 + $0x120] sm:$0xff] %v403_v36  ;;  %406 = vst [vmem:[%s1459_s12 + $0x128] sm:$0xff] %v405_v37  ;;  %v409_v39 = vld [vmem:[%s1454_s11 + $0x270] sm:$0xff] }
  0x2d   : > { %408 = vst [vmem:[%s1459_s12 + $0x130] sm:$0xff] %v407_v38  ;;  %v411_v40 = vld [vmem:[%s1454_s11 + $0x280] sm:$0xff]  ;;  %v413_v41 = vld [vmem:[%s1454_s11 + $0x290] sm:$0xff]  ;;  %410 = vst [vmem:[%s1459_s12 + $0x138] sm:$0xff] %v409_v39 }
  0x2e   : > { %412 = vst [vmem:[%s1459_s12 + $0x140] sm:$0xff] %v411_v40  ;;  %414 = vst [vmem:[%s1459_s12 + $0x148] sm:$0xff] %v413_v41  ;;  %v415_v42 = vld [vmem:[%s1454_s11 + $0x2a0] sm:$0xff]  ;;  %v417_v43 = vld [vmem:[%s1454_s11 + $0x2b0] sm:$0xff] }
  0x2f   : > { %v419_v44 = vld [vmem:[%s1454_s11 + $0x2c0] sm:$0xff]  ;;  %416 = vst [vmem:[%s1459_s12 + $0x150] sm:$0xff] %v415_v42  ;;  %418 = vst [vmem:[%s1459_s12 + $0x158] sm:$0xff] %v417_v43  ;;  %v421_v45 = vld [vmem:[%s1454_s11 + $0x2d0] sm:$0xff] }
  0x30   : > { %420 = vst [vmem:[%s1459_s12 + $0x160] sm:$0xff] %v419_v44  ;;  %v423_v46 = vld [vmem:[%s1454_s11 + $0x2e0] sm:$0xff]  ;;  %v425_v47 = vld [vmem:[%s1454_s11 + $0x2f0] sm:$0xff]  ;;  %422 = vst [vmem:[%s1459_s12 + $0x168] sm:$0xff] %v421_v45 }
  0x31   : > { %424 = vst [vmem:[%s1459_s12 + $0x170] sm:$0xff] %v423_v46  ;;  %426 = vst [vmem:[%s1459_s12 + $0x178] sm:$0xff] %v425_v47 }
  0x32 PF: > { %p1112_p7 = scmp.ge.s32.totalorder %s1365_s21, 1  ;;  %p447_p8 = scmp.lt.s32.totalorder %s1365_s21, 13 }
  0x34   : > { %p448_p9 = pnand %p1112_p7, %p447_p8 }
  0x35   : > { %s454_s13 = sand.u32 (!%p448_p9), 1, %s1341_s15   ;;  %s500_s14 = smul.u32 (!%p448_p9), 3, %s1349_s17 }
  0x36   : > { %451 = sbr.rel (%p448_p9) target bundleno = 370 (0x172), region = 70  ;;  %s1114_s25 = sshll.u32 (!%p448_p9), %s1353_s18, 1 }
  0x37   : > { %s1177_s24 = smul.u32 (!%p448_p9), 384, %s454_s13  ;;  %p503_p10 = scmp.lt.s32.totalorder (!%p448_p9), %s500_s14, 17 }
  0x38   : > { %p513_p11 = scmp.lt.s32.totalorder (!%p448_p9), %s1114_s25, 3  ;;  %p1118_p12 = scmp.ne.s32.totalorder (!%p448_p9), %s1349_s17, 0 }
  0x39   : > { %s1580_s13 = scalar_lea.vmem (!%p448_p9), [#allocation3], %s1177_s24 }
  0x3d   : > { %s1684_s14 = smov (!%p503_p10, %s500_s14), 17  ;;  %s1686_s25 = smov (!%p513_p11, %s1114_s25), 3 }
  0x3e   : > { %s1113_s26 = sshll.u32 %s1684_s14, 2  ;;  %s515_s15 = scalar_lea.vmem %s1668_s2, %s1686_s25  ;;  %v1367_v48 = vmov (!%p1118_p12), 0.0  }
  0x3f   : > { %s1564_s30 = scalar_lea.vmem %s1666_s0, %s1113_s26  ;;  %s520_s8 = scalar_lea.vmem %s1669_s3, %s1686_s25  ;;  %537 = vst [vmem:[#allocation2] sm:$0xff] (!%p1118_p12), %v1367_v48  ;;  %538 = vst [vmem:[#allocation2 + $0x8] sm:$0xff] (!%p1118_p12), %v1367_v48 }
  0x40   : > { %s1117_s9 = sshll.u32 %s1686_s25, 2  ;;  %536 = sbr.rel (%p1118_p12) target bundleno = 71 (0x47), region = 78 }
  0x41   : > { %s1578_s12 = scalar_lea.vmem %s1670_s4, %s1117_s9 }
  0x47 PF: > { %v1236_v49 = vld [vmem:[%s1580_s13 + $0x4] ss:$8 sps:$4 sm:$0xff]   ;;  %v1238_v50 = vld [vmem:[%s1580_s13] ss:$8 sps:$4 sm:$0xff]   ;;  %v1368_v51 = vmov 0   ;;  %v541_v18 = vld [vmem:[%s1564_s30] sm:$0xff] }
  0x48   : > { %915 = vmatprep.mubr.bf16.mxu1 %v1368_v51  ;;  %842 = vmatprep.subr.bf16.mxu0 %v1236_v49  ;;  %v1239_v52 = vld [vmem:[%s1580_s13 + $0x14] ss:$8 sps:$4 sm:$0xff]   ;;  %v1241_v53 = vld [vmem:[%s1580_s13 + $0x10] ss:$8 sps:$4 sm:$0xff]   ;;  %v1242_v54 = vld [vmem:[%s1580_s13 + $0x24] ss:$8 sps:$4 sm:$0xff]   ;;  %v1120_v19 = vcombine.high %v541_v18, %v541_v18  ;;  %v1119_v37 = vcombine.low %v541_v18, %v541_v18 }
  0x49   : > { %843 = vmatpush1.bf16.msra.mxu0 %v1238_v50  ;;  %v1244_v55 = vld [vmem:[%s1580_s13 + $0x20] ss:$8 sps:$4 sm:$0xff]   ;;  %v1245_v56 = vld [vmem:[%s1580_s13 + $0x34] ss:$8 sps:$4 sm:$0xff]   ;;  %v1247_v57 = vld [vmem:[%s1580_s13 + $0x30] ss:$8 sps:$4 sm:$0xff]  }
  0x4a   : > { %844 = vmatprep.subr.bf16.mxu0 %v1239_v52  ;;  %v1260_v58 = vld [vmem:[%s1580_s13 + $0x104] ss:$8 sps:$4 sm:$0xff]   ;;  %v1262_v59 = vld [vmem:[%s1580_s13 + $0x100] ss:$8 sps:$4 sm:$0xff]   ;;  %v1266_v61 = vld [vmem:[%s1580_s13 + $0x114] ss:$8 sps:$4 sm:$0xff]   ;;  %874 = vmatprep.mubr.bf16.mxu0 %v1120_v19 }
  0x4b   : > { %v1248_v60 = vld [vmem:[%s1580_s13 + $0x44] ss:$8 sps:$4 sm:$0xff]   ;;  %883 = vmatprep.subr.bf16.mxu1 %v1260_v58  ;;  %v1268_v62 = vld [vmem:[%s1580_s13 + $0x110] ss:$8 sps:$4 sm:$0xff]   ;;  %v1250_v63 = vld [vmem:[%s1580_s13 + $0x40] ss:$8 sps:$4 sm:$0xff]  }
  0x4c   : > { %884 = vmatpush1.bf16.msra.mxu1 %v1262_v59  ;;  %v1251_v0 = vld [vmem:[%s1580_s13 + $0x54] ss:$8 sps:$4 sm:$0xff]   ;;  %v1272_v1 = vld [vmem:[%s1580_s13 + $0x124] ss:$8 sps:$4 sm:$0xff]   ;;  %v1274_v2 = vld [vmem:[%s1580_s13 + $0x120] ss:$8 sps:$4 sm:$0xff]  }
  0x4d   : > { %845 = vmatpush1.bf16.msra.mxu0 %v1241_v53  ;;  %885 = vmatprep.subr.bf16.mxu1 %v1266_v61  ;;  %v1253_v3 = vld [vmem:[%s1580_s13 + $0x50] ss:$8 sps:$4 sm:$0xff]   ;;  %v1278_v4 = vld [vmem:[%s1580_s13 + $0x134] ss:$8 sps:$4 sm:$0xff]   ;;  %v1254_v5 = vld [vmem:[%s1580_s13 + $0x64] ss:$8 sps:$4 sm:$0xff]  }
  0x4e   : > { %846 = vmatprep.subr.bf16.mxu0 %v1242_v54  ;;  %v1280_v6 = vld [vmem:[%s1580_s13 + $0x130] ss:$8 sps:$4 sm:$0xff]   ;;  %v1256_v7 = vld [vmem:[%s1580_s13 + $0x60] ss:$8 sps:$4 sm:$0xff]   ;;  %v1284_v8 = vld [vmem:[%s1580_s13 + $0x144] ss:$8 sps:$4 sm:$0xff]  }
  0x4f   : > { %v1257_v9 = vld [vmem:[%s1580_s13 + $0x74] ss:$8 sps:$4 sm:$0xff]   ;;  %v1286_v10 = vld [vmem:[%s1580_s13 + $0x140] ss:$8 sps:$4 sm:$0xff]   ;;  %v1259_v11 = vld [vmem:[%s1580_s13 + $0x70] ss:$8 sps:$4 sm:$0xff]  }
  0x50   : > { %886 = vmatpush1.bf16.msra.mxu1 %v1268_v62  ;;  %v1290_v12 = vld [vmem:[%s1580_s13 + $0x154] ss:$8 sps:$4 sm:$0xff]   ;;  %v1263_v13 = vld [vmem:[%s1580_s13 + $0x84] ss:$8 sps:$4 sm:$0xff]   ;;  %v1292_v14 = vld [vmem:[%s1580_s13 + $0x150] ss:$8 sps:$4 sm:$0xff]  }
  0x51   : > { %847 = vmatpush1.bf16.msra.mxu0 %v1244_v55  ;;  %887 = vmatprep.subr.bf16.mxu1 %v1272_v1  ;;  %v1265_v15 = vld [vmem:[%s1580_s13 + $0x80] ss:$8 sps:$4 sm:$0xff]   ;;  %v1296_v16 = vld [vmem:[%s1580_s13 + $0x164] ss:$8 sps:$4 sm:$0xff]   ;;  %v1269_v17 = vld [vmem:[%s1580_s13 + $0x94] ss:$8 sps:$4 sm:$0xff]  }
  0x52   : > { %848 = vmatprep.subr.bf16.mxu0 %v1245_v56  ;;  %v1298_v20 = vld [vmem:[%s1580_s13 + $0x160] ss:$8 sps:$4 sm:$0xff]   ;;  %v1271_v21 = vld [vmem:[%s1580_s13 + $0x90] ss:$8 sps:$4 sm:$0xff]   ;;  %v1302_v22 = vld [vmem:[%s1580_s13 + $0x174] ss:$8 sps:$4 sm:$0xff]  }
  0x53   : > { %v1275_v23 = vld [vmem:[%s1580_s13 + $0xa4] ss:$8 sps:$4 sm:$0xff]   ;;  %v1304_v24 = vld [vmem:[%s1580_s13 + $0x170] ss:$8 sps:$4 sm:$0xff]   ;;  %v1277_v25 = vld [vmem:[%s1580_s13 + $0xa0] ss:$8 sps:$4 sm:$0xff]  }
  0x54   : > { %888 = vmatpush1.bf16.msra.mxu1 %v1274_v2  ;;  %v1281_v26 = vld [vmem:[%s1580_s13 + $0xb4] ss:$8 sps:$4 sm:$0xff]   ;;  %v1308_v27 = vld [vmem:[%s1564_s30 + $0x8] ss:$0 sps:$4 sm:$0xff]   ;;  %v1287_v29 = vld [vmem:[%s1580_s13 + $0xc4] ss:$8 sps:$4 sm:$0xff]  }
  0x55   : > { %849 = vmatpush1.bf16.msra.mxu0 %v1247_v57  ;;  %889 = vmatprep.subr.bf16.mxu1 %v1278_v4  ;;  %v1283_v28 = vld [vmem:[%s1580_s13 + $0xb0] ss:$8 sps:$4 sm:$0xff]   ;;  %v1289_v30 = vld [vmem:[%s1580_s13 + $0xc0] ss:$8 sps:$4 sm:$0xff]   ;;  %v1293_v31 = vld [vmem:[%s1580_s13 + $0xd4] ss:$8 sps:$4 sm:$0xff]  }
  0x56   : > { %850 = vmatprep.subr.bf16.mxu0 %v1248_v60  ;;  %v1295_v32 = vld [vmem:[%s1580_s13 + $0xd0] ss:$8 sps:$4 sm:$0xff]   ;;  %v1299_v33 = vld [vmem:[%s1580_s13 + $0xe4] ss:$8 sps:$4 sm:$0xff]   ;;  %v1301_v34 = vld [vmem:[%s1580_s13 + $0xe0] ss:$8 sps:$4 sm:$0xff]  }
  0x57   : > { %v1305_v35 = vld [vmem:[%s1580_s13 + $0xf4] ss:$8 sps:$4 sm:$0xff]   ;;  %v1307_v36 = vld [vmem:[%s1580_s13 + $0xf0] ss:$8 sps:$4 sm:$0xff]   ;;  %p1170_p13 = scmp.ne.s32.totalorder %s1349_s17, 5 }
  0x58   : > { %890 = vmatpush1.bf16.msra.mxu1 %v1280_v6  ;;  %v539_v42 = vld [vmem:[#allocation2] sm:$0xff]  ;;  %v540_v45 = vld [vmem:[#allocation2 + $0x8] sm:$0xff]  ;;  %v936_v52 = vlaneseq (!%p1170_p13) }
  0x59   : > { %851 = vmatpush1.bf16.msra.mxu0 %v1250_v63  ;;  %891 = vmatprep.subr.bf16.mxu1 %v1284_v8  ;;  %v934_v54 = vld [vmem:[%s515_s15] sm:$0x3] (!%p1170_p13) }
  0x5a   : > { %852 = vmatprep.subr.bf16.mxu0 %v1251_v0  ;;  %v937_v53 = vshrl.u32 (!%p1170_p13), %v936_v52, 7  ;;  %v948_v55 = vld [vmem:[%s520_s8] sm:$0x3] (!%p1170_p13) }
  0x5c   : > { %892 = vmatpush1.bf16.msra.mxu1 %v1286_v10  ;;  %v938_v56 = vsub.s32 (!%p1170_p13), 0, %v937_v53  ;;  %v942_v57 = vsub.s32 (!%p1170_p13), 1, %v937_v53 }
  0x5d   : > { %853 = vmatpush1.bf16.msra.mxu0 %v1253_v3  ;;  %893 = vmatprep.subr.bf16.mxu1 %v1290_v12 }
  0x5e   : > { %854 = vmatprep.subr.bf16.mxu0 %v1254_v5  ;;  %v939_v60 = vrot.slane (!%p1170_p13), %v934_v54, %v938_v56  ;;  %v943_v61 = vrot.slane (!%p1170_p13), %v934_v54, %v942_v57  ;;  %v953_v62 = vrot.slane (!%p1170_p13), %v948_v55, %v938_v56  ;;  %v957_v63 = vrot.slane (!%p1170_p13), %v948_v55, %v942_v57 }
  0x60   : > { %894 = vmatpush1.bf16.msra.mxu1 %v1292_v14 }
  0x61   : > { %855 = vmatpush1.bf16.msra.mxu0 %v1256_v7  ;;  %895 = vmatprep.subr.bf16.mxu1 %v1296_v16 }
  0x62   : > { %856 = vmatprep.subr.bf16.mxu0 %v1257_v9 }
  0x64   : > { %896 = vmatpush1.bf16.msra.mxu1 %v1298_v20 }
  0x65   : > { %857 = vmatpush1.bf16.msra.mxu0 %v1259_v11  ;;  %897 = vmatprep.subr.bf16.mxu1 %v1302_v22 }
  0x66   : > { %858 = vmatprep.subr.bf16.mxu0 %v1263_v13 }
  0x68   : > { %898 = vmatpush1.bf16.msra.mxu1 %v1304_v24 }
  0x69   : > { %859 = vmatpush1.bf16.msra.mxu0 %v1265_v15 }
  0x6a   : > { %860 = vmatprep.subr.bf16.mxu0 %v1269_v17 }
  0x6b   : > { %916 = vmatmul.mubr.bf16.vlgmr.msra.gmra.mrb[0].mxu1 %v1308_v27 }
  0x6d   : > { %861 = vmatpush1.bf16.msra.mxu0 %v1271_v21 }
  0x6e   : > { %862 = vmatprep.subr.bf16.mxu0 %v1275_v23 }
  0x71   : > { %863 = vmatpush1.bf16.msra.mxu0 %v1277_v25 }
  0x72   : > { %864 = vmatprep.subr.bf16.mxu0 %v1281_v26 }
  0x75   : > { %865 = vmatpush1.bf16.msra.mxu0 %v1283_v28 }
  0x76   : > { %866 = vmatprep.subr.bf16.mxu0 %v1287_v29 }
  0x79   : > { %867 = vmatpush1.bf16.msra.mxu0 %v1289_v30 }
  0x7a   : > { %868 = vmatprep.subr.bf16.mxu0 %v1293_v31 }
  0x7d   : > { %869 = vmatpush1.bf16.msra.mxu0 %v1295_v32 }
  0x7e   : > { %870 = vmatprep.subr.bf16.mxu0 %v1299_v33 }
  0x81   : > { %871 = vmatpush1.bf16.msra.mxu0 %v1301_v34 }
  0x82   : > { %872 = vmatprep.subr.bf16.mxu0 %v1305_v35 }
  0x85   : > { %873 = vmatpush1.bf16.msra.mxu0 %v1307_v36 }
  0x88   : > { %875 = vmatmul.mubr.bf16.vlgmr.msra.gmra.mrb[0].mxu0 %v1119_v37 }
 0x13e   : > { %v917_v38 = vpop.f32.mrb[0].mxu1 }
 0x13f   : > { %v919_v39 = vpop.f32.mrb[1].mxu1 }
 0x140   : > { %v921_v40 = vpop.f32.mrb[2].mxu1 }
 0x141   : > { %v922_v41 = vpop.f32.mrb[3].mxu1 }
 0x15b   : > { %v876_v43 = vpop.f32.mrb[0].mxu0  ;;  %931 = sbr.rel (%p1170_p13) target bundleno = 370 (0x172), region = 82 }
 0x15c   : > { %v918_v44 = vadd.f32 %v917_v38, %v876_v43  ;;  %v878_v46 = vpop.f32.mrb[1].mxu0 }
 0x15d   : > { %v920_v47 = vadd.f32 %v919_v39, %v878_v46  ;;  %v880_v48 = vpop.f32.mrb[2].mxu0 }
 0x15e   : > { %v924_v49 = vadd.f32 %v918_v44, %v539_v42  ;;  %v881_v50 = vpop.f32.mrb[3].mxu0 }
 0x15f   : > { %v925_v51 = vadd.f32 %v920_v47, %v540_v45 }
 0x160   : > { %926 = vst [vmem:[#allocation2] sm:$0xff] %v924_v49 }
 0x161   : > { %927 = vst [vmem:[#allocation2 + $0x8] sm:$0xff] %v925_v51 }
 0x167   : > { %v932_v58 = vld [vmem:[#allocation2] sm:$0xff] }
 0x168   : > { %v933_v59 = vld [vmem:[#allocation2 + $0x8] sm:$0xff]  ;;  %v946_v0 = vmul.f32 %v939_v60, %v932_v58 }
 0x169   : > { %v947_v1 = vmul.f32 %v943_v61, %v933_v59 }
 0x16a   : > { %v960_v2 = vadd.f32 %v953_v62, %v946_v0 }
 0x16b   : > { %v961_v3 = vadd.f32 %v957_v63, %v947_v1 }
 0x16c   : > { %v962_v4 = vmax.f32 %v960_v2, 0.0 }
 0x16d   : > { %v963_v5 = vmax.f32 %v961_v3, 0.0 }
 0x16f   : > { %v1175_v6 = vpack.c.bf16 %v963_v5, %v962_v4 }
 0x171   : > { %972 = vst [vmem:[%s1578_s12] sm:$0xff] %v1175_v6 }
 0x172 PF: > { %s14_s21 = sadd.s32 1, %s1365_s21   ;;  %s1671_s15 = smov %s1345_s16 }
 0x173   : > { %p11_p0 = scmp.ge.s32.totalorder %s14_s21, 14   ;;  %s1672_s16 = smov %s1445_s28 }
 0x174   : > { %s1673_s17 = smov %s1357_s19  ;;  %s1674_s18 = smov %s1361_s20 }
 0x175   : > { %s1675_s19 = smov %s1678_s22  ;;  %s1676_s20 = smov %s1682_s23 }
 0x176   :  { %13 = sbr.rel (!%p11_p0) target bundleno = 4 (0x4), region = 126 }

// kernel: bcnn_forward.28
= control target key start
LH: loop header
LB: loop body
LE: loop exit
PB: predicated region body
PF: predicated region fallthrough
CT: control target
= control target key end

     0   :  { %vm23_vm0 = vcmask 1040384   ;;  %vm24_vm1 = vsmask.f32 256  ;;  %vm26_vm2 = vcmask 1041409   ;;  %vm27_vm3 = vsmask.f32 1280  ;;  %s90_s0 = inlined_call_operand.vmem [shape: bf16[2,2,1,1024], index: 0, kind: input, shape index: {}]   ;;  %s91_s1 = inlined_call_operand.vmem [shape: bf16[2,1,512], index: 1, kind: output, shape index: {}]  }
   0x1   :  { %v8_v0 = vld [vmem:[%s90_s0] sm:$0xff]  ;;  %v48_v1 = vld [vmem:[%s90_s0 + $0x8] sm:$0xff]  ;;  %vm66_vm4 = vmand %vm23_vm0, %vm24_vm1  ;;  %vm30_vm5 = vcmask 1042434   ;;  %vm31_vm6 = vsmask.f32 2304  ;;  %vm34_vm9 = vcmask 1043459  }
   0x2   :  { %v13_v3 = vmax.bf16 %v48_v1, %v8_v0  ;;  %vm28_vm7 = vmand %vm26_vm2, %vm27_vm3  ;;  %v9_v4 = vld [vmem:[%s90_s0 + $0x10] sm:$0xff]  ;;  %vm35_vm10 = vsmask.f32 3328  ;;  %v49_v5 = vld [vmem:[%s90_s0 + $0x18] sm:$0xff] }
   0x3   :  { %vm29_vm8 = vmor %vm28_vm7, %vm66_vm4  ;;  %v14_v7 = vmax.bf16 %v49_v5, %v9_v4  ;;  %v38_v8 = vld [vmem:[%s91_s1] sm:$0xf]  ;;  %v41_v11 = vld [vmem:[%s91_s1 + $0x4] sm:$0xf] }
   0x4   :  { %v17_v6 = vrot.slane %v13_v3, 4  ;;  %vm32_vm11 = vmand %vm30_vm5, %vm31_vm6 }
   0x5   :  { %vm33_vm12 = vmor %vm32_vm11, %vm29_vm8  ;;  %v18_v10 = vrot.slane %v14_v7, 4 }
   0x6   :  { %v21_v9 = vmax.bf16 %v17_v6, %v13_v3  ;;  %vm36_vm13 = vmand %vm34_vm9, %vm35_vm10 }
   0x7   :  { %vm37_vm14 = vmor %vm36_vm13, %vm33_vm12  ;;  %v22_v13 = vmax.bf16 %v18_v10, %v14_v7 }
   0x8   :  { %v39_v12 = vsel %vm37_vm14, %v21_v9, %v38_v8 }
   0x9   :  { %40 = vst [vmem:[%s91_s1] sm:$0xf] %v39_v12  ;;  %v42_v14 = vsel %vm37_vm14, %v22_v13, %v41_v11 }
   0xa   :  { %43 = vst [vmem:[%s91_s1 + $0x4] sm:$0xf] %v42_v14 }

// kernel: bcnn_forward.27
= control target key start
LH: loop header
LB: loop body
LE: loop exit
PB: predicated region body
PF: predicated region fallthrough
CT: control target
= control target key end

     0   :  { %s1598_s15 = smov 0   ;;  %s1600_s16 = smov 0   ;;  %s1918_s0 = inlined_call_operand.vmem [shape: bf16[8,4608], index: 0, kind: input, shape index: {}]   ;;  %s1919_s1 = inlined_call_operand.vmem [shape: bf16[4608,512], index: 1, kind: input, shape index: {}]   ;;  %s1920_s2 = inlined_call_operand.vmem [shape: f32[1,512], index: 2, kind: input, shape index: {}]   ;;  %s1921_s3 = inlined_call_operand.vmem [shape: f32[1,512], index: 3, kind: input, shape index: {}]   ;;  %s1922_s4 = inlined_call_operand.vmem [shape: bf16[8,512], index: 4, kind: output, shape index: {}]  }
   0x1   :  { %s1602_s17 = smov 0   ;;  %s1604_s18 = smov 0  }
   0x2   :  { %s1606_s19 = smov 0   ;;  %s1608_s20 = smov 0  }
   0x3   :  { %s1610_s21 = smov 0  }
   0x4 LB: > { %s26_s22 = sadd.s32 1, %s1562_s19  ;;  %s29_s23 = sadd.s32 1, %s1566_s20  ;;  %s1570_s21 = sphi %s1610_s21, %s14_s21   ;;  %s1566_s20 = sphi %s1608_s20, %s1928_s20   ;;  %s1562_s19 = sphi %s1606_s19, %s1927_s19   ;;  %s1558_s18 = sphi %s1604_s18, %s1926_s18   ;;  %s1554_s17 = sphi %s1602_s17, %s1925_s17   ;;  %s1550_s16 = sphi %s1600_s16, %s1924_s16   ;;  %s1546_s15 = sphi %s1598_s15, %s1923_s15  }
   0x5   : > { %p27_p0 = scmp.ge.s32.totalorder %s26_s22, 9  ;;  %p77_p1 = scmp.ne.s32.totalorder %s1550_s16, %s1546_s15 }
   0x6   : > { %p78_p2 = scmp.eq.s32.totalorder %s1570_s21, 0  ;;  %s70_s27 = sadd.s32 1, %s1550_s16 }
   0x7   : > { %s1930_s22 = smov (%p27_p0, %s26_s22), 0  ;;  %s1932_s23 = smov (!%p27_p0, %s29_s23), %s1566_s20 }
   0x8   : > { %p79_p3 = por %p78_p2, %p77_p1  ;;  %p31_p4 = scmp.ge.s32.totalorder %s1932_s23, 2 }
   0x9   : > { %s65_s24 = ssub.s32 %s1562_s19, %s1930_s22  ;;  %p1270_p6 = scmp.ge.s32.totalorder %s1570_s21, 18 }
   0xa   : > { %s1934_s23 = smov (%p31_p4, %s1932_s23), 0 }
   0xb   : > { %s66_s25 = ssub.s32 %s1566_s20, %s1934_s23  ;;  %183 = sbr.rel (%p1270_p6) target bundleno = 57 (0x39), region = 16 }
   0xc   : > { %s67_s26 = sor.u32 %s66_s25, %s65_s24 }
   0xd   : > { %p68_p5 = scmp.eq.s32.totalorder %s67_s26, 0 }
   0xf   : > { %s1649_s28 = scalar_select %p68_p5, %s1550_s16, %s70_s27  }
  0x12   : > { %199 = sbr.rel (!%p79_p3) target bundleno = 57 (0x39), region = 24  ;;  %s201_s29 = sand.u32 (%p79_p3), 1, %s1550_s16  }
  0x13   : > { %s1273_s30 = sshll.u32 (%p79_p3), %s1566_s20, 1  ;;  %s1271_s5 = sshll.u32 (%p79_p3), %s201_s29, 9 }
  0x14   : > { %s1357_s6 = sshll.u32 (%p79_p3), %s1562_s19, 8  ;;  %s1663_s12 = scalar_lea.vmem (%p79_p3), [#allocation3], %s1271_s5 }
  0x15   : > { %s207_s7 = sadd.s32 (%p79_p3), %s1357_s6, %s1273_s30 }
  0x16   : > { %s1275_s8 = sshll.u32 (%p79_p3), %s207_s7, 2 }
  0x17   : > { %s1658_s11 = scalar_lea.vmem (%p79_p3), %s1919_s1, %s1275_s8 }
  0x18   : > { %v363_v0 = vld [vmem:[%s1658_s11] sm:$0xff] (%p79_p3)  ;;  %v365_v1 = vld [vmem:[%s1658_s11 + $0x10] sm:$0xff] (%p79_p3) }
  0x19   : > { %v367_v2 = vld [vmem:[%s1658_s11 + $0x20] sm:$0xff]  ;;  %364 = vst [vmem:[%s1663_s12] sm:$0xff] %v363_v0  ;;  %366 = vst [vmem:[%s1663_s12 + $0x8] sm:$0xff] %v365_v1  ;;  %v369_v3 = vld [vmem:[%s1658_s11 + $0x30] sm:$0xff] }
  0x1a   : > { %368 = vst [vmem:[%s1663_s12 + $0x10] sm:$0xff] %v367_v2  ;;  %v371_v4 = vld [vmem:[%s1658_s11 + $0x40] sm:$0xff]  ;;  %v373_v5 = vld [vmem:[%s1658_s11 + $0x50] sm:$0xff]  ;;  %370 = vst [vmem:[%s1663_s12 + $0x18] sm:$0xff] %v369_v3 }
  0x1b   : > { %372 = vst [vmem:[%s1663_s12 + $0x20] sm:$0xff] %v371_v4  ;;  %374 = vst [vmem:[%s1663_s12 + $0x28] sm:$0xff] %v373_v5  ;;  %v375_v6 = vld [vmem:[%s1658_s11 + $0x60] sm:$0xff]  ;;  %v377_v7 = vld [vmem:[%s1658_s11 + $0x70] sm:$0xff] }
  0x1c   : > { %v379_v8 = vld [vmem:[%s1658_s11 + $0x80] sm:$0xff]  ;;  %376 = vst [vmem:[%s1663_s12 + $0x30] sm:$0xff] %v375_v6  ;;  %378 = vst [vmem:[%s1663_s12 + $0x38] sm:$0xff] %v377_v7  ;;  %v381_v9 = vld [vmem:[%s1658_s11 + $0x90] sm:$0xff] }
  0x1d   : > { %380 = vst [vmem:[%s1663_s12 + $0x40] sm:$0xff] %v379_v8  ;;  %v383_v10 = vld [vmem:[%s1658_s11 + $0xa0] sm:$0xff]  ;;  %v385_v11 = vld [vmem:[%s1658_s11 + $0xb0] sm:$0xff]  ;;  %382 = vst [vmem:[%s1663_s12 + $0x48] sm:$0xff] %v381_v9 }
  0x1e   : > { %384 = vst [vmem:[%s1663_s12 + $0x50] sm:$0xff] %v383_v10  ;;  %386 = vst [vmem:[%s1663_s12 + $0x58] sm:$0xff] %v385_v11  ;;  %v387_v12 = vld [vmem:[%s1658_s11 + $0xc0] sm:$0xff]  ;;  %v389_v13 = vld [vmem:[%s1658_s11 + $0xd0] sm:$0xff] }
  0x1f   : > { %v391_v14 = vld [vmem:[%s1658_s11 + $0xe0] sm:$0xff]  ;;  %388 = vst [vmem:[%s1663_s12 + $0x60] sm:$0xff] %v387_v12  ;;  %390 = vst [vmem:[%s1663_s12 + $0x68] sm:$0xff] %v389_v13  ;;  %v393_v15 = vld [vmem:[%s1658_s11 + $0xf0] sm:$0xff] }
  0x20   : > { %392 = vst [vmem:[%s1663_s12 + $0x70] sm:$0xff] %v391_v14  ;;  %v395_v16 = vld [vmem:[%s1658_s11 + $0x100] sm:$0xff]  ;;  %v397_v17 = vld [vmem:[%s1658_s11 + $0x110] sm:$0xff]  ;;  %394 = vst [vmem:[%s1663_s12 + $0x78] sm:$0xff] %v393_v15 }
  0x21   : > { %396 = vst [vmem:[%s1663_s12 + $0x80] sm:$0xff] %v395_v16  ;;  %398 = vst [vmem:[%s1663_s12 + $0x88] sm:$0xff] %v397_v17  ;;  %v399_v18 = vld [vmem:[%s1658_s11 + $0x120] sm:$0xff]  ;;  %v401_v19 = vld [vmem:[%s1658_s11 + $0x130] sm:$0xff] }
  0x22   : > { %v403_v20 = vld [vmem:[%s1658_s11 + $0x140] sm:$0xff]  ;;  %400 = vst [vmem:[%s1663_s12 + $0x90] sm:$0xff] %v399_v18  ;;  %402 = vst [vmem:[%s1663_s12 + $0x98] sm:$0xff] %v401_v19  ;;  %v405_v21 = vld [vmem:[%s1658_s11 + $0x150] sm:$0xff] }
  0x23   : > { %404 = vst [vmem:[%s1663_s12 + $0xa0] sm:$0xff] %v403_v20  ;;  %v407_v22 = vld [vmem:[%s1658_s11 + $0x160] sm:$0xff]  ;;  %v409_v23 = vld [vmem:[%s1658_s11 + $0x170] sm:$0xff]  ;;  %406 = vst [vmem:[%s1663_s12 + $0xa8] sm:$0xff] %v405_v21 }
  0x24   : > { %408 = vst [vmem:[%s1663_s12 + $0xb0] sm:$0xff] %v407_v22  ;;  %410 = vst [vmem:[%s1663_s12 + $0xb8] sm:$0xff] %v409_v23  ;;  %v411_v24 = vld [vmem:[%s1658_s11 + $0x180] sm:$0xff]  ;;  %v413_v25 = vld [vmem:[%s1658_s11 + $0x190] sm:$0xff] }
  0x25   : > { %v415_v26 = vld [vmem:[%s1658_s11 + $0x1a0] sm:$0xff]  ;;  %412 = vst [vmem:[%s1663_s12 + $0xc0] sm:$0xff] %v411_v24  ;;  %414 = vst [vmem:[%s1663_s12 + $0xc8] sm:$0xff] %v413_v25  ;;  %v417_v27 = vld [vmem:[%s1658_s11 + $0x1b0] sm:$0xff] }
  0x26   : > { %416 = vst [vmem:[%s1663_s12 + $0xd0] sm:$0xff] %v415_v26  ;;  %v419_v28 = vld [vmem:[%s1658_s11 + $0x1c0] sm:$0xff]  ;;  %v421_v29 = vld [vmem:[%s1658_s11 + $0x1d0] sm:$0xff]  ;;  %418 = vst [vmem:[%s1663_s12 + $0xd8] sm:$0xff] %v417_v27 }
  0x27   : > { %420 = vst [vmem:[%s1663_s12 + $0xe0] sm:$0xff] %v419_v28  ;;  %422 = vst [vmem:[%s1663_s12 + $0xe8] sm:$0xff] %v421_v29  ;;  %v423_v30 = vld [vmem:[%s1658_s11 + $0x1e0] sm:$0xff]  ;;  %v425_v31 = vld [vmem:[%s1658_s11 + $0x1f0] sm:$0xff] }
  0x28   : > { %v427_v32 = vld [vmem:[%s1658_s11 + $0x200] sm:$0xff]  ;;  %424 = vst [vmem:[%s1663_s12 + $0xf0] sm:$0xff] %v423_v30  ;;  %426 = vst [vmem:[%s1663_s12 + $0xf8] sm:$0xff] %v425_v31  ;;  %v429_v33 = vld [vmem:[%s1658_s11 + $0x210] sm:$0xff] }
  0x29   : > { %428 = vst [vmem:[%s1663_s12 + $0x100] sm:$0xff] %v427_v32  ;;  %v431_v34 = vld [vmem:[%s1658_s11 + $0x220] sm:$0xff]  ;;  %v433_v35 = vld [vmem:[%s1658_s11 + $0x230] sm:$0xff]  ;;  %430 = vst [vmem:[%s1663_s12 + $0x108] sm:$0xff] %v429_v33 }
  0x2a   : > { %432 = vst [vmem:[%s1663_s12 + $0x110] sm:$0xff] %v431_v34  ;;  %434 = vst [vmem:[%s1663_s12 + $0x118] sm:$0xff] %v433_v35  ;;  %v435_v36 = vld [vmem:[%s1658_s11 + $0x240] sm:$0xff]  ;;  %v437_v37 = vld [vmem:[%s1658_s11 + $0x250] sm:$0xff] }
  0x2b   : > { %v439_v38 = vld [vmem:[%s1658_s11 + $0x260] sm:$0xff]  ;;  %436 = vst [vmem:[%s1663_s12 + $0x120] sm:$0xff] %v435_v36  ;;  %438 = vst [vmem:[%s1663_s12 + $0x128] sm:$0xff] %v437_v37  ;;  %v441_v39 = vld [vmem:[%s1658_s11 + $0x270] sm:$0xff] }
  0x2c   : > { %440 = vst [vmem:[%s1663_s12 + $0x130] sm:$0xff] %v439_v38  ;;  %v443_v40 = vld [vmem:[%s1658_s11 + $0x280] sm:$0xff]  ;;  %v445_v41 = vld [vmem:[%s1658_s11 + $0x290] sm:$0xff]  ;;  %442 = vst [vmem:[%s1663_s12 + $0x138] sm:$0xff] %v441_v39 }
  0x2d   : > { %444 = vst [vmem:[%s1663_s12 + $0x140] sm:$0xff] %v443_v40  ;;  %446 = vst [vmem:[%s1663_s12 + $0x148] sm:$0xff] %v445_v41  ;;  %v447_v42 = vld [vmem:[%s1658_s11 + $0x2a0] sm:$0xff]  ;;  %v449_v43 = vld [vmem:[%s1658_s11 + $0x2b0] sm:$0xff] }
  0x2e   : > { %v451_v44 = vld [vmem:[%s1658_s11 + $0x2c0] sm:$0xff]  ;;  %448 = vst [vmem:[%s1663_s12 + $0x150] sm:$0xff] %v447_v42  ;;  %450 = vst [vmem:[%s1663_s12 + $0x158] sm:$0xff] %v449_v43  ;;  %v453_v45 = vld [vmem:[%s1658_s11 + $0x2d0] sm:$0xff] }
  0x2f   : > { %452 = vst [vmem:[%s1663_s12 + $0x160] sm:$0xff] %v451_v44  ;;  %v455_v46 = vld [vmem:[%s1658_s11 + $0x2e0] sm:$0xff]  ;;  %v457_v47 = vld [vmem:[%s1658_s11 + $0x2f0] sm:$0xff]  ;;  %454 = vst [vmem:[%s1663_s12 + $0x168] sm:$0xff] %v453_v45 }
  0x30   : > { %456 = vst [vmem:[%s1663_s12 + $0x170] sm:$0xff] %v455_v46  ;;  %458 = vst [vmem:[%s1663_s12 + $0x178] sm:$0xff] %v457_v47  ;;  %v459_v48 = vld [vmem:[%s1658_s11 + $0x300] sm:$0xff]  ;;  %v461_v49 = vld [vmem:[%s1658_s11 + $0x310] sm:$0xff] }
  0x31   : > { %v463_v50 = vld [vmem:[%s1658_s11 + $0x320] sm:$0xff]  ;;  %460 = vst [vmem:[%s1663_s12 + $0x180] sm:$0xff] %v459_v48  ;;  %462 = vst [vmem:[%s1663_s12 + $0x188] sm:$0xff] %v461_v49  ;;  %v465_v51 = vld [vmem:[%s1658_s11 + $0x330] sm:$0xff] }
  0x32   : > { %464 = vst [vmem:[%s1663_s12 + $0x190] sm:$0xff] %v463_v50  ;;  %v467_v52 = vld [vmem:[%s1658_s11 + $0x340] sm:$0xff]  ;;  %v469_v53 = vld [vmem:[%s1658_s11 + $0x350] sm:$0xff]  ;;  %466 = vst [vmem:[%s1663_s12 + $0x198] sm:$0xff] %v465_v51 }
  0x33   : > { %468 = vst [vmem:[%s1663_s12 + $0x1a0] sm:$0xff] %v467_v52  ;;  %470 = vst [vmem:[%s1663_s12 + $0x1a8] sm:$0xff] %v469_v53  ;;  %v471_v54 = vld [vmem:[%s1658_s11 + $0x360] sm:$0xff]  ;;  %v473_v55 = vld [vmem:[%s1658_s11 + $0x370] sm:$0xff] }
  0x34   : > { %v475_v56 = vld [vmem:[%s1658_s11 + $0x380] sm:$0xff]  ;;  %472 = vst [vmem:[%s1663_s12 + $0x1b0] sm:$0xff] %v471_v54  ;;  %474 = vst [vmem:[%s1663_s12 + $0x1b8] sm:$0xff] %v473_v55  ;;  %v477_v57 = vld [vmem:[%s1658_s11 + $0x390] sm:$0xff] }
  0x35   : > { %476 = vst [vmem:[%s1663_s12 + $0x1c0] sm:$0xff] %v475_v56  ;;  %v479_v58 = vld [vmem:[%s1658_s11 + $0x3a0] sm:$0xff]  ;;  %v481_v59 = vld [vmem:[%s1658_s11 + $0x3b0] sm:$0xff]  ;;  %478 = vst [vmem:[%s1663_s12 + $0x1c8] sm:$0xff] %v477_v57 }
  0x36   : > { %480 = vst [vmem:[%s1663_s12 + $0x1d0] sm:$0xff] %v479_v58  ;;  %482 = vst [vmem:[%s1663_s12 + $0x1d8] sm:$0xff] %v481_v59  ;;  %v483_v60 = vld [vmem:[%s1658_s11 + $0x3c0] sm:$0xff]  ;;  %v485_v61 = vld [vmem:[%s1658_s11 + $0x3d0] sm:$0xff] }
  0x37   : > { %v487_v62 = vld [vmem:[%s1658_s11 + $0x3e0] sm:$0xff]  ;;  %484 = vst [vmem:[%s1663_s12 + $0x1e0] sm:$0xff] %v483_v60  ;;  %486 = vst [vmem:[%s1663_s12 + $0x1e8] sm:$0xff] %v485_v61  ;;  %v489_v63 = vld [vmem:[%s1658_s11 + $0x3f0] sm:$0xff] }
  0x38   : > { %488 = vst [vmem:[%s1663_s12 + $0x1f0] sm:$0xff] %v487_v62  ;;  %490 = vst [vmem:[%s1663_s12 + $0x1f8] sm:$0xff] %v489_v63 }
  0x39 PF: > { %p1276_p7 = scmp.ge.s32.totalorder %s1570_s21, 1  ;;  %p511_p8 = scmp.lt.s32.totalorder %s1570_s21, 19 }
  0x3b   : > { %p512_p9 = pnand %p1276_p7, %p511_p8 }
  0x3c   : > { %s518_s13 = sand.u32 (!%p512_p9), 1, %s1546_s15   ;;  %s1278_s14 = sshll.u32 (!%p512_p9), %s1554_s17, 2 }
  0x3d   : > { %515 = sbr.rel (%p512_p9) target bundleno = 378 (0x17a), region = 70  ;;  %s1277_s24 = sshll.u32 (!%p512_p9), %s518_s13, 9 }
  0x3e   : > { %p567_p10 = scmp.lt.s32.totalorder (!%p512_p9), %s1278_s14, 35  ;;  %s1280_s25 = sshll.u32 (!%p512_p9), %s1558_s18, 1 }
  0x3f   : > { %p577_p11 = scmp.lt.s32.totalorder (!%p512_p9), %s1280_s25, 3  ;;  %s1816_s13 = scalar_lea.vmem (!%p512_p9), [#allocation3], %s1277_s24 }
  0x40   : > { %p1284_p12 = scmp.ne.s32.totalorder (!%p512_p9), %s1554_s17, 0 }
  0x44   : > { %s1936_s14 = smov (!%p567_p10, %s1278_s14), 35  ;;  %s1938_s25 = smov (!%p577_p11, %s1280_s25), 3 }
  0x45   : > { %s1279_s26 = sshll.u32 %s1936_s14, 2  ;;  %s579_s15 = scalar_lea.vmem %s1920_s2, %s1938_s25  ;;  %v1572_v0 = vmov (!%p1284_p12), 0.0  }
  0x46   : > { %s1798_s30 = scalar_lea.vmem %s1918_s0, %s1279_s26  ;;  %s584_s18 = scalar_lea.vmem %s1921_s3, %s1938_s25  ;;  %600 = vst [vmem:[#allocation2] sm:$0xff] (!%p1284_p12), %v1572_v0  ;;  %601 = vst [vmem:[#allocation2 + $0x8] sm:$0xff] (!%p1284_p12), %v1572_v0 }
  0x47   : > { %s1283_s9 = sshll.u32 %s1938_s25, 2  ;;  %599 = sbr.rel (%p1284_p12) target bundleno = 78 (0x4e), region = 78 }
  0x48   : > { %s1814_s12 = scalar_lea.vmem %s1922_s4, %s1283_s9 }
  0x4e PF: > { %v1416_v1 = vld [vmem:[%s1816_s13 + $0x4] ss:$8 sps:$4 sm:$0xff]   ;;  %v1420_v3 = vld [vmem:[%s1816_s13] ss:$8 sps:$4 sm:$0xff]   ;;  %v1422_v5 = vld [vmem:[%s1816_s13 + $0x14] ss:$8 sps:$4 sm:$0xff]  }
  0x4f   : > { %v1418_v2 = vld [vmem:[%s1816_s13 + $0x104] ss:$8 sps:$4 sm:$0xff]   ;;  %1004 = vmatprep.subr.bf16.mxu0 %v1416_v1  ;;  %v1421_v4 = vld [vmem:[%s1816_s13 + $0x100] ss:$8 sps:$4 sm:$0xff]   ;;  %v1424_v6 = vld [vmem:[%s1816_s13 + $0x114] ss:$8 sps:$4 sm:$0xff]  }
  0x50   : > { %1045 = vmatprep.subr.bf16.mxu1 %v1418_v2  ;;  %1005 = vmatpush1.bf16.msra.mxu0 %v1420_v3  ;;  %v1426_v7 = vld [vmem:[%s1816_s13 + $0x10] ss:$8 sps:$4 sm:$0xff]   ;;  %v1428_v9 = vld [vmem:[%s1816_s13 + $0x24] ss:$8 sps:$4 sm:$0xff]   ;;  %v1432_v11 = vld [vmem:[%s1816_s13 + $0x20] ss:$8 sps:$4 sm:$0xff]  }
  0x51   : > { %1046 = vmatpush1.bf16.msra.mxu1 %v1421_v4  ;;  %1006 = vmatprep.subr.bf16.mxu0 %v1422_v5  ;;  %v1427_v8 = vld [vmem:[%s1816_s13 + $0x110] ss:$8 sps:$4 sm:$0xff]   ;;  %v1430_v10 = vld [vmem:[%s1816_s13 + $0x124] ss:$8 sps:$4 sm:$0xff]   ;;  %v1433_v12 = vld [vmem:[%s1816_s13 + $0x120] ss:$8 sps:$4 sm:$0xff]  }
  0x52   : > { %1047 = vmatprep.subr.bf16.mxu1 %v1424_v6  ;;  %v1434_v13 = vld [vmem:[%s1816_s13 + $0x34] ss:$8 sps:$4 sm:$0xff]   ;;  %v1438_v15 = vld [vmem:[%s1816_s13 + $0x30] ss:$8 sps:$4 sm:$0xff]   ;;  %v1440_v17 = vld [vmem:[%s1816_s13 + $0x44] ss:$8 sps:$4 sm:$0xff]  }
  0x53   : > { %v1436_v14 = vld [vmem:[%s1816_s13 + $0x134] ss:$8 sps:$4 sm:$0xff]   ;;  %v1439_v16 = vld [vmem:[%s1816_s13 + $0x130] ss:$8 sps:$4 sm:$0xff]   ;;  %v1442_v18 = vld [vmem:[%s1816_s13 + $0x144] ss:$8 sps:$4 sm:$0xff]  }
  0x54   : > { %1007 = vmatpush1.bf16.msra.mxu0 %v1426_v7  ;;  %v1444_v19 = vld [vmem:[%s1816_s13 + $0x40] ss:$8 sps:$4 sm:$0xff]   ;;  %v1446_v21 = vld [vmem:[%s1816_s13 + $0x54] ss:$8 sps:$4 sm:$0xff]   ;;  %v1450_v23 = vld [vmem:[%s1816_s13 + $0x50] ss:$8 sps:$4 sm:$0xff]  }
  0x55   : > { %1048 = vmatpush1.bf16.msra.mxu1 %v1427_v8  ;;  %1008 = vmatprep.subr.bf16.mxu0 %v1428_v9  ;;  %v1445_v20 = vld [vmem:[%s1816_s13 + $0x140] ss:$8 sps:$4 sm:$0xff]   ;;  %v1448_v22 = vld [vmem:[%s1816_s13 + $0x154] ss:$8 sps:$4 sm:$0xff]   ;;  %v1451_v24 = vld [vmem:[%s1816_s13 + $0x150] ss:$8 sps:$4 sm:$0xff]  }
  0x56   : > { %1049 = vmatprep.subr.bf16.mxu1 %v1430_v10  ;;  %v1452_v25 = vld [vmem:[%s1816_s13 + $0x64] ss:$8 sps:$4 sm:$0xff]   ;;  %v1456_v27 = vld [vmem:[%s1816_s13 + $0x60] ss:$8 sps:$4 sm:$0xff]   ;;  %v1458_v29 = vld [vmem:[%s1816_s13 + $0x74] ss:$8 sps:$4 sm:$0xff]  }
  0x57   : > { %v1454_v26 = vld [vmem:[%s1816_s13 + $0x164] ss:$8 sps:$4 sm:$0xff]   ;;  %v1457_v28 = vld [vmem:[%s1816_s13 + $0x160] ss:$8 sps:$4 sm:$0xff]   ;;  %v1460_v30 = vld [vmem:[%s1816_s13 + $0x174] ss:$8 sps:$4 sm:$0xff]  }
  0x58   : > { %1009 = vmatpush1.bf16.msra.mxu0 %v1432_v11  ;;  %v1462_v31 = vld [vmem:[%s1816_s13 + $0x70] ss:$8 sps:$4 sm:$0xff]   ;;  %v1464_v33 = vld [vmem:[%s1816_s13 + $0x84] ss:$8 sps:$4 sm:$0xff]   ;;  %v1468_v35 = vld [vmem:[%s1816_s13 + $0x80] ss:$8 sps:$4 sm:$0xff]  }
  0x59   : > { %1050 = vmatpush1.bf16.msra.mxu1 %v1433_v12  ;;  %1010 = vmatprep.subr.bf16.mxu0 %v1434_v13  ;;  %v1463_v32 = vld [vmem:[%s1816_s13 + $0x170] ss:$8 sps:$4 sm:$0xff]   ;;  %v1466_v34 = vld [vmem:[%s1816_s13 + $0x184] ss:$8 sps:$4 sm:$0xff]   ;;  %v1469_v36 = vld [vmem:[%s1816_s13 + $0x180] ss:$8 sps:$4 sm:$0xff]  }
  0x5a   : > { %1051 = vmatprep.subr.bf16.mxu1 %v1436_v14  ;;  %v1470_v37 = vld [vmem:[%s1816_s13 + $0x94] ss:$8 sps:$4 sm:$0xff]   ;;  %v1474_v39 = vld [vmem:[%s1816_s13 + $0x90] ss:$8 sps:$4 sm:$0xff]   ;;  %v1476_v41 = vld [vmem:[%s1816_s13 + $0xa4] ss:$8 sps:$4 sm:$0xff]  }
  0x5b   : > { %v1472_v38 = vld [vmem:[%s1816_s13 + $0x194] ss:$8 sps:$4 sm:$0xff]   ;;  %v1475_v40 = vld [vmem:[%s1816_s13 + $0x190] ss:$8 sps:$4 sm:$0xff]   ;;  %v1478_v42 = vld [vmem:[%s1816_s13 + $0x1a4] ss:$8 sps:$4 sm:$0xff]  }
  0x5c   : > { %1011 = vmatpush1.bf16.msra.mxu0 %v1438_v15  ;;  %v1480_v43 = vld [vmem:[%s1816_s13 + $0xa0] ss:$8 sps:$4 sm:$0xff]   ;;  %v1482_v45 = vld [vmem:[%s1816_s13 + $0xb4] ss:$8 sps:$4 sm:$0xff]   ;;  %v1486_v50 = vld [vmem:[%s1816_s13 + $0xb0] ss:$8 sps:$4 sm:$0xff]  }
  0x5d   : > { %1052 = vmatpush1.bf16.msra.mxu1 %v1439_v16  ;;  %1012 = vmatprep.subr.bf16.mxu0 %v1440_v17  ;;  %v1481_v44 = vld [vmem:[%s1816_s13 + $0x1a0] ss:$8 sps:$4 sm:$0xff]   ;;  %v1484_v46 = vld [vmem:[%s1816_s13 + $0x1b4] ss:$8 sps:$4 sm:$0xff]   ;;  %v1487_v51 = vld [vmem:[%s1816_s13 + $0x1b0] ss:$8 sps:$4 sm:$0xff]  }
  0x5e   : > { %1053 = vmatprep.subr.bf16.mxu1 %v1442_v18  ;;  %v604_v47 = vld [vmem:[%s1798_s30] sm:$0xff]  ;;  %v605_v49 = vld [vmem:[%s1798_s30 + $0x8] sm:$0xff]  ;;  %v1488_v53 = vld [vmem:[%s1816_s13 + $0xc4] ss:$8 sps:$4 sm:$0xff]   ;;  %p1353_p13 = scmp.ne.s32.totalorder %s1554_s17, 8 }
  0x5f   : > { %v1286_v48 = vcombine.high %v604_v47, %v604_v47  ;;  %v1288_v52 = vcombine.high %v605_v49, %v605_v49  ;;  %v1490_v54 = vld [vmem:[%s1816_s13 + $0x1c4] ss:$8 sps:$4 sm:$0xff]   ;;  %v1492_v55 = vld [vmem:[%s1816_s13 + $0xc0] ss:$8 sps:$4 sm:$0xff]   ;;  %v1494_v57 = vld [vmem:[%s1816_s13 + $0xd4] ss:$8 sps:$4 sm:$0xff]   ;;  %v1285_v5 = vcombine.low %v604_v47, %v604_v47  ;;  %v1287_v6 = vcombine.low %v605_v49, %v605_v49 }
  0x60   : > { %1013 = vmatpush1.bf16.msra.mxu0 %v1444_v19  ;;  %v1493_v56 = vld [vmem:[%s1816_s13 + $0x1c0] ss:$8 sps:$4 sm:$0xff]   ;;  %v1496_v58 = vld [vmem:[%s1816_s13 + $0x1d4] ss:$8 sps:$4 sm:$0xff]   ;;  %v1498_v59 = vld [vmem:[%s1816_s13 + $0xd0] ss:$8 sps:$4 sm:$0xff]  }
  0x61   : > { %1054 = vmatpush1.bf16.msra.mxu1 %v1445_v20  ;;  %1014 = vmatprep.subr.bf16.mxu0 %v1446_v21  ;;  %v1499_v60 = vld [vmem:[%s1816_s13 + $0x1d0] ss:$8 sps:$4 sm:$0xff]   ;;  %v1500_v61 = vld [vmem:[%s1816_s13 + $0xe4] ss:$8 sps:$4 sm:$0xff]   ;;  %v1504_v63 = vld [vmem:[%s1816_s13 + $0xe0] ss:$8 sps:$4 sm:$0xff]   ;;  %v1098_v21 = vlaneseq (!%p1353_p13) }
  0x62   : > { %1055 = vmatprep.subr.bf16.mxu1 %v1448_v22  ;;  %1036 = vmatprep.mubr.bf16.mxu0 %v1286_v48  ;;  %v1502_v62 = vld [vmem:[%s1816_s13 + $0x1e4] ss:$8 sps:$4 sm:$0xff]   ;;  %v1505_v0 = vld [vmem:[%s1816_s13 + $0x1e0] ss:$8 sps:$4 sm:$0xff]   ;;  %v1506_v1 = vld [vmem:[%s1816_s13 + $0xf4] ss:$8 sps:$4 sm:$0xff]  }
  0x63   : > { %1077 = vmatprep.mubr.bf16.mxu1 %v1288_v52  ;;  %v1508_v2 = vld [vmem:[%s1816_s13 + $0x1f4] ss:$8 sps:$4 sm:$0xff]   ;;  %v1510_v3 = vld [vmem:[%s1816_s13 + $0xf0] ss:$8 sps:$4 sm:$0xff]   ;;  %v1099_v22 = vshrl.u32 (!%p1353_p13), %v1098_v21, 7 }
  0x64   : > { %1015 = vmatpush1.bf16.msra.mxu0 %v1450_v23  ;;  %v1511_v4 = vld [vmem:[%s1816_s13 + $0x1f0] ss:$8 sps:$4 sm:$0xff]  }
  0x65   : > { %1056 = vmatpush1.bf16.msra.mxu1 %v1451_v24  ;;  %1016 = vmatprep.subr.bf16.mxu0 %v1452_v25  ;;  %v602_v8 = vld [vmem:[#allocation2] sm:$0xff]  ;;  %v603_v12 = vld [vmem:[#allocation2 + $0x8] sm:$0xff]  ;;  %v1100_v25 = vsub.s32 (!%p1353_p13), 0, %v1099_v22 }
  0x66   : > { %1057 = vmatprep.subr.bf16.mxu1 %v1454_v26  ;;  %v1096_v23 = vld [vmem:[%s579_s15] sm:$0x3] (!%p1353_p13)  ;;  %v1104_v26 = vsub.s32 (!%p1353_p13), 1, %v1099_v22 }
  0x67   : > { %v1110_v24 = vld [vmem:[%s584_s18] sm:$0x3] (!%p1353_p13) }
  0x68   : > { %1017 = vmatpush1.bf16.msra.mxu0 %v1456_v27 }
  0x69   : > { %1058 = vmatpush1.bf16.msra.mxu1 %v1457_v28  ;;  %1018 = vmatprep.subr.bf16.mxu0 %v1458_v29  ;;  %v1101_v29 = vrot.slane (!%p1353_p13), %v1096_v23, %v1100_v25 }
  0x6a   : > { %1059 = vmatprep.subr.bf16.mxu1 %v1460_v30  ;;  %v1105_v30 = vrot.slane (!%p1353_p13), %v1096_v23, %v1104_v26 }
  0x6c   : > { %1019 = vmatpush1.bf16.msra.mxu0 %v1462_v31  ;;  %v1115_v31 = vrot.slane (!%p1353_p13), %v1110_v24, %v1100_v25 }
  0x6d   : > { %1060 = vmatpush1.bf16.msra.mxu1 %v1463_v32  ;;  %1020 = vmatprep.subr.bf16.mxu0 %v1464_v33  ;;  %v1119_v32 = vrot.slane (!%p1353_p13), %v1110_v24, %v1104_v26 }
  0x6e   : > { %1061 = vmatprep.subr.bf16.mxu1 %v1466_v34 }
  0x70   : > { %1021 = vmatpush1.bf16.msra.mxu0 %v1468_v35 }
  0x71   : > { %1062 = vmatpush1.bf16.msra.mxu1 %v1469_v36  ;;  %1022 = vmatprep.subr.bf16.mxu0 %v1470_v37 }
  0x72   : > { %1063 = vmatprep.subr.bf16.mxu1 %v1472_v38 }
  0x74   : > { %1023 = vmatpush1.bf16.msra.mxu0 %v1474_v39 }
  0x75   : > { %1064 = vmatpush1.bf16.msra.mxu1 %v1475_v40  ;;  %1024 = vmatprep.subr.bf16.mxu0 %v1476_v41 }
  0x76   : > { %1065 = vmatprep.subr.bf16.mxu1 %v1478_v42 }
  0x78   : > { %1025 = vmatpush1.bf16.msra.mxu0 %v1480_v43 }
  0x79   : > { %1066 = vmatpush1.bf16.msra.mxu1 %v1481_v44  ;;  %1026 = vmatprep.subr.bf16.mxu0 %v1482_v45 }
  0x7a   : > { %1067 = vmatprep.subr.bf16.mxu1 %v1484_v46 }
  0x7c   : > { %1027 = vmatpush1.bf16.msra.mxu0 %v1486_v50 }
  0x7d   : > { %1068 = vmatpush1.bf16.msra.mxu1 %v1487_v51  ;;  %1028 = vmatprep.subr.bf16.mxu0 %v1488_v53 }
  0x7e   : > { %1069 = vmatprep.subr.bf16.mxu1 %v1490_v54 }
  0x80   : > { %1029 = vmatpush1.bf16.msra.mxu0 %v1492_v55 }
  0x81   : > { %1070 = vmatpush1.bf16.msra.mxu1 %v1493_v56  ;;  %1030 = vmatprep.subr.bf16.mxu0 %v1494_v57 }
  0x82   : > { %1071 = vmatprep.subr.bf16.mxu1 %v1496_v58 }
  0x84   : > { %1031 = vmatpush1.bf16.msra.mxu0 %v1498_v59 }
  0x85   : > { %1072 = vmatpush1.bf16.msra.mxu1 %v1499_v60  ;;  %1032 = vmatprep.subr.bf16.mxu0 %v1500_v61 }
  0x86   : > { %1073 = vmatprep.subr.bf16.mxu1 %v1502_v62 }
  0x88   : > { %1033 = vmatpush1.bf16.msra.mxu0 %v1504_v63 }
  0x89   : > { %1074 = vmatpush1.bf16.msra.mxu1 %v1505_v0  ;;  %1034 = vmatprep.subr.bf16.mxu0 %v1506_v1 }
  0x8a   : > { %1075 = vmatprep.subr.bf16.mxu1 %v1508_v2 }
  0x8c   : > { %1035 = vmatpush1.bf16.msra.mxu0 %v1510_v3 }
  0x8d   : > { %1076 = vmatpush1.bf16.msra.mxu1 %v1511_v4 }
  0x8f   : > { %1037 = vmatmul.mubr.bf16.vlgmr.msra.gmra.mrb[0].mxu0 %v1285_v5 }
  0x90   : > { %1078 = vmatmul.mubr.bf16.vlgmr.msra.gmra.mrb[0].mxu1 %v1287_v6 }
 0x162   : > { %v1038_v7 = vpop.f32.mrb[0].mxu0 }
 0x163   : > { %v1079_v9 = vpop.f32.mrb[0].mxu1  ;;  %v1040_v11 = vpop.f32.mrb[1].mxu0  ;;  %1093 = sbr.rel (%p1353_p13) target bundleno = 378 (0x17a), region = 82 }
 0x164   : > { %v1080_v10 = vadd.f32 %v1079_v9, %v1038_v7  ;;  %v1081_v13 = vpop.f32.mrb[1].mxu1  ;;  %v1042_v15 = vpop.f32.mrb[2].mxu0 }
 0x165   : > { %v1082_v14 = vadd.f32 %v1081_v13, %v1040_v11  ;;  %v1083_v16 = vpop.f32.mrb[2].mxu1  ;;  %v1043_v18 = vpop.f32.mrb[3].mxu0 }
 0x166   : > { %v1086_v17 = vadd.f32 %v1080_v10, %v602_v8  ;;  %v1084_v19 = vpop.f32.mrb[3].mxu1 }
 0x167   : > { %v1087_v20 = vadd.f32 %v1082_v14, %v603_v12 }
 0x168   : > { %1088 = vst [vmem:[#allocation2] sm:$0xff] %v1086_v17 }
 0x169   : > { %1089 = vst [vmem:[#allocation2 + $0x8] sm:$0xff] %v1087_v20 }
 0x16f   : > { %v1094_v27 = vld [vmem:[#allocation2] sm:$0xff] }
 0x170   : > { %v1095_v28 = vld [vmem:[#allocation2 + $0x8] sm:$0xff]  ;;  %v1108_v33 = vmul.f32 %v1101_v29, %v1094_v27 }
 0x171   : > { %v1109_v34 = vmul.f32 %v1105_v30, %v1095_v28 }
 0x172   : > { %v1122_v35 = vadd.f32 %v1115_v31, %v1108_v33 }
 0x173   : > { %v1123_v36 = vadd.f32 %v1119_v32, %v1109_v34 }
 0x174   : > { %v1124_v37 = vmax.f32 %v1122_v35, 0.0 }
 0x175   : > { %v1125_v38 = vmax.f32 %v1123_v36, 0.0 }
 0x177   : > { %v1358_v39 = vpack.c.bf16 %v1125_v38, %v1124_v37 }
 0x179   : > { %1134 = vst [vmem:[%s1814_s12] sm:$0xff] %v1358_v39 }
 0x17a PF: > { %s14_s21 = sadd.s32 1, %s1570_s21   ;;  %s1923_s15 = smov %s1550_s16 }
 0x17b   : > { %p11_p0 = scmp.ge.s32.totalorder %s14_s21, 20   ;;  %s1924_s16 = smov %s1649_s28 }
 0x17c   : > { %s1925_s17 = smov %s1562_s19  ;;  %s1926_s18 = smov %s1566_s20 }
 0x17d   : > { %s1927_s19 = smov %s1930_s22  ;;  %s1928_s20 = smov %s1934_s23 }
 0x17e   :  { %13 = sbr.rel (!%p11_p0) target bundleno = 4 (0x4), region = 126 }

// kernel: bcnn_forward.21
= control target key start
LH: loop header
LB: loop body
LE: loop exit
PB: predicated region body
PF: predicated region fallthrough
CT: control target
= control target key end

     0   :  { %s1030_s21 = smov 0   ;;  %s1127_s0 = inlined_call_operand.vmem [shape: bf16[8,2048], index: 0, kind: input, shape index: {}]   ;;  %s1128_s1 = inlined_call_operand.vmem [shape: bf16[2048,128], index: 1, kind: input, shape index: {}]   ;;  %s1129_s2 = inlined_call_operand.vmem [shape: f32[1,128], index: 2, kind: input, shape index: {}]   ;;  %s1130_s3 = inlined_call_operand.vmem [shape: f32[1,128], index: 3, kind: input, shape index: {}]   ;;  %s1131_s4 = inlined_call_operand.vmem [shape: bf16[128,128], index: 4, kind: input, shape index: {}]   ;;  %s1132_s5 = inlined_call_operand.vmem [shape: f32[1,128], index: 5, kind: input, shape index: {}]   ;;  %s1133_s6 = inlined_call_operand.vmem [shape: f32[8,128], index: 6, kind: output, shape index: {}]  }
   0x1 LB: > { %s1036_s22 = sadd.s32 4294967295, %s990_s21   ;;  %p800_p0 = scmp.ge.s32.totalorder %s990_s21, 1  ;;  %s990_s21 = sphi %s1030_s21, %s16_s21  }
   0x2   : > { %p219_p1 = scmp.lt.s32.totalorder %s990_s21, 5 }
   0x4   : > { %p220_p2 = pnand %p800_p0, %p219_p1 }
   0x5   : > { %s801_s23 = sshll.u32 (!%p220_p2), %s1036_s22, 2  ;;  %s803_s24 = sshll.u32 (!%p220_p2), %s1036_s22, 6 }
   0x6   : > { %223 = sbr.rel (%p220_p2) target bundleno = 508 (0x1fc), region = 44  ;;  %p250_p3 = scmp.lt.s32.totalorder (!%p220_p2), %s801_s23, 15 }
   0x7   : > { %p256_p4 = scmp.lt.s32.totalorder (!%p220_p2), %s803_s24, 255  ;;  %p805_p5 = scmp.ne.s32.totalorder (!%p220_p2), %s1036_s22, 0 }
   0xd   : > { %s1135_s23 = smov (!%p250_p3, %s801_s23), 15  ;;  %s1137_s24 = smov (!%p256_p4, %s803_s24), 255 }
   0xe   : > { %s802_s25 = sshll.u32 %s1135_s23, 2  ;;  %s804_s29 = sshll.u32 %s1137_s24, 2  ;;  %v992_v0 = vmov (!%p805_p5), 0.0  }
   0xf   : > { %s1045_s28 = scalar_lea.vmem %s1127_s0, %s802_s25  ;;  %s1050_s8 = scalar_lea.vmem %s1128_s1, %s804_s29  ;;  %266 = vst [vmem:[#allocation2] sm:$0xff] (!%p805_p5), %v992_v0 }
  0x10   : > { %265 = sbr.rel (%p805_p5) target bundleno = 23 (0x17), region = 48 }
  0x17 PF: > { %v940_v1 = vld [vmem:[%s1050_s8 + $0x40] sm:$0xff]   ;;  %v944_v5 = vld [vmem:[%s1050_s8 + $0x48] sm:$0xff]   ;;  %v948_v9 = vld [vmem:[%s1050_s8 + $0x50] sm:$0xff]   ;;  %p842_p6 = scmp.ne.s32.totalorder %s1036_s22, 3 }
  0x18   : > { %v941_v2 = vld [vmem:[%s1050_s8 + $0xc0] sm:$0xff]   ;;  %856 = vmatprep.subr.bf16.mxu0 %v940_v1  ;;  %v945_v6 = vld [vmem:[%s1050_s8 + $0xc8] sm:$0xff]   ;;  %v949_v10 = vld [vmem:[%s1050_s8 + $0xd0] sm:$0xff]   ;;  %v993_v53 = vmov (!%p842_p6), 0.0   ;;  %vm994_vm0 = vmmov (!%p842_p6), 0  }
  0x19   : > { %v942_v3 = vld [vmem:[%s1050_s8] sm:$0xff]   ;;  %878 = vmatprep.subr.bf16.mxu1 %v941_v2  ;;  %v946_v7 = vld [vmem:[%s1050_s8 + $0x8] sm:$0xff]   ;;  %v950_v11 = vld [vmem:[%s1050_s8 + $0x10] sm:$0xff]  }
  0x1a   : > { %v943_v4 = vld [vmem:[%s1050_s8 + $0x80] sm:$0xff]   ;;  %857 = vmatpush3.bf16.msra.mxu0 %v942_v3  ;;  %v947_v8 = vld [vmem:[%s1050_s8 + $0x88] sm:$0xff]   ;;  %v951_v12 = vld [vmem:[%s1050_s8 + $0x90] sm:$0xff]  }
  0x1b   : > { %879 = vmatpush3.bf16.msra.mxu1 %v943_v4  ;;  %858 = vmatprep.subr.bf16.mxu0 %v944_v5  ;;  %v952_v13 = vld [vmem:[%s1050_s8 + $0x58] sm:$0xff]   ;;  %v956_v17 = vld [vmem:[%s1050_s8 + $0x60] sm:$0xff]   ;;  %v960_v21 = vld [vmem:[%s1050_s8 + $0x68] sm:$0xff]  }
  0x1c   : > { %880 = vmatprep.subr.bf16.mxu1 %v945_v6  ;;  %v953_v14 = vld [vmem:[%s1050_s8 + $0xd8] sm:$0xff]   ;;  %v957_v18 = vld [vmem:[%s1050_s8 + $0xe0] sm:$0xff]   ;;  %v961_v22 = vld [vmem:[%s1050_s8 + $0xe8] sm:$0xff]  }
  0x1d   : > { %v954_v15 = vld [vmem:[%s1050_s8 + $0x18] sm:$0xff]   ;;  %v958_v19 = vld [vmem:[%s1050_s8 + $0x20] sm:$0xff]   ;;  %v962_v23 = vld [vmem:[%s1050_s8 + $0x28] sm:$0xff]  }
  0x1e   : > { %859 = vmatpush3.bf16.msra.mxu0 %v946_v7  ;;  %v955_v16 = vld [vmem:[%s1050_s8 + $0x98] sm:$0xff]   ;;  %v959_v20 = vld [vmem:[%s1050_s8 + $0xa0] sm:$0xff]   ;;  %v963_v24 = vld [vmem:[%s1050_s8 + $0xa8] sm:$0xff]  }
  0x1f   : > { %881 = vmatpush3.bf16.msra.mxu1 %v947_v8  ;;  %860 = vmatprep.subr.bf16.mxu0 %v948_v9  ;;  %v964_v25 = vld [vmem:[%s1050_s8 + $0x70] sm:$0xff]   ;;  %v968_v29 = vld [vmem:[%s1050_s8 + $0x78] sm:$0xff]   ;;  %v268_v33 = vld [vmem:[%s1045_s28] sm:$0xff] }
  0x20   : > { %882 = vmatprep.subr.bf16.mxu1 %v949_v10  ;;  %v965_v26 = vld [vmem:[%s1050_s8 + $0xf0] sm:$0xff]   ;;  %v969_v30 = vld [vmem:[%s1050_s8 + $0xf8] sm:$0xff]   ;;  %v269_v34 = vld [vmem:[%s1045_s28 + $0x8] sm:$0xff]  ;;  %v806_v35 = vcombine.low %v268_v33, %v268_v33  ;;  %v807_v36 = vcombine.high %v268_v33, %v268_v33 }
  0x21   : > { %v966_v27 = vld [vmem:[%s1050_s8 + $0x30] sm:$0xff]   ;;  %v970_v31 = vld [vmem:[%s1050_s8 + $0x38] sm:$0xff]   ;;  %v808_v37 = vcombine.low %v269_v34, %v269_v34  ;;  %v809_v38 = vcombine.high %v269_v34, %v269_v34  ;;  %v267_v47 = vld [vmem:[#allocation2] sm:$0xff] }
  0x22   : > { %861 = vmatpush3.bf16.msra.mxu0 %v950_v11  ;;  %v967_v28 = vld [vmem:[%s1050_s8 + $0xb0] sm:$0xff]   ;;  %v971_v32 = vld [vmem:[%s1050_s8 + $0xb8] sm:$0xff]   ;;  %572 = vmatprep.mubr.bf16.mxu0 %v807_v36  ;;  %v976_v52 = vld [vmem:[%s1131_s4] sm:$0xff] (!%p842_p6)  }
  0x23   : > { %883 = vmatpush3.bf16.msra.mxu1 %v951_v12  ;;  %862 = vmatprep.subr.bf16.mxu0 %v952_v13  ;;  %v977_v54 = vld [vmem:[%s1131_s4 + $0x8] sm:$0xff] (!%p842_p6)   ;;  %v978_v55 = vld [vmem:[%s1131_s4 + $0x10] sm:$0xff] (!%p842_p6)   ;;  %v979_v56 = vld [vmem:[%s1131_s4 + $0x18] sm:$0xff] (!%p842_p6)  }
  0x24   : > { %884 = vmatprep.subr.bf16.mxu1 %v953_v14  ;;  %612 = vmatprep.mubr.bf16.mxu1 %v809_v38  ;;  %v980_v57 = vld [vmem:[%s1131_s4 + $0x20] sm:$0xff] (!%p842_p6)   ;;  %v981_v61 = vld [vmem:[%s1131_s4 + $0x28] sm:$0xff] (!%p842_p6)   ;;  %v982_v0 = vld [vmem:[%s1131_s4 + $0x30] sm:$0xff] (!%p842_p6)  }
  0x25   : > { %v843_v59 = vld [vmem:[%s1129_s2] ss:$0 sm:$0xff] (!%p842_p6)  ;;  %v983_v2 = vld [vmem:[%s1131_s4 + $0x38] sm:$0xff] (!%p842_p6)  }
  0x26   : > { %863 = vmatpush3.bf16.msra.mxu0 %v954_v15  ;;  %v844_v62 = vld [vmem:[%s1130_s3] ss:$0 sm:$0xff] (!%p842_p6) }
  0x27   : > { %885 = vmatpush3.bf16.msra.mxu1 %v955_v16  ;;  %864 = vmatprep.subr.bf16.mxu0 %v956_v17  ;;  %v845_v4 = vld [vmem:[%s1132_s5] ss:$0 sm:$0xff] (!%p842_p6) }
  0x28   : > { %886 = vmatprep.subr.bf16.mxu1 %v957_v18 }
  0x2a   : > { %865 = vmatpush3.bf16.msra.mxu0 %v958_v19 }
  0x2b   : > { %887 = vmatpush3.bf16.msra.mxu1 %v959_v20  ;;  %866 = vmatprep.subr.bf16.mxu0 %v960_v21 }
  0x2c   : > { %888 = vmatprep.subr.bf16.mxu1 %v961_v22 }
  0x2e   : > { %867 = vmatpush3.bf16.msra.mxu0 %v962_v23 }
  0x2f   : > { %889 = vmatpush3.bf16.msra.mxu1 %v963_v24  ;;  %868 = vmatprep.subr.bf16.mxu0 %v964_v25 }
  0x30   : > { %890 = vmatprep.subr.bf16.mxu1 %v965_v26 }
  0x32   : > { %869 = vmatpush3.bf16.msra.mxu0 %v966_v27 }
  0x33   : > { %891 = vmatpush3.bf16.msra.mxu1 %v967_v28  ;;  %870 = vmatprep.subr.bf16.mxu0 %v968_v29 }
  0x34   : > { %892 = vmatprep.subr.bf16.mxu1 %v969_v30 }
  0x36   : > { %871 = vmatpush3.bf16.msra.mxu0 %v970_v31 }
  0x37   : > { %893 = vmatpush3.bf16.msra.mxu1 %v971_v32  ;;  %909 = vmatprep.subr.bf16.mxu0 (!%p842_p6), %v993_v53 }
  0x39   : > { %573 = vmatmul.mubr.bf16.vlgmr.msra.gmra.mrb[0].mxu0 %v806_v35 }
  0x3a   : > { %613 = vmatmul.mubr.bf16.vlgmr.msra.gmra.mrb[0].mxu1 %v808_v37  ;;  %910 = vmatpush3.bf16.msra.mxu0 (!%p842_p6), %v976_v52 }
  0x3b   : > { %925 = vmatprep.mubr.msk.bf16.mxu0 (!%p842_p6), %vm994_vm0, %v993_v53  ;;  %911 = vmatprep.subr.bf16.mxu0 (!%p842_p6), %v993_v53 }
  0x3e   : > { %912 = vmatpush3.bf16.msra.mxu0 (!%p842_p6), %v977_v54 }
  0x3f   : > { %913 = vmatprep.subr.bf16.mxu0 (!%p842_p6), %v993_v53 }
  0x42   : > { %914 = vmatpush3.bf16.msra.mxu0 (!%p842_p6), %v978_v55 }
  0x43   : > { %915 = vmatprep.subr.bf16.mxu0 (!%p842_p6), %v993_v53 }
  0x46   : > { %916 = vmatpush3.bf16.msra.mxu0 (!%p842_p6), %v979_v56 }
  0x47   : > { %917 = vmatprep.subr.bf16.mxu0 (!%p842_p6), %v993_v53 }
  0x4a   : > { %918 = vmatpush3.bf16.msra.mxu0 (!%p842_p6), %v980_v57 }
  0x4b   : > { %919 = vmatprep.subr.bf16.mxu0 (!%p842_p6), %v993_v53 }
  0x4e   : > { %920 = vmatpush3.bf16.msra.mxu0 (!%p842_p6), %v981_v61 }
  0x4f   : > { %921 = vmatprep.subr.bf16.mxu0 (!%p842_p6), %v993_v53 }
  0x52   : > { %922 = vmatpush3.bf16.msra.mxu0 (!%p842_p6), %v982_v0 }
  0x53   : > { %923 = vmatprep.subr.bf16.mxu0 (!%p842_p6), %v993_v53 }
  0x56   : > { %924 = vmatpush3.bf16.msra.mxu0 (!%p842_p6), %v983_v2 }
 0x10c   : > { %v872_v39 = vpop.f32.mrb[0].mxu0 }
 0x10d   : > { %v894_v40 = vpop.f32.mrb[0].mxu1  ;;  %v873_v41 = vpop.f32.mrb[1].mxu0 }
 0x10e   : > { %v895_v42 = vpop.f32.mrb[1].mxu1  ;;  %v874_v43 = vadd.f32 %v873_v41, %v872_v39  ;;  %v875_v45 = vpop.f32.mrb[2].mxu0 }
 0x10f   : > { %v896_v44 = vadd.f32 %v895_v42, %v894_v40  ;;  %v897_v46 = vpop.f32.mrb[2].mxu1  ;;  %v876_v48 = vpop.f32.mrb[3].mxu0  ;;  %625 = sbr.rel (%p842_p6) target bundleno = 508 (0x1fc), region = 52 }
 0x110   : > { %v898_v49 = vpop.f32.mrb[3].mxu1 }
 0x111   : > { %v615_v50 = vadd.f32 %v896_v44, %v874_v43 }
 0x113   : > { %v620_v51 = vadd.f32 %v615_v50, %v267_v47 }
 0x115   : > { %621 = vst [vmem:[#allocation2] sm:$0xff] %v620_v51 }
 0x11c   : > { %v626_v58 = vld [vmem:[#allocation2] sm:$0xff] }
 0x11d   : > { %v634_v60 = vmul.f32 %v843_v59, %v626_v58 }
 0x11f   : > { %v642_v63 = vadd.f32 %v844_v62, %v634_v60 }
 0x121   : > { %v643_v1 = vmax.f32 %v642_v63, 0.0 }
 0x123   : > { %v644_v3 = vpack.c.bf16 %v643_v1, %v643_v1 }
 0x125   : > { %926 = vmatmul.mubr.bf16.vlgmr.msra.gmra.mrb[0].mxu0 %v644_v3 }
 0x1f8   : > { %v750_v5 = vpop.f32.mrb[0].mxu0 }
 0x1f9   : > { %v751_v6 = vadd.f32 %v845_v4, %v750_v5  ;;  %v927_v7 = vpop.f32.mrb[1].mxu0 }
 0x1fa   : > { %v753_v8 = vpop.f32.mrb[2].mxu0 }
 0x1fb   : > { %756 = vst [vmem:[%s1133_s6] sm:$0xff] %v751_v6  ;;  %v928_v9 = vpop.f32.mrb[3].mxu0 }
 0x1fc PF: > { %s16_s21 = sadd.s32 1, %s990_s21  }
 0x1fd   : > { %p13_p7 = scmp.ge.s32.totalorder %s16_s21, 6  }
 0x1ff   :  { %15 = sbr.rel (!%p13_p7) target bundleno = 1 (0x1), region = 81 }

// kernel: bcnn_forward.29
= control target key start
LH: loop header
LB: loop body
LE: loop exit
PB: predicated region body
PF: predicated region fallthrough
CT: control target
= control target key end

     0   :  { %s4327_s1 = inlined_call_operand.vmem [shape: bf16[512,1024], index: 1, kind: input, shape index: {}]   ;;  %s4328_s0 = inlined_call_operand.vmem [shape: bf16[8,512], index: 0, kind: input, shape index: {}]   ;;  %s4329_s4 = inlined_call_operand.vmem [shape: bf16[1024,128], index: 4, kind: input, shape index: {}]   ;;  %s4330_s2 = inlined_call_operand.vmem [shape: f32[1,1024], index: 2, kind: input, shape index: {}]   ;;  %s4331_s3 = inlined_call_operand.vmem [shape: f32[1,1024], index: 3, kind: input, shape index: {}]   ;;  %s4332_s5 = inlined_call_operand.vmem [shape: f32[1,128], index: 5, kind: input, shape index: {}]   ;;  %s4333_s6 = inlined_call_operand.vmem [shape: f32[8,128], index: 6, kind: output, shape index: {}]  }
   0x1   :  { %v46_v0 = vld [vmem:[%s4327_s1] sm:$0xff]  ;;  %v47_v2 = vld [vmem:[%s4327_s1 + $0x8] sm:$0xff] }
   0x2   :  { %v50_v1 = vld [vmem:[%s4327_s1 + $0x20] sm:$0xff]  ;;  %v51_v4 = vld [vmem:[%s4327_s1 + $0x28] sm:$0xff] }
   0x3   :  { %v2756_v3 = vcombine.high %v46_v0, %v50_v1  ;;  %v2755_v5 = vcombine.low %v46_v0, %v50_v1  ;;  %v54_v6 = vld [vmem:[%s4327_s1 + $0x40] sm:$0xff]  ;;  %v2758_v8 = vcombine.high %v47_v2, %v51_v4  ;;  %v2757_v9 = vcombine.low %v47_v2, %v51_v4  ;;  %v55_v11 = vld [vmem:[%s4327_s1 + $0x48] sm:$0xff] }
   0x4   :  { %v58_v7 = vld [vmem:[%s4327_s1 + $0x60] sm:$0xff]  ;;  %v59_v12 = vld [vmem:[%s4327_s1 + $0x68] sm:$0xff] }
   0x5   :  { %v2764_v10 = vcombine.high %v54_v6, %v58_v7  ;;  %v62_v13 = vld [vmem:[%s4327_s1 + $0x80] sm:$0xff]  ;;  %1596 = vmatprep.subr.bf16.mxu0 %v2756_v3  ;;  %v2766_v14 = vcombine.high %v55_v11, %v59_v12  ;;  %v63_v16 = vld [vmem:[%s4327_s1 + $0x88] sm:$0xff]  ;;  %1678 = vmatprep.subr.bf16.mxu1 %v2758_v8  ;;  %v2763_v18 = vcombine.low %v54_v6, %v58_v7 }
   0x6   :  { %v66_v15 = vld [vmem:[%s4327_s1 + $0xa0] sm:$0xff]  ;;  %v67_v17 = vld [vmem:[%s4327_s1 + $0xa8] sm:$0xff]  ;;  %1597 = vmatpush1.bf16.msra.mxu0 %v2755_v5  ;;  %1679 = vmatpush1.bf16.msra.mxu1 %v2757_v9  ;;  %v2765_v19 = vcombine.low %v55_v11, %v59_v12 }
   0x7   :  { %1598 = vmatprep.subr.bf16.mxu0 %v2764_v10  ;;  %v2772_v20 = vcombine.high %v62_v13, %v66_v15  ;;  %1680 = vmatprep.subr.bf16.mxu1 %v2766_v14  ;;  %v2774_v21 = vcombine.high %v63_v16, %v67_v17  ;;  %v70_v22 = vld [vmem:[%s4327_s1 + $0xc0] sm:$0xff]  ;;  %v71_v24 = vld [vmem:[%s4327_s1 + $0xc8] sm:$0xff]  ;;  %v2771_v26 = vcombine.low %v62_v13, %v66_v15 }
   0x8   :  { %v74_v23 = vld [vmem:[%s4327_s1 + $0xe0] sm:$0xff]  ;;  %v75_v25 = vld [vmem:[%s4327_s1 + $0xe8] sm:$0xff]  ;;  %v2773_v27 = vcombine.low %v63_v16, %v67_v17 }
   0x9   :  { %v2780_v28 = vcombine.high %v70_v22, %v74_v23  ;;  %v2782_v29 = vcombine.high %v71_v24, %v75_v25  ;;  %v78_v30 = vld [vmem:[%s4327_s1 + $0x100] sm:$0xff]  ;;  %v79_v32 = vld [vmem:[%s4327_s1 + $0x108] sm:$0xff]  ;;  %v2779_v34 = vcombine.low %v70_v22, %v74_v23  ;;  %v2781_v35 = vcombine.low %v71_v24, %v75_v25 }
   0xa   :  { %1599 = vmatpush1.bf16.msra.mxu0 %v2763_v18  ;;  %1681 = vmatpush1.bf16.msra.mxu1 %v2765_v19  ;;  %v82_v31 = vld [vmem:[%s4327_s1 + $0x120] sm:$0xff]  ;;  %v83_v33 = vld [vmem:[%s4327_s1 + $0x128] sm:$0xff] }
   0xb   :  { %1600 = vmatprep.subr.bf16.mxu0 %v2772_v20  ;;  %1682 = vmatprep.subr.bf16.mxu1 %v2774_v21  ;;  %v2788_v36 = vcombine.high %v78_v30, %v82_v31  ;;  %v2790_v37 = vcombine.high %v79_v32, %v83_v33  ;;  %v86_v38 = vld [vmem:[%s4327_s1 + $0x140] sm:$0xff]  ;;  %v87_v40 = vld [vmem:[%s4327_s1 + $0x148] sm:$0xff]  ;;  %v2787_v42 = vcombine.low %v78_v30, %v82_v31 }
   0xc   :  { %v90_v39 = vld [vmem:[%s4327_s1 + $0x160] sm:$0xff]  ;;  %v91_v41 = vld [vmem:[%s4327_s1 + $0x168] sm:$0xff]  ;;  %v2789_v43 = vcombine.low %v79_v32, %v83_v33 }
   0xd   :  { %v2796_v44 = vcombine.high %v86_v38, %v90_v39  ;;  %v2798_v45 = vcombine.high %v87_v40, %v91_v41  ;;  %v94_v46 = vld [vmem:[%s4327_s1 + $0x180] sm:$0xff]  ;;  %v95_v48 = vld [vmem:[%s4327_s1 + $0x188] sm:$0xff]  ;;  %v2795_v50 = vcombine.low %v86_v38, %v90_v39  ;;  %v2797_v51 = vcombine.low %v87_v40, %v91_v41 }
   0xe   :  { %1601 = vmatpush1.bf16.msra.mxu0 %v2771_v26  ;;  %1683 = vmatpush1.bf16.msra.mxu1 %v2773_v27  ;;  %v98_v47 = vld [vmem:[%s4327_s1 + $0x1a0] sm:$0xff]  ;;  %v99_v49 = vld [vmem:[%s4327_s1 + $0x1a8] sm:$0xff] }
   0xf   :  { %1602 = vmatprep.subr.bf16.mxu0 %v2780_v28  ;;  %1684 = vmatprep.subr.bf16.mxu1 %v2782_v29  ;;  %v2804_v52 = vcombine.high %v94_v46, %v98_v47  ;;  %v3370_v53 = vld [vmem:[%s4328_s0] sm:$0xff]  ;;  %v2806_v54 = vcombine.high %v95_v48, %v99_v49  ;;  %v103_v58 = vld [vmem:[%s4327_s1 + $0x1c8] sm:$0xff]  ;;  %v2803_v60 = vcombine.low %v94_v46, %v98_v47 }
  0x10   :  { %v102_v55 = vld [vmem:[%s4327_s1 + $0x1c0] sm:$0xff]  ;;  %v3380_v57 = vcombine.high %v3370_v53, %v3370_v53  ;;  %v107_v59 = vld [vmem:[%s4327_s1 + $0x1e8] sm:$0xff]  ;;  %v2805_v61 = vcombine.low %v95_v48, %v99_v49 }
  0x11   :  { %v106_v56 = vld [vmem:[%s4327_s1 + $0x1e0] sm:$0xff]  ;;  %v2814_v63 = vcombine.high %v103_v58, %v107_v59  ;;  %v111_v2 = vld [vmem:[%s4327_s1 + $0x208] sm:$0xff]  ;;  %v2813_v5 = vcombine.low %v103_v58, %v107_v59 }
  0x12   :  { %1603 = vmatpush1.bf16.msra.mxu0 %v2779_v34  ;;  %1685 = vmatpush1.bf16.msra.mxu1 %v2781_v35  ;;  %v2812_v62 = vcombine.high %v102_v55, %v106_v56  ;;  %v110_v0 = vld [vmem:[%s4327_s1 + $0x200] sm:$0xff]  ;;  %v115_v3 = vld [vmem:[%s4327_s1 + $0x228] sm:$0xff]  ;;  %v2811_v4 = vcombine.low %v102_v55, %v106_v56 }
  0x13   :  { %1604 = vmatprep.subr.bf16.mxu0 %v2788_v36  ;;  %1686 = vmatprep.subr.bf16.mxu1 %v2790_v37  ;;  %v114_v1 = vld [vmem:[%s4327_s1 + $0x220] sm:$0xff]  ;;  %v2822_v7 = vcombine.high %v111_v2, %v115_v3  ;;  %v119_v10 = vld [vmem:[%s4327_s1 + $0x248] sm:$0xff]  ;;  %v2821_v13 = vcombine.low %v111_v2, %v115_v3 }
  0x14   :  { %1628 = vmatprep.mubr.bf16.mxu0 %v3380_v57  ;;  %1710 = vmatprep.mubr.bf16.mxu1 %v3380_v57  ;;  %v2820_v6 = vcombine.high %v110_v0, %v114_v1  ;;  %v118_v8 = vld [vmem:[%s4327_s1 + $0x240] sm:$0xff]  ;;  %v123_v11 = vld [vmem:[%s4327_s1 + $0x268] sm:$0xff]  ;;  %v2819_v12 = vcombine.low %v110_v0, %v114_v1 }
  0x15   :  { %v122_v9 = vld [vmem:[%s4327_s1 + $0x260] sm:$0xff]  ;;  %v2830_v15 = vcombine.high %v119_v10, %v123_v11  ;;  %v127_v18 = vld [vmem:[%s4327_s1 + $0x288] sm:$0xff]  ;;  %v2829_v21 = vcombine.low %v119_v10, %v123_v11 }
  0x16   :  { %1605 = vmatpush1.bf16.msra.mxu0 %v2787_v42  ;;  %1687 = vmatpush1.bf16.msra.mxu1 %v2789_v43  ;;  %v2828_v14 = vcombine.high %v118_v8, %v122_v9  ;;  %v126_v16 = vld [vmem:[%s4327_s1 + $0x280] sm:$0xff]  ;;  %v131_v19 = vld [vmem:[%s4327_s1 + $0x2a8] sm:$0xff]  ;;  %v2827_v20 = vcombine.low %v118_v8, %v122_v9 }
  0x17   :  { %1606 = vmatprep.subr.bf16.mxu0 %v2796_v44  ;;  %1688 = vmatprep.subr.bf16.mxu1 %v2798_v45  ;;  %v130_v17 = vld [vmem:[%s4327_s1 + $0x2a0] sm:$0xff]  ;;  %v2838_v23 = vcombine.high %v127_v18, %v131_v19  ;;  %v135_v26 = vld [vmem:[%s4327_s1 + $0x2c8] sm:$0xff]  ;;  %v2837_v29 = vcombine.low %v127_v18, %v131_v19 }
  0x18   :  { %v2836_v22 = vcombine.high %v126_v16, %v130_v17  ;;  %v134_v24 = vld [vmem:[%s4327_s1 + $0x2c0] sm:$0xff]  ;;  %v139_v27 = vld [vmem:[%s4327_s1 + $0x2e8] sm:$0xff]  ;;  %v2835_v28 = vcombine.low %v126_v16, %v130_v17 }
  0x19   :  { %v138_v25 = vld [vmem:[%s4327_s1 + $0x2e0] sm:$0xff]  ;;  %v2846_v31 = vcombine.high %v135_v26, %v139_v27  ;;  %v143_v34 = vld [vmem:[%s4327_s1 + $0x308] sm:$0xff]  ;;  %v2845_v37 = vcombine.low %v135_v26, %v139_v27 }
  0x1a   :  { %1607 = vmatpush1.bf16.msra.mxu0 %v2795_v50  ;;  %1689 = vmatpush1.bf16.msra.mxu1 %v2797_v51  ;;  %v2844_v30 = vcombine.high %v134_v24, %v138_v25  ;;  %v142_v32 = vld [vmem:[%s4327_s1 + $0x300] sm:$0xff]  ;;  %v147_v35 = vld [vmem:[%s4327_s1 + $0x328] sm:$0xff]  ;;  %v2843_v36 = vcombine.low %v134_v24, %v138_v25 }
  0x1b   :  { %1608 = vmatprep.subr.bf16.mxu0 %v2804_v52  ;;  %1690 = vmatprep.subr.bf16.mxu1 %v2806_v54  ;;  %v146_v33 = vld [vmem:[%s4327_s1 + $0x320] sm:$0xff]  ;;  %v2854_v39 = vcombine.high %v143_v34, %v147_v35  ;;  %v151_v42 = vld [vmem:[%s4327_s1 + $0x348] sm:$0xff]  ;;  %v2853_v45 = vcombine.low %v143_v34, %v147_v35 }
  0x1c   :  { %v2852_v38 = vcombine.high %v142_v32, %v146_v33  ;;  %v150_v40 = vld [vmem:[%s4327_s1 + $0x340] sm:$0xff]  ;;  %v155_v43 = vld [vmem:[%s4327_s1 + $0x368] sm:$0xff]  ;;  %v2851_v44 = vcombine.low %v142_v32, %v146_v33 }
  0x1d   :  { %v154_v41 = vld [vmem:[%s4327_s1 + $0x360] sm:$0xff]  ;;  %v2862_v47 = vcombine.high %v151_v42, %v155_v43  ;;  %v159_v50 = vld [vmem:[%s4327_s1 + $0x388] sm:$0xff]  ;;  %v2861_v54 = vcombine.low %v151_v42, %v155_v43 }
  0x1e   :  { %1609 = vmatpush1.bf16.msra.mxu0 %v2803_v60  ;;  %1691 = vmatpush1.bf16.msra.mxu1 %v2805_v61  ;;  %v2860_v46 = vcombine.high %v150_v40, %v154_v41  ;;  %v158_v48 = vld [vmem:[%s4327_s1 + $0x380] sm:$0xff]  ;;  %v163_v51 = vld [vmem:[%s4327_s1 + $0x3a8] sm:$0xff]  ;;  %v2859_v52 = vcombine.low %v150_v40, %v154_v41 }
  0x1f   :  { %1610 = vmatprep.subr.bf16.mxu0 %v2812_v62  ;;  %1692 = vmatprep.subr.bf16.mxu1 %v2814_v63  ;;  %v162_v49 = vld [vmem:[%s4327_s1 + $0x3a0] sm:$0xff]  ;;  %v2870_v56 = vcombine.high %v159_v50, %v163_v51  ;;  %v167_v60 = vld [vmem:[%s4327_s1 + $0x3c8] sm:$0xff]  ;;  %v2869_v63 = vcombine.low %v159_v50, %v163_v51 }
  0x20   :  { %v2868_v55 = vcombine.high %v158_v48, %v162_v49  ;;  %v166_v58 = vld [vmem:[%s4327_s1 + $0x3c0] sm:$0xff]  ;;  %v171_v61 = vld [vmem:[%s4327_s1 + $0x3e8] sm:$0xff]  ;;  %v2867_v62 = vcombine.low %v158_v48, %v162_v49 }
  0x21   :  { %v170_v59 = vld [vmem:[%s4327_s1 + $0x3e0] sm:$0xff]  ;;  %v2878_v1 = vcombine.high %v167_v60, %v171_v61 }
  0x22   :  { %1611 = vmatpush1.bf16.msra.mxu0 %v2811_v4  ;;  %1693 = vmatpush1.bf16.msra.mxu1 %v2813_v5  ;;  %v2876_v0 = vcombine.high %v166_v58, %v170_v59  ;;  %v174_v2 = vld [vmem:[%s4327_s1 + $0x400] sm:$0xff]  ;;  %v175_v4 = vld [vmem:[%s4327_s1 + $0x408] sm:$0xff] }
  0x23   :  { %1612 = vmatprep.subr.bf16.mxu0 %v2820_v6  ;;  %1694 = vmatprep.subr.bf16.mxu1 %v2822_v7  ;;  %v178_v3 = vld [vmem:[%s4327_s1 + $0x420] sm:$0xff]  ;;  %v179_v5 = vld [vmem:[%s4327_s1 + $0x428] sm:$0xff]  ;;  %v2875_v6 = vcombine.low %v166_v58, %v170_v59  ;;  %v2877_v7 = vcombine.low %v167_v60, %v171_v61 }
  0x24   :  { %v2884_v8 = vcombine.high %v174_v2, %v178_v3  ;;  %v2886_v9 = vcombine.high %v175_v4, %v179_v5  ;;  %v182_v10 = vld [vmem:[%s4327_s1 + $0x440] sm:$0xff]  ;;  %v2883_v16 = vcombine.low %v174_v2, %v178_v3  ;;  %v2885_v17 = vcombine.low %v175_v4, %v179_v5 }
  0x25   :  { %v186_v11 = vld [vmem:[%s4327_s1 + $0x460] sm:$0xff] }
  0x26   :  { %1613 = vmatpush1.bf16.msra.mxu0 %v2819_v12  ;;  %1695 = vmatpush1.bf16.msra.mxu1 %v2821_v13  ;;  %v3506_v12 = vcombine.low %v3370_v53, %v3370_v53  ;;  %v183_v13 = vld [vmem:[%s4327_s1 + $0x448] sm:$0xff]  ;;  %v2892_v53 = vcombine.high %v182_v10, %v186_v11  ;;  %v190_v19 = vld [vmem:[%s4327_s1 + $0x480] sm:$0xff]  ;;  %v2891_v24 = vcombine.low %v182_v10, %v186_v11 }
  0x27   :  { %1614 = vmatprep.subr.bf16.mxu0 %v2828_v14  ;;  %1696 = vmatprep.subr.bf16.mxu1 %v2830_v15  ;;  %v187_v14 = vld [vmem:[%s4327_s1 + $0x468] sm:$0xff] }
  0x28   :  { %v3517_v15 = vld [vmem:[%s4328_s0 + $0x8] sm:$0xff]  ;;  %v2894_v18 = vcombine.high %v183_v13, %v187_v14  ;;  %v2893_v25 = vcombine.low %v183_v13, %v187_v14 }
  0x2a   :  { %1615 = vmatpush1.bf16.msra.mxu0 %v2827_v20  ;;  %1697 = vmatpush1.bf16.msra.mxu1 %v2829_v21  ;;  %v194_v20 = vld [vmem:[%s4327_s1 + $0x4a0] sm:$0xff]  ;;  %v3527_v21 = vcombine.high %v3517_v15, %v3517_v15 }
  0x2b   :  { %1616 = vmatprep.subr.bf16.mxu0 %v2836_v22  ;;  %1698 = vmatprep.subr.bf16.mxu1 %v2838_v23  ;;  %v191_v22 = vld [vmem:[%s4327_s1 + $0x488] sm:$0xff]  ;;  %v2900_v26 = vcombine.high %v190_v19, %v194_v20  ;;  %v2899_v32 = vcombine.low %v190_v19, %v194_v20 }
  0x2c   :  { %v195_v23 = vld [vmem:[%s4327_s1 + $0x4a8] sm:$0xff] }
  0x2d   :  { %v2902_v27 = vcombine.high %v191_v22, %v195_v23  ;;  %v2901_v33 = vcombine.low %v191_v22, %v195_v23 }
  0x2e   :  { %1617 = vmatpush1.bf16.msra.mxu0 %v2835_v28  ;;  %1699 = vmatpush1.bf16.msra.mxu1 %v2837_v29  ;;  %v198_v28 = vld [vmem:[%s4327_s1 + $0x4c0] sm:$0xff] }
  0x2f   :  { %1618 = vmatprep.subr.bf16.mxu0 %v2844_v30  ;;  %1700 = vmatprep.subr.bf16.mxu1 %v2846_v31  ;;  %v202_v29 = vld [vmem:[%s4327_s1 + $0x4e0] sm:$0xff]  ;;  %v199_v30 = vld [vmem:[%s4327_s1 + $0x4c8] sm:$0xff] }
  0x30   :  { %v203_v31 = vld [vmem:[%s4327_s1 + $0x4e8] sm:$0xff]  ;;  %v2908_v34 = vcombine.high %v198_v28, %v202_v29  ;;  %v2907_v40 = vcombine.low %v198_v28, %v202_v29 }
  0x31   :  { %v2910_v35 = vcombine.high %v199_v30, %v203_v31  ;;  %v2909_v41 = vcombine.low %v199_v30, %v203_v31 }
  0x32   :  { %1619 = vmatpush1.bf16.msra.mxu0 %v2843_v36  ;;  %1701 = vmatpush1.bf16.msra.mxu1 %v2845_v37  ;;  %v206_v36 = vld [vmem:[%s4327_s1 + $0x500] sm:$0xff] }
  0x33   :  { %1620 = vmatprep.subr.bf16.mxu0 %v2852_v38  ;;  %1702 = vmatprep.subr.bf16.mxu1 %v2854_v39  ;;  %v210_v37 = vld [vmem:[%s4327_s1 + $0x520] sm:$0xff]  ;;  %v207_v38 = vld [vmem:[%s4327_s1 + $0x508] sm:$0xff] }
  0x34   :  { %v211_v39 = vld [vmem:[%s4327_s1 + $0x528] sm:$0xff]  ;;  %v2916_v42 = vcombine.high %v206_v36, %v210_v37  ;;  %v2915_v48 = vcombine.low %v206_v36, %v210_v37 }
  0x35   :  { %v2918_v43 = vcombine.high %v207_v38, %v211_v39  ;;  %v2917_v49 = vcombine.low %v207_v38, %v211_v39 }
  0x36   :  { %1621 = vmatpush1.bf16.msra.mxu0 %v2851_v44  ;;  %1703 = vmatpush1.bf16.msra.mxu1 %v2853_v45  ;;  %v214_v44 = vld [vmem:[%s4327_s1 + $0x540] sm:$0xff] }
  0x37   :  { %1622 = vmatprep.subr.bf16.mxu0 %v2860_v46  ;;  %1704 = vmatprep.subr.bf16.mxu1 %v2862_v47  ;;  %v218_v45 = vld [vmem:[%s4327_s1 + $0x560] sm:$0xff]  ;;  %v215_v46 = vld [vmem:[%s4327_s1 + $0x548] sm:$0xff] }
  0x38   :  { %v219_v47 = vld [vmem:[%s4327_s1 + $0x568] sm:$0xff]  ;;  %v2924_v50 = vcombine.high %v214_v44, %v218_v45  ;;  %v2923_v58 = vcombine.low %v214_v44, %v218_v45 }
  0x39   :  { %v2926_v51 = vcombine.high %v215_v46, %v219_v47  ;;  %v2925_v59 = vcombine.low %v215_v46, %v219_v47 }
  0x3a   :  { %1623 = vmatpush1.bf16.msra.mxu0 %v2859_v52  ;;  %1705 = vmatpush1.bf16.msra.mxu1 %v2861_v54  ;;  %v222_v52 = vld [vmem:[%s4327_s1 + $0x580] sm:$0xff] }
  0x3b   :  { %1624 = vmatprep.subr.bf16.mxu0 %v2868_v55  ;;  %1706 = vmatprep.subr.bf16.mxu1 %v2870_v56  ;;  %v226_v54 = vld [vmem:[%s4327_s1 + $0x5a0] sm:$0xff]  ;;  %v223_v55 = vld [vmem:[%s4327_s1 + $0x588] sm:$0xff] }
  0x3c   :  { %v227_v56 = vld [vmem:[%s4327_s1 + $0x5a8] sm:$0xff]  ;;  %v2932_v60 = vcombine.high %v222_v52, %v226_v54  ;;  %v2931_v2 = vcombine.low %v222_v52, %v226_v54 }
  0x3d   :  { %v2934_v61 = vcombine.high %v223_v55, %v227_v56  ;;  %v2933_v3 = vcombine.low %v223_v55, %v227_v56 }
  0x3e   :  { %1625 = vmatpush1.bf16.msra.mxu0 %v2867_v62  ;;  %1707 = vmatpush1.bf16.msra.mxu1 %v2869_v63  ;;  %v230_v62 = vld [vmem:[%s4327_s1 + $0x5c0] sm:$0xff] }
  0x3f   :  { %1626 = vmatprep.subr.bf16.mxu0 %v2876_v0  ;;  %1708 = vmatprep.subr.bf16.mxu1 %v2878_v1  ;;  %v234_v63 = vld [vmem:[%s4327_s1 + $0x5e0] sm:$0xff]  ;;  %v231_v0 = vld [vmem:[%s4327_s1 + $0x5c8] sm:$0xff] }
  0x40   :  { %v235_v1 = vld [vmem:[%s4327_s1 + $0x5e8] sm:$0xff]  ;;  %v2940_v4 = vcombine.high %v230_v62, %v234_v63  ;;  %v2939_v10 = vcombine.low %v230_v62, %v234_v63 }
  0x41   :  { %v2942_v5 = vcombine.high %v231_v0, %v235_v1  ;;  %v2941_v11 = vcombine.low %v231_v0, %v235_v1 }
  0x42   :  { %1627 = vmatpush1.bf16.msra.mxu0 %v2875_v6  ;;  %1709 = vmatpush1.bf16.msra.mxu1 %v2877_v7  ;;  %v238_v6 = vld [vmem:[%s4327_s1 + $0x600] sm:$0xff] }
  0x43   :  { %1637 = vmatprep.subr.bf16.mxu0 %v2884_v8  ;;  %1719 = vmatprep.subr.bf16.mxu1 %v2886_v9  ;;  %v242_v7 = vld [vmem:[%s4327_s1 + $0x620] sm:$0xff]  ;;  %v239_v8 = vld [vmem:[%s4327_s1 + $0x608] sm:$0xff] }
  0x44   :  { %v243_v9 = vld [vmem:[%s4327_s1 + $0x628] sm:$0xff]  ;;  %v2948_v13 = vcombine.high %v238_v6, %v242_v7  ;;  %v2947_v19 = vcombine.low %v238_v6, %v242_v7 }
  0x45   :  { %1629 = vmatmul.mubr.bf16.vlgmr.msra.gmra.mrb[0].mxu0 %v3506_v12  ;;  %1711 = vmatmul.mubr.bf16.vlgmr.msra.gmra.mrb[0].mxu1 %v3506_v12  ;;  %v2950_v14 = vcombine.high %v239_v8, %v243_v9  ;;  %v2949_v20 = vcombine.low %v239_v8, %v243_v9 }
  0x46   :  { %1638 = vmatpush1.bf16.msra.mxu0 %v2883_v16  ;;  %1720 = vmatpush1.bf16.msra.mxu1 %v2885_v17  ;;  %v246_v16 = vld [vmem:[%s4327_s1 + $0x640] sm:$0xff] }
  0x47   :  { %1639 = vmatprep.subr.bf16.mxu0 %v2892_v53  ;;  %1721 = vmatprep.subr.bf16.mxu1 %v2894_v18  ;;  %v250_v17 = vld [vmem:[%s4327_s1 + $0x660] sm:$0xff]  ;;  %v247_v53 = vld [vmem:[%s4327_s1 + $0x648] sm:$0xff] }
  0x48   :  { %1669 = vmatprep.mubr.bf16.mxu0 %v3527_v21  ;;  %1751 = vmatprep.mubr.bf16.mxu1 %v3527_v21  ;;  %v251_v18 = vld [vmem:[%s4327_s1 + $0x668] sm:$0xff]  ;;  %v2956_v22 = vcombine.high %v246_v16, %v250_v17  ;;  %v2955_v28 = vcombine.low %v246_v16, %v250_v17 }
  0x49   :  { %v2958_v23 = vcombine.high %v247_v53, %v251_v18  ;;  %v2957_v29 = vcombine.low %v247_v53, %v251_v18 }
  0x4a   :  { %1640 = vmatpush1.bf16.msra.mxu0 %v2891_v24  ;;  %1722 = vmatpush1.bf16.msra.mxu1 %v2893_v25  ;;  %v254_v24 = vld [vmem:[%s4327_s1 + $0x680] sm:$0xff] }
  0x4b   :  { %1641 = vmatprep.subr.bf16.mxu0 %v2900_v26  ;;  %1723 = vmatprep.subr.bf16.mxu1 %v2902_v27  ;;  %v258_v25 = vld [vmem:[%s4327_s1 + $0x6a0] sm:$0xff]  ;;  %v255_v26 = vld [vmem:[%s4327_s1 + $0x688] sm:$0xff] }
  0x4c   :  { %v259_v27 = vld [vmem:[%s4327_s1 + $0x6a8] sm:$0xff]  ;;  %v2964_v30 = vcombine.high %v254_v24, %v258_v25  ;;  %v2963_v36 = vcombine.low %v254_v24, %v258_v25  ;;  %v61_v24 = vld [vmem:[%s4327_s1 + $0x78] sm:$0xff] }
  0x4d   :  { %v2966_v31 = vcombine.high %v255_v26, %v259_v27  ;;  %v2965_v37 = vcombine.low %v255_v26, %v259_v27 }
  0x4e   :  { %1642 = vmatpush1.bf16.msra.mxu0 %v2899_v32  ;;  %1724 = vmatpush1.bf16.msra.mxu1 %v2901_v33  ;;  %v262_v32 = vld [vmem:[%s4327_s1 + $0x6c0] sm:$0xff] }
  0x4f   :  { %1643 = vmatprep.subr.bf16.mxu0 %v2908_v34  ;;  %1725 = vmatprep.subr.bf16.mxu1 %v2910_v35  ;;  %v266_v33 = vld [vmem:[%s4327_s1 + $0x6e0] sm:$0xff]  ;;  %v263_v34 = vld [vmem:[%s4327_s1 + $0x6c8] sm:$0xff] }
  0x50   :  { %v267_v35 = vld [vmem:[%s4327_s1 + $0x6e8] sm:$0xff]  ;;  %v2972_v38 = vcombine.high %v262_v32, %v266_v33  ;;  %v2971_v44 = vcombine.low %v262_v32, %v266_v33  ;;  %v72_v33 = vld [vmem:[%s4327_s1 + $0xd0] sm:$0xff] }
  0x51   :  { %v2974_v39 = vcombine.high %v263_v34, %v267_v35  ;;  %v2973_v45 = vcombine.low %v263_v34, %v267_v35 }
  0x52   :  { %1644 = vmatpush1.bf16.msra.mxu0 %v2907_v40  ;;  %1726 = vmatpush1.bf16.msra.mxu1 %v2909_v41  ;;  %v270_v40 = vld [vmem:[%s4327_s1 + $0x700] sm:$0xff] }
  0x53   :  { %1645 = vmatprep.subr.bf16.mxu0 %v2916_v42  ;;  %1727 = vmatprep.subr.bf16.mxu1 %v2918_v43  ;;  %v274_v41 = vld [vmem:[%s4327_s1 + $0x720] sm:$0xff]  ;;  %v271_v42 = vld [vmem:[%s4327_s1 + $0x708] sm:$0xff] }
  0x54   :  { %v275_v43 = vld [vmem:[%s4327_s1 + $0x728] sm:$0xff]  ;;  %v2980_v46 = vcombine.high %v270_v40, %v274_v41  ;;  %v2979_v52 = vcombine.low %v270_v40, %v274_v41  ;;  %v80_v41 = vld [vmem:[%s4327_s1 + $0x110] sm:$0xff] }
  0x55   :  { %v2982_v47 = vcombine.high %v271_v42, %v275_v43  ;;  %v2981_v54 = vcombine.low %v271_v42, %v275_v43 }
  0x56   :  { %1646 = vmatpush1.bf16.msra.mxu0 %v2915_v48  ;;  %1728 = vmatpush1.bf16.msra.mxu1 %v2917_v49  ;;  %v278_v48 = vld [vmem:[%s4327_s1 + $0x740] sm:$0xff] }
  0x57   :  { %1647 = vmatprep.subr.bf16.mxu0 %v2924_v50  ;;  %1729 = vmatprep.subr.bf16.mxu1 %v2926_v51  ;;  %v282_v49 = vld [vmem:[%s4327_s1 + $0x760] sm:$0xff]  ;;  %v279_v50 = vld [vmem:[%s4327_s1 + $0x748] sm:$0xff] }
  0x58   :  { %v283_v51 = vld [vmem:[%s4327_s1 + $0x768] sm:$0xff]  ;;  %v2988_v55 = vcombine.high %v278_v48, %v282_v49  ;;  %v2987_v62 = vcombine.low %v278_v48, %v282_v49  ;;  %v88_v48 = vld [vmem:[%s4327_s1 + $0x150] sm:$0xff] }
  0x59   :  { %v2990_v56 = vcombine.high %v279_v50, %v283_v51  ;;  %v2989_v63 = vcombine.low %v279_v50, %v283_v51  ;;  %v92_v51 = vld [vmem:[%s4327_s1 + $0x170] sm:$0xff] }
  0x5a   :  { %1648 = vmatpush1.bf16.msra.mxu0 %v2923_v58  ;;  %1730 = vmatpush1.bf16.msra.mxu1 %v2925_v59  ;;  %v286_v58 = vld [vmem:[%s4327_s1 + $0x780] sm:$0xff] }
  0x5b   :  { %1649 = vmatprep.subr.bf16.mxu0 %v2932_v60  ;;  %1731 = vmatprep.subr.bf16.mxu1 %v2934_v61  ;;  %v290_v59 = vld [vmem:[%s4327_s1 + $0x7a0] sm:$0xff]  ;;  %v287_v60 = vld [vmem:[%s4327_s1 + $0x788] sm:$0xff] }
  0x5c   :  { %v291_v61 = vld [vmem:[%s4327_s1 + $0x7a8] sm:$0xff]  ;;  %v2996_v0 = vcombine.high %v286_v58, %v290_v59  ;;  %v2995_v6 = vcombine.low %v286_v58, %v290_v59  ;;  %v96_v58 = vld [vmem:[%s4327_s1 + $0x190] sm:$0xff] }
  0x5d   :  { %v2998_v1 = vcombine.high %v287_v60, %v291_v61  ;;  %v2997_v7 = vcombine.low %v287_v60, %v291_v61  ;;  %v2800_v60 = vcombine.high %v88_v48, %v92_v51  ;;  %v100_v61 = vld [vmem:[%s4327_s1 + $0x1b0] sm:$0xff] }
  0x5e   :  { %1650 = vmatpush1.bf16.msra.mxu0 %v2931_v2  ;;  %1732 = vmatpush1.bf16.msra.mxu1 %v2933_v3  ;;  %v294_v2 = vld [vmem:[%s4327_s1 + $0x7c0] sm:$0xff] }
  0x5f   :  { %1651 = vmatprep.subr.bf16.mxu0 %v2940_v4  ;;  %1733 = vmatprep.subr.bf16.mxu1 %v2942_v5  ;;  %v298_v3 = vld [vmem:[%s4327_s1 + $0x7e0] sm:$0xff]  ;;  %v295_v4 = vld [vmem:[%s4327_s1 + $0x7c8] sm:$0xff] }
  0x60   :  { %v299_v5 = vld [vmem:[%s4327_s1 + $0x7e8] sm:$0xff]  ;;  %v3004_v8 = vcombine.high %v294_v2, %v298_v3  ;;  %v3003_v16 = vcombine.low %v294_v2, %v298_v3  ;;  %v104_v2 = vld [vmem:[%s4327_s1 + $0x1d0] sm:$0xff] }
  0x61   :  { %v3006_v9 = vcombine.high %v295_v4, %v299_v5  ;;  %v3005_v17 = vcombine.low %v295_v4, %v299_v5  ;;  %v2808_v4 = vcombine.high %v96_v58, %v100_v61  ;;  %v108_v5 = vld [vmem:[%s4327_s1 + $0x1f0] sm:$0xff] }
  0x62   :  { %1652 = vmatpush1.bf16.msra.mxu0 %v2939_v10  ;;  %1734 = vmatpush1.bf16.msra.mxu1 %v2941_v11  ;;  %v48_v10 = vld [vmem:[%s4327_s1 + $0x10] sm:$0xff] }
  0x63   :  { %1653 = vmatprep.subr.bf16.mxu0 %v2948_v13  ;;  %1735 = vmatprep.subr.bf16.mxu1 %v2950_v14  ;;  %v52_v11 = vld [vmem:[%s4327_s1 + $0x30] sm:$0xff]  ;;  %v49_v13 = vld [vmem:[%s4327_s1 + $0x18] sm:$0xff] }
  0x64   :  { %v53_v14 = vld [vmem:[%s4327_s1 + $0x38] sm:$0xff]  ;;  %v2760_v53 = vcombine.high %v48_v10, %v52_v11  ;;  %v2759_v25 = vcombine.low %v48_v10, %v52_v11  ;;  %v112_v10 = vld [vmem:[%s4327_s1 + $0x210] sm:$0xff] }
  0x65   :  { %v2762_v18 = vcombine.high %v49_v13, %v53_v14  ;;  %v2761_v26 = vcombine.low %v49_v13, %v53_v14  ;;  %v116_v11 = vld [vmem:[%s4327_s1 + $0x230] sm:$0xff]  ;;  %v2816_v14 = vcombine.high %v104_v2, %v108_v5 }
  0x66   :  { %1654 = vmatpush1.bf16.msra.mxu0 %v2947_v19  ;;  %1736 = vmatpush1.bf16.msra.mxu1 %v2949_v20  ;;  %v56_v19 = vld [vmem:[%s4327_s1 + $0x50] sm:$0xff] }
  0x67   :  { %1655 = vmatprep.subr.bf16.mxu0 %v2956_v22  ;;  %1737 = vmatprep.subr.bf16.mxu1 %v2958_v23  ;;  %v60_v20 = vld [vmem:[%s4327_s1 + $0x70] sm:$0xff]  ;;  %v3715_v22 = vcombine.low %v3517_v15, %v3517_v15  ;;  %v57_v23 = vld [vmem:[%s4327_s1 + $0x58] sm:$0xff] }
  0x68   :  { %v2768_v27 = vcombine.high %v56_v19, %v60_v20  ;;  %v64_v15 = vld [vmem:[%s4327_s1 + $0x90] sm:$0xff]  ;;  %v2767_v32 = vcombine.low %v56_v19, %v60_v20  ;;  %v2769_v34 = vcombine.low %v57_v23, %v61_v24 }
  0x69   :  { %v120_v19 = vld [vmem:[%s4327_s1 + $0x250] sm:$0xff] }
  0x6a   :  { %1656 = vmatpush1.bf16.msra.mxu0 %v2955_v28  ;;  %1738 = vmatpush1.bf16.msra.mxu1 %v2957_v29  ;;  %v2770_v28 = vcombine.high %v57_v23, %v61_v24  ;;  %v68_v29 = vld [vmem:[%s4327_s1 + $0xb0] sm:$0xff]  ;;  %v2824_v24 = vcombine.high %v112_v10, %v116_v11 }
  0x6b   :  { %1657 = vmatprep.subr.bf16.mxu0 %v2964_v30  ;;  %1739 = vmatprep.subr.bf16.mxu1 %v2966_v31  ;;  %v65_v30 = vld [vmem:[%s4327_s1 + $0x98] sm:$0xff]  ;;  %v2776_v35 = vcombine.high %v64_v15, %v68_v29  ;;  %v2775_v40 = vcombine.low %v64_v15, %v68_v29  ;;  %v124_v20 = vld [vmem:[%s4327_s1 + $0x270] sm:$0xff] }
  0x6c   :  { %v69_v31 = vld [vmem:[%s4327_s1 + $0xb8] sm:$0xff]  ;;  %v128_v15 = vld [vmem:[%s4327_s1 + $0x290] sm:$0xff] }
  0x6d   :  { %v2777_v42 = vcombine.low %v65_v30, %v69_v31  ;;  %v132_v29 = vld [vmem:[%s4327_s1 + $0x2b0] sm:$0xff] }
  0x6e   :  { %1658 = vmatpush1.bf16.msra.mxu0 %v2963_v36  ;;  %1740 = vmatpush1.bf16.msra.mxu1 %v2965_v37  ;;  %v76_v36 = vld [vmem:[%s4327_s1 + $0xf0] sm:$0xff]  ;;  %v2778_v37 = vcombine.high %v65_v30, %v69_v31  ;;  %v2832_v31 = vcombine.high %v120_v19, %v124_v20 }
  0x6f   :  { %1659 = vmatprep.subr.bf16.mxu0 %v2972_v38  ;;  %1741 = vmatprep.subr.bf16.mxu1 %v2974_v39  ;;  %v73_v38 = vld [vmem:[%s4327_s1 + $0xd8] sm:$0xff]  ;;  %v2784_v43 = vcombine.high %v72_v33, %v76_v36 }
  0x70   :  { %v77_v39 = vld [vmem:[%s4327_s1 + $0xf8] sm:$0xff] }
  0x71   :  { %v2785_v49 = vcombine.low %v73_v38, %v77_v39 }
  0x72   :  { %1660 = vmatpush1.bf16.msra.mxu0 %v2971_v44  ;;  %1742 = vmatpush1.bf16.msra.mxu1 %v2973_v45  ;;  %v84_v44 = vld [vmem:[%s4327_s1 + $0x130] sm:$0xff]  ;;  %v2786_v45 = vcombine.high %v73_v38, %v77_v39  ;;  %v2840_v39 = vcombine.high %v128_v15, %v132_v29 }
  0x73   :  { %1661 = vmatprep.subr.bf16.mxu0 %v2980_v46  ;;  %1743 = vmatprep.subr.bf16.mxu1 %v2982_v47  ;;  %v85_v46 = vld [vmem:[%s4327_s1 + $0x138] sm:$0xff]  ;;  %v2783_v47 = vcombine.low %v72_v33, %v76_v36  ;;  %v2792_v50 = vcombine.high %v80_v41, %v84_v44  ;;  %v136_v36 = vld [vmem:[%s4327_s1 + $0x2d0] sm:$0xff] }
  0x74   :  { %v133_v33 = vld [vmem:[%s4327_s1 + $0x2b8] sm:$0xff] }
  0x76   :  { %1662 = vmatpush1.bf16.msra.mxu0 %v2979_v52  ;;  %1744 = vmatpush1.bf16.msra.mxu1 %v2981_v54  ;;  %v89_v54 = vld [vmem:[%s4327_s1 + $0x158] sm:$0xff] }
  0x77   :  { %1663 = vmatprep.subr.bf16.mxu0 %v2988_v55  ;;  %1745 = vmatprep.subr.bf16.mxu1 %v2990_v56  ;;  %v93_v55 = vld [vmem:[%s4327_s1 + $0x178] sm:$0xff]  ;;  %v2791_v56 = vcombine.low %v80_v41, %v84_v44  ;;  %v144_v44 = vld [vmem:[%s4327_s1 + $0x310] sm:$0xff] }
  0x78   :  { %v2801_v3 = vcombine.low %v89_v54, %v93_v55  ;;  %v141_v41 = vld [vmem:[%s4327_s1 + $0x2f8] sm:$0xff] }
  0x7a   :  { %1664 = vmatpush1.bf16.msra.mxu0 %v2987_v62  ;;  %1746 = vmatpush1.bf16.msra.mxu1 %v2989_v63  ;;  %v2802_v62 = vcombine.high %v89_v54, %v93_v55  ;;  %v97_v63 = vld [vmem:[%s4327_s1 + $0x198] sm:$0xff] }
  0x7b   :  { %1665 = vmatprep.subr.bf16.mxu0 %v2996_v0  ;;  %1747 = vmatprep.subr.bf16.mxu1 %v2998_v1  ;;  %v101_v0 = vld [vmem:[%s4327_s1 + $0x1b8] sm:$0xff]  ;;  %v2799_v1 = vcombine.low %v88_v48, %v92_v51  ;;  %v152_v51 = vld [vmem:[%s4327_s1 + $0x350] sm:$0xff] }
  0x7c   :  { %v2809_v13 = vcombine.low %v97_v63, %v101_v0  ;;  %v149_v48 = vld [vmem:[%s4327_s1 + $0x338] sm:$0xff] }
  0x7e   :  { %1666 = vmatpush1.bf16.msra.mxu0 %v2995_v6  ;;  %1748 = vmatpush1.bf16.msra.mxu1 %v2997_v7  ;;  %v2810_v6 = vcombine.high %v97_v63, %v101_v0  ;;  %v105_v7 = vld [vmem:[%s4327_s1 + $0x1d8] sm:$0xff] }
  0x7f   :  { %1667 = vmatprep.subr.bf16.mxu0 %v3004_v8  ;;  %1749 = vmatprep.subr.bf16.mxu1 %v3006_v9  ;;  %v109_v8 = vld [vmem:[%s4327_s1 + $0x1f8] sm:$0xff]  ;;  %v2807_v9 = vcombine.low %v96_v58, %v100_v61  ;;  %v160_v61 = vld [vmem:[%s4327_s1 + $0x390] sm:$0xff] }
  0x80   :  { %v2817_v23 = vcombine.low %v105_v7, %v109_v8  ;;  %v157_v58 = vld [vmem:[%s4327_s1 + $0x378] sm:$0xff] }
  0x82   :  { %1668 = vmatpush1.bf16.msra.mxu0 %v3003_v16  ;;  %1750 = vmatpush1.bf16.msra.mxu1 %v3005_v17  ;;  %v113_v16 = vld [vmem:[%s4327_s1 + $0x218] sm:$0xff]  ;;  %v2818_v17 = vcombine.high %v105_v7, %v109_v8 }
  0x83   :  { %1760 = vmatprep.subr.bf16.mxu0 %v2760_v53  ;;  %1842 = vmatprep.subr.bf16.mxu1 %v2762_v18  ;;  %v117_v53 = vld [vmem:[%s4327_s1 + $0x238] sm:$0xff]  ;;  %v2815_v18 = vcombine.low %v104_v2, %v108_v5  ;;  %v168_v5 = vld [vmem:[%s4327_s1 + $0x3d0] sm:$0xff] }
  0x84   :  { %v2825_v30 = vcombine.low %v113_v16, %v117_v53  ;;  %v165_v2 = vld [vmem:[%s4327_s1 + $0x3b8] sm:$0xff] }
  0x85   :  { %1670 = vmatmul.mubr.bf16.vlgmr.msra.gmra.mrb[0].mxu0 %v3715_v22  ;;  %1752 = vmatmul.mubr.bf16.vlgmr.msra.gmra.mrb[0].mxu1 %v3715_v22 }
  0x86   :  { %1761 = vmatpush1.bf16.msra.mxu0 %v2759_v25  ;;  %1843 = vmatpush1.bf16.msra.mxu1 %v2761_v26  ;;  %v121_v25 = vld [vmem:[%s4327_s1 + $0x258] sm:$0xff] }
  0x87   :  { %1762 = vmatprep.subr.bf16.mxu0 %v2768_v27  ;;  %1844 = vmatprep.subr.bf16.mxu1 %v2770_v28  ;;  %v125_v26 = vld [vmem:[%s4327_s1 + $0x278] sm:$0xff]  ;;  %v2826_v27 = vcombine.high %v113_v16, %v117_v53  ;;  %v2823_v28 = vcombine.low %v112_v10, %v116_v11  ;;  %v176_v53 = vld [vmem:[%s4327_s1 + $0x410] sm:$0xff] }
  0x88   :  { %1792 = vmatprep.mubr.bf16.mxu0 %v3380_v57  ;;  %1874 = vmatprep.mubr.bf16.mxu1 %v3380_v57  ;;  %v81_v57 = vld [vmem:[%s4327_s1 + $0x118] sm:$0xff]  ;;  %v2833_v38 = vcombine.low %v121_v25, %v125_v26 }
  0x89   :  { %v2794_v52 = vcombine.high %v81_v57, %v85_v46  ;;  %v2793_v59 = vcombine.low %v81_v57, %v85_v46  ;;  %v169_v10 = vld [vmem:[%s4327_s1 + $0x3d8] sm:$0xff] }
  0x8a   :  { %1763 = vmatpush1.bf16.msra.mxu0 %v2767_v32  ;;  %1845 = vmatpush1.bf16.msra.mxu1 %v2769_v34  ;;  %v129_v32 = vld [vmem:[%s4327_s1 + $0x298] sm:$0xff]  ;;  %v2834_v34 = vcombine.high %v121_v25, %v125_v26 }
  0x8b   :  { %1764 = vmatprep.subr.bf16.mxu0 %v2776_v35  ;;  %1846 = vmatprep.subr.bf16.mxu1 %v2778_v37  ;;  %v2831_v35 = vcombine.low %v120_v19, %v124_v20  ;;  %v140_v37 = vld [vmem:[%s4327_s1 + $0x2f0] sm:$0xff]  ;;  %v2841_v57 = vcombine.low %v129_v32, %v133_v33  ;;  %v173_v11 = vld [vmem:[%s4327_s1 + $0x3f8] sm:$0xff] }
  0x8c   :  { %v2848_v46 = vcombine.high %v136_v36, %v140_v37  ;;  %v177_v19 = vld [vmem:[%s4327_s1 + $0x418] sm:$0xff] }
  0x8d   :  { %v181_v20 = vld [vmem:[%s4327_s1 + $0x438] sm:$0xff] }
  0x8e   :  { %1765 = vmatpush1.bf16.msra.mxu0 %v2775_v40  ;;  %1847 = vmatpush1.bf16.msra.mxu1 %v2777_v42  ;;  %v137_v40 = vld [vmem:[%s4327_s1 + $0x2d8] sm:$0xff]  ;;  %v2842_v42 = vcombine.high %v129_v32, %v133_v33  ;;  %v2890_v26 = vcombine.high %v177_v19, %v181_v20 }
  0x8f   :  { %1766 = vmatprep.subr.bf16.mxu0 %v2784_v43  ;;  %1848 = vmatprep.subr.bf16.mxu1 %v2786_v45  ;;  %v2839_v43 = vcombine.low %v128_v15, %v132_v29  ;;  %v148_v45 = vld [vmem:[%s4327_s1 + $0x330] sm:$0xff]  ;;  %v2849_v54 = vcombine.low %v137_v40, %v141_v41  ;;  %v185_v15 = vld [vmem:[%s4327_s1 + $0x458] sm:$0xff] }
  0x90   :  { %v2856_v55 = vcombine.high %v144_v44, %v148_v45  ;;  %v189_v29 = vld [vmem:[%s4327_s1 + $0x478] sm:$0xff] }
  0x91   :  { %v2898_v33 = vcombine.high %v185_v15, %v189_v29 }
  0x92   :  { %1767 = vmatpush1.bf16.msra.mxu0 %v2783_v47  ;;  %1849 = vmatpush1.bf16.msra.mxu1 %v2785_v49  ;;  %v145_v47 = vld [vmem:[%s4327_s1 + $0x318] sm:$0xff]  ;;  %v2850_v49 = vcombine.high %v137_v40, %v141_v41 }
  0x93   :  { %1768 = vmatprep.subr.bf16.mxu0 %v2792_v50  ;;  %1850 = vmatprep.subr.bf16.mxu1 %v2794_v52  ;;  %v2847_v50 = vcombine.low %v136_v36, %v140_v37  ;;  %v156_v52 = vld [vmem:[%s4327_s1 + $0x370] sm:$0xff]  ;;  %v2857_v63 = vcombine.low %v145_v47, %v149_v48  ;;  %v193_v36 = vld [vmem:[%s4327_s1 + $0x498] sm:$0xff] }
  0x94   :  { %v2864_v0 = vcombine.high %v152_v51, %v156_v52  ;;  %v197_v37 = vld [vmem:[%s4327_s1 + $0x4b8] sm:$0xff] }
  0x95   :  { %v2906_v41 = vcombine.high %v193_v36, %v197_v37 }
  0x96   :  { %1769 = vmatpush1.bf16.msra.mxu0 %v2791_v56  ;;  %1851 = vmatpush1.bf16.msra.mxu1 %v2793_v59  ;;  %v153_v56 = vld [vmem:[%s4327_s1 + $0x358] sm:$0xff]  ;;  %v2858_v59 = vcombine.high %v145_v47, %v149_v48  ;;  %v208_v48 = vld [vmem:[%s4327_s1 + $0x510] sm:$0xff] }
  0x97   :  { %1770 = vmatprep.subr.bf16.mxu0 %v2800_v60  ;;  %1852 = vmatprep.subr.bf16.mxu1 %v2802_v62  ;;  %v2855_v60 = vcombine.low %v144_v44, %v148_v45  ;;  %v164_v62 = vld [vmem:[%s4327_s1 + $0x3b0] sm:$0xff]  ;;  %v2865_v7 = vcombine.low %v153_v56, %v157_v58  ;;  %v205_v44 = vld [vmem:[%s4327_s1 + $0x4f8] sm:$0xff] }
  0x98   :  { %v2872_v8 = vcombine.high %v160_v61, %v164_v62 }
  0x9a   :  { %1771 = vmatpush1.bf16.msra.mxu0 %v2799_v1  ;;  %1853 = vmatpush1.bf16.msra.mxu1 %v2801_v3  ;;  %v161_v1 = vld [vmem:[%s4327_s1 + $0x398] sm:$0xff]  ;;  %v2866_v3 = vcombine.high %v153_v56, %v157_v58  ;;  %v216_v56 = vld [vmem:[%s4327_s1 + $0x550] sm:$0xff] }
  0x9b   :  { %1772 = vmatprep.subr.bf16.mxu0 %v2808_v4  ;;  %1854 = vmatprep.subr.bf16.mxu1 %v2810_v6  ;;  %v2863_v4 = vcombine.low %v152_v51, %v156_v52  ;;  %v172_v6 = vld [vmem:[%s4327_s1 + $0x3f0] sm:$0xff] }
  0x9c   :  { %v2880_v16 = vcombine.high %v168_v5, %v172_v6  ;;  %v220_v58 = vld [vmem:[%s4327_s1 + $0x570] sm:$0xff] }
  0x9e   :  { %1773 = vmatpush1.bf16.msra.mxu0 %v2807_v9  ;;  %1855 = vmatpush1.bf16.msra.mxu1 %v2809_v13  ;;  %v2874_v9 = vcombine.high %v161_v1, %v165_v2  ;;  %v2871_v13 = vcombine.low %v160_v61, %v164_v62 }
  0x9f   :  { %1774 = vmatprep.subr.bf16.mxu0 %v2816_v14  ;;  %1856 = vmatprep.subr.bf16.mxu1 %v2818_v17  ;;  %v2873_v14 = vcombine.low %v161_v1, %v165_v2  ;;  %v2882_v17 = vcombine.high %v169_v10, %v173_v11  ;;  %v224_v1 = vld [vmem:[%s4327_s1 + $0x590] sm:$0xff] }
  0xa0   :  { %v228_v2 = vld [vmem:[%s4327_s1 + $0x5b0] sm:$0xff] }
  0xa2   :  { %1775 = vmatpush1.bf16.msra.mxu0 %v2815_v18  ;;  %1857 = vmatpush1.bf16.msra.mxu1 %v2817_v23  ;;  %v180_v18 = vld [vmem:[%s4327_s1 + $0x430] sm:$0xff]  ;;  %v2879_v23 = vcombine.low %v168_v5, %v172_v6  ;;  %v2927_v5 = vcombine.low %v216_v56, %v220_v58 }
  0xa3   :  { %1776 = vmatprep.subr.bf16.mxu0 %v2824_v24  ;;  %1858 = vmatprep.subr.bf16.mxu1 %v2826_v27  ;;  %v2881_v24 = vcombine.low %v169_v10, %v173_v11  ;;  %v2888_v25 = vcombine.high %v176_v53, %v180_v18  ;;  %v184_v27 = vld [vmem:[%s4327_s1 + $0x450] sm:$0xff]  ;;  %v233_v11 = vld [vmem:[%s4327_s1 + $0x5d8] sm:$0xff] }
  0xa4   :  { %v236_v10 = vld [vmem:[%s4327_s1 + $0x5f0] sm:$0xff] }
  0xa6   :  { %1777 = vmatpush1.bf16.msra.mxu0 %v2823_v28  ;;  %1859 = vmatpush1.bf16.msra.mxu1 %v2825_v30  ;;  %v188_v28 = vld [vmem:[%s4327_s1 + $0x470] sm:$0xff]  ;;  %v2887_v30 = vcombine.low %v176_v53, %v180_v18 }
  0xa7   :  { %1778 = vmatprep.subr.bf16.mxu0 %v2832_v31  ;;  %1860 = vmatprep.subr.bf16.mxu1 %v2834_v34  ;;  %v2889_v31 = vcombine.low %v177_v19, %v181_v20  ;;  %v2896_v32 = vcombine.high %v184_v27, %v188_v28  ;;  %v192_v34 = vld [vmem:[%s4327_s1 + $0x490] sm:$0xff]  ;;  %v241_v20 = vld [vmem:[%s4327_s1 + $0x618] sm:$0xff] }
  0xa8   :  { %v240_v18 = vld [vmem:[%s4327_s1 + $0x610] sm:$0xff] }
  0xa9   :  { %v244_v19 = vld [vmem:[%s4327_s1 + $0x630] sm:$0xff] }
  0xaa   :  { %1779 = vmatpush1.bf16.msra.mxu0 %v2831_v35  ;;  %1861 = vmatpush1.bf16.msra.mxu1 %v2833_v38  ;;  %v196_v35 = vld [vmem:[%s4327_s1 + $0x4b0] sm:$0xff]  ;;  %v2895_v38 = vcombine.low %v184_v27, %v188_v28 }
  0xab   :  { %1780 = vmatprep.subr.bf16.mxu0 %v2840_v39  ;;  %1862 = vmatprep.subr.bf16.mxu1 %v2842_v42  ;;  %v2897_v39 = vcombine.low %v185_v15, %v189_v29  ;;  %v2904_v40 = vcombine.high %v192_v34, %v196_v35  ;;  %v200_v42 = vld [vmem:[%s4327_s1 + $0x4d0] sm:$0xff]  ;;  %v2903_v45 = vcombine.low %v192_v34, %v196_v35  ;;  %v249_v29 = vld [vmem:[%s4327_s1 + $0x658] sm:$0xff] }
  0xac   :  { %v248_v28 = vld [vmem:[%s4327_s1 + $0x650] sm:$0xff] }
  0xad   :  { %v252_v15 = vld [vmem:[%s4327_s1 + $0x670] sm:$0xff] }
  0xae   :  { %1781 = vmatpush1.bf16.msra.mxu0 %v2839_v43  ;;  %1863 = vmatpush1.bf16.msra.mxu1 %v2841_v57  ;;  %v204_v43 = vld [vmem:[%s4327_s1 + $0x4f0] sm:$0xff]  ;;  %v2905_v57 = vcombine.low %v193_v36, %v197_v37  ;;  %v257_v37 = vld [vmem:[%s4327_s1 + $0x698] sm:$0xff] }
  0xaf   :  { %1782 = vmatprep.subr.bf16.mxu0 %v2848_v46  ;;  %1864 = vmatprep.subr.bf16.mxu1 %v2850_v49  ;;  %v2912_v46 = vcombine.high %v200_v42, %v204_v43  ;;  %v212_v49 = vld [vmem:[%s4327_s1 + $0x530] sm:$0xff]  ;;  %v2911_v51 = vcombine.low %v200_v42, %v204_v43 }
  0xb0   :  { %v2919_v61 = vcombine.low %v208_v48, %v212_v49  ;;  %v256_v35 = vld [vmem:[%s4327_s1 + $0x690] sm:$0xff] }
  0xb1   :  { %v260_v36 = vld [vmem:[%s4327_s1 + $0x6b0] sm:$0xff] }
  0xb2   :  { %1783 = vmatpush1.bf16.msra.mxu0 %v2847_v50  ;;  %1865 = vmatpush1.bf16.msra.mxu1 %v2849_v54  ;;  %v213_v50 = vld [vmem:[%s4327_s1 + $0x538] sm:$0xff]  ;;  %v2920_v54 = vcombine.high %v208_v48, %v212_v49  ;;  %v264_v43 = vld [vmem:[%s4327_s1 + $0x6d0] sm:$0xff] }
  0xb3   :  { %1784 = vmatprep.subr.bf16.mxu0 %v2856_v55  ;;  %1866 = vmatprep.subr.bf16.mxu1 %v2858_v59  ;;  %v217_v59 = vld [vmem:[%s4327_s1 + $0x558] sm:$0xff]  ;;  %v272_v49 = vld [vmem:[%s4327_s1 + $0x710] sm:$0xff] }
  0xb6   :  { %1785 = vmatpush1.bf16.msra.mxu0 %v2855_v60  ;;  %1867 = vmatpush1.bf16.msra.mxu1 %v2857_v63  ;;  %v221_v60 = vld [vmem:[%s4327_s1 + $0x578] sm:$0xff]  ;;  %v2928_v63 = vcombine.high %v216_v56, %v220_v58  ;;  %v280_v58 = vld [vmem:[%s4327_s1 + $0x750] sm:$0xff] }
  0xb7   :  { %1786 = vmatprep.subr.bf16.mxu0 %v2864_v0  ;;  %1868 = vmatprep.subr.bf16.mxu1 %v2866_v3  ;;  %v2930_v0 = vcombine.high %v217_v59, %v221_v60  ;;  %v225_v3 = vld [vmem:[%s4327_s1 + $0x598] sm:$0xff]  ;;  %v2929_v6 = vcombine.low %v217_v59, %v221_v60  ;;  %v284_v59 = vld [vmem:[%s4327_s1 + $0x770] sm:$0xff] }
  0xb8   :  { %v281_v60 = vld [vmem:[%s4327_s1 + $0x758] sm:$0xff] }
  0xba   :  { %1787 = vmatpush1.bf16.msra.mxu0 %v2863_v4  ;;  %1869 = vmatpush1.bf16.msra.mxu1 %v2865_v7  ;;  %v229_v4 = vld [vmem:[%s4327_s1 + $0x5b8] sm:$0xff]  ;;  %v2936_v7 = vcombine.high %v224_v1, %v228_v2 }
  0xbb   :  { %1788 = vmatprep.subr.bf16.mxu0 %v2872_v8  ;;  %1870 = vmatprep.subr.bf16.mxu1 %v2874_v9  ;;  %v2938_v8 = vcombine.high %v225_v3, %v229_v4  ;;  %v232_v9 = vld [vmem:[%s4327_s1 + $0x5d0] sm:$0xff] }
  0xbe   :  { %1789 = vmatpush1.bf16.msra.mxu0 %v2871_v13  ;;  %1871 = vmatpush1.bf16.msra.mxu1 %v2873_v14  ;;  %v237_v13 = vld [vmem:[%s4327_s1 + $0x5f8] sm:$0xff]  ;;  %v2935_v14 = vcombine.low %v224_v1, %v228_v2  ;;  %v288_v2 = vld [vmem:[%s4327_s1 + $0x790] sm:$0xff] }
  0xbf   :  { %1790 = vmatprep.subr.bf16.mxu0 %v2880_v16  ;;  %1872 = vmatprep.subr.bf16.mxu1 %v2882_v17  ;;  %v2937_v16 = vcombine.low %v225_v3, %v229_v4  ;;  %v2944_v17 = vcombine.high %v232_v9, %v236_v10  ;;  %v2946_v53 = vcombine.high %v233_v11, %v237_v13  ;;  %v292_v3 = vld [vmem:[%s4327_s1 + $0x7b0] sm:$0xff]  ;;  %v289_v4 = vld [vmem:[%s4327_s1 + $0x798] sm:$0xff] }
  0xc2   :  { %1791 = vmatpush1.bf16.msra.mxu0 %v2879_v23  ;;  %1873 = vmatpush1.bf16.msra.mxu1 %v2881_v24  ;;  %v245_v23 = vld [vmem:[%s4327_s1 + $0x638] sm:$0xff]  ;;  %v2943_v24 = vcombine.low %v232_v9, %v236_v10  ;;  %v296_v10 = vld [vmem:[%s4327_s1 + $0x7d0] sm:$0xff] }
  0xc3   :  { %1801 = vmatprep.subr.bf16.mxu0 %v2888_v25  ;;  %1883 = vmatprep.subr.bf16.mxu1 %v2890_v26  ;;  %v2945_v25 = vcombine.low %v233_v11, %v237_v13  ;;  %v2952_v26 = vcombine.high %v240_v18, %v244_v19  ;;  %v2954_v27 = vcombine.high %v241_v20, %v245_v23  ;;  %v300_v11 = vld [vmem:[%s4327_s1 + $0x7f0] sm:$0xff]  ;;  %v297_v13 = vld [vmem:[%s4327_s1 + $0x7d8] sm:$0xff] }
  0xc5   :  { %1793 = vmatmul.mubr.bf16.vlgmr.msra.gmra.mrb[4].mxu0 %v3506_v12  ;;  %1875 = vmatmul.mubr.bf16.vlgmr.msra.gmra.mrb[4].mxu1 %v3506_v12  ;;  %v201_v12 = vld [vmem:[%s4327_s1 + $0x4d8] sm:$0xff] }
  0xc6   :  { %1802 = vmatpush1.bf16.msra.mxu0 %v2887_v30  ;;  %1884 = vmatpush1.bf16.msra.mxu1 %v2889_v31  ;;  %v2914_v47 = vcombine.high %v201_v12, %v205_v44  ;;  %v2913_v52 = vcombine.low %v201_v12, %v205_v44  ;;  %v253_v30 = vld [vmem:[%s4327_s1 + $0x678] sm:$0xff]  ;;  %v2951_v31 = vcombine.low %v240_v18, %v244_v19  ;;  %v268_v12 = vld [vmem:[%s4327_s1 + $0x6f0] sm:$0xff] }
  0xc7   :  { %1803 = vmatprep.subr.bf16.mxu0 %v2896_v32  ;;  %1885 = vmatprep.subr.bf16.mxu1 %v2898_v33  ;;  %v2953_v32 = vcombine.low %v241_v20, %v245_v23  ;;  %v2960_v33 = vcombine.high %v248_v28, %v252_v15  ;;  %v2962_v34 = vcombine.high %v249_v29, %v253_v30  ;;  %v265_v44 = vld [vmem:[%s4327_s1 + $0x6d8] sm:$0xff]  ;;  %v3184_v23 = vld [vmem:[%s4329_s4 + $0x40] sm:$0xff]  }
  0xc8   :  { %1833 = vmatprep.mubr.bf16.mxu0 %v3527_v21  ;;  %1915 = vmatprep.mubr.bf16.mxu1 %v3527_v21  ;;  %v209_v21 = vld [vmem:[%s4327_s1 + $0x518] sm:$0xff]  ;;  %v3007_v19 = vcombine.low %v296_v10, %v300_v11 }
  0xc9   :  { %v2922_v55 = vcombine.high %v209_v21, %v213_v50  ;;  %v2921_v62 = vcombine.low %v209_v21, %v213_v50  ;;  %v276_v21 = vld [vmem:[%s4327_s1 + $0x730] sm:$0xff]  ;;  %v273_v50 = vld [vmem:[%s4327_s1 + $0x718] sm:$0xff] }
  0xca   :  { %1804 = vmatpush1.bf16.msra.mxu0 %v2895_v38  ;;  %1886 = vmatpush1.bf16.msra.mxu1 %v2897_v39  ;;  %v261_v38 = vld [vmem:[%s4327_s1 + $0x6b8] sm:$0xff]  ;;  %v2959_v39 = vcombine.low %v248_v28, %v252_v15  ;;  %v3189_v28 = vld [vmem:[%s4329_s4 + $0xc8] sm:$0xff]  }
  0xcb   :  { %1805 = vmatprep.subr.bf16.mxu0 %v2904_v40  ;;  %1887 = vmatprep.subr.bf16.mxu1 %v2906_v41  ;;  %v2961_v40 = vcombine.low %v249_v29, %v253_v30  ;;  %v2968_v41 = vcombine.high %v256_v35, %v260_v36  ;;  %v2970_v42 = vcombine.high %v257_v37, %v261_v38  ;;  %v3190_v15 = vld [vmem:[%s4329_s4 + $0x8] sm:$0xff]   ;;  %v3192_v30 = vld [vmem:[%s4329_s4 + $0x50] sm:$0xff]  }
  0xcc   :  { %v3191_v29 = vld [vmem:[%s4329_s4 + $0x88] sm:$0xff]  }
  0xce   :  { %1806 = vmatpush1.bf16.msra.mxu0 %v2903_v45  ;;  %1888 = vmatpush1.bf16.msra.mxu1 %v2905_v57  ;;  %v269_v45 = vld [vmem:[%s4327_s1 + $0x6f8] sm:$0xff]  ;;  %v2967_v57 = vcombine.low %v256_v35, %v260_v36 }
  0xcf   :  { %1807 = vmatprep.subr.bf16.mxu0 %v2912_v46  ;;  %1889 = vmatprep.subr.bf16.mxu1 %v2914_v47  ;;  %v2969_v46 = vcombine.low %v257_v37, %v261_v38  ;;  %v2976_v47 = vcombine.high %v264_v43, %v268_v12  ;;  %v2978_v48 = vcombine.high %v265_v44, %v269_v45  ;;  %v3198_v35 = vld [vmem:[%s4329_s4 + $0x18] sm:$0xff]   ;;  %v3200_v37 = vld [vmem:[%s4329_s4 + $0x60] sm:$0xff]  }
  0xd0   :  { %v3199_v36 = vld [vmem:[%s4329_s4 + $0x98] sm:$0xff]   ;;  %v3201_v38 = vld [vmem:[%s4329_s4 + $0xe0] sm:$0xff]  }
  0xd2   :  { %1808 = vmatpush1.bf16.msra.mxu0 %v2911_v51  ;;  %1890 = vmatpush1.bf16.msra.mxu1 %v2913_v52  ;;  %v277_v51 = vld [vmem:[%s4327_s1 + $0x738] sm:$0xff]  ;;  %v2975_v52 = vcombine.low %v264_v43, %v268_v12  ;;  %v3206_v43 = vld [vmem:[%s4329_s4 + $0x28] sm:$0xff]  }
  0xd3   :  { %1809 = vmatprep.subr.bf16.mxu0 %v2920_v54  ;;  %1891 = vmatprep.subr.bf16.mxu1 %v2922_v55  ;;  %v2977_v54 = vcombine.low %v265_v44, %v269_v45  ;;  %v2984_v55 = vcombine.high %v272_v49, %v276_v21  ;;  %v2986_v56 = vcombine.high %v273_v50, %v277_v51  ;;  %v3207_v12 = vld [vmem:[%s4329_s4 + $0xa8] sm:$0xff]   ;;  %v3208_v44 = vld [vmem:[%s4329_s4 + $0x70] sm:$0xff]  }
  0xd4   :  { %v3209_v45 = vld [vmem:[%s4329_s4 + $0xf0] sm:$0xff]  }
  0xd6   :  { %1810 = vmatpush1.bf16.msra.mxu0 %v2919_v61  ;;  %1892 = vmatpush1.bf16.msra.mxu1 %v2921_v62  ;;  %v285_v61 = vld [vmem:[%s4327_s1 + $0x778] sm:$0xff]  ;;  %v2983_v62 = vcombine.low %v272_v49, %v276_v21 }
  0xd7   :  { %1811 = vmatprep.subr.bf16.mxu0 %v2928_v63  ;;  %1893 = vmatprep.subr.bf16.mxu1 %v2930_v0  ;;  %v2985_v63 = vcombine.low %v273_v50, %v277_v51  ;;  %v2992_v0 = vcombine.high %v280_v58, %v284_v59  ;;  %v2994_v1 = vcombine.high %v281_v60, %v285_v61  ;;  %v3214_v49 = vld [vmem:[%s4329_s4 + $0x38] sm:$0xff]   ;;  %v3216_v50 = vld [vmem:[%s4329_s4 + $0x140] sm:$0xff]  }
  0xd8   :  { %v3215_v21 = vld [vmem:[%s4329_s4 + $0xb8] sm:$0xff]   ;;  %v3217_v51 = vld [vmem:[%s4329_s4 + $0x1c0] sm:$0xff]  }
  0xda   :  { %1812 = vmatpush1.bf16.msra.mxu0 %v2927_v5  ;;  %1894 = vmatpush1.bf16.msra.mxu1 %v2929_v6  ;;  %v293_v5 = vld [vmem:[%s4327_s1 + $0x7b8] sm:$0xff]  ;;  %v2991_v6 = vcombine.low %v280_v58, %v284_v59 }
  0xdb   :  { %1813 = vmatprep.subr.bf16.mxu0 %v2936_v7  ;;  %1895 = vmatprep.subr.bf16.mxu1 %v2938_v8  ;;  %v2993_v7 = vcombine.low %v281_v60, %v285_v61  ;;  %v3000_v8 = vcombine.high %v288_v2, %v292_v3  ;;  %v3002_v9 = vcombine.high %v289_v4, %v293_v5  ;;  %v4209_v61 = vld [vmem:[%s4331_s3] sm:$0xff] }
  0xde   :  { %1814 = vmatpush1.bf16.msra.mxu0 %v2935_v14  ;;  %1896 = vmatpush1.bf16.msra.mxu1 %v2937_v16  ;;  %v301_v14 = vld [vmem:[%s4327_s1 + $0x7f8] sm:$0xff]  ;;  %v2999_v16 = vcombine.low %v288_v2, %v292_v3 }
  0xdf   :  { %1815 = vmatprep.subr.bf16.mxu0 %v2944_v17  ;;  %1897 = vmatprep.subr.bf16.mxu1 %v2946_v53  ;;  %v3001_v17 = vcombine.low %v289_v4, %v293_v5  ;;  %v3008_v53 = vcombine.high %v296_v10, %v300_v11  ;;  %v3010_v18 = vcombine.high %v297_v13, %v301_v14 }
  0xe0   :  { %v3009_v20 = vcombine.low %v297_v13, %v301_v14 }
  0xe2   :  { %1816 = vmatpush1.bf16.msra.mxu0 %v2943_v24  ;;  %1898 = vmatpush1.bf16.msra.mxu1 %v2945_v25  ;;  %v3185_v24 = vld [vmem:[%s4329_s4 + $0xc0] sm:$0xff]  }
  0xe3   :  { %1817 = vmatprep.subr.bf16.mxu0 %v2952_v26  ;;  %1899 = vmatprep.subr.bf16.mxu1 %v2954_v27  ;;  %v3186_v25 = vld [vmem:[%s4329_s4] sm:$0xff]   ;;  %v3188_v27 = vld [vmem:[%s4329_s4 + $0x48] sm:$0xff]  }
  0xe4   :  { %v3187_v26 = vld [vmem:[%s4329_s4 + $0x80] sm:$0xff]  }
  0xe6   :  { %1818 = vmatpush1.bf16.msra.mxu0 %v2951_v31  ;;  %1900 = vmatpush1.bf16.msra.mxu1 %v2953_v32  ;;  %v3194_v31 = vld [vmem:[%s4329_s4 + $0x10] sm:$0xff]  }
  0xe7   :  { %1819 = vmatprep.subr.bf16.mxu0 %v2960_v33  ;;  %1901 = vmatprep.subr.bf16.mxu1 %v2962_v34  ;;  %v3195_v32 = vld [vmem:[%s4329_s4 + $0x90] sm:$0xff]   ;;  %v3196_v33 = vld [vmem:[%s4329_s4 + $0x58] sm:$0xff]  }
  0xe8   :  { %v3197_v34 = vld [vmem:[%s4329_s4 + $0xd8] sm:$0xff]  }
  0xea   :  { %1820 = vmatpush1.bf16.msra.mxu0 %v2959_v39  ;;  %1902 = vmatpush1.bf16.msra.mxu1 %v2961_v40  ;;  %v3202_v39 = vld [vmem:[%s4329_s4 + $0x20] sm:$0xff]  }
  0xeb   :  { %1821 = vmatprep.subr.bf16.mxu0 %v2968_v41  ;;  %1903 = vmatprep.subr.bf16.mxu1 %v2970_v42  ;;  %v3203_v40 = vld [vmem:[%s4329_s4 + $0xa0] sm:$0xff]   ;;  %v3204_v41 = vld [vmem:[%s4329_s4 + $0x68] sm:$0xff]  }
  0xec   :  { %v3205_v42 = vld [vmem:[%s4329_s4 + $0xe8] sm:$0xff]  }
  0xee   :  { %1822 = vmatpush1.bf16.msra.mxu0 %v2967_v57  ;;  %1904 = vmatpush1.bf16.msra.mxu1 %v2969_v46  ;;  %v3210_v57 = vld [vmem:[%s4329_s4 + $0x30] sm:$0xff]  }
  0xef   :  { %1823 = vmatprep.subr.bf16.mxu0 %v2976_v47  ;;  %1905 = vmatprep.subr.bf16.mxu1 %v2978_v48  ;;  %v3211_v46 = vld [vmem:[%s4329_s4 + $0xb0] sm:$0xff]   ;;  %v3212_v47 = vld [vmem:[%s4329_s4 + $0x78] sm:$0xff]  }
  0xf0   :  { %v3213_v48 = vld [vmem:[%s4329_s4 + $0xf8] sm:$0xff]  }
  0xf2   :  { %1824 = vmatpush1.bf16.msra.mxu0 %v2975_v52  ;;  %1906 = vmatpush1.bf16.msra.mxu1 %v2977_v54  ;;  %v1953_v52 = vlaneseq }
  0xf3   :  { %1825 = vmatprep.subr.bf16.mxu0 %v2984_v55  ;;  %1907 = vmatprep.subr.bf16.mxu1 %v2986_v56  ;;  %v4201_v56 = vld [vmem:[%s4330_s2] sm:$0xff] }
  0xf4   :  { %v4195_v54 = vshrl.u32 %v1953_v52, 7  ;;  %v3242_v52 = vld [vmem:[%s4329_s4 + $0x130] sm:$0xff]  }
  0xf6   :  { %1826 = vmatpush1.bf16.msra.mxu0 %v2983_v62  ;;  %1908 = vmatpush1.bf16.msra.mxu1 %v2985_v63  ;;  %v1955_v55 = vsub.s32 0, %v4195_v54  ;;  %v1963_v58 = vsub.s32 2, %v4195_v54  ;;  %v1959_v59 = vsub.s32 1, %v4195_v54  ;;  %v1967_v60 = vsub.s32 3, %v4195_v54 }
  0xf7   :  { %1827 = vmatprep.subr.bf16.mxu0 %v2992_v0  ;;  %1909 = vmatprep.subr.bf16.mxu1 %v2994_v1 }
  0xf8   :  { %v1956_v62 = vrot.slane %v4201_v56, %v1955_v55  ;;  %v1964_v63 = vrot.slane %v4201_v56, %v1963_v58  ;;  %v1960_v0 = vrot.slane %v4201_v56, %v1959_v59  ;;  %v2006_v1 = vrot.slane %v4209_v61, %v1955_v55  ;;  %v3243_v55 = vld [vmem:[%s4329_s4 + $0x1b0] sm:$0xff]  }
  0xf9   :  { %v1968_v2 = vrot.slane %v4201_v56, %v1967_v60  ;;  %v2014_v4 = vrot.slane %v4209_v61, %v1963_v58  ;;  %v2010_v5 = vrot.slane %v4209_v61, %v1959_v59  ;;  %v3244_v58 = vld [vmem:[%s4329_s4 + $0x178] sm:$0xff]  }
  0xfa   :  { %1828 = vmatpush1.bf16.msra.mxu0 %v2991_v6  ;;  %1910 = vmatpush1.bf16.msra.mxu1 %v2993_v7  ;;  %v3245_v59 = vld [vmem:[%s4329_s4 + $0x1f8] sm:$0xff]  }
  0xfb   :  { %1829 = vmatprep.subr.bf16.mxu0 %v3000_v8  ;;  %1911 = vmatprep.subr.bf16.mxu1 %v3002_v9  ;;  %v2018_v9 = vrot.slane %v4209_v61, %v1967_v60  ;;  %v3246_v60 = vld [vmem:[%s4329_s4 + $0x138] sm:$0xff]  }
  0xfe   :  { %1830 = vmatpush1.bf16.msra.mxu0 %v2999_v16  ;;  %1912 = vmatpush1.bf16.msra.mxu1 %v3001_v17 }
  0xff   :  { %1831 = vmatprep.subr.bf16.mxu0 %v3008_v53  ;;  %1913 = vmatprep.subr.bf16.mxu1 %v3010_v18 }
 0x102   :  { %1832 = vmatpush1.bf16.msra.mxu0 %v3007_v19  ;;  %1914 = vmatpush1.bf16.msra.mxu1 %v3009_v20 }
 0x103   :  { %3076 = vmatprep.subr.bf16.mxu0 %v3184_v23  ;;  %3098 = vmatprep.subr.bf16.mxu1 %v3185_v24 }
 0x105   :  { %1834 = vmatmul.mubr.bf16.vlgmr.msra.gmra.mrb[4].mxu0 %v3715_v22  ;;  %1916 = vmatmul.mubr.bf16.vlgmr.msra.gmra.mrb[4].mxu1 %v3715_v22  ;;  %v3193_v22 = vld [vmem:[%s4329_s4 + $0xd0] sm:$0xff]  }
 0x106   :  { %3077 = vmatpush3.bf16.msra.mxu0 %v3186_v25  ;;  %3099 = vmatpush3.bf16.msra.mxu1 %v3187_v26 }
 0x107   :  { %3078 = vmatprep.subr.bf16.mxu0 %v3188_v27  ;;  %3100 = vmatprep.subr.bf16.mxu1 %v3189_v28 }
 0x10a   :  { %3079 = vmatpush3.bf16.msra.mxu0 %v3190_v15  ;;  %3101 = vmatpush3.bf16.msra.mxu1 %v3191_v29  ;;  %v3218_v29 = vld [vmem:[%s4329_s4 + $0x100] sm:$0xff]  }
 0x10b   :  { %3080 = vmatprep.subr.bf16.mxu0 %v3192_v30  ;;  %3102 = vmatprep.subr.bf16.mxu1 %v3193_v22 }
 0x10e   :  { %3081 = vmatpush3.bf16.msra.mxu0 %v3194_v31  ;;  %3103 = vmatpush3.bf16.msra.mxu1 %v3195_v32  ;;  %v3219_v31 = vld [vmem:[%s4329_s4 + $0x180] sm:$0xff]   ;;  %v3220_v32 = vld [vmem:[%s4329_s4 + $0x148] sm:$0xff]  }
 0x10f   :  { %3082 = vmatprep.subr.bf16.mxu0 %v3196_v33  ;;  %3104 = vmatprep.subr.bf16.mxu1 %v3197_v34  ;;  %v3221_v34 = vld [vmem:[%s4329_s4 + $0x1c8] sm:$0xff]  }
 0x112   :  { %3083 = vmatpush3.bf16.msra.mxu0 %v3198_v35  ;;  %3105 = vmatpush3.bf16.msra.mxu1 %v3199_v36  ;;  %v3222_v35 = vld [vmem:[%s4329_s4 + $0x108] sm:$0xff]  }
 0x113   :  { %3084 = vmatprep.subr.bf16.mxu0 %v3200_v37  ;;  %3106 = vmatprep.subr.bf16.mxu1 %v3201_v38  ;;  %v3223_v36 = vld [vmem:[%s4329_s4 + $0x188] sm:$0xff]   ;;  %v3224_v37 = vld [vmem:[%s4329_s4 + $0x150] sm:$0xff]  }
 0x114   :  { %v3225_v38 = vld [vmem:[%s4329_s4 + $0x1d0] sm:$0xff]  }
 0x116   :  { %3085 = vmatpush3.bf16.msra.mxu0 %v3202_v39  ;;  %3107 = vmatpush3.bf16.msra.mxu1 %v3203_v40  ;;  %v3226_v39 = vld [vmem:[%s4329_s4 + $0x110] sm:$0xff]  }
 0x117   :  { %3086 = vmatprep.subr.bf16.mxu0 %v3204_v41  ;;  %3108 = vmatprep.subr.bf16.mxu1 %v3205_v42  ;;  %v3227_v40 = vld [vmem:[%s4329_s4 + $0x190] sm:$0xff]   ;;  %v3228_v41 = vld [vmem:[%s4329_s4 + $0x158] sm:$0xff]  }
 0x118   :  { %v3229_v42 = vld [vmem:[%s4329_s4 + $0x1d8] sm:$0xff]  }
 0x11a   :  { %3087 = vmatpush3.bf16.msra.mxu0 %v3206_v43  ;;  %3109 = vmatpush3.bf16.msra.mxu1 %v3207_v12  ;;  %v3230_v43 = vld [vmem:[%s4329_s4 + $0x118] sm:$0xff]  }
 0x11b   :  { %3088 = vmatprep.subr.bf16.mxu0 %v3208_v44  ;;  %3110 = vmatprep.subr.bf16.mxu1 %v3209_v45  ;;  %v3231_v12 = vld [vmem:[%s4329_s4 + $0x198] sm:$0xff]   ;;  %v3232_v44 = vld [vmem:[%s4329_s4 + $0x160] sm:$0xff]  }
 0x11c   :  { %v3233_v45 = vld [vmem:[%s4329_s4 + $0x1e0] sm:$0xff]  }
 0x11e   :  { %3089 = vmatpush3.bf16.msra.mxu0 %v3210_v57  ;;  %3111 = vmatpush3.bf16.msra.mxu1 %v3211_v46  ;;  %v3234_v57 = vld [vmem:[%s4329_s4 + $0x120] sm:$0xff]  }
 0x11f   :  { %3090 = vmatprep.subr.bf16.mxu0 %v3212_v47  ;;  %3112 = vmatprep.subr.bf16.mxu1 %v3213_v48  ;;  %v3235_v46 = vld [vmem:[%s4329_s4 + $0x1a0] sm:$0xff]   ;;  %v3236_v47 = vld [vmem:[%s4329_s4 + $0x168] sm:$0xff]  }
 0x120   :  { %v3237_v48 = vld [vmem:[%s4329_s4 + $0x1e8] sm:$0xff]  }
 0x122   :  { %3091 = vmatpush3.bf16.msra.mxu0 %v3214_v49  ;;  %3113 = vmatpush3.bf16.msra.mxu1 %v3215_v21  ;;  %v3238_v49 = vld [vmem:[%s4329_s4 + $0x128] sm:$0xff]  }
 0x123   :  { %3120 = vmatprep.subr.bf16.mxu0 %v3216_v50  ;;  %3142 = vmatprep.subr.bf16.mxu1 %v3217_v51  ;;  %v3239_v21 = vld [vmem:[%s4329_s4 + $0x1a8] sm:$0xff]   ;;  %v3240_v50 = vld [vmem:[%s4329_s4 + $0x170] sm:$0xff]  }
 0x124   :  { %v3241_v51 = vld [vmem:[%s4329_s4 + $0x1f0] sm:$0xff]  }
 0x158   :  { %v1671_v3 = vpop.f32.mrb[0].mxu0  ;;  %v1753_v7 = vpop.f32.mrb[0].mxu1 }
 0x159   :  { %v1993_v6 = vmul.f32 %v1956_v62, %v1671_v3  ;;  %v1673_v8 = vpop.f32.mrb[1].mxu0  ;;  %v1995_v10 = vmul.f32 %v1964_v63, %v1753_v7  ;;  %v1755_v13 = vpop.f32.mrb[1].mxu1  ;;  %v3247_v62 = vld [vmem:[%s4329_s4 + $0x1b8] sm:$0xff]   ;;  %v1971_v63 = vsub.s32 4, %v4195_v54 }
 0x15a   :  { %v1994_v11 = vmul.f32 %v1960_v0, %v1673_v8  ;;  %v1675_v14 = vpop.f32.mrb[2].mxu0  ;;  %v1996_v17 = vmul.f32 %v1968_v2, %v1755_v13  ;;  %v1757_v53 = vpop.f32.mrb[2].mxu1  ;;  %v1979_v0 = vsub.s32 6, %v4195_v54  ;;  %v1983_v2 = vsub.s32 7, %v4195_v54 }
 0x15b   :  { %v2043_v16 = vadd.f32 %v2006_v1, %v1993_v6  ;;  %v1676_v18 = vpop.f32.mrb[3].mxu0  ;;  %v2045_v19 = vadd.f32 %v2014_v4, %v1995_v10  ;;  %v1758_v23 = vpop.f32.mrb[3].mxu1  ;;  %v1975_v1 = vsub.s32 5, %v4195_v54  ;;  %v1972_v3 = vrot.slane %v4201_v56, %v1971_v63 }
 0x15c   :  { %v2044_v20 = vadd.f32 %v2010_v5, %v1994_v11  ;;  %v2046_v25 = vadd.f32 %v2018_v9, %v1996_v17  ;;  %v1980_v4 = vrot.slane %v4201_v56, %v1979_v0  ;;  %v2022_v6 = vrot.slane %v4209_v61, %v1971_v63 }
 0x15d   :  { %v2051_v24 = vmax.f32 %v2043_v16, 0.0  ;;  %v2053_v26 = vmax.f32 %v2045_v19, 0.0  ;;  %v1976_v5 = vrot.slane %v4201_v56, %v1975_v1  ;;  %v1984_v7 = vrot.slane %v4201_v56, %v1983_v2 }
 0x15e   :  { %v2052_v27 = vmax.f32 %v2044_v20, 0.0  ;;  %v2054_v28 = vmax.f32 %v2046_v25, 0.0  ;;  %v2030_v9 = vrot.slane %v4209_v61, %v1979_v0  ;;  %v2026_v10 = vrot.slane %v4209_v61, %v1975_v1 }
 0x15f   :  { %v2059_v30 = vpack.c.bf16 %v2051_v24, %v2051_v24  ;;  %v2061_v33 = vpack.c.bf16 %v2053_v26, %v2053_v26  ;;  %v2034_v54 = vrot.slane %v4209_v61, %v1983_v2 }
 0x160   :  { %v2060_v15 = vpack.c.bf16 %v2052_v27, %v2052_v27  ;;  %v2062_v22 = vpack.c.bf16 %v2054_v28, %v2054_v28 }
 0x162   :  { %2618 = vmatprep.mubr.bf16.mxu0 %v2060_v15  ;;  %2658 = vmatprep.mubr.bf16.mxu1 %v2062_v22 }
 0x163   :  { %2619 = vmatmul.mubr.bf16.vlgmr.msra.gmra.mrb[8].mxu0 %v2059_v30  ;;  %2659 = vmatmul.mubr.bf16.vlgmr.msra.gmra.mrb[8].mxu1 %v2061_v33 }
 0x164   :  { %3121 = vmatpush3.bf16.msra.mxu0 %v3218_v29  ;;  %3143 = vmatpush3.bf16.msra.mxu1 %v3219_v31 }
 0x165   :  { %3122 = vmatprep.subr.bf16.mxu0 %v3220_v32  ;;  %3144 = vmatprep.subr.bf16.mxu1 %v3221_v34 }
 0x168   :  { %3123 = vmatpush3.bf16.msra.mxu0 %v3222_v35  ;;  %3145 = vmatpush3.bf16.msra.mxu1 %v3223_v36  ;;  %v3011_v35 = vld [vmem:[%s4332_s5] ss:$0 sm:$0xff] }
 0x169   :  { %3124 = vmatprep.subr.bf16.mxu0 %v3224_v37  ;;  %3146 = vmatprep.subr.bf16.mxu1 %v3225_v38 }
 0x16c   :  { %3125 = vmatpush3.bf16.msra.mxu0 %v3226_v39  ;;  %3147 = vmatpush3.bf16.msra.mxu1 %v3227_v40 }
 0x16d   :  { %3126 = vmatprep.subr.bf16.mxu0 %v3228_v41  ;;  %3148 = vmatprep.subr.bf16.mxu1 %v3229_v42 }
 0x170   :  { %3127 = vmatpush3.bf16.msra.mxu0 %v3230_v43  ;;  %3149 = vmatpush3.bf16.msra.mxu1 %v3231_v12 }
 0x171   :  { %3128 = vmatprep.subr.bf16.mxu0 %v3232_v44  ;;  %3150 = vmatprep.subr.bf16.mxu1 %v3233_v45 }
 0x174   :  { %3129 = vmatpush3.bf16.msra.mxu0 %v3234_v57  ;;  %3151 = vmatpush3.bf16.msra.mxu1 %v3235_v46 }
 0x175   :  { %3130 = vmatprep.subr.bf16.mxu0 %v3236_v47  ;;  %3152 = vmatprep.subr.bf16.mxu1 %v3237_v48 }
 0x178   :  { %3131 = vmatpush3.bf16.msra.mxu0 %v3238_v49  ;;  %3153 = vmatpush3.bf16.msra.mxu1 %v3239_v21 }
 0x179   :  { %3132 = vmatprep.subr.bf16.mxu0 %v3240_v50  ;;  %3154 = vmatprep.subr.bf16.mxu1 %v3241_v51 }
 0x17c   :  { %3133 = vmatpush3.bf16.msra.mxu0 %v3242_v52  ;;  %3155 = vmatpush3.bf16.msra.mxu1 %v3243_v55 }
 0x17d   :  { %3134 = vmatprep.subr.bf16.mxu0 %v3244_v58  ;;  %3156 = vmatprep.subr.bf16.mxu1 %v3245_v59 }
 0x180   :  { %3135 = vmatpush3.bf16.msra.mxu0 %v3246_v60  ;;  %3157 = vmatpush3.bf16.msra.mxu1 %v3247_v62 }
 0x1d8   :  { %v1835_v8 = vpop.f32.mrb[4].mxu0  ;;  %v1917_v13 = vpop.f32.mrb[4].mxu1 }
 0x1d9   :  { %v1997_v11 = vmul.f32 %v1972_v3, %v1835_v8  ;;  %v1837_v14 = vpop.f32.mrb[5].mxu0  ;;  %v1999_v16 = vmul.f32 %v1980_v4, %v1917_v13  ;;  %v1919_v53 = vpop.f32.mrb[5].mxu1 }
 0x1da   :  { %v1998_v17 = vmul.f32 %v1976_v5, %v1837_v14  ;;  %v1839_v18 = vpop.f32.mrb[6].mxu0  ;;  %v2000_v20 = vmul.f32 %v1984_v7, %v1919_v53  ;;  %v1921_v23 = vpop.f32.mrb[6].mxu1 }
 0x1db   :  { %v2047_v19 = vadd.f32 %v2022_v6, %v1997_v11  ;;  %v1840_v24 = vpop.f32.mrb[7].mxu0  ;;  %v2049_v25 = vadd.f32 %v2030_v9, %v1999_v16  ;;  %v1922_v26 = vpop.f32.mrb[7].mxu1 }
 0x1dc   :  { %v2048_v56 = vadd.f32 %v2026_v10, %v1998_v17  ;;  %v2050_v28 = vadd.f32 %v2034_v54, %v2000_v20 }
 0x1dd   :  { %v2055_v27 = vmax.f32 %v2047_v19, 0.0  ;;  %v2057_v15 = vmax.f32 %v2049_v25, 0.0 }
 0x1de   :  { %v2056_v29 = vmax.f32 %v2048_v56, 0.0  ;;  %v2058_v30 = vmax.f32 %v2050_v28, 0.0 }
 0x1df   :  { %v2063_v31 = vpack.c.bf16 %v2055_v27, %v2055_v27  ;;  %v2065_v61 = vpack.c.bf16 %v2057_v15, %v2057_v15 }
 0x1e0   :  { %v2064_v22 = vpack.c.bf16 %v2056_v29, %v2056_v29  ;;  %v2066_v32 = vpack.c.bf16 %v2058_v30, %v2058_v30 }
 0x1e2   :  { %2698 = vmatprep.mubr.bf16.mxu0 %v2064_v22  ;;  %2738 = vmatprep.mubr.bf16.mxu1 %v2066_v32 }
 0x1e3   :  { %2699 = vmatmul.mubr.bf16.vlgmr.msra.gmra.mrb[12].mxu0 %v2063_v31  ;;  %2739 = vmatmul.mubr.bf16.vlgmr.msra.gmra.mrb[12].mxu1 %v2065_v61 }
 0x236   :  { %v3092_v33 = vpop.f32.mrb[8].mxu0  ;;  %v3114_v34 = vpop.f32.mrb[8].mxu1 }
 0x237   :  { %v3093_v36 = vpop.f32.mrb[9].mxu0  ;;  %v3115_v38 = vpop.f32.mrb[9].mxu1 }
 0x238   :  { %v3094_v37 = vadd.f32 %v3093_v36, %v3092_v33  ;;  %v3095_v39 = vpop.f32.mrb[10].mxu0  ;;  %v3116_v40 = vadd.f32 %v3115_v38, %v3114_v34  ;;  %v3117_v41 = vpop.f32.mrb[10].mxu1 }
 0x239   :  { %v3096_v42 = vpop.f32.mrb[11].mxu0  ;;  %v3118_v12 = vpop.f32.mrb[11].mxu1 }
 0x23a   :  { %v2621_v43 = vadd.f32 %v3094_v37, %v3011_v35 }
 0x23c   :  { %v2661_v44 = vadd.f32 %v3116_v40, %v2621_v43 }
 0x2b6   :  { %v3136_v45 = vpop.f32.mrb[12].mxu0  ;;  %v3158_v57 = vpop.f32.mrb[12].mxu1 }
 0x2b7   :  { %v3137_v46 = vpop.f32.mrb[13].mxu0  ;;  %v3159_v48 = vpop.f32.mrb[13].mxu1 }
 0x2b8   :  { %v3138_v47 = vadd.f32 %v3137_v46, %v3136_v45  ;;  %v3139_v49 = vpop.f32.mrb[14].mxu0  ;;  %v3160_v21 = vadd.f32 %v3159_v48, %v3158_v57  ;;  %v3161_v50 = vpop.f32.mrb[14].mxu1 }
 0x2b9   :  { %v3140_v51 = vpop.f32.mrb[15].mxu0  ;;  %v3162_v55 = vpop.f32.mrb[15].mxu1 }
 0x2ba   :  { %v2701_v52 = vadd.f32 %v3138_v47, %v2661_v44 }
 0x2bc   :  { %v2741_v58 = vadd.f32 %v3160_v21, %v2701_v52 }
 0x2be   :  { %2746 = vst [vmem:[%s4333_s6] sm:$0xff] %v2741_v58 }

// kernel: bcnn_forward.25
= control target key start
LH: loop header
LB: loop body
LE: loop exit
PB: predicated region body
PF: predicated region fallthrough
CT: control target
= control target key end

     0   :  { %s3577_s21 = smov 0   ;;  %s4132_s0 = inlined_call_operand.vmem [shape: bf16[8,1024], index: 0, kind: input, shape index: {}]   ;;  %s4133_s1 = inlined_call_operand.vmem [shape: bf16[1024,1024], index: 1, kind: input, shape index: {}]   ;;  %s4134_s2 = inlined_call_operand.vmem [shape: f32[1,1024], index: 2, kind: input, shape index: {}]   ;;  %s4135_s3 = inlined_call_operand.vmem [shape: f32[1,1024], index: 3, kind: input, shape index: {}]   ;;  %s4136_s4 = inlined_call_operand.vmem [shape: bf16[1024,128], index: 4, kind: input, shape index: {}]   ;;  %s4137_s5 = inlined_call_operand.vmem [shape: f32[1,128], index: 5, kind: input, shape index: {}]   ;;  %s4138_s6 = inlined_call_operand.vmem [shape: f32[8,128], index: 6, kind: output, shape index: {}]  }
   0x1 LB: > { %s3583_s22 = sadd.s32 4294967295, %s3539_s21   ;;  %p3032_p0 = scmp.ge.s32.totalorder %s3539_s21, 1  ;;  %s3539_s21 = sphi %s3577_s21, %s16_s21  }
   0x2   : > { %p220_p1 = scmp.lt.s32.totalorder %s3539_s21, 3 }
   0x4   : > { %p221_p2 = pnand %p3032_p0, %p220_p1 }
   0x5   : > { %s3033_s23 = sshll.u32 (!%p221_p2), %s3583_s22, 2  ;;  %s3035_s24 = sshll.u32 (!%p221_p2), %s3583_s22, 6 }
   0x6   : > { %224 = sbr.rel (%p221_p2) target bundleno = 760 (0x2f8), region = 44  ;;  %p252_p3 = scmp.lt.s32.totalorder (!%p221_p2), %s3033_s23, 7 }
   0x7   : > { %p258_p4 = scmp.lt.s32.totalorder (!%p221_p2), %s3035_s24, 127  ;;  %p3038_p5 = scmp.ne.s32.totalorder (!%p221_p2), %s3583_s22, 0 }
   0xd   : > { %s4140_s23 = smov (!%p252_p3, %s3033_s23), 7  ;;  %s4142_s24 = smov (!%p258_p4, %s3035_s24), 127 }
   0xe   : > { %s3034_s25 = sshll.u32 %s4140_s23, 2  ;;  %s3367_s29 = sshll.u32 %s4142_s24, 5  ;;  %v3541_v0 = vmov (!%p3038_p5), 0.0  }
   0xf   : > { %s3592_s28 = scalar_lea.vmem %s4132_s0, %s3034_s25  ;;  %s3597_s8 = scalar_lea.vmem %s4133_s1, %s3367_s29  ;;  %269 = vst [vmem:[#allocation2] sm:$0xff] (!%p3038_p5), %v3541_v0  ;;  %270 = vst [vmem:[#allocation2 + $0x8] sm:$0xff] (!%p3038_p5), %v3541_v0 }
  0x10   : > { %268 = sbr.rel (%p3038_p5) target bundleno = 23 (0x17), region = 48  ;;  %271 = vst [vmem:[#allocation2 + $0x10] sm:$0xff] (!%p3038_p5), %v3541_v0  ;;  %272 = vst [vmem:[#allocation2 + $0x18] sm:$0xff] (!%p3038_p5), %v3541_v0 }
  0x11   : > { %273 = vst [vmem:[#allocation2 + $0x20] sm:$0xff] (!%p3038_p5), %v3541_v0  ;;  %274 = vst [vmem:[#allocation2 + $0x28] sm:$0xff] (!%p3038_p5), %v3541_v0 }
  0x12   : > { %275 = vst [vmem:[#allocation2 + $0x30] sm:$0xff] (!%p3038_p5), %v3541_v0  ;;  %276 = vst [vmem:[#allocation2 + $0x38] sm:$0xff] (!%p3038_p5), %v3541_v0 }
  0x17 PF: > { %v287_v1 = vld [vmem:[%s3597_s8] sm:$0xff]  ;;  %v3632_v55 = vld [vmem:[%s3592_s28 + $0x8] sm:$0xff]  ;;  %p3299_p6 = scmp.ne.s32.totalorder %s3583_s22, 1 }
  0x18   : > { %v291_v2 = vld [vmem:[%s3597_s8 + $0x20] sm:$0xff]  ;;  %v3642_v60 = vcombine.high %v3632_v55, %v3632_v55 }
  0x19   : > { %v415_v3 = vld [vmem:[%s3597_s8 + $0x400] sm:$0xff]  ;;  %v3044_v4 = vcombine.high %v287_v1, %v291_v2  ;;  %v3043_v6 = vcombine.low %v287_v1, %v291_v2 }
  0x1a   : > { %v419_v5 = vld [vmem:[%s3597_s8 + $0x420] sm:$0xff]  ;;  %1910 = vmatprep.mubr.bf16.mxu1 %v3642_v60 }
  0x1b   : > { %v295_v7 = vld [vmem:[%s3597_s8 + $0x40] sm:$0xff]  ;;  %v3172_v9 = vcombine.high %v415_v3, %v419_v5  ;;  %v3171_v10 = vcombine.low %v415_v3, %v419_v5  ;;  %1837 = vmatprep.subr.bf16.mxu0 %v3044_v4 }
  0x1c   : > { %v299_v8 = vld [vmem:[%s3597_s8 + $0x60] sm:$0xff]  ;;  %1838 = vmatpush1.bf16.msra.mxu0 %v3043_v6 }
  0x1d   : > { %v3052_v11 = vcombine.high %v295_v7, %v299_v8  ;;  %v423_v12 = vld [vmem:[%s3597_s8 + $0x440] sm:$0xff]  ;;  %1878 = vmatprep.subr.bf16.mxu1 %v3172_v9  ;;  %v3051_v19 = vcombine.low %v295_v7, %v299_v8 }
  0x1e   : > { %v427_v13 = vld [vmem:[%s3597_s8 + $0x460] sm:$0xff]  ;;  %1879 = vmatpush1.bf16.msra.mxu1 %v3171_v10 }
  0x1f   : > { %v303_v14 = vld [vmem:[%s3597_s8 + $0x80] sm:$0xff]  ;;  %v3180_v15 = vcombine.high %v423_v12, %v427_v13  ;;  %1839 = vmatprep.subr.bf16.mxu0 %v3052_v11  ;;  %v3179_v20 = vcombine.low %v423_v12, %v427_v13 }
  0x20   : > { %v307_v16 = vld [vmem:[%s3597_s8 + $0xa0] sm:$0xff]  ;;  %1840 = vmatpush1.bf16.msra.mxu0 %v3051_v19 }
  0x21   : > { %v431_v17 = vld [vmem:[%s3597_s8 + $0x480] sm:$0xff]  ;;  %v3060_v21 = vcombine.high %v303_v14, %v307_v16  ;;  %1880 = vmatprep.subr.bf16.mxu1 %v3180_v15  ;;  %v3059_v27 = vcombine.low %v303_v14, %v307_v16 }
  0x22   : > { %v435_v18 = vld [vmem:[%s3597_s8 + $0x4a0] sm:$0xff]  ;;  %1881 = vmatpush1.bf16.msra.mxu1 %v3179_v20 }
  0x23   : > { %v3188_v22 = vcombine.high %v431_v17, %v435_v18  ;;  %v311_v23 = vld [vmem:[%s3597_s8 + $0xc0] sm:$0xff]  ;;  %1841 = vmatprep.subr.bf16.mxu0 %v3060_v21  ;;  %v3187_v28 = vcombine.low %v431_v17, %v435_v18 }
  0x24   : > { %v315_v24 = vld [vmem:[%s3597_s8 + $0xe0] sm:$0xff]  ;;  %1842 = vmatpush1.bf16.msra.mxu0 %v3059_v27 }
  0x25   : > { %v439_v25 = vld [vmem:[%s3597_s8 + $0x4c0] sm:$0xff]  ;;  %v3068_v29 = vcombine.high %v311_v23, %v315_v24  ;;  %1882 = vmatprep.subr.bf16.mxu1 %v3188_v22  ;;  %v3067_v35 = vcombine.low %v311_v23, %v315_v24 }
  0x26   : > { %v443_v26 = vld [vmem:[%s3597_s8 + $0x4e0] sm:$0xff]  ;;  %1883 = vmatpush1.bf16.msra.mxu1 %v3187_v28 }
  0x27   : > { %v3196_v30 = vcombine.high %v439_v25, %v443_v26  ;;  %v319_v31 = vld [vmem:[%s3597_s8 + $0x100] sm:$0xff]  ;;  %1843 = vmatprep.subr.bf16.mxu0 %v3068_v29  ;;  %v3195_v36 = vcombine.low %v439_v25, %v443_v26 }
  0x28   : > { %v323_v32 = vld [vmem:[%s3597_s8 + $0x120] sm:$0xff]  ;;  %1844 = vmatpush1.bf16.msra.mxu0 %v3067_v35 }
  0x29   : > { %v447_v33 = vld [vmem:[%s3597_s8 + $0x500] sm:$0xff]  ;;  %v3076_v37 = vcombine.high %v319_v31, %v323_v32  ;;  %1884 = vmatprep.subr.bf16.mxu1 %v3196_v30  ;;  %v3075_v43 = vcombine.low %v319_v31, %v323_v32 }
  0x2a   : > { %v451_v34 = vld [vmem:[%s3597_s8 + $0x520] sm:$0xff]  ;;  %1885 = vmatpush1.bf16.msra.mxu1 %v3195_v36 }
  0x2b   : > { %v3204_v38 = vcombine.high %v447_v33, %v451_v34  ;;  %v327_v39 = vld [vmem:[%s3597_s8 + $0x140] sm:$0xff]  ;;  %1845 = vmatprep.subr.bf16.mxu0 %v3076_v37  ;;  %v3203_v44 = vcombine.low %v447_v33, %v451_v34 }
  0x2c   : > { %v331_v40 = vld [vmem:[%s3597_s8 + $0x160] sm:$0xff]  ;;  %1846 = vmatpush1.bf16.msra.mxu0 %v3075_v43 }
  0x2d   : > { %v455_v41 = vld [vmem:[%s3597_s8 + $0x540] sm:$0xff]  ;;  %v3084_v45 = vcombine.high %v327_v39, %v331_v40  ;;  %1886 = vmatprep.subr.bf16.mxu1 %v3204_v38  ;;  %v3083_v51 = vcombine.low %v327_v39, %v331_v40 }
  0x2e   : > { %v459_v42 = vld [vmem:[%s3597_s8 + $0x560] sm:$0xff]  ;;  %1887 = vmatpush1.bf16.msra.mxu1 %v3203_v44 }
  0x2f   : > { %v3212_v46 = vcombine.high %v455_v41, %v459_v42  ;;  %v335_v47 = vld [vmem:[%s3597_s8 + $0x180] sm:$0xff]  ;;  %1847 = vmatprep.subr.bf16.mxu0 %v3084_v45  ;;  %v3211_v52 = vcombine.low %v455_v41, %v459_v42 }
  0x30   : > { %v339_v48 = vld [vmem:[%s3597_s8 + $0x1a0] sm:$0xff]  ;;  %1848 = vmatpush1.bf16.msra.mxu0 %v3083_v51 }
  0x31   : > { %v463_v49 = vld [vmem:[%s3597_s8 + $0x580] sm:$0xff]  ;;  %v3092_v53 = vcombine.high %v335_v47, %v339_v48  ;;  %1888 = vmatprep.subr.bf16.mxu1 %v3212_v46  ;;  %v3091_v63 = vcombine.low %v335_v47, %v339_v48 }
  0x32   : > { %v467_v50 = vld [vmem:[%s3597_s8 + $0x5a0] sm:$0xff]  ;;  %1889 = vmatpush1.bf16.msra.mxu1 %v3211_v52 }
  0x33   : > { %v3629_v54 = vld [vmem:[%s3592_s28] sm:$0xff]  ;;  %v3220_v56 = vcombine.high %v463_v49, %v467_v50  ;;  %1849 = vmatprep.subr.bf16.mxu0 %v3092_v53  ;;  %v3219_v0 = vcombine.low %v463_v49, %v467_v50 }
  0x34   : > { %v343_v57 = vld [vmem:[%s3597_s8 + $0x1c0] sm:$0xff]  ;;  %v3638_v59 = vcombine.high %v3629_v54, %v3629_v54  ;;  %1850 = vmatpush1.bf16.msra.mxu0 %v3091_v63 }
  0x35   : > { %v347_v58 = vld [vmem:[%s3597_s8 + $0x1e0] sm:$0xff]  ;;  %1890 = vmatprep.subr.bf16.mxu1 %v3220_v56 }
  0x36   : > { %v471_v61 = vld [vmem:[%s3597_s8 + $0x5c0] sm:$0xff]  ;;  %1869 = vmatprep.mubr.bf16.mxu0 %v3638_v59  ;;  %v3100_v1 = vcombine.high %v343_v57, %v347_v58  ;;  %v3099_v7 = vcombine.low %v343_v57, %v347_v58  ;;  %1891 = vmatpush1.bf16.msra.mxu1 %v3219_v0 }
  0x37   : > { %v475_v62 = vld [vmem:[%s3597_s8 + $0x5e0] sm:$0xff] }
  0x38   : > { %v3228_v2 = vcombine.high %v471_v61, %v475_v62  ;;  %v351_v3 = vld [vmem:[%s3597_s8 + $0x200] sm:$0xff]  ;;  %1851 = vmatprep.subr.bf16.mxu0 %v3100_v1  ;;  %v3227_v8 = vcombine.low %v471_v61, %v475_v62 }
  0x39   : > { %v355_v4 = vld [vmem:[%s3597_s8 + $0x220] sm:$0xff]  ;;  %1852 = vmatpush1.bf16.msra.mxu0 %v3099_v7  ;;  %v288_v7 = vld [vmem:[%s3597_s8 + $0x8] sm:$0xff] }
  0x3a   : > { %v479_v5 = vld [vmem:[%s3597_s8 + $0x600] sm:$0xff]  ;;  %v3108_v9 = vcombine.high %v351_v3, %v355_v4  ;;  %1892 = vmatprep.subr.bf16.mxu1 %v3228_v2  ;;  %v3107_v15 = vcombine.low %v351_v3, %v355_v4 }
  0x3b   : > { %v483_v6 = vld [vmem:[%s3597_s8 + $0x620] sm:$0xff]  ;;  %1893 = vmatpush1.bf16.msra.mxu1 %v3227_v8  ;;  %v292_v8 = vld [vmem:[%s3597_s8 + $0x28] sm:$0xff] }
  0x3c   : > { %v3236_v10 = vcombine.high %v479_v5, %v483_v6  ;;  %v359_v11 = vld [vmem:[%s3597_s8 + $0x240] sm:$0xff]  ;;  %1853 = vmatprep.subr.bf16.mxu0 %v3108_v9  ;;  %v3235_v16 = vcombine.low %v479_v5, %v483_v6  ;;  %v416_v9 = vld [vmem:[%s3597_s8 + $0x408] sm:$0xff] }
  0x3d   : > { %v363_v12 = vld [vmem:[%s3597_s8 + $0x260] sm:$0xff]  ;;  %1854 = vmatpush1.bf16.msra.mxu0 %v3107_v15  ;;  %v296_v15 = vld [vmem:[%s3597_s8 + $0x48] sm:$0xff] }
  0x3e   : > { %v487_v13 = vld [vmem:[%s3597_s8 + $0x640] sm:$0xff]  ;;  %v3116_v17 = vcombine.high %v359_v11, %v363_v12  ;;  %1894 = vmatprep.subr.bf16.mxu1 %v3236_v10  ;;  %v3115_v23 = vcombine.low %v359_v11, %v363_v12  ;;  %v420_v10 = vld [vmem:[%s3597_s8 + $0x428] sm:$0xff] }
  0x3f   : > { %v491_v14 = vld [vmem:[%s3597_s8 + $0x660] sm:$0xff]  ;;  %1895 = vmatpush1.bf16.msra.mxu1 %v3235_v16  ;;  %v300_v16 = vld [vmem:[%s3597_s8 + $0x68] sm:$0xff] }
  0x40   : > { %v3244_v18 = vcombine.high %v487_v13, %v491_v14  ;;  %v367_v19 = vld [vmem:[%s3597_s8 + $0x280] sm:$0xff]  ;;  %1855 = vmatprep.subr.bf16.mxu0 %v3116_v17  ;;  %v3243_v24 = vcombine.low %v487_v13, %v491_v14  ;;  %v3046_v13 = vcombine.high %v288_v7, %v292_v8  ;;  %v3174_v14 = vcombine.high %v416_v9, %v420_v10 }
  0x41   : > { %v371_v20 = vld [vmem:[%s3597_s8 + $0x2a0] sm:$0xff]  ;;  %1856 = vmatpush1.bf16.msra.mxu0 %v3115_v23  ;;  %v3688_v17 = vcombine.low %v3629_v54, %v3629_v54  ;;  %v3054_v23 = vcombine.high %v296_v15, %v300_v16  ;;  %v308_v54 = vld [vmem:[%s3597_s8 + $0xa8] sm:$0xff] }
  0x42   : > { %v495_v21 = vld [vmem:[%s3597_s8 + $0x680] sm:$0xff]  ;;  %v3124_v25 = vcombine.high %v367_v19, %v371_v20  ;;  %1896 = vmatprep.subr.bf16.mxu1 %v3244_v18  ;;  %v3123_v31 = vcombine.low %v367_v19, %v371_v20  ;;  %v424_v18 = vld [vmem:[%s3597_s8 + $0x448] sm:$0xff]  ;;  %v3694_v20 = vcombine.low %v3632_v55, %v3632_v55  ;;  %v3053_v55 = vcombine.low %v296_v15, %v300_v16 }
  0x43   : > { %v499_v22 = vld [vmem:[%s3597_s8 + $0x6a0] sm:$0xff]  ;;  %1897 = vmatpush1.bf16.msra.mxu1 %v3243_v24  ;;  %v428_v19 = vld [vmem:[%s3597_s8 + $0x468] sm:$0xff] }
  0x44   : > { %v3252_v26 = vcombine.high %v495_v21, %v499_v22  ;;  %v375_v27 = vld [vmem:[%s3597_s8 + $0x2c0] sm:$0xff]  ;;  %1857 = vmatprep.subr.bf16.mxu0 %v3124_v25  ;;  %v3251_v32 = vcombine.low %v495_v21, %v499_v22  ;;  %v3045_v21 = vcombine.low %v288_v7, %v292_v8  ;;  %v3173_v22 = vcombine.low %v416_v9, %v420_v10  ;;  %v304_v25 = vld [vmem:[%s3597_s8 + $0x88] sm:$0xff] }
  0x45   : > { %v379_v28 = vld [vmem:[%s3597_s8 + $0x2e0] sm:$0xff]  ;;  %1858 = vmatpush1.bf16.msra.mxu0 %v3123_v31  ;;  %v3182_v24 = vcombine.high %v424_v18, %v428_v19  ;;  %v312_v31 = vld [vmem:[%s3597_s8 + $0xc8] sm:$0xff] }
  0x46   : > { %v503_v29 = vld [vmem:[%s3597_s8 + $0x6c0] sm:$0xff]  ;;  %v3132_v33 = vcombine.high %v375_v27, %v379_v28  ;;  %1898 = vmatprep.subr.bf16.mxu1 %v3252_v26  ;;  %v3131_v39 = vcombine.low %v375_v27, %v379_v28  ;;  %v432_v26 = vld [vmem:[%s3597_s8 + $0x488] sm:$0xff]  ;;  %v3181_v28 = vcombine.low %v424_v18, %v428_v19 }
  0x47   : > { %v507_v30 = vld [vmem:[%s3597_s8 + $0x6e0] sm:$0xff]  ;;  %1899 = vmatpush1.bf16.msra.mxu1 %v3251_v32  ;;  %v436_v27 = vld [vmem:[%s3597_s8 + $0x4a8] sm:$0xff] }
  0x48   : > { %v3260_v34 = vcombine.high %v503_v29, %v507_v30  ;;  %v383_v35 = vld [vmem:[%s3597_s8 + $0x300] sm:$0xff]  ;;  %1859 = vmatprep.subr.bf16.mxu0 %v3132_v33  ;;  %v3259_v40 = vcombine.low %v503_v29, %v507_v30  ;;  %v3062_v29 = vcombine.high %v304_v25, %v308_v54  ;;  %v3190_v30 = vcombine.high %v432_v26, %v436_v27  ;;  %v316_v32 = vld [vmem:[%s3597_s8 + $0xe8] sm:$0xff] }
  0x49   : > { %v387_v36 = vld [vmem:[%s3597_s8 + $0x320] sm:$0xff]  ;;  %1860 = vmatpush1.bf16.msra.mxu0 %v3131_v39  ;;  %v440_v33 = vld [vmem:[%s3597_s8 + $0x4c8] sm:$0xff] }
  0x4a   : > { %v511_v37 = vld [vmem:[%s3597_s8 + $0x700] sm:$0xff]  ;;  %v3140_v41 = vcombine.high %v383_v35, %v387_v36  ;;  %1900 = vmatprep.subr.bf16.mxu1 %v3260_v34  ;;  %v3139_v47 = vcombine.low %v383_v35, %v387_v36  ;;  %v444_v34 = vld [vmem:[%s3597_s8 + $0x4e8] sm:$0xff]  ;;  %v3061_v35 = vcombine.low %v304_v25, %v308_v54  ;;  %v3189_v36 = vcombine.low %v432_v26, %v436_v27 }
  0x4b   : > { %v515_v38 = vld [vmem:[%s3597_s8 + $0x720] sm:$0xff]  ;;  %1901 = vmatpush1.bf16.msra.mxu1 %v3259_v40  ;;  %v320_v39 = vld [vmem:[%s3597_s8 + $0x108] sm:$0xff] }
  0x4c   : > { %v3268_v42 = vcombine.high %v511_v37, %v515_v38  ;;  %v391_v43 = vld [vmem:[%s3597_s8 + $0x340] sm:$0xff]  ;;  %1861 = vmatprep.subr.bf16.mxu0 %v3140_v41  ;;  %v3267_v48 = vcombine.low %v511_v37, %v515_v38  ;;  %v3070_v37 = vcombine.high %v312_v31, %v316_v32  ;;  %v3198_v38 = vcombine.high %v440_v33, %v444_v34  ;;  %v324_v40 = vld [vmem:[%s3597_s8 + $0x128] sm:$0xff] }
  0x4d   : > { %v395_v44 = vld [vmem:[%s3597_s8 + $0x360] sm:$0xff]  ;;  %1862 = vmatpush1.bf16.msra.mxu0 %v3139_v47  ;;  %v448_v41 = vld [vmem:[%s3597_s8 + $0x508] sm:$0xff] }
  0x4e   : > { %v519_v45 = vld [vmem:[%s3597_s8 + $0x740] sm:$0xff]  ;;  %v3148_v49 = vcombine.high %v391_v43, %v395_v44  ;;  %1902 = vmatprep.subr.bf16.mxu1 %v3268_v42  ;;  %v3147_v57 = vcombine.low %v391_v43, %v395_v44  ;;  %v452_v42 = vld [vmem:[%s3597_s8 + $0x528] sm:$0xff]  ;;  %v3069_v43 = vcombine.low %v312_v31, %v316_v32  ;;  %v3197_v44 = vcombine.low %v440_v33, %v444_v34 }
  0x4f   : > { %v523_v46 = vld [vmem:[%s3597_s8 + $0x760] sm:$0xff]  ;;  %1903 = vmatpush1.bf16.msra.mxu1 %v3267_v48  ;;  %v328_v47 = vld [vmem:[%s3597_s8 + $0x148] sm:$0xff] }
  0x50   : > { %v3276_v50 = vcombine.high %v519_v45, %v523_v46  ;;  %v399_v51 = vld [vmem:[%s3597_s8 + $0x380] sm:$0xff]  ;;  %1863 = vmatprep.subr.bf16.mxu0 %v3148_v49  ;;  %v3275_v58 = vcombine.low %v519_v45, %v523_v46  ;;  %v3078_v45 = vcombine.high %v320_v39, %v324_v40  ;;  %v3206_v46 = vcombine.high %v448_v41, %v452_v42  ;;  %v332_v48 = vld [vmem:[%s3597_s8 + $0x168] sm:$0xff] }
  0x51   : > { %v403_v52 = vld [vmem:[%s3597_s8 + $0x3a0] sm:$0xff]  ;;  %1864 = vmatpush1.bf16.msra.mxu0 %v3147_v57  ;;  %v456_v49 = vld [vmem:[%s3597_s8 + $0x548] sm:$0xff] }
  0x52   : > { %v527_v53 = vld [vmem:[%s3597_s8 + $0x780] sm:$0xff]  ;;  %v3156_v61 = vcombine.high %v399_v51, %v403_v52  ;;  %1904 = vmatprep.subr.bf16.mxu1 %v3276_v50  ;;  %v3155_v3 = vcombine.low %v399_v51, %v403_v52  ;;  %v460_v50 = vld [vmem:[%s3597_s8 + $0x568] sm:$0xff]  ;;  %v3077_v51 = vcombine.low %v320_v39, %v324_v40  ;;  %v3205_v52 = vcombine.low %v448_v41, %v452_v42 }
  0x53   : > { %v531_v56 = vld [vmem:[%s3597_s8 + $0x7a0] sm:$0xff]  ;;  %1905 = vmatpush1.bf16.msra.mxu1 %v3275_v58  ;;  %v336_v57 = vld [vmem:[%s3597_s8 + $0x188] sm:$0xff] }
  0x54   : > { %v3284_v62 = vcombine.high %v527_v53, %v531_v56  ;;  %v407_v63 = vld [vmem:[%s3597_s8 + $0x3c0] sm:$0xff]  ;;  %1865 = vmatprep.subr.bf16.mxu0 %v3156_v61  ;;  %v3283_v4 = vcombine.low %v527_v53, %v531_v56  ;;  %v3086_v53 = vcombine.high %v328_v47, %v332_v48  ;;  %v3214_v56 = vcombine.high %v456_v49, %v460_v50  ;;  %v340_v58 = vld [vmem:[%s3597_s8 + $0x1a8] sm:$0xff] }
  0x55   : > { %v411_v0 = vld [vmem:[%s3597_s8 + $0x3e0] sm:$0xff]  ;;  %1866 = vmatpush1.bf16.msra.mxu0 %v3155_v3  ;;  %v464_v61 = vld [vmem:[%s3597_s8 + $0x588] sm:$0xff]  ;;  %v3093_v7 = vcombine.low %v336_v57, %v340_v58 }
  0x56   : > { %v535_v1 = vld [vmem:[%s3597_s8 + $0x7c0] sm:$0xff]  ;;  %v3164_v5 = vcombine.high %v407_v63, %v411_v0  ;;  %1906 = vmatprep.subr.bf16.mxu1 %v3284_v62  ;;  %v3163_v11 = vcombine.low %v407_v63, %v411_v0  ;;  %v468_v62 = vld [vmem:[%s3597_s8 + $0x5a8] sm:$0xff]  ;;  %v3085_v63 = vcombine.low %v328_v47, %v332_v48  ;;  %v3213_v0 = vcombine.low %v456_v49, %v460_v50 }
  0x57   : > { %v539_v2 = vld [vmem:[%s3597_s8 + $0x7e0] sm:$0xff]  ;;  %1907 = vmatpush1.bf16.msra.mxu1 %v3283_v4  ;;  %v344_v3 = vld [vmem:[%s3597_s8 + $0x1c8] sm:$0xff]  ;;  %v3221_v8 = vcombine.low %v464_v61, %v468_v62 }
  0x58   : > { %v3292_v6 = vcombine.high %v535_v1, %v539_v2  ;;  %1867 = vmatprep.subr.bf16.mxu0 %v3164_v5  ;;  %v3291_v12 = vcombine.low %v535_v1, %v539_v2  ;;  %v3094_v1 = vcombine.high %v336_v57, %v340_v58  ;;  %v3222_v2 = vcombine.high %v464_v61, %v468_v62  ;;  %v348_v4 = vld [vmem:[%s3597_s8 + $0x1e8] sm:$0xff] }
  0x59   : > { %1868 = vmatpush1.bf16.msra.mxu0 %v3163_v11  ;;  %v472_v5 = vld [vmem:[%s3597_s8 + $0x5c8] sm:$0xff]  ;;  %v3102_v9 = vcombine.high %v344_v3, %v348_v4  ;;  %v3101_v15 = vcombine.low %v344_v3, %v348_v4 }
  0x5a   : > { %1908 = vmatprep.subr.bf16.mxu1 %v3292_v6  ;;  %1919 = vmatprep.subr.bf16.mxu0 %v3046_v13  ;;  %v476_v6 = vld [vmem:[%s3597_s8 + $0x5e8] sm:$0xff] }
  0x5b   : > { %1909 = vmatpush1.bf16.msra.mxu1 %v3291_v12  ;;  %v3230_v10 = vcombine.high %v472_v5, %v476_v6  ;;  %v352_v11 = vld [vmem:[%s3597_s8 + $0x208] sm:$0xff]  ;;  %v3229_v16 = vcombine.low %v472_v5, %v476_v6 }
  0x5c   : > { %1960 = vmatprep.subr.bf16.mxu1 %v3174_v14  ;;  %1870 = vmatmul.mubr.bf16.vlgmr.msra.gmra.mrb[0].mxu0 %v3688_v17  ;;  %v356_v12 = vld [vmem:[%s3597_s8 + $0x228] sm:$0xff] }
  0x5d   : > { %1920 = vmatpush1.bf16.msra.mxu0 %v3045_v21  ;;  %1951 = vmatprep.mubr.bf16.mxu0 %v3638_v59  ;;  %v480_v13 = vld [vmem:[%s3597_s8 + $0x608] sm:$0xff]  ;;  %v3110_v18 = vcombine.high %v352_v11, %v356_v12  ;;  %v3109_v25 = vcombine.low %v352_v11, %v356_v12 }
  0x5e   : > { %1911 = vmatmul.mubr.bf16.vlgmr.msra.gmra.mrb[0].mxu1 %v3694_v20  ;;  %1921 = vmatprep.subr.bf16.mxu0 %v3054_v23  ;;  %v484_v14 = vld [vmem:[%s3597_s8 + $0x628] sm:$0xff] }
  0x5f   : > { %1961 = vmatpush1.bf16.msra.mxu1 %v3173_v22  ;;  %1992 = vmatprep.mubr.bf16.mxu1 %v3642_v60  ;;  %v3238_v19 = vcombine.high %v480_v13, %v484_v14  ;;  %v360_v21 = vld [vmem:[%s3597_s8 + $0x248] sm:$0xff]  ;;  %v3237_v54 = vcombine.low %v480_v13, %v484_v14 }
  0x60   : > { %1962 = vmatprep.subr.bf16.mxu1 %v3182_v24  ;;  %v364_v22 = vld [vmem:[%s3597_s8 + $0x268] sm:$0xff] }
  0x61   : > { %1922 = vmatpush1.bf16.msra.mxu0 %v3053_v55  ;;  %v488_v23 = vld [vmem:[%s3597_s8 + $0x648] sm:$0xff]  ;;  %v3118_v26 = vcombine.high %v360_v21, %v364_v22  ;;  %v3117_v31 = vcombine.low %v360_v21, %v364_v22 }
  0x62   : > { %1923 = vmatprep.subr.bf16.mxu0 %v3062_v29  ;;  %v492_v24 = vld [vmem:[%s3597_s8 + $0x668] sm:$0xff] }
  0x63   : > { %1963 = vmatpush1.bf16.msra.mxu1 %v3181_v28  ;;  %v3246_v27 = vcombine.high %v488_v23, %v492_v24  ;;  %v368_v55 = vld [vmem:[%s3597_s8 + $0x288] sm:$0xff]  ;;  %v3245_v32 = vcombine.low %v488_v23, %v492_v24 }
  0x64   : > { %1964 = vmatprep.subr.bf16.mxu1 %v3190_v30  ;;  %v372_v28 = vld [vmem:[%s3597_s8 + $0x2a8] sm:$0xff] }
  0x65   : > { %1924 = vmatpush1.bf16.msra.mxu0 %v3061_v35  ;;  %v496_v29 = vld [vmem:[%s3597_s8 + $0x688] sm:$0xff]  ;;  %v3126_v33 = vcombine.high %v368_v55, %v372_v28  ;;  %v3125_v39 = vcombine.low %v368_v55, %v372_v28 }
  0x66   : > { %1925 = vmatprep.subr.bf16.mxu0 %v3070_v37  ;;  %v500_v30 = vld [vmem:[%s3597_s8 + $0x6a8] sm:$0xff] }
  0x67   : > { %1965 = vmatpush1.bf16.msra.mxu1 %v3189_v36  ;;  %v3254_v34 = vcombine.high %v496_v29, %v500_v30  ;;  %v376_v35 = vld [vmem:[%s3597_s8 + $0x2c8] sm:$0xff]  ;;  %v3253_v40 = vcombine.low %v496_v29, %v500_v30 }
  0x68   : > { %1966 = vmatprep.subr.bf16.mxu1 %v3198_v38  ;;  %v380_v36 = vld [vmem:[%s3597_s8 + $0x2e8] sm:$0xff] }
  0x69   : > { %1926 = vmatpush1.bf16.msra.mxu0 %v3069_v43  ;;  %v504_v37 = vld [vmem:[%s3597_s8 + $0x6c8] sm:$0xff]  ;;  %v3134_v41 = vcombine.high %v376_v35, %v380_v36  ;;  %v3133_v47 = vcombine.low %v376_v35, %v380_v36 }
  0x6a   : > { %1927 = vmatprep.subr.bf16.mxu0 %v3078_v45  ;;  %v508_v38 = vld [vmem:[%s3597_s8 + $0x6e8] sm:$0xff] }
  0x6b   : > { %1967 = vmatpush1.bf16.msra.mxu1 %v3197_v44  ;;  %v3262_v42 = vcombine.high %v504_v37, %v508_v38  ;;  %v384_v43 = vld [vmem:[%s3597_s8 + $0x308] sm:$0xff]  ;;  %v3261_v48 = vcombine.low %v504_v37, %v508_v38 }
  0x6c   : > { %1968 = vmatprep.subr.bf16.mxu1 %v3206_v46  ;;  %v388_v44 = vld [vmem:[%s3597_s8 + $0x328] sm:$0xff] }
  0x6d   : > { %1928 = vmatpush1.bf16.msra.mxu0 %v3077_v51  ;;  %v512_v45 = vld [vmem:[%s3597_s8 + $0x708] sm:$0xff]  ;;  %v3142_v49 = vcombine.high %v384_v43, %v388_v44  ;;  %v3141_v57 = vcombine.low %v384_v43, %v388_v44 }
  0x6e   : > { %1929 = vmatprep.subr.bf16.mxu0 %v3086_v53  ;;  %v516_v46 = vld [vmem:[%s3597_s8 + $0x728] sm:$0xff] }
  0x6f   : > { %1969 = vmatpush1.bf16.msra.mxu1 %v3205_v52  ;;  %v3270_v50 = vcombine.high %v512_v45, %v516_v46  ;;  %v392_v51 = vld [vmem:[%s3597_s8 + $0x348] sm:$0xff]  ;;  %v3269_v58 = vcombine.low %v512_v45, %v516_v46 }
  0x70   : > { %1970 = vmatprep.subr.bf16.mxu1 %v3214_v56  ;;  %v396_v52 = vld [vmem:[%s3597_s8 + $0x368] sm:$0xff] }
  0x71   : > { %1930 = vmatpush1.bf16.msra.mxu0 %v3085_v63  ;;  %v520_v53 = vld [vmem:[%s3597_s8 + $0x748] sm:$0xff]  ;;  %v3150_v61 = vcombine.high %v392_v51, %v396_v52  ;;  %v3149_v3 = vcombine.low %v392_v51, %v396_v52 }
  0x72   : > { %1931 = vmatprep.subr.bf16.mxu0 %v3094_v1  ;;  %v524_v56 = vld [vmem:[%s3597_s8 + $0x768] sm:$0xff] }
  0x73   : > { %1971 = vmatpush1.bf16.msra.mxu1 %v3213_v0  ;;  %v3278_v62 = vcombine.high %v520_v53, %v524_v56  ;;  %v400_v63 = vld [vmem:[%s3597_s8 + $0x388] sm:$0xff]  ;;  %v3277_v4 = vcombine.low %v520_v53, %v524_v56 }
  0x74   : > { %1972 = vmatprep.subr.bf16.mxu1 %v3222_v2  ;;  %v404_v0 = vld [vmem:[%s3597_s8 + $0x3a8] sm:$0xff] }
  0x75   : > { %1932 = vmatpush1.bf16.msra.mxu0 %v3093_v7  ;;  %v528_v1 = vld [vmem:[%s3597_s8 + $0x788] sm:$0xff]  ;;  %v3158_v5 = vcombine.high %v400_v63, %v404_v0  ;;  %v3157_v11 = vcombine.low %v400_v63, %v404_v0 }
  0x76   : > { %1933 = vmatprep.subr.bf16.mxu0 %v3102_v9  ;;  %v532_v2 = vld [vmem:[%s3597_s8 + $0x7a8] sm:$0xff] }
  0x77   : > { %1973 = vmatpush1.bf16.msra.mxu1 %v3221_v8  ;;  %v3286_v6 = vcombine.high %v528_v1, %v532_v2  ;;  %v408_v7 = vld [vmem:[%s3597_s8 + $0x3c8] sm:$0xff]  ;;  %v3285_v12 = vcombine.low %v528_v1, %v532_v2 }
  0x78   : > { %1974 = vmatprep.subr.bf16.mxu1 %v3230_v10  ;;  %v412_v8 = vld [vmem:[%s3597_s8 + $0x3e8] sm:$0xff] }
  0x79   : > { %1934 = vmatpush1.bf16.msra.mxu0 %v3101_v15  ;;  %v536_v9 = vld [vmem:[%s3597_s8 + $0x7c8] sm:$0xff]  ;;  %v3166_v13 = vcombine.high %v408_v7, %v412_v8  ;;  %v289_v15 = vld [vmem:[%s3597_s8 + $0x10] sm:$0xff]  ;;  %v3165_v21 = vcombine.low %v408_v7, %v412_v8 }
  0x7a   : > { %1935 = vmatprep.subr.bf16.mxu0 %v3110_v18  ;;  %v540_v10 = vld [vmem:[%s3597_s8 + $0x7e8] sm:$0xff]  ;;  %v417_v18 = vld [vmem:[%s3597_s8 + $0x410] sm:$0xff] }
  0x7b   : > { %1975 = vmatpush1.bf16.msra.mxu1 %v3229_v16  ;;  %v3294_v14 = vcombine.high %v536_v9, %v540_v10  ;;  %v293_v16 = vld [vmem:[%s3597_s8 + $0x30] sm:$0xff]  ;;  %v3293_v22 = vcombine.low %v536_v9, %v540_v10 }
  0x7c   : > { %1976 = vmatprep.subr.bf16.mxu1 %v3238_v19  ;;  %v421_v19 = vld [vmem:[%s3597_s8 + $0x430] sm:$0xff]  ;;  %v3048_v23 = vcombine.high %v289_v15, %v293_v16  ;;  %v3047_v55 = vcombine.low %v289_v15, %v293_v16 }
  0x7d   : > { %1936 = vmatpush1.bf16.msra.mxu0 %v3109_v25  ;;  %v3176_v24 = vcombine.high %v417_v18, %v421_v19  ;;  %v297_v25 = vld [vmem:[%s3597_s8 + $0x50] sm:$0xff]  ;;  %v3175_v28 = vcombine.low %v417_v18, %v421_v19 }
  0x7e   : > { %1937 = vmatprep.subr.bf16.mxu0 %v3118_v26  ;;  %v425_v26 = vld [vmem:[%s3597_s8 + $0x450] sm:$0xff] }
  0x7f   : > { %1977 = vmatpush1.bf16.msra.mxu1 %v3237_v54  ;;  %v301_v54 = vld [vmem:[%s3597_s8 + $0x70] sm:$0xff] }
  0x80   : > { %1978 = vmatprep.subr.bf16.mxu1 %v3246_v27  ;;  %v429_v27 = vld [vmem:[%s3597_s8 + $0x470] sm:$0xff]  ;;  %v3056_v29 = vcombine.high %v297_v25, %v301_v54  ;;  %v3055_v35 = vcombine.low %v297_v25, %v301_v54 }
  0x81   : > { %1938 = vmatpush1.bf16.msra.mxu0 %v3117_v31  ;;  %v3184_v30 = vcombine.high %v425_v26, %v429_v27  ;;  %v305_v31 = vld [vmem:[%s3597_s8 + $0x90] sm:$0xff]  ;;  %v3183_v36 = vcombine.low %v425_v26, %v429_v27 }
  0x82   : > { %1939 = vmatprep.subr.bf16.mxu0 %v3126_v33  ;;  %v433_v33 = vld [vmem:[%s3597_s8 + $0x490] sm:$0xff] }
  0x83   : > { %1979 = vmatpush1.bf16.msra.mxu1 %v3245_v32  ;;  %v309_v32 = vld [vmem:[%s3597_s8 + $0xb0] sm:$0xff] }
  0x84   : > { %1980 = vmatprep.subr.bf16.mxu1 %v3254_v34  ;;  %v437_v34 = vld [vmem:[%s3597_s8 + $0x4b0] sm:$0xff]  ;;  %v3064_v37 = vcombine.high %v305_v31, %v309_v32  ;;  %v3063_v43 = vcombine.low %v305_v31, %v309_v32 }
  0x85   : > { %1940 = vmatpush1.bf16.msra.mxu0 %v3125_v39  ;;  %v3192_v38 = vcombine.high %v433_v33, %v437_v34  ;;  %v313_v39 = vld [vmem:[%s3597_s8 + $0xd0] sm:$0xff]  ;;  %v3191_v44 = vcombine.low %v433_v33, %v437_v34 }
  0x86   : > { %1941 = vmatprep.subr.bf16.mxu0 %v3134_v41  ;;  %v441_v41 = vld [vmem:[%s3597_s8 + $0x4d0] sm:$0xff] }
  0x87   : > { %1981 = vmatpush1.bf16.msra.mxu1 %v3253_v40  ;;  %v317_v40 = vld [vmem:[%s3597_s8 + $0xf0] sm:$0xff] }
  0x88   : > { %1982 = vmatprep.subr.bf16.mxu1 %v3262_v42  ;;  %v445_v42 = vld [vmem:[%s3597_s8 + $0x4f0] sm:$0xff]  ;;  %v3072_v45 = vcombine.high %v313_v39, %v317_v40  ;;  %v3071_v51 = vcombine.low %v313_v39, %v317_v40 }
  0x89   : > { %1942 = vmatpush1.bf16.msra.mxu0 %v3133_v47  ;;  %v3200_v46 = vcombine.high %v441_v41, %v445_v42  ;;  %v321_v47 = vld [vmem:[%s3597_s8 + $0x110] sm:$0xff]  ;;  %v3199_v52 = vcombine.low %v441_v41, %v445_v42 }
  0x8a   : > { %1943 = vmatprep.subr.bf16.mxu0 %v3142_v49  ;;  %v449_v49 = vld [vmem:[%s3597_s8 + $0x510] sm:$0xff] }
  0x8b   : > { %1983 = vmatpush1.bf16.msra.mxu1 %v3261_v48  ;;  %v325_v48 = vld [vmem:[%s3597_s8 + $0x130] sm:$0xff] }
  0x8c   : > { %1984 = vmatprep.subr.bf16.mxu1 %v3270_v50  ;;  %v453_v50 = vld [vmem:[%s3597_s8 + $0x530] sm:$0xff]  ;;  %v3080_v53 = vcombine.high %v321_v47, %v325_v48  ;;  %v3079_v63 = vcombine.low %v321_v47, %v325_v48 }
  0x8d   : > { %1944 = vmatpush1.bf16.msra.mxu0 %v3141_v57  ;;  %v3208_v56 = vcombine.high %v449_v49, %v453_v50  ;;  %v329_v57 = vld [vmem:[%s3597_s8 + $0x150] sm:$0xff]  ;;  %v3207_v0 = vcombine.low %v449_v49, %v453_v50 }
  0x8e   : > { %1945 = vmatprep.subr.bf16.mxu0 %v3150_v61  ;;  %v457_v61 = vld [vmem:[%s3597_s8 + $0x550] sm:$0xff] }
  0x8f   : > { %1985 = vmatpush1.bf16.msra.mxu1 %v3269_v58  ;;  %v333_v58 = vld [vmem:[%s3597_s8 + $0x170] sm:$0xff] }
  0x90   : > { %1986 = vmatprep.subr.bf16.mxu1 %v3278_v62  ;;  %v461_v62 = vld [vmem:[%s3597_s8 + $0x570] sm:$0xff]  ;;  %v3088_v1 = vcombine.high %v329_v57, %v333_v58  ;;  %v3087_v7 = vcombine.low %v329_v57, %v333_v58 }
  0x91   : > { %1946 = vmatpush1.bf16.msra.mxu0 %v3149_v3  ;;  %v3216_v2 = vcombine.high %v457_v61, %v461_v62  ;;  %v337_v3 = vld [vmem:[%s3597_s8 + $0x190] sm:$0xff]  ;;  %v3215_v8 = vcombine.low %v457_v61, %v461_v62 }
  0x92   : > { %1947 = vmatprep.subr.bf16.mxu0 %v3158_v5  ;;  %v465_v5 = vld [vmem:[%s3597_s8 + $0x590] sm:$0xff] }
  0x93   : > { %1987 = vmatpush1.bf16.msra.mxu1 %v3277_v4  ;;  %v341_v4 = vld [vmem:[%s3597_s8 + $0x1b0] sm:$0xff] }
  0x94   : > { %1988 = vmatprep.subr.bf16.mxu1 %v3286_v6  ;;  %v469_v6 = vld [vmem:[%s3597_s8 + $0x5b0] sm:$0xff]  ;;  %v3096_v9 = vcombine.high %v337_v3, %v341_v4  ;;  %v3095_v15 = vcombine.low %v337_v3, %v341_v4 }
  0x95   : > { %1948 = vmatpush1.bf16.msra.mxu0 %v3157_v11  ;;  %v3224_v10 = vcombine.high %v465_v5, %v469_v6  ;;  %v345_v11 = vld [vmem:[%s3597_s8 + $0x1d0] sm:$0xff]  ;;  %v3223_v16 = vcombine.low %v465_v5, %v469_v6 }
  0x96   : > { %1949 = vmatprep.subr.bf16.mxu0 %v3166_v13  ;;  %v473_v13 = vld [vmem:[%s3597_s8 + $0x5d0] sm:$0xff] }
  0x97   : > { %1989 = vmatpush1.bf16.msra.mxu1 %v3285_v12  ;;  %v349_v12 = vld [vmem:[%s3597_s8 + $0x1f0] sm:$0xff] }
  0x98   : > { %1990 = vmatprep.subr.bf16.mxu1 %v3294_v14  ;;  %v477_v14 = vld [vmem:[%s3597_s8 + $0x5f0] sm:$0xff]  ;;  %v3104_v18 = vcombine.high %v345_v11, %v349_v12  ;;  %v3103_v25 = vcombine.low %v345_v11, %v349_v12 }
  0x99   : > { %1950 = vmatpush1.bf16.msra.mxu0 %v3165_v21  ;;  %v3232_v19 = vcombine.high %v473_v13, %v477_v14  ;;  %v353_v21 = vld [vmem:[%s3597_s8 + $0x210] sm:$0xff]  ;;  %v3231_v54 = vcombine.low %v473_v13, %v477_v14 }
  0x9a   : > { %2001 = vmatprep.subr.bf16.mxu0 %v3048_v23  ;;  %v481_v23 = vld [vmem:[%s3597_s8 + $0x610] sm:$0xff] }
  0x9b   : > { %1991 = vmatpush1.bf16.msra.mxu1 %v3293_v22  ;;  %v357_v22 = vld [vmem:[%s3597_s8 + $0x230] sm:$0xff] }
  0x9c   : > { %2042 = vmatprep.subr.bf16.mxu1 %v3176_v24  ;;  %1952 = vmatmul.mubr.bf16.vlgmr.msra.gmra.mrb[4].mxu0 %v3688_v17  ;;  %v485_v24 = vld [vmem:[%s3597_s8 + $0x630] sm:$0xff]  ;;  %v3112_v26 = vcombine.high %v353_v21, %v357_v22  ;;  %v3111_v31 = vcombine.low %v353_v21, %v357_v22 }
  0x9d   : > { %2002 = vmatpush1.bf16.msra.mxu0 %v3047_v55  ;;  %2033 = vmatprep.mubr.bf16.mxu0 %v3638_v59  ;;  %v3240_v27 = vcombine.high %v481_v23, %v485_v24  ;;  %v361_v55 = vld [vmem:[%s3597_s8 + $0x250] sm:$0xff]  ;;  %v3239_v32 = vcombine.low %v481_v23, %v485_v24 }
  0x9e   : > { %1993 = vmatmul.mubr.bf16.vlgmr.msra.gmra.mrb[4].mxu1 %v3694_v20  ;;  %2003 = vmatprep.subr.bf16.mxu0 %v3056_v29  ;;  %v489_v29 = vld [vmem:[%s3597_s8 + $0x650] sm:$0xff] }
  0x9f   : > { %2043 = vmatpush1.bf16.msra.mxu1 %v3175_v28  ;;  %2074 = vmatprep.mubr.bf16.mxu1 %v3642_v60  ;;  %v365_v28 = vld [vmem:[%s3597_s8 + $0x270] sm:$0xff] }
  0xa0   : > { %2044 = vmatprep.subr.bf16.mxu1 %v3184_v30  ;;  %v493_v30 = vld [vmem:[%s3597_s8 + $0x670] sm:$0xff]  ;;  %v3120_v33 = vcombine.high %v361_v55, %v365_v28  ;;  %v3119_v39 = vcombine.low %v361_v55, %v365_v28 }
  0xa1   : > { %2004 = vmatpush1.bf16.msra.mxu0 %v3055_v35  ;;  %v3248_v34 = vcombine.high %v489_v29, %v493_v30  ;;  %v369_v35 = vld [vmem:[%s3597_s8 + $0x290] sm:$0xff]  ;;  %v3247_v40 = vcombine.low %v489_v29, %v493_v30 }
  0xa2   : > { %2005 = vmatprep.subr.bf16.mxu0 %v3064_v37  ;;  %v497_v37 = vld [vmem:[%s3597_s8 + $0x690] sm:$0xff] }
  0xa3   : > { %2045 = vmatpush1.bf16.msra.mxu1 %v3183_v36  ;;  %v373_v36 = vld [vmem:[%s3597_s8 + $0x2b0] sm:$0xff] }
  0xa4   : > { %2046 = vmatprep.subr.bf16.mxu1 %v3192_v38  ;;  %v501_v38 = vld [vmem:[%s3597_s8 + $0x6b0] sm:$0xff]  ;;  %v3128_v41 = vcombine.high %v369_v35, %v373_v36  ;;  %v3127_v47 = vcombine.low %v369_v35, %v373_v36 }
  0xa5   : > { %2006 = vmatpush1.bf16.msra.mxu0 %v3063_v43  ;;  %v3256_v42 = vcombine.high %v497_v37, %v501_v38  ;;  %v377_v43 = vld [vmem:[%s3597_s8 + $0x2d0] sm:$0xff]  ;;  %v3255_v48 = vcombine.low %v497_v37, %v501_v38 }
  0xa6   : > { %2007 = vmatprep.subr.bf16.mxu0 %v3072_v45  ;;  %v505_v45 = vld [vmem:[%s3597_s8 + $0x6d0] sm:$0xff] }
  0xa7   : > { %2047 = vmatpush1.bf16.msra.mxu1 %v3191_v44  ;;  %v381_v44 = vld [vmem:[%s3597_s8 + $0x2f0] sm:$0xff] }
  0xa8   : > { %2048 = vmatprep.subr.bf16.mxu1 %v3200_v46  ;;  %v509_v46 = vld [vmem:[%s3597_s8 + $0x6f0] sm:$0xff]  ;;  %v3136_v49 = vcombine.high %v377_v43, %v381_v44  ;;  %v3135_v57 = vcombine.low %v377_v43, %v381_v44 }
  0xa9   : > { %2008 = vmatpush1.bf16.msra.mxu0 %v3071_v51  ;;  %v3264_v50 = vcombine.high %v505_v45, %v509_v46  ;;  %v385_v51 = vld [vmem:[%s3597_s8 + $0x310] sm:$0xff]  ;;  %v3263_v58 = vcombine.low %v505_v45, %v509_v46 }
  0xaa   : > { %2009 = vmatprep.subr.bf16.mxu0 %v3080_v53  ;;  %v513_v53 = vld [vmem:[%s3597_s8 + $0x710] sm:$0xff] }
  0xab   : > { %2049 = vmatpush1.bf16.msra.mxu1 %v3199_v52  ;;  %v389_v52 = vld [vmem:[%s3597_s8 + $0x330] sm:$0xff] }
  0xac   : > { %2050 = vmatprep.subr.bf16.mxu1 %v3208_v56  ;;  %v517_v56 = vld [vmem:[%s3597_s8 + $0x730] sm:$0xff]  ;;  %v3144_v61 = vcombine.high %v385_v51, %v389_v52  ;;  %v3143_v3 = vcombine.low %v385_v51, %v389_v52 }
  0xad   : > { %2010 = vmatpush1.bf16.msra.mxu0 %v3079_v63  ;;  %v3272_v62 = vcombine.high %v513_v53, %v517_v56  ;;  %v393_v63 = vld [vmem:[%s3597_s8 + $0x350] sm:$0xff]  ;;  %v3271_v4 = vcombine.low %v513_v53, %v517_v56 }
  0xae   : > { %2011 = vmatprep.subr.bf16.mxu0 %v3088_v1  ;;  %v521_v1 = vld [vmem:[%s3597_s8 + $0x750] sm:$0xff] }
  0xaf   : > { %2051 = vmatpush1.bf16.msra.mxu1 %v3207_v0  ;;  %v397_v0 = vld [vmem:[%s3597_s8 + $0x370] sm:$0xff] }
  0xb0   : > { %2052 = vmatprep.subr.bf16.mxu1 %v3216_v2  ;;  %v525_v2 = vld [vmem:[%s3597_s8 + $0x770] sm:$0xff]  ;;  %v3152_v5 = vcombine.high %v393_v63, %v397_v0  ;;  %v3151_v11 = vcombine.low %v393_v63, %v397_v0 }
  0xb1   : > { %2012 = vmatpush1.bf16.msra.mxu0 %v3087_v7  ;;  %v3280_v6 = vcombine.high %v521_v1, %v525_v2  ;;  %v401_v7 = vld [vmem:[%s3597_s8 + $0x390] sm:$0xff]  ;;  %v3279_v12 = vcombine.low %v521_v1, %v525_v2  ;;  %v330_v1 = vld [vmem:[%s3597_s8 + $0x158] sm:$0xff] }
  0xb2   : > { %2013 = vmatprep.subr.bf16.mxu0 %v3096_v9  ;;  %v529_v9 = vld [vmem:[%s3597_s8 + $0x790] sm:$0xff]  ;;  %v334_v2 = vld [vmem:[%s3597_s8 + $0x178] sm:$0xff] }
  0xb3   : > { %2053 = vmatpush1.bf16.msra.mxu1 %v3215_v8  ;;  %v405_v8 = vld [vmem:[%s3597_s8 + $0x3b0] sm:$0xff] }
  0xb4   : > { %2054 = vmatprep.subr.bf16.mxu1 %v3224_v10  ;;  %v533_v10 = vld [vmem:[%s3597_s8 + $0x7b0] sm:$0xff]  ;;  %v3160_v13 = vcombine.high %v401_v7, %v405_v8  ;;  %v3159_v21 = vcombine.low %v401_v7, %v405_v8  ;;  %v3090_v7 = vcombine.high %v330_v1, %v334_v2 }
  0xb5   : > { %2014 = vmatpush1.bf16.msra.mxu0 %v3095_v15  ;;  %v3288_v14 = vcombine.high %v529_v9, %v533_v10  ;;  %v409_v15 = vld [vmem:[%s3597_s8 + $0x3d0] sm:$0xff]  ;;  %v3287_v22 = vcombine.low %v529_v9, %v533_v10  ;;  %v338_v9 = vld [vmem:[%s3597_s8 + $0x198] sm:$0xff] }
  0xb6   : > { %2015 = vmatprep.subr.bf16.mxu0 %v3104_v18  ;;  %v537_v18 = vld [vmem:[%s3597_s8 + $0x7d0] sm:$0xff]  ;;  %v342_v10 = vld [vmem:[%s3597_s8 + $0x1b8] sm:$0xff] }
  0xb7   : > { %2055 = vmatpush1.bf16.msra.mxu1 %v3223_v16  ;;  %v413_v16 = vld [vmem:[%s3597_s8 + $0x3f0] sm:$0xff] }
  0xb8   : > { %2056 = vmatprep.subr.bf16.mxu1 %v3232_v19  ;;  %v541_v19 = vld [vmem:[%s3597_s8 + $0x7f0] sm:$0xff]  ;;  %v3168_v23 = vcombine.high %v409_v15, %v413_v16  ;;  %v3167_v55 = vcombine.low %v409_v15, %v413_v16  ;;  %v3098_v15 = vcombine.high %v338_v9, %v342_v10 }
  0xb9   : > { %2016 = vmatpush1.bf16.msra.mxu0 %v3103_v25  ;;  %v3296_v24 = vcombine.high %v537_v18, %v541_v19  ;;  %v290_v25 = vld [vmem:[%s3597_s8 + $0x18] sm:$0xff]  ;;  %v3295_v28 = vcombine.low %v537_v18, %v541_v19 }
  0xba   : > { %2017 = vmatprep.subr.bf16.mxu0 %v3112_v26  ;;  %v418_v26 = vld [vmem:[%s3597_s8 + $0x418] sm:$0xff] }
  0xbb   : > { %2057 = vmatpush1.bf16.msra.mxu1 %v3231_v54  ;;  %v294_v54 = vld [vmem:[%s3597_s8 + $0x38] sm:$0xff] }
  0xbc   : > { %2058 = vmatprep.subr.bf16.mxu1 %v3240_v27  ;;  %v422_v27 = vld [vmem:[%s3597_s8 + $0x438] sm:$0xff]  ;;  %v3050_v29 = vcombine.high %v290_v25, %v294_v54  ;;  %v3049_v35 = vcombine.low %v290_v25, %v294_v54 }
  0xbd   : > { %2018 = vmatpush1.bf16.msra.mxu0 %v3111_v31  ;;  %v3178_v30 = vcombine.high %v418_v26, %v422_v27  ;;  %v298_v31 = vld [vmem:[%s3597_s8 + $0x58] sm:$0xff]  ;;  %v3177_v36 = vcombine.low %v418_v26, %v422_v27 }
  0xbe   : > { %2019 = vmatprep.subr.bf16.mxu0 %v3120_v33  ;;  %v426_v33 = vld [vmem:[%s3597_s8 + $0x458] sm:$0xff] }
  0xbf   : > { %2059 = vmatpush1.bf16.msra.mxu1 %v3239_v32  ;;  %v302_v32 = vld [vmem:[%s3597_s8 + $0x78] sm:$0xff] }
  0xc0   : > { %2060 = vmatprep.subr.bf16.mxu1 %v3248_v34  ;;  %v430_v34 = vld [vmem:[%s3597_s8 + $0x478] sm:$0xff]  ;;  %v3058_v37 = vcombine.high %v298_v31, %v302_v32  ;;  %v3057_v43 = vcombine.low %v298_v31, %v302_v32 }
  0xc1   : > { %2020 = vmatpush1.bf16.msra.mxu0 %v3119_v39  ;;  %v3186_v38 = vcombine.high %v426_v33, %v430_v34  ;;  %v306_v39 = vld [vmem:[%s3597_s8 + $0x98] sm:$0xff]  ;;  %v3185_v44 = vcombine.low %v426_v33, %v430_v34 }
  0xc2   : > { %2021 = vmatprep.subr.bf16.mxu0 %v3128_v41  ;;  %v434_v41 = vld [vmem:[%s3597_s8 + $0x498] sm:$0xff] }
  0xc3   : > { %2061 = vmatpush1.bf16.msra.mxu1 %v3247_v40  ;;  %v310_v40 = vld [vmem:[%s3597_s8 + $0xb8] sm:$0xff] }
  0xc4   : > { %2062 = vmatprep.subr.bf16.mxu1 %v3256_v42  ;;  %v438_v42 = vld [vmem:[%s3597_s8 + $0x4b8] sm:$0xff]  ;;  %v3066_v45 = vcombine.high %v306_v39, %v310_v40  ;;  %v3065_v51 = vcombine.low %v306_v39, %v310_v40 }
  0xc5   : > { %2022 = vmatpush1.bf16.msra.mxu0 %v3127_v47  ;;  %v3194_v46 = vcombine.high %v434_v41, %v438_v42  ;;  %v314_v47 = vld [vmem:[%s3597_s8 + $0xd8] sm:$0xff]  ;;  %v3193_v52 = vcombine.low %v434_v41, %v438_v42 }
  0xc6   : > { %2023 = vmatprep.subr.bf16.mxu0 %v3136_v49  ;;  %v442_v49 = vld [vmem:[%s3597_s8 + $0x4d8] sm:$0xff] }
  0xc7   : > { %2063 = vmatpush1.bf16.msra.mxu1 %v3255_v48  ;;  %v318_v48 = vld [vmem:[%s3597_s8 + $0xf8] sm:$0xff] }
  0xc8   : > { %2064 = vmatprep.subr.bf16.mxu1 %v3264_v50  ;;  %v446_v50 = vld [vmem:[%s3597_s8 + $0x4f8] sm:$0xff]  ;;  %v3074_v53 = vcombine.high %v314_v47, %v318_v48 }
  0xc9   : > { %2024 = vmatpush1.bf16.msra.mxu0 %v3135_v57  ;;  %v3202_v56 = vcombine.high %v442_v49, %v446_v50  ;;  %v322_v57 = vld [vmem:[%s3597_s8 + $0x118] sm:$0xff] }
  0xca   : > { %2025 = vmatprep.subr.bf16.mxu0 %v3144_v61  ;;  %v450_v61 = vld [vmem:[%s3597_s8 + $0x518] sm:$0xff] }
  0xcb   : > { %2065 = vmatpush1.bf16.msra.mxu1 %v3263_v58  ;;  %v326_v58 = vld [vmem:[%s3597_s8 + $0x138] sm:$0xff] }
  0xcc   : > { %2066 = vmatprep.subr.bf16.mxu1 %v3272_v62  ;;  %v3073_v62 = vcombine.low %v314_v47, %v318_v48  ;;  %v3082_v63 = vcombine.high %v322_v57, %v326_v58  ;;  %v346_v18 = vld [vmem:[%s3597_s8 + $0x1d8] sm:$0xff] }
  0xcd   : > { %2026 = vmatpush1.bf16.msra.mxu0 %v3143_v3  ;;  %v458_v3 = vld [vmem:[%s3597_s8 + $0x558] sm:$0xff] }
  0xce   : > { %2027 = vmatprep.subr.bf16.mxu0 %v3152_v5  ;;  %v3081_v5 = vcombine.low %v322_v57, %v326_v58  ;;  %v350_v19 = vld [vmem:[%s3597_s8 + $0x1f8] sm:$0xff] }
  0xcf   : > { %2067 = vmatpush1.bf16.msra.mxu1 %v3271_v4  ;;  %v462_v4 = vld [vmem:[%s3597_s8 + $0x578] sm:$0xff]  ;;  %v3106_v25 = vcombine.high %v346_v18, %v350_v19 }
  0xd0   : > { %2068 = vmatprep.subr.bf16.mxu1 %v3280_v6  ;;  %v3218_v8 = vcombine.high %v458_v3, %v462_v4  ;;  %v354_v26 = vld [vmem:[%s3597_s8 + $0x218] sm:$0xff] }
  0xd1   : > { %2028 = vmatpush1.bf16.msra.mxu0 %v3151_v11  ;;  %v466_v11 = vld [vmem:[%s3597_s8 + $0x598] sm:$0xff] }
  0xd2   : > { %2029 = vmatprep.subr.bf16.mxu0 %v3160_v13  ;;  %v3089_v13 = vcombine.low %v330_v1, %v334_v2  ;;  %v358_v27 = vld [vmem:[%s3597_s8 + $0x238] sm:$0xff] }
  0xd3   : > { %2069 = vmatpush1.bf16.msra.mxu1 %v3279_v12  ;;  %v470_v12 = vld [vmem:[%s3597_s8 + $0x5b8] sm:$0xff]  ;;  %v3114_v31 = vcombine.high %v354_v26, %v358_v27 }
  0xd4   : > { %2070 = vmatprep.subr.bf16.mxu1 %v3288_v14  ;;  %v3217_v14 = vcombine.low %v458_v3, %v462_v4  ;;  %v3226_v16 = vcombine.high %v466_v11, %v470_v12  ;;  %v362_v33 = vld [vmem:[%s3597_s8 + $0x258] sm:$0xff] }
  0xd5   : > { %2030 = vmatpush1.bf16.msra.mxu0 %v3159_v21  ;;  %v474_v21 = vld [vmem:[%s3597_s8 + $0x5d8] sm:$0xff] }
  0xd6   : > { %2031 = vmatprep.subr.bf16.mxu0 %v3168_v23  ;;  %v3097_v23 = vcombine.low %v338_v9, %v342_v10  ;;  %v366_v34 = vld [vmem:[%s3597_s8 + $0x278] sm:$0xff] }
  0xd7   : > { %2071 = vmatpush1.bf16.msra.mxu1 %v3287_v22  ;;  %v478_v22 = vld [vmem:[%s3597_s8 + $0x5f8] sm:$0xff]  ;;  %v3122_v39 = vcombine.high %v362_v33, %v366_v34 }
  0xd8   : > { %2072 = vmatprep.subr.bf16.mxu1 %v3296_v24  ;;  %v3225_v24 = vcombine.low %v466_v11, %v470_v12  ;;  %v3234_v54 = vcombine.high %v474_v21, %v478_v22  ;;  %v370_v41 = vld [vmem:[%s3597_s8 + $0x298] sm:$0xff] }
  0xd9   : > { %2032 = vmatpush1.bf16.msra.mxu0 %v3167_v55  ;;  %v482_v55 = vld [vmem:[%s3597_s8 + $0x618] sm:$0xff] }
  0xda   : > { %2083 = vmatprep.subr.bf16.mxu0 %v3050_v29  ;;  %v3105_v29 = vcombine.low %v346_v18, %v350_v19  ;;  %v374_v42 = vld [vmem:[%s3597_s8 + $0x2b8] sm:$0xff] }
  0xdb   : > { %2073 = vmatpush1.bf16.msra.mxu1 %v3295_v28  ;;  %v486_v28 = vld [vmem:[%s3597_s8 + $0x638] sm:$0xff]  ;;  %v3130_v47 = vcombine.high %v370_v41, %v374_v42 }
  0xdc   : > { %2124 = vmatprep.subr.bf16.mxu1 %v3178_v30  ;;  %2034 = vmatmul.mubr.bf16.vlgmr.msra.gmra.mrb[8].mxu0 %v3688_v17  ;;  %v3233_v30 = vcombine.low %v474_v21, %v478_v22  ;;  %v3242_v32 = vcombine.high %v482_v55, %v486_v28  ;;  %v394_v3 = vld [vmem:[%s3597_s8 + $0x358] sm:$0xff] }
  0xdd   : > { %2084 = vmatpush1.bf16.msra.mxu0 %v3049_v35  ;;  %2115 = vmatprep.mubr.bf16.mxu0 %v3638_v59  ;;  %v454_v59 = vld [vmem:[%s3597_s8 + $0x538] sm:$0xff] }
  0xde   : > { %2075 = vmatmul.mubr.bf16.vlgmr.msra.gmra.mrb[8].mxu1 %v3694_v20  ;;  %2085 = vmatprep.subr.bf16.mxu0 %v3058_v37  ;;  %v3210_v0 = vcombine.high %v450_v61, %v454_v59  ;;  %v3209_v6 = vcombine.low %v450_v61, %v454_v59  ;;  %v490_v35 = vld [vmem:[%s3597_s8 + $0x658] sm:$0xff]  ;;  %v3113_v37 = vcombine.low %v354_v26, %v358_v27 }
  0xdf   : > { %2125 = vmatpush1.bf16.msra.mxu1 %v3177_v36  ;;  %2156 = vmatprep.mubr.bf16.mxu1 %v3642_v60  ;;  %v3201_v60 = vcombine.low %v442_v49, %v446_v50  ;;  %v494_v36 = vld [vmem:[%s3597_s8 + $0x678] sm:$0xff] }
  0xe0   : > { %2126 = vmatprep.subr.bf16.mxu1 %v3186_v38  ;;  %v3241_v38 = vcombine.low %v482_v55, %v486_v28  ;;  %v3250_v40 = vcombine.high %v490_v35, %v494_v36  ;;  %v378_v49 = vld [vmem:[%s3597_s8 + $0x2d8] sm:$0xff] }
  0xe1   : > { %2086 = vmatpush1.bf16.msra.mxu0 %v3057_v43  ;;  %v498_v43 = vld [vmem:[%s3597_s8 + $0x698] sm:$0xff] }
  0xe2   : > { %2087 = vmatprep.subr.bf16.mxu0 %v3066_v45  ;;  %v3121_v45 = vcombine.low %v362_v33, %v366_v34  ;;  %v382_v50 = vld [vmem:[%s3597_s8 + $0x2f8] sm:$0xff]  ;;  %v278_v34 = vld [vmem:[#allocation2 + $0x8] sm:$0xff] }
  0xe3   : > { %2127 = vmatpush1.bf16.msra.mxu1 %v3185_v44  ;;  %v502_v44 = vld [vmem:[%s3597_s8 + $0x6b8] sm:$0xff]  ;;  %v3138_v57 = vcombine.high %v378_v49, %v382_v50 }
  0xe4   : > { %2128 = vmatprep.subr.bf16.mxu1 %v3194_v46  ;;  %v3249_v46 = vcombine.low %v490_v35, %v494_v36  ;;  %v3258_v48 = vcombine.high %v498_v43, %v502_v44  ;;  %v386_v61 = vld [vmem:[%s3597_s8 + $0x318] sm:$0xff] }
  0xe5   : > { %2088 = vmatpush1.bf16.msra.mxu0 %v3065_v51  ;;  %v506_v51 = vld [vmem:[%s3597_s8 + $0x6d8] sm:$0xff] }
  0xe6   : > { %2089 = vmatprep.subr.bf16.mxu0 %v3074_v53  ;;  %v3129_v53 = vcombine.low %v370_v41, %v374_v42  ;;  %v390_v59 = vld [vmem:[%s3597_s8 + $0x338] sm:$0xff] }
  0xe7   : > { %2129 = vmatpush1.bf16.msra.mxu1 %v3193_v52  ;;  %v510_v52 = vld [vmem:[%s3597_s8 + $0x6f8] sm:$0xff]  ;;  %v3146_v1 = vcombine.high %v386_v61, %v390_v59 }
  0xe8   : > { %2130 = vmatprep.subr.bf16.mxu1 %v3202_v56  ;;  %v3257_v56 = vcombine.low %v498_v43, %v502_v44  ;;  %v3266_v58 = vcombine.high %v506_v51, %v510_v52  ;;  %v398_v4 = vld [vmem:[%s3597_s8 + $0x378] sm:$0xff] }
  0xe9   : > { %2090 = vmatpush1.bf16.msra.mxu0 %v3073_v62  ;;  %v514_v62 = vld [vmem:[%s3597_s8 + $0x718] sm:$0xff]  ;;  %v3154_v9 = vcombine.high %v394_v3, %v398_v4 }
  0xea   : > { %2091 = vmatprep.subr.bf16.mxu0 %v3082_v63  ;;  %v3137_v63 = vcombine.low %v378_v49, %v382_v50  ;;  %v402_v11 = vld [vmem:[%s3597_s8 + $0x398] sm:$0xff] }
  0xeb   : > { %2131 = vmatpush1.bf16.msra.mxu1 %v3201_v60  ;;  %v518_v60 = vld [vmem:[%s3597_s8 + $0x738] sm:$0xff] }
  0xec   : > { %2132 = vmatprep.subr.bf16.mxu1 %v3210_v0  ;;  %v3265_v0 = vcombine.low %v506_v51, %v510_v52  ;;  %v3274_v2 = vcombine.high %v514_v62, %v518_v60  ;;  %v406_v12 = vld [vmem:[%s3597_s8 + $0x3b8] sm:$0xff] }
  0xed   : > { %2092 = vmatpush1.bf16.msra.mxu0 %v3081_v5  ;;  %v522_v5 = vld [vmem:[%s3597_s8 + $0x758] sm:$0xff]  ;;  %v3162_v18 = vcombine.high %v402_v11, %v406_v12 }
  0xee   : > { %2093 = vmatprep.subr.bf16.mxu0 %v3090_v7  ;;  %v3145_v7 = vcombine.low %v386_v61, %v390_v59  ;;  %v410_v21 = vld [vmem:[%s3597_s8 + $0x3d8] sm:$0xff] }
  0xef   : > { %2133 = vmatpush1.bf16.msra.mxu1 %v3209_v6  ;;  %v526_v6 = vld [vmem:[%s3597_s8 + $0x778] sm:$0xff] }
  0xf0   : > { %2134 = vmatprep.subr.bf16.mxu1 %v3218_v8  ;;  %v3273_v8 = vcombine.low %v514_v62, %v518_v60  ;;  %v3282_v10 = vcombine.high %v522_v5, %v526_v6  ;;  %v414_v22 = vld [vmem:[%s3597_s8 + $0x3f8] sm:$0xff]  ;;  %v282_v60 = vld [vmem:[#allocation2 + $0x28] sm:$0xff] }
  0xf1   : > { %2094 = vmatpush1.bf16.msra.mxu0 %v3089_v13  ;;  %v530_v13 = vld [vmem:[%s3597_s8 + $0x798] sm:$0xff]  ;;  %v3170_v26 = vcombine.high %v410_v21, %v414_v22  ;;  %v3169_v55 = vcombine.low %v410_v21, %v414_v22 }
  0xf2   : > { %2095 = vmatprep.subr.bf16.mxu0 %v3098_v15  ;;  %v3153_v15 = vcombine.low %v394_v3, %v398_v4 }
  0xf3   : > { %2135 = vmatpush1.bf16.msra.mxu1 %v3217_v14  ;;  %v534_v14 = vld [vmem:[%s3597_s8 + $0x7b8] sm:$0xff] }
  0xf4   : > { %2136 = vmatprep.subr.bf16.mxu1 %v3226_v16  ;;  %v3281_v16 = vcombine.low %v522_v5, %v526_v6  ;;  %v3290_v19 = vcombine.high %v530_v13, %v534_v14 }
  0xf5   : > { %2096 = vmatpush1.bf16.msra.mxu0 %v3097_v23  ;;  %v538_v23 = vld [vmem:[%s3597_s8 + $0x7d8] sm:$0xff] }
  0xf6   : > { %2097 = vmatprep.subr.bf16.mxu0 %v3106_v25  ;;  %v3161_v25 = vcombine.low %v402_v11, %v406_v12  ;;  %v284_v12 = vld [vmem:[#allocation2 + $0x38] sm:$0xff] }
  0xf7   : > { %2137 = vmatpush1.bf16.msra.mxu1 %v3225_v24  ;;  %v542_v24 = vld [vmem:[%s3597_s8 + $0x7f8] sm:$0xff] }
  0xf8   : > { %2138 = vmatprep.subr.bf16.mxu1 %v3234_v54  ;;  %v3289_v54 = vcombine.low %v530_v13, %v534_v14  ;;  %v3298_v27 = vcombine.high %v538_v23, %v542_v24  ;;  %v3297_v28 = vcombine.low %v538_v23, %v542_v24  ;;  %v3469_v23 = vld [vmem:[%s4136_s4 + $0x40] sm:$0xff] (!%p3299_p6)  }
  0xf9   : > { %2098 = vmatpush1.bf16.msra.mxu0 %v3105_v29  ;;  %v3470_v24 = vld [vmem:[%s4136_s4 + $0xc0] sm:$0xff] (!%p3299_p6)  }
  0xfa   : > { %2099 = vmatprep.subr.bf16.mxu0 %v3114_v31 }
  0xfb   : > { %2139 = vmatpush1.bf16.msra.mxu1 %v3233_v30  ;;  %v277_v30 = vld [vmem:[#allocation2] sm:$0xff] }
  0xfc   : > { %2140 = vmatprep.subr.bf16.mxu1 %v3242_v32 }
  0xfd   : > { %2100 = vmatpush1.bf16.msra.mxu0 %v3113_v37 }
  0xfe   : > { %2101 = vmatprep.subr.bf16.mxu0 %v3122_v39 }
  0xff   : > { %2141 = vmatpush1.bf16.msra.mxu1 %v3241_v38 }
 0x100   : > { %2142 = vmatprep.subr.bf16.mxu1 %v3250_v40 }
 0x101   : > { %2102 = vmatpush1.bf16.msra.mxu0 %v3121_v45 }
 0x102   : > { %2103 = vmatprep.subr.bf16.mxu0 %v3130_v47 }
 0x103   : > { %2143 = vmatpush1.bf16.msra.mxu1 %v3249_v46  ;;  %v280_v46 = vld [vmem:[#allocation2 + $0x18] sm:$0xff] }
 0x104   : > { %2144 = vmatprep.subr.bf16.mxu1 %v3258_v48 }
 0x105   : > { %2104 = vmatpush1.bf16.msra.mxu0 %v3129_v53 }
 0x106   : > { %2105 = vmatprep.subr.bf16.mxu0 %v3138_v57 }
 0x107   : > { %2145 = vmatpush1.bf16.msra.mxu1 %v3257_v56 }
 0x108   : > { %2146 = vmatprep.subr.bf16.mxu1 %v3266_v58  ;;  %v281_v58 = vld [vmem:[#allocation2 + $0x20] sm:$0xff] }
 0x109   : > { %2106 = vmatpush1.bf16.msra.mxu0 %v3137_v63 }
 0x10a   : > { %2107 = vmatprep.subr.bf16.mxu0 %v3146_v1 }
 0x10b   : > { %2147 = vmatpush1.bf16.msra.mxu1 %v3265_v0 }
 0x10c   : > { %2148 = vmatprep.subr.bf16.mxu1 %v3274_v2 }
 0x10d   : > { %2108 = vmatpush1.bf16.msra.mxu0 %v3145_v7 }
 0x10e   : > { %2109 = vmatprep.subr.bf16.mxu0 %v3154_v9 }
 0x10f   : > { %2149 = vmatpush1.bf16.msra.mxu1 %v3273_v8  ;;  %v283_v8 = vld [vmem:[#allocation2 + $0x30] sm:$0xff] }
 0x110   : > { %2150 = vmatprep.subr.bf16.mxu1 %v3282_v10 }
 0x111   : > { %2110 = vmatpush1.bf16.msra.mxu0 %v3153_v15 }
 0x112   : > { %2111 = vmatprep.subr.bf16.mxu0 %v3162_v18 }
 0x113   : > { %2151 = vmatpush1.bf16.msra.mxu1 %v3281_v16 }
 0x114   : > { %2152 = vmatprep.subr.bf16.mxu1 %v3290_v19 }
 0x115   : > { %2112 = vmatpush1.bf16.msra.mxu0 %v3161_v25  ;;  %v3471_v25 = vld [vmem:[%s4136_s4] sm:$0xff] (!%p3299_p6)  }
 0x116   : > { %2113 = vmatprep.subr.bf16.mxu0 %v3170_v26  ;;  %v3473_v26 = vld [vmem:[%s4136_s4 + $0x48] sm:$0xff] (!%p3299_p6)  }
 0x117   : > { %2153 = vmatpush1.bf16.msra.mxu1 %v3289_v54  ;;  %v3472_v54 = vld [vmem:[%s4136_s4 + $0x80] sm:$0xff] (!%p3299_p6)  }
 0x118   : > { %2154 = vmatprep.subr.bf16.mxu1 %v3298_v27  ;;  %v3474_v27 = vld [vmem:[%s4136_s4 + $0xc8] sm:$0xff] (!%p3299_p6)  }
 0x119   : > { %2114 = vmatpush1.bf16.msra.mxu0 %v3169_v55  ;;  %v3475_v55 = vld [vmem:[%s4136_s4 + $0x8] sm:$0xff] (!%p3299_p6)  }
 0x11a   : > { %3368 = vmatprep.subr.bf16.mxu0 (!%p3299_p6), %v3469_v23  ;;  %v3503_v23 = vld [vmem:[%s4136_s4 + $0x100] sm:$0xff] (!%p3299_p6)  }
 0x11b   : > { %2155 = vmatpush1.bf16.msra.mxu1 %v3297_v28  ;;  %v3476_v28 = vld [vmem:[%s4136_s4 + $0x88] sm:$0xff] (!%p3299_p6)  }
 0x11c   : > { %2116 = vmatmul.mubr.bf16.vlgmr.msra.gmra.mrb[12].mxu0 %v3688_v17  ;;  %v279_v17 = vld [vmem:[#allocation2 + $0x10] sm:$0xff]  ;;  %3390 = vmatprep.subr.bf16.mxu1 (!%p3299_p6), %v3470_v24 }
 0x11d   : > { %3369 = vmatpush3.bf16.msra.mxu0 (!%p3299_p6), %v3471_v25 }
 0x11e   : > { %2157 = vmatmul.mubr.bf16.vlgmr.msra.gmra.mrb[12].mxu1 %v3694_v20  ;;  %3370 = vmatprep.subr.bf16.mxu0 (!%p3299_p6), %v3473_v26  ;;  %v3505_v26 = vld [vmem:[%s4136_s4 + $0x148] sm:$0xff] (!%p3299_p6)  }
 0x11f   : > { %3391 = vmatpush3.bf16.msra.mxu1 (!%p3299_p6), %v3472_v54  ;;  %v3504_v54 = vld [vmem:[%s4136_s4 + $0x180] sm:$0xff] (!%p3299_p6)  }
 0x120   : > { %3392 = vmatprep.subr.bf16.mxu1 (!%p3299_p6), %v3474_v27 }
 0x121   : > { %3371 = vmatpush3.bf16.msra.mxu0 (!%p3299_p6), %v3475_v55 }
 0x123   : > { %3393 = vmatpush3.bf16.msra.mxu1 (!%p3299_p6), %v3476_v28 }
 0x12f   : > { %v1871_v29 = vpop.f32.mrb[0].mxu0 }
 0x130   : > { %v1873_v32 = vpop.f32.mrb[1].mxu0 }
 0x131   : > { %v1912_v31 = vpop.f32.mrb[0].mxu1  ;;  %v1875_v36 = vpop.f32.mrb[2].mxu0 }
 0x132   : > { %v1913_v33 = vadd.f32 %v1912_v31, %v1871_v29  ;;  %v1914_v35 = vpop.f32.mrb[1].mxu1  ;;  %v1876_v39 = vpop.f32.mrb[3].mxu0  ;;  %v3477_v29 = vld [vmem:[%s4136_s4 + $0x50] sm:$0xff] (!%p3299_p6)   ;;  %v3484_v36 = vld [vmem:[%s4136_s4 + $0x98] sm:$0xff] (!%p3299_p6)  }
 0x133   : > { %v1915_v37 = vadd.f32 %v1914_v35, %v1873_v32  ;;  %v1916_v38 = vpop.f32.mrb[2].mxu1  ;;  %3372 = vmatprep.subr.bf16.mxu0 (!%p3299_p6), %v3477_v29  ;;  %v3479_v31 = vld [vmem:[%s4136_s4 + $0x10] sm:$0xff] (!%p3299_p6)   ;;  %v3483_v35 = vld [vmem:[%s4136_s4 + $0x18] sm:$0xff] (!%p3299_p6)   ;;  %v3487_v39 = vld [vmem:[%s4136_s4 + $0x20] sm:$0xff] (!%p3299_p6)  }
 0x134   : > { %v2165_v40 = vadd.f32 %v1913_v33, %v277_v30  ;;  %v1917_v41 = vpop.f32.mrb[3].mxu1  ;;  %v3478_v30 = vld [vmem:[%s4136_s4 + $0xd0] sm:$0xff] (!%p3299_p6)   ;;  %3373 = vmatpush3.bf16.msra.mxu0 (!%p3299_p6), %v3479_v31  ;;  %v3481_v33 = vld [vmem:[%s4136_s4 + $0x58] sm:$0xff] (!%p3299_p6)   ;;  %v3486_v38 = vld [vmem:[%s4136_s4 + $0xe0] sm:$0xff] (!%p3299_p6)  }
 0x135   : > { %v2166_v42 = vadd.f32 %v1915_v37, %v278_v34  ;;  %3394 = vmatprep.subr.bf16.mxu1 (!%p3299_p6), %v3478_v30  ;;  %v3480_v32 = vld [vmem:[%s4136_s4 + $0x90] sm:$0xff] (!%p3299_p6)   ;;  %v3482_v34 = vld [vmem:[%s4136_s4 + $0xd8] sm:$0xff] (!%p3299_p6)   ;;  %3374 = vmatprep.subr.bf16.mxu0 (!%p3299_p6), %v3481_v33  ;;  %v3485_v37 = vld [vmem:[%s4136_s4 + $0x60] sm:$0xff] (!%p3299_p6)   ;;  %v2195_v41 = vlaneseq (!%p3299_p6) }
 0x136   : > { %2173 = vst [vmem:[#allocation2] sm:$0xff] %v2165_v40  ;;  %3395 = vmatpush3.bf16.msra.mxu1 (!%p3299_p6), %v3480_v32  ;;  %v3488_v40 = vld [vmem:[%s4136_s4 + $0xa0] sm:$0xff] (!%p3299_p6)   ;;  %v3506_v30 = vld [vmem:[%s4136_s4 + $0x1c8] sm:$0xff] (!%p3299_p6)   ;;  %v3509_v33 = vld [vmem:[%s4136_s4 + $0x150] sm:$0xff] (!%p3299_p6)  }
 0x137   : > { %2174 = vst [vmem:[#allocation2 + $0x8] sm:$0xff] %v2166_v42  ;;  %3396 = vmatprep.subr.bf16.mxu1 (!%p3299_p6), %v3482_v34  ;;  %v3489_v42 = vld [vmem:[%s4136_s4 + $0x68] sm:$0xff] (!%p3299_p6)   ;;  %v3510_v34 = vld [vmem:[%s4136_s4 + $0x1d0] sm:$0xff] (!%p3299_p6)  }
 0x138   : > { %3375 = vmatpush3.bf16.msra.mxu0 (!%p3299_p6), %v3483_v35  ;;  %v3507_v31 = vld [vmem:[%s4136_s4 + $0x108] sm:$0xff] (!%p3299_p6)   ;;  %v3511_v35 = vld [vmem:[%s4136_s4 + $0x110] sm:$0xff] (!%p3299_p6)  }
 0x139   : > { %3376 = vmatprep.subr.bf16.mxu0 (!%p3299_p6), %v3485_v37  ;;  %v3508_v32 = vld [vmem:[%s4136_s4 + $0x188] sm:$0xff] (!%p3299_p6)   ;;  %v3513_v37 = vld [vmem:[%s4136_s4 + $0x158] sm:$0xff] (!%p3299_p6)  }
 0x13a   : > { %3397 = vmatpush3.bf16.msra.mxu1 (!%p3299_p6), %v3484_v36  ;;  %v3512_v36 = vld [vmem:[%s4136_s4 + $0x190] sm:$0xff] (!%p3299_p6)  }
 0x13b   : > { %3398 = vmatprep.subr.bf16.mxu1 (!%p3299_p6), %v3486_v38  ;;  %v3514_v38 = vld [vmem:[%s4136_s4 + $0x1d8] sm:$0xff] (!%p3299_p6)  }
 0x13c   : > { %3377 = vmatpush3.bf16.msra.mxu0 (!%p3299_p6), %v3487_v39  ;;  %v3515_v39 = vld [vmem:[%s4136_s4 + $0x118] sm:$0xff] (!%p3299_p6)  }
 0x13d   : > { %3378 = vmatprep.subr.bf16.mxu0 (!%p3299_p6), %v3489_v42  ;;  %v3518_v42 = vld [vmem:[%s4136_s4 + $0x1e0] sm:$0xff] (!%p3299_p6)  }
 0x13e   : > { %3399 = vmatpush3.bf16.msra.mxu1 (!%p3299_p6), %v3488_v40  ;;  %v3516_v40 = vld [vmem:[%s4136_s4 + $0x198] sm:$0xff] (!%p3299_p6)  }
 0x16f   : > { %v1953_v43 = vpop.f32.mrb[4].mxu0 }
 0x170   : > { %v1955_v20 = vpop.f32.mrb[5].mxu0 }
 0x171   : > { %v1994_v44 = vpop.f32.mrb[4].mxu1  ;;  %v1957_v48 = vpop.f32.mrb[6].mxu0 }
 0x172   : > { %v1995_v45 = vadd.f32 %v1994_v44, %v1953_v43  ;;  %v1996_v47 = vpop.f32.mrb[5].mxu1  ;;  %v1958_v51 = vpop.f32.mrb[7].mxu0  ;;  %v3490_v43 = vld [vmem:[%s4136_s4 + $0xe8] sm:$0xff] (!%p3299_p6)   ;;  %v3496_v48 = vld [vmem:[%s4136_s4 + $0xb0] sm:$0xff] (!%p3299_p6)  }
 0x173   : > { %v1997_v49 = vadd.f32 %v1996_v47, %v1955_v20  ;;  %v1998_v50 = vpop.f32.mrb[6].mxu1  ;;  %3400 = vmatprep.subr.bf16.mxu1 (!%p3299_p6), %v3490_v43  ;;  %v3492_v44 = vld [vmem:[%s4136_s4 + $0xa8] sm:$0xff] (!%p3299_p6)   ;;  %v3967_v20 = vshrl.u32 (!%p3299_p6), %v2195_v41, 7  ;;  %v3495_v47 = vld [vmem:[%s4136_s4 + $0x30] sm:$0xff] (!%p3299_p6)   ;;  %v3517_v41 = vld [vmem:[%s4136_s4 + $0x160] sm:$0xff] (!%p3299_p6)  }
 0x174   : > { %v2167_v52 = vadd.f32 %v1995_v45, %v279_v17  ;;  %v1999_v53 = vpop.f32.mrb[7].mxu1  ;;  %v3491_v17 = vld [vmem:[%s4136_s4 + $0x28] sm:$0xff] (!%p3299_p6)   ;;  %v3493_v45 = vld [vmem:[%s4136_s4 + $0x70] sm:$0xff] (!%p3299_p6)   ;;  %3401 = vmatpush3.bf16.msra.mxu1 (!%p3299_p6), %v3492_v44  ;;  %v3497_v50 = vld [vmem:[%s4136_s4 + $0x78] sm:$0xff] (!%p3299_p6)  }
 0x175   : > { %v2168_v56 = vadd.f32 %v1997_v49, %v280_v46  ;;  %3379 = vmatpush3.bf16.msra.mxu0 (!%p3299_p6), %v3491_v17  ;;  %v3494_v46 = vld [vmem:[%s4136_s4 + $0xf0] sm:$0xff] (!%p3299_p6)   ;;  %v2201_v49 = vsub.s32 (!%p3299_p6), 1, %v3967_v20  ;;  %v2209_v51 = vsub.s32 (!%p3299_p6), 3, %v3967_v20  ;;  %v2197_v53 = vsub.s32 (!%p3299_p6), 0, %v3967_v20  ;;  %v3519_v43 = vld [vmem:[%s4136_s4 + $0x120] sm:$0xff] (!%p3299_p6)   ;;  %v3521_v44 = vld [vmem:[%s4136_s4 + $0x168] sm:$0xff] (!%p3299_p6)  }
 0x176   : > { %2175 = vst [vmem:[#allocation2 + $0x10] sm:$0xff] %v2167_v52  ;;  %3380 = vmatprep.subr.bf16.mxu0 (!%p3299_p6), %v3493_v45  ;;  %3402 = vmatprep.subr.bf16.mxu1 (!%p3299_p6), %v3494_v46  ;;  %v3498_v52 = vld [vmem:[%s4136_s4 + $0xf8] sm:$0xff] (!%p3299_p6)   ;;  %v3520_v17 = vld [vmem:[%s4136_s4 + $0x1a0] sm:$0xff] (!%p3299_p6)   ;;  %v2217_v45 = vsub.s32 (!%p3299_p6), 5, %v3967_v20  ;;  %v3522_v46 = vld [vmem:[%s4136_s4 + $0x1e8] sm:$0xff] (!%p3299_p6)  }
 0x177   : > { %2176 = vst [vmem:[#allocation2 + $0x18] sm:$0xff] %v2168_v56  ;;  %v3499_v56 = vld [vmem:[%s4136_s4 + $0x38] sm:$0xff] (!%p3299_p6)  }
 0x178   : > { %3403 = vmatpush3.bf16.msra.mxu1 (!%p3299_p6), %v3496_v48  ;;  %v3523_v48 = vld [vmem:[%s4136_s4 + $0x128] sm:$0xff] (!%p3299_p6)  }
 0x179   : > { %3381 = vmatpush3.bf16.msra.mxu0 (!%p3299_p6), %v3495_v47  ;;  %3404 = vmatprep.subr.bf16.mxu1 (!%p3299_p6), %v3498_v52  ;;  %v2225_v47 = vsub.s32 (!%p3299_p6), 7, %v3967_v20  ;;  %v3525_v52 = vld [vmem:[%s4136_s4 + $0x170] sm:$0xff] (!%p3299_p6)  }
 0x17a   : > { %3382 = vmatprep.subr.bf16.mxu0 (!%p3299_p6), %v3497_v50  ;;  %v3524_v50 = vld [vmem:[%s4136_s4 + $0x1a8] sm:$0xff] (!%p3299_p6)  }
 0x17d   : > { %3383 = vmatpush3.bf16.msra.mxu0 (!%p3299_p6), %v3499_v56  ;;  %v3527_v56 = vld [vmem:[%s4136_s4 + $0x130] sm:$0xff] (!%p3299_p6)  }
 0x1af   : > { %v2035_v57 = vpop.f32.mrb[8].mxu0 }
 0x1b0   : > { %v2037_v59 = vpop.f32.mrb[9].mxu0 }
 0x1b1   : > { %v2076_v61 = vpop.f32.mrb[8].mxu1  ;;  %v2039_v0 = vpop.f32.mrb[10].mxu0 }
 0x1b2   : > { %v2077_v62 = vadd.f32 %v2076_v61, %v2035_v57  ;;  %v2078_v63 = vpop.f32.mrb[9].mxu1  ;;  %v2040_v3 = vpop.f32.mrb[11].mxu0  ;;  %v2205_v57 = vsub.s32 (!%p3299_p6), 2, %v3967_v20  ;;  %v2186_v61 = vld [vmem:[#allocation2 + $0x8] sm:$0xff] (!%p3299_p6)  ;;  %v2188_v0 = vld [vmem:[#allocation2 + $0x18] sm:$0xff] (!%p3299_p6) }
 0x1b3   : > { %v2079_v1 = vadd.f32 %v2078_v63, %v2037_v59  ;;  %v2080_v2 = vpop.f32.mrb[10].mxu1  ;;  %v4000_v59 = vld [vmem:[%s4134_s2] sm:$0xff] (!%p3299_p6) }
 0x1b4   : > { %v2169_v4 = vadd.f32 %v2077_v62, %v281_v58  ;;  %v2081_v5 = vpop.f32.mrb[11].mxu1  ;;  %v3500_v58 = vld [vmem:[%s4136_s4 + $0xb8] sm:$0xff] (!%p3299_p6)   ;;  %v4005_v62 = vld [vmem:[%s4135_s3] sm:$0xff] (!%p3299_p6) }
 0x1b5   : > { %v2170_v6 = vadd.f32 %v2079_v1, %v282_v60  ;;  %3405 = vmatpush3.bf16.msra.mxu1 (!%p3299_p6), %v3500_v58  ;;  %v2202_v60 = vrot.slane (!%p3299_p6), %v4000_v59, %v2201_v49  ;;  %v2252_v63 = vrot.slane (!%p3299_p6), %v4005_v62, %v2201_v49  ;;  %v2210_v1 = vrot.slane (!%p3299_p6), %v4000_v59, %v2209_v51  ;;  %v2185_v3 = vld [vmem:[#allocation2] sm:$0xff] (!%p3299_p6)  ;;  %v3528_v58 = vld [vmem:[%s4136_s4 + $0x1b0] sm:$0xff] (!%p3299_p6)  }
 0x1b6   : > { %2177 = vst [vmem:[#allocation2 + $0x20] sm:$0xff] %v2169_v4  ;;  %v2260_v2 = vrot.slane (!%p3299_p6), %v4005_v62, %v2209_v51  ;;  %v2187_v4 = vld [vmem:[#allocation2 + $0x10] sm:$0xff] (!%p3299_p6)  ;;  %v2198_v5 = vrot.slane (!%p3299_p6), %v4000_v59, %v2197_v53  ;;  %v2213_v49 = vsub.s32 (!%p3299_p6), 4, %v3967_v20  ;;  %v2221_v51 = vsub.s32 (!%p3299_p6), 6, %v3967_v20 }
 0x1b7   : > { %2178 = vst [vmem:[#allocation2 + $0x28] sm:$0xff] %v2170_v6  ;;  %v2248_v6 = vrot.slane (!%p3299_p6), %v4005_v62, %v2197_v53  ;;  %v3526_v53 = vld [vmem:[%s4136_s4 + $0x1f0] sm:$0xff] (!%p3299_p6)   ;;  %v2226_v20 = vrot.slane (!%p3299_p6), %v4000_v59, %v2225_v47 }
 0x1ef   : > { %v2117_v7 = vpop.f32.mrb[12].mxu0 }
 0x1f0   : > { %v2119_v10 = vpop.f32.mrb[13].mxu0 }
 0x1f1   : > { %v2158_v9 = vpop.f32.mrb[12].mxu1  ;;  %v2121_v14 = vpop.f32.mrb[14].mxu0  ;;  %2184 = sbr.rel (%p3299_p6) target bundleno = 760 (0x2f8), region = 52 }
 0x1f2   : > { %v2159_v11 = vadd.f32 %v2158_v9, %v2117_v7  ;;  %v2160_v13 = vpop.f32.mrb[13].mxu1  ;;  %v2122_v18 = vpop.f32.mrb[15].mxu0  ;;  %v2206_v7 = vrot.slane (!%p3299_p6), %v4000_v59, %v2205_v57  ;;  %v3501_v9 = vld [vmem:[%s4136_s4 + $0x140] sm:$0xff] (!%p3299_p6)  }
 0x1f3   : > { %v2161_v15 = vadd.f32 %v2160_v13, %v2119_v10  ;;  %v2162_v16 = vpop.f32.mrb[14].mxu1  ;;  %v2236_v10 = vmul.f32 (!%p3299_p6), %v2202_v60, %v2186_v61  ;;  %v2235_v13 = vmul.f32 (!%p3299_p6), %v2198_v5, %v2185_v3  ;;  %3412 = vmatprep.subr.bf16.mxu0 (!%p3299_p6), %v3501_v9  ;;  %v2214_v61 = vrot.slane (!%p3299_p6), %v4000_v59, %v2213_v49  ;;  %v2190_v3 = vld [vmem:[#allocation2 + $0x28] sm:$0xff] (!%p3299_p6) }
 0x1f4   : > { %v2171_v19 = vadd.f32 %v2159_v11, %v283_v8  ;;  %v2163_v21 = vpop.f32.mrb[15].mxu1  ;;  %v2256_v8 = vrot.slane (!%p3299_p6), %v4005_v62, %v2205_v57  ;;  %v2238_v11 = vmul.f32 (!%p3299_p6), %v2210_v1, %v2188_v0  ;;  %v2237_v14 = vmul.f32 (!%p3299_p6), %v2206_v7, %v2187_v4 }
 0x1f5   : > { %v2172_v22 = vadd.f32 %v2161_v15, %v284_v12  ;;  %v3502_v12 = vld [vmem:[%s4136_s4 + $0x1c0] sm:$0xff] (!%p3299_p6)   ;;  %v2286_v15 = vadd.f32 (!%p3299_p6), %v2252_v63, %v2236_v10  ;;  %v2285_v18 = vadd.f32 (!%p3299_p6), %v2248_v6, %v2235_v13  ;;  %v2218_v57 = vrot.slane (!%p3299_p6), %v4000_v59, %v2217_v45  ;;  %v3529_v63 = vld [vmem:[%s4136_s4 + $0x178] sm:$0xff] (!%p3299_p6)  }
 0x1f6   : > { %2179 = vst [vmem:[#allocation2 + $0x30] sm:$0xff] %v2171_v19  ;;  %v2288_v16 = vadd.f32 (!%p3299_p6), %v2260_v2, %v2238_v11  ;;  %3434 = vmatprep.subr.bf16.mxu1 (!%p3299_p6), %v3502_v12  ;;  %v2287_v19 = vadd.f32 (!%p3299_p6), %v2256_v8, %v2237_v14  ;;  %v2222_v60 = vrot.slane (!%p3299_p6), %v4000_v59, %v2221_v51  ;;  %v3530_v2 = vld [vmem:[%s4136_s4 + $0x1f8] sm:$0xff] (!%p3299_p6)   ;;  %v2189_v8 = vld [vmem:[#allocation2 + $0x20] sm:$0xff] (!%p3299_p6) }
 0x1f7   : > { %2180 = vst [vmem:[#allocation2 + $0x38] sm:$0xff] %v2172_v22  ;;  %v2294_v21 = vmax.f32 (!%p3299_p6), %v2286_v15, 0.0  ;;  %v2293_v24 = vmax.f32 (!%p3299_p6), %v2285_v18, 0.0  ;;  %v2268_v0 = vrot.slane (!%p3299_p6), %v4005_v62, %v2217_v45  ;;  %v2276_v1 = vrot.slane (!%p3299_p6), %v4005_v62, %v2225_v47  ;;  %v3531_v12 = vld [vmem:[%s4136_s4 + $0x138] sm:$0xff] (!%p3299_p6)  }
 0x1f8   : > { %v2296_v22 = vmax.f32 %v2288_v16, 0.0  ;;  %v2295_v25 = vmax.f32 %v2287_v19, 0.0  ;;  %v2264_v59 = vrot.slane %v4005_v62, %v2213_v49  ;;  %v2272_v5 = vrot.slane %v4005_v62, %v2221_v51  ;;  %v3532_v13 = vld [vmem:[%s4136_s4 + $0x1b8] sm:$0xff]  }
 0x1f9   : > { %v2302_v27 = vpack.c.bf16 %v2294_v21, %v2294_v21  ;;  %v2301_v28 = vpack.c.bf16 %v2293_v24, %v2293_v24  ;;  %v2240_v6 = vmul.f32 %v2218_v57, %v2190_v3  ;;  %v2239_v10 = vmul.f32 %v2214_v61, %v2189_v8 }
 0x1fa   : > { %v2304_v55 = vpack.c.bf16 %v2296_v22, %v2296_v22  ;;  %v2303_v29 = vpack.c.bf16 %v2295_v25, %v2295_v25 }
 0x1fb   : > { %2860 = vmatprep.mubr.bf16.mxu0 %v2302_v27  ;;  %v2290_v14 = vadd.f32 %v2268_v0, %v2240_v6  ;;  %v2289_v62 = vadd.f32 %v2264_v59, %v2239_v10 }
 0x1fc   : > { %2900 = vmatprep.mubr.bf16.mxu1 %v2304_v55  ;;  %2861 = vmatmul.mubr.bf16.vlgmr.msra.gmra.mrb[0].mxu0 %v2301_v28  ;;  %v3300_v55 = vld [vmem:[%s4137_s5] ss:$0 sm:$0xff] }
 0x1fd   : > { %2901 = vmatmul.mubr.bf16.vlgmr.msra.gmra.mrb[0].mxu1 %v2303_v29  ;;  %3413 = vmatpush3.bf16.msra.mxu0 %v3503_v23  ;;  %v2191_v9 = vld [vmem:[#allocation2 + $0x30] sm:$0xff]  ;;  %v2298_v18 = vmax.f32 %v2290_v14, 0.0  ;;  %v2297_v21 = vmax.f32 %v2289_v62, 0.0 }
 0x1fe   : > { %3435 = vmatpush3.bf16.msra.mxu1 %v3504_v54  ;;  %3414 = vmatprep.subr.bf16.mxu0 %v3505_v26  ;;  %v2192_v4 = vld [vmem:[#allocation2 + $0x38] sm:$0xff]  ;;  %v2241_v11 = vmul.f32 %v2222_v60, %v2191_v9 }
 0x1ff   : > { %3436 = vmatprep.subr.bf16.mxu1 %v3506_v30  ;;  %v2242_v7 = vmul.f32 %v2226_v20, %v2192_v4  ;;  %v2306_v23 = vpack.c.bf16 %v2298_v18, %v2298_v18  ;;  %v2305_v25 = vpack.c.bf16 %v2297_v21, %v2297_v21 }
 0x200   : > { %v2291_v16 = vadd.f32 %v2272_v5, %v2241_v11 }
 0x201   : > { %3415 = vmatpush3.bf16.msra.mxu0 %v3507_v31  ;;  %v2292_v15 = vadd.f32 %v2276_v1, %v2242_v7  ;;  %2940 = vmatprep.mubr.bf16.mxu0 %v2306_v23 }
 0x202   : > { %3437 = vmatpush3.bf16.msra.mxu1 %v3508_v32  ;;  %3416 = vmatprep.subr.bf16.mxu0 %v3509_v33  ;;  %v2299_v22 = vmax.f32 %v2291_v16, 0.0 }
 0x203   : > { %3438 = vmatprep.subr.bf16.mxu1 %v3510_v34  ;;  %v2300_v19 = vmax.f32 %v2292_v15, 0.0 }
 0x204   : > { %v2307_v54 = vpack.c.bf16 %v2299_v22, %v2299_v22 }
 0x205   : > { %3417 = vmatpush3.bf16.msra.mxu0 %v3511_v35  ;;  %v2308_v24 = vpack.c.bf16 %v2300_v19, %v2300_v19 }
 0x206   : > { %3439 = vmatpush3.bf16.msra.mxu1 %v3512_v36  ;;  %3418 = vmatprep.subr.bf16.mxu0 %v3513_v37 }
 0x207   : > { %3440 = vmatprep.subr.bf16.mxu1 %v3514_v38  ;;  %2980 = vmatprep.mubr.bf16.mxu1 %v2308_v24 }
 0x209   : > { %3419 = vmatpush3.bf16.msra.mxu0 %v3515_v39 }
 0x20a   : > { %3441 = vmatpush3.bf16.msra.mxu1 %v3516_v40  ;;  %3420 = vmatprep.subr.bf16.mxu0 %v3517_v41 }
 0x20b   : > { %3442 = vmatprep.subr.bf16.mxu1 %v3518_v42 }
 0x20d   : > { %3421 = vmatpush3.bf16.msra.mxu0 %v3519_v43 }
 0x20e   : > { %3443 = vmatpush3.bf16.msra.mxu1 %v3520_v17  ;;  %3422 = vmatprep.subr.bf16.mxu0 %v3521_v44 }
 0x20f   : > { %3444 = vmatprep.subr.bf16.mxu1 %v3522_v46 }
 0x211   : > { %3423 = vmatpush3.bf16.msra.mxu0 %v3523_v48 }
 0x212   : > { %3445 = vmatpush3.bf16.msra.mxu1 %v3524_v50  ;;  %3424 = vmatprep.subr.bf16.mxu0 %v3525_v52 }
 0x213   : > { %3446 = vmatprep.subr.bf16.mxu1 %v3526_v53 }
 0x215   : > { %3425 = vmatpush3.bf16.msra.mxu0 %v3527_v56 }
 0x216   : > { %3447 = vmatpush3.bf16.msra.mxu1 %v3528_v58  ;;  %3426 = vmatprep.subr.bf16.mxu0 %v3529_v63 }
 0x217   : > { %3448 = vmatprep.subr.bf16.mxu1 %v3530_v2 }
 0x219   : > { %3427 = vmatpush3.bf16.msra.mxu0 %v3531_v12 }
 0x21a   : > { %3449 = vmatpush3.bf16.msra.mxu1 %v3532_v13 }
 0x21c   : > { %2941 = vmatmul.mubr.bf16.vlgmr.msra.gmra.mrb[4].mxu0 %v2305_v25 }
 0x21d   : > { %2981 = vmatmul.mubr.bf16.vlgmr.msra.gmra.mrb[4].mxu1 %v2307_v54 }
 0x2cf   : > { %v3384_v26 = vpop.f32.mrb[0].mxu0 }
 0x2d0   : > { %v3406_v27 = vpop.f32.mrb[0].mxu1  ;;  %v3385_v28 = vpop.f32.mrb[1].mxu0 }
 0x2d1   : > { %v3407_v29 = vpop.f32.mrb[1].mxu1  ;;  %v3386_v30 = vadd.f32 %v3385_v28, %v3384_v26  ;;  %v3387_v32 = vpop.f32.mrb[2].mxu0 }
 0x2d2   : > { %v3408_v31 = vadd.f32 %v3407_v29, %v3406_v27  ;;  %v3409_v33 = vpop.f32.mrb[2].mxu1  ;;  %v3388_v34 = vpop.f32.mrb[3].mxu0 }
 0x2d3   : > { %v3410_v35 = vpop.f32.mrb[3].mxu1  ;;  %v2863_v36 = vadd.f32 %v3386_v30, %v3300_v55 }
 0x2d5   : > { %v2903_v37 = vadd.f32 %v3408_v31, %v2863_v36 }
 0x2ef   : > { %v3428_v38 = vpop.f32.mrb[4].mxu0 }
 0x2f0   : > { %v3450_v39 = vpop.f32.mrb[4].mxu1  ;;  %v3429_v40 = vpop.f32.mrb[5].mxu0 }
 0x2f1   : > { %v3451_v41 = vpop.f32.mrb[5].mxu1  ;;  %v3430_v42 = vadd.f32 %v3429_v40, %v3428_v38  ;;  %v3431_v17 = vpop.f32.mrb[6].mxu0 }
 0x2f2   : > { %v3452_v43 = vadd.f32 %v3451_v41, %v3450_v39  ;;  %v3453_v44 = vpop.f32.mrb[6].mxu1  ;;  %v3432_v45 = vpop.f32.mrb[7].mxu0 }
 0x2f3   : > { %v3454_v46 = vpop.f32.mrb[7].mxu1  ;;  %v2943_v47 = vadd.f32 %v3430_v42, %v2903_v37 }
 0x2f5   : > { %v2983_v48 = vadd.f32 %v3452_v43, %v2943_v47 }
 0x2f7   : > { %2988 = vst [vmem:[%s4138_s6] sm:$0xff] %v2983_v48 }
 0x2f8 PF: > { %s16_s21 = sadd.s32 1, %s3539_s21  }
 0x2f9   : > { %p13_p7 = scmp.ge.s32.totalorder %s16_s21, 4  }
 0x2fb   :  { %15 = sbr.rel (!%p13_p7) target bundleno = 1 (0x1), region = 81 }

</bundles_post_ra>
